<compile_context>
chip_gen: v5e
topology: v5e:2x2
jax: 0.10.0
libtpu: 0.0.40
codegen_flags: <defaults>
</compile_context>

<pallas_src>
import jax
import jax.numpy as jnp
from jax.experimental import pallas as pl
from jax.experimental.pallas import tpu as pltpu

D = 32            # embedding dim
NUM_HEADS = 4
HEAD_DIM = D // NUM_HEADS
SCALE = HEAD_DIM ** -0.5   # qk_scale=None -> head_dim**-0.5
LN_EPS = 1e-5

# Row indices into the packed (18, D) small-parameter array.
(_G1, _B1, _G2, _B2, _G3, _B3, _G4, _B4, _G5, _B5,
 _BADJ, _BP1, _BP2, _BM, _GAMMA1, _GAMMA2, _WSIM, _BSIM) = range(18)
_VROW_NAMES = ["g1", "b1", "g2", "b2", "g3", "b3", "g4", "b4", "g5", "b5",
               "b_adj", "bp1", "bp2", "bm", "gamma1", "gamma2"]
_WMAT_NAMES = ["w_adj", "wg1", "wg2",
               "wq1", "wk1", "wv1", "wp1",
               "wq2", "wk2", "wv2", "wp2", "wm"]


# ---------------------------------------------------------------------------
# in-kernel helpers (pure jnp, traced inside the Pallas kernel body)
# ---------------------------------------------------------------------------
def _softmax_last(x):
    m = jnp.max(x, axis=-1, keepdims=True)
    e = jnp.exp(x - m)
    # reciprocal on the EUP slot instead of a VPU divide
    return e * pl.reciprocal(jnp.sum(e, axis=-1, keepdims=True), approx=True)


def _norm_stats(x):
    """Shared mean / rsqrt(var) pass for LayerNorm."""
    mu = jnp.mean(x, axis=-1, keepdims=True)
    var = jnp.mean((x - mu) ** 2, axis=-1, keepdims=True)
    return (x - mu) * jax.lax.rsqrt(var + LN_EPS)


def _layernorm(x, g, b):
    return _norm_stats(x) * g + b


def _cross_attention(xq, xkv, wq, wk, wv, wp, bp, head_masks):
    """Multi-head cross attention without lane slicing / concat.

    xq: (B, Nq, D), xkv: (B, Nk, D).  Per-head restriction of the contraction
    is done with 0/1 lane masks; summing the per-head (attn @ (v*mask)) terms
    reconstructs the head-concatenated output exactly (each head owns its own
    HEAD_DIM output lanes).
    """
    B, Nq, Dm = xq.shape
    Nk = xkv.shape[1]
    q = (jnp.dot(xq.reshape(B * Nq, Dm), wq,
                 preferred_element_type=jnp.float32) * SCALE).reshape(B, Nq, Dm)
    k = jnp.dot(xkv.reshape(B * Nk, Dm), wk,
                preferred_element_type=jnp.float32).reshape(B, Nk, Dm)
    v = jnp.dot(xkv.reshape(B * Nk, Dm), wv,
                preferred_element_type=jnp.float32).reshape(B, Nk, Dm)

    out = jnp.zeros((B, Nq, Dm), jnp.float32)
    for mh in head_masks:
        s = jnp.einsum('bqd,bkd->bqk', q * mh, k,
                       preferred_element_type=jnp.float32)        # (B,Nq,Nk)
        a = _softmax_last(s)
        out = out + jnp.einsum('bqk,bkd->bqd', a, v * mh,
                               preferred_element_type=jnp.float32)
    out = (jnp.dot(out.reshape(B * Nq, Dm), wp,
                   preferred_element_type=jnp.float32) + bp).reshape(B, Nq, Dm)
    return out


# ---------------------------------------------------------------------------
# fused kernel: SimBlock + top-k + AdjBlock + GCN + dual cross-attn + MLP
# ---------------------------------------------------------------------------
def fused_kernel(x_ref, mask_ref, pe_ref, wmat_ref, vp_ref, out_ref, sim_ref):
    B, N, Dm = x_ref.shape
    K = N // 16

    x = x_ref[...]                 # (B, N, D)
    m = mask_ref[...]              # (B, N)
    pe = pe_ref[...]               # (N, D)
    vp = vp_ref[...]               # (18, D)

    def row(i):                    # (1, D) packed-parameter row (static slice)
        return vp[i:i + 1, :]

    w_adj = wmat_ref[0]
    wg1, wg2 = wmat_ref[1], wmat_ref[2]
    wq1, wk1, wv1, wp1 = wmat_ref[3], wmat_ref[4], wmat_ref[5], wmat_ref[6]
    wq2, wk2, wv2, wp2 = wmat_ref[7], wmat_ref[8], wmat_ref[9], wmat_ref[10]
    wm = wmat_ref[11]

    # ---- SimBlock (positive branch), lane-dense output --------------------
    pos_mask = (m > 0.5).astype(jnp.float32)[..., None]            # (B, N, 1)
    denom = jnp.sum(pos_mask, axis=1, keepdims=True) + 1e-6        # (B, 1, 1)
    pos_query = jnp.sum(x * pos_mask, axis=1, keepdims=True) / denom   # (B,1,D)
    w_sim = row(_WSIM)                                             # (1, D)
    b_sim = vp[_BSIM:_BSIM + 1, 0:1]                               # (1, 1)
    logits = jnp.sum(x * (pos_query * w_sim), axis=-1) + b_sim     # (B, N)
    pos_sim = jax.nn.sigmoid(logits)
    sim_ref[...] = pos_sim

    # ---- top-k (K iterative argmax passes) + one-hot gather ---------------
    iota_n = jax.lax.broadcasted_iota(jnp.int32, (B, N), 1)
    remaining = pos_sim
    sel_rows, gate_rows = [], []
    for _ in range(K):
        mval = jnp.max(remaining, axis=-1, keepdims=True)          # (B, 1)
        is_max = remaining >= mval
        first_idx = jnp.min(jnp.where(is_max, iota_n, N),
                            axis=-1, keepdims=True)                # (B, 1)
        sel = iota_n == first_idx                                  # (B, N)
        sel_rows.append(sel.astype(jnp.float32))
        gate_rows.append((mval > 0.6).astype(jnp.float32))         # (B, 1)
        remaining = jnp.where(sel, -1.0, remaining)
    S = jnp.stack(sel_rows, axis=1)                                # (B, K, N)
    gate = jnp.stack(gate_rows, axis=1)                            # (B, K, 1)

    node = jnp.einsum('bkn,bnd->bkd', S, x,
                      preferred_element_type=jnp.float32) * gate   # (B, K, D)
    pe_sel = jnp.dot(S.reshape(B * K, N), pe,
                     preferred_element_type=jnp.float32).reshape(B, K, Dm)

    # ---- AdjBlock ----------------------------------------------------------
    node_flat = node.reshape(B * K, Dm)
    proj = (jnp.dot(node_flat, w_adj, preferred_element_type=jnp.float32)
            + row(_BADJ)).reshape(B, K, Dm)
    adj = _softmax_last(jnp.einsum('bkd,bjd->bkj', proj, node,
                                   preferred_element_type=jnp.float32))  # (B,K,K)

    # ---- GCNBlock: gc2(relu(gc1(node, adj)), adj) --------------------------
    s1 = jnp.dot(node_flat, wg1,
                 preferred_element_type=jnp.float32).reshape(B, K, Dm)
    h1 = jnp.maximum(jnp.einsum('bkj,bjd->bkd', adj, s1,
                                preferred_element_type=jnp.float32), 0.0)
    s2 = jnp.dot(h1.reshape(B * K, Dm), wg2,
                 preferred_element_type=jnp.float32).reshape(B, K, Dm)
    query = jnp.einsum('bkj,bjd->bkd', adj, s2,
                       preferred_element_type=jnp.float32) + pe_sel      # (B,K,D)

    # ---- per-head lane masks (built once, shared by both attentions) ------
    lane = jax.lax.broadcasted_iota(jnp.int32, (1, 1, Dm), 2)
    head_masks = [((lane >= h * HEAD_DIM) &
                   (lane < (h + 1) * HEAD_DIM)).astype(jnp.float32)
                  for h in range(NUM_HEADS)]

    feat = x

    # norm2(feat) and norm3(feat) see the SAME feat (updated only after the
    # second attention) -> share the mean/var/rsqrt pass.
    feat_norm = _norm_stats(feat)                                   # (B, N, D)
    feat_n2 = feat_norm * row(_G2) + row(_B2)
    feat_n3 = feat_norm * row(_G3) + row(_B3)

    # query_p = query_p + img2token_gamma * im2query(norm1(query_p), norm2(feat))
    a1 = _cross_attention(_layernorm(query, row(_G1), row(_B1)), feat_n2,
                          wq1, wk1, wv1, wp1, row(_BP1), head_masks)
    query = query + row(_GAMMA1) * a1

    # feat = feat + token2img_gamma * query2img(norm3(feat), norm4(query_p))
    a2 = _cross_attention(feat_n3,
                          _layernorm(query, row(_G4), row(_B4)),
                          wq2, wk2, wv2, wp2, row(_BP2), head_masks)
    feat = feat + row(_GAMMA2) * a2

    # feat = feat + mlp(norm5(feat))        (mlp = single Linear)
    y = _layernorm(feat, row(_G5), row(_B5))
    feat = feat + (jnp.dot(y.reshape(B * N, Dm), wm,
                           preferred_element_type=jnp.float32)
                   + row(_BM)).reshape(B, N, Dm)

    out_ref[...] = feat


# ---------------------------------------------------------------------------
# wrapper
# ---------------------------------------------------------------------------
def gcn_fusion_block_pos_only(x, mask, pos_emb, params):
    B, N, Dm = x.shape
    assert Dm == D
    assert N % 16 == 0

    # pack the 18 tiny parameters into one (18, D) array
    vrows = [params[n] for n in _VROW_NAMES]                       # 16 x (1, D)
    vrows.append(params["w_sim"].reshape(1, Dm))                   # w_sim row
    vrows.append(jnp.broadcast_to(params["b_sim"].reshape(1, 1), (1, Dm)))
    vparams = jnp.concatenate(vrows, axis=0).astype(jnp.float32)   # (18, D)

    # pack the 12 (D, D) weight matrices into one (12, D, D) array
    wmats = jnp.stack([params[n] for n in _WMAT_NAMES],
                      axis=0).astype(jnp.float32)                  # (12, D, D)

    mask2 = mask.astype(jnp.float32).reshape(B, N)
    pe = pos_emb.reshape(N, Dm).astype(jnp.float32)

    out, pos_sim = pl.pallas_call(
        fused_kernel,
        out_shape=(jax.ShapeDtypeStruct((B, N, Dm), jnp.float32),
                   jax.ShapeDtypeStruct((B, N), jnp.float32)),
        grid=(1,),
        in_specs=[
            pl.BlockSpec((B, N, Dm), lambda i: (0, 0, 0)),
            pl.BlockSpec((B, N), lambda i: (0, 0)),
            pl.BlockSpec((N, Dm), lambda i: (0, 0)),
            pl.BlockSpec(wmats.shape, lambda i: (0, 0, 0)),
            pl.BlockSpec(vparams.shape, lambda i: (0, 0)),
        ],
        out_specs=(pl.BlockSpec((B, N, Dm), lambda i: (0, 0, 0)),
                   pl.BlockSpec((B, N), lambda i: (0, 0))),
        compiler_params=pltpu.CompilerParams(
            dimension_semantics=("arbitrary",)),
    )(x.astype(jnp.float32), mask2, pe, wmats, vparams)

    out = out[:, None, :, :]     # matches torch.vmap output shape (B, 1, N, D)
    return out, {"pos_sim": pos_sim, "neg_sim": None}


# ---------------------------------------------------------------------------
# deterministic parameter initialization (synthetic; shapes follow __init__)
# ---------------------------------------------------------------------------
def init_params(key, dim=D):
    keys = jax.random.split(key, 16)
    it = iter(range(16))

    def nrm(shape, std):
        return (jax.random.normal(keys[next(it)], shape) * std).astype(jnp.float32)

    kaiming = (2.0 / dim) ** 0.5
    ones = jnp.ones((1, dim), jnp.float32)
    zeros = jnp.zeros((1, dim), jnp.float32)

    p = {}
    # SimBlock (pos branch)
    p["w_sim"] = nrm((dim, 1), kaiming)
    p["b_sim"] = jnp.zeros((1, 1), jnp.float32)
    # AdjBlock
    p["w_adj"] = nrm((dim, dim), kaiming)
    p["b_adj"] = zeros
    # GCNBlock gnn_p  (GraphConvolution weights are raw randn, (in, out))
    p["wg1"] = nrm((dim, dim), 1.0)
    p["wg2"] = nrm((dim, dim), 1.0)
    # LayerNorms 1..5 (default init: weight=1, bias=0)
    for i in range(1, 6):
        p[f"g{i}"] = ones
        p[f"b{i}"] = zeros
    # im2query cross attention (qkv_bias=False, proj has bias=0)
    p["wq1"] = nrm((dim, dim), kaiming)
    p["wk1"] = nrm((dim, dim), kaiming)
    p["wv1"] = nrm((dim, dim), kaiming)
    p["wp1"] = nrm((dim, dim), kaiming)
    p["bp1"] = zeros
    p["gamma1"] = nrm((1, dim), 1.0)      # img2token_gamma (1,1,D) -> (1,D)
    # query2img cross attention
    p["wq2"] = nrm((dim, dim), kaiming)
    p["wk2"] = nrm((dim, dim), kaiming)
    p["wv2"] = nrm((dim, dim), kaiming)
    p["wp2"] = nrm((dim, dim), kaiming)
    p["bp2"] = zeros
    p["gamma2"] = nrm((1, dim), 1.0)      # token2img_gamma
    # mlp = Sequential(Linear(dim, dim))
    p["wm"] = nrm((dim, dim), kaiming)
    p["bm"] = zeros
    return p


if __name__ == "__main__":
    key = jax.random.PRNGKey(0)
    kx, km, kp, kw = jax.random.split(key, 4)

    B, N = 2, 64                       # N // 16 = 4 selected nodes per batch
    x = jax.random.normal(kx, (B, N, D), jnp.float32)
    mask = (jax.random.uniform(km, (B, N)) > 0.7).astype(jnp.float32)
    pos_emb = jax.random.normal(kp, (1, N, D), jnp.float32) * 0.02
    params = init_params(kw)

    out, aux = gcn_fusion_block_pos_only(x, mask, pos_emb, params)
    out = jax.block_until_ready(out)
    pos_sim = jax.block_until_ready(aux["pos_sim"])

    assert out.shape == (B, 1, N, D)
    assert pos_sim.shape == (B, N)
    assert bool(jnp.all(jnp.isfinite(out)))
    assert bool(jnp.all(jnp.isfinite(pos_sim)))
    print("KERNEL_OK")
</pallas_src>

<mosaic_0001>
module attributes {stable_mosaic.version = 11 : i64} {
  func.func @fused_kernel(%arg0: i32, %arg1: memref<2x64x32xf32, #tpu.memory_space<vmem>>, %arg2: memref<2x64xf32, #tpu.memory_space<vmem>>, %arg3: memref<64x32xf32, #tpu.memory_space<vmem>>, %arg4: memref<12x32x32xf32, #tpu.memory_space<vmem>>, %arg5: memref<18x32xf32, #tpu.memory_space<vmem>>, %arg6: memref<2x64x32xf32, #tpu.memory_space<vmem>>, %arg7: memref<2x64xf32, #tpu.memory_space<vmem>>) attributes {dimension_semantics = [#tpu.dimension_semantics<arbitrary>], iteration_bounds = array<i64: 1>, scalar_prefetch = 0 : i64, scratch_operands = 0 : i64, tpu.core_type = #tpu.core_type<tc>, window_params = [{pipeline_mode = #tpu.pipeline_mode<synchronous>, transform_indices = @transform_0, window_bounds = array<i64: 2, 64, 32>}, {pipeline_mode = #tpu.pipeline_mode<synchronous>, transform_indices = @transform_1, window_bounds = array<i64: 2, 64>}, {pipeline_mode = #tpu.pipeline_mode<synchronous>, transform_indices = @transform_2, window_bounds = array<i64: 64, 32>}, {pipeline_mode = #tpu.pipeline_mode<synchronous>, transform_indices = @transform_3, window_bounds = array<i64: 12, 32, 32>}, {pipeline_mode = #tpu.pipeline_mode<synchronous>, transform_indices = @transform_4, window_bounds = array<i64: 18, 32>}, {pipeline_mode = #tpu.pipeline_mode<synchronous>, transform_indices = @transform_5, window_bounds = array<i64: 2, 64, 32>}, {pipeline_mode = #tpu.pipeline_mode<synchronous>, transform_indices = @transform_6, window_bounds = array<i64: 2, 64>}]} {
    %c0 = arith.constant 0 : index
    %c0_0 = arith.constant 0 : index
    %c0_1 = arith.constant 0 : index
    %0 = vector.load %arg1[%c0, %c0_0, %c0_1] : memref<2x64x32xf32, #tpu.memory_space<vmem>>, vector<2x64x32xf32>
    %c0_2 = arith.constant 0 : index
    %c0_3 = arith.constant 0 : index
    %1 = vector.load %arg2[%c0_2, %c0_3] : memref<2x64xf32, #tpu.memory_space<vmem>>, vector<2x64xf32>
    %c0_4 = arith.constant 0 : index
    %c0_5 = arith.constant 0 : index
    %2 = vector.load %arg3[%c0_4, %c0_5] : memref<64x32xf32, #tpu.memory_space<vmem>>, vector<64x32xf32>
    %c0_6 = arith.constant 0 : index
    %c0_7 = arith.constant 0 : index
    %3 = vector.load %arg5[%c0_6, %c0_7] : memref<18x32xf32, #tpu.memory_space<vmem>>, vector<18x32xf32>
    %c0_8 = arith.constant 0 : index
    %c0_9 = arith.constant 0 : index
    %c0_10 = arith.constant 0 : index
    %4 = vector.load %arg4[%c0_8, %c0_9, %c0_10] : memref<12x32x32xf32, #tpu.memory_space<vmem>>, vector<1x32x32xf32>
    %5 = vector.shape_cast %4 : vector<1x32x32xf32> to vector<32x32xf32>
    %c1 = arith.constant 1 : index
    %c0_11 = arith.constant 0 : index
    %c0_12 = arith.constant 0 : index
    %6 = vector.load %arg4[%c1, %c0_11, %c0_12] : memref<12x32x32xf32, #tpu.memory_space<vmem>>, vector<1x32x32xf32>
    %7 = vector.shape_cast %6 : vector<1x32x32xf32> to vector<32x32xf32>
    %c2 = arith.constant 2 : index
    %c0_13 = arith.constant 0 : index
    %c0_14 = arith.constant 0 : index
    %8 = vector.load %arg4[%c2, %c0_13, %c0_14] : memref<12x32x32xf32, #tpu.memory_space<vmem>>, vector<1x32x32xf32>
    %9 = vector.shape_cast %8 : vector<1x32x32xf32> to vector<32x32xf32>
    %c3 = arith.constant 3 : index
    %c0_15 = arith.constant 0 : index
    %c0_16 = arith.constant 0 : index
    %10 = vector.load %arg4[%c3, %c0_15, %c0_16] : memref<12x32x32xf32, #tpu.memory_space<vmem>>, vector<1x32x32xf32>
    %11 = vector.shape_cast %10 : vector<1x32x32xf32> to vector<32x32xf32>
    %c4 = arith.constant 4 : index
    %c0_17 = arith.constant 0 : index
    %c0_18 = arith.constant 0 : index
    %12 = vector.load %arg4[%c4, %c0_17, %c0_18] : memref<12x32x32xf32, #tpu.memory_space<vmem>>, vector<1x32x32xf32>
    %13 = vector.shape_cast %12 : vector<1x32x32xf32> to vector<32x32xf32>
    %c5 = arith.constant 5 : index
    %c0_19 = arith.constant 0 : index
    %c0_20 = arith.constant 0 : index
    %14 = vector.load %arg4[%c5, %c0_19, %c0_20] : memref<12x32x32xf32, #tpu.memory_space<vmem>>, vector<1x32x32xf32>
    %15 = vector.shape_cast %14 : vector<1x32x32xf32> to vector<32x32xf32>
    %c6 = arith.constant 6 : index
    %c0_21 = arith.constant 0 : index
    %c0_22 = arith.constant 0 : index
    %16 = vector.load %arg4[%c6, %c0_21, %c0_22] : memref<12x32x32xf32, #tpu.memory_space<vmem>>, vector<1x32x32xf32>
    %17 = vector.shape_cast %16 : vector<1x32x32xf32> to vector<32x32xf32>
    %c7 = arith.constant 7 : index
    %c0_23 = arith.constant 0 : index
    %c0_24 = arith.constant 0 : index
    %18 = vector.load %arg4[%c7, %c0_23, %c0_24] : memref<12x32x32xf32, #tpu.memory_space<vmem>>, vector<1x32x32xf32>
    %19 = vector.shape_cast %18 : vector<1x32x32xf32> to vector<32x32xf32>
    %c8 = arith.constant 8 : index
    %c0_25 = arith.constant 0 : index
    %c0_26 = arith.constant 0 : index
    %20 = vector.load %arg4[%c8, %c0_25, %c0_26] : memref<12x32x32xf32, #tpu.memory_space<vmem>>, vector<1x32x32xf32>
    %21 = vector.shape_cast %20 : vector<1x32x32xf32> to vector<32x32xf32>
    %c9 = arith.constant 9 : index
    %c0_27 = arith.constant 0 : index
    %c0_28 = arith.constant 0 : index
    %22 = vector.load %arg4[%c9, %c0_27, %c0_28] : memref<12x32x32xf32, #tpu.memory_space<vmem>>, vector<1x32x32xf32>
    %23 = vector.shape_cast %22 : vector<1x32x32xf32> to vector<32x32xf32>
    %c10 = arith.constant 10 : index
    %c0_29 = arith.constant 0 : index
    %c0_30 = arith.constant 0 : index
    %24 = vector.load %arg4[%c10, %c0_29, %c0_30] : memref<12x32x32xf32, #tpu.memory_space<vmem>>, vector<1x32x32xf32>
    %25 = vector.shape_cast %24 : vector<1x32x32xf32> to vector<32x32xf32>
    %c11 = arith.constant 11 : index
    %c0_31 = arith.constant 0 : index
    %c0_32 = arith.constant 0 : index
    %26 = vector.load %arg4[%c11, %c0_31, %c0_32] : memref<12x32x32xf32, #tpu.memory_space<vmem>>, vector<1x32x32xf32>
    %27 = vector.shape_cast %26 : vector<1x32x32xf32> to vector<32x32xf32>
    %cst = arith.constant 5.000000e-01 : f32
    %28 = vector.broadcast %cst : f32 to vector<2x64xf32>
    %29 = arith.cmpf ogt, %1, %28 : vector<2x64xf32>
    %30 = arith.extui %29 : vector<2x64xi1> to vector<2x64xi32>
    %31 = arith.sitofp %30 : vector<2x64xi32> to vector<2x64xf32>
    %32 = vector.shape_cast %31 : vector<2x64xf32> to vector<2x64x1xf32>
    %cst_33 = arith.constant dense<0.000000e+00> : vector<2x1xf32>
    %33 = vector.multi_reduction <add>, %32, %cst_33 [1] : vector<2x64x1xf32> to vector<2x1xf32>
    %34 = vector.shape_cast %33 : vector<2x1xf32> to vector<2x1x1xf32>
    %cst_34 = arith.constant 9.99999997E-7 : f32
    %35 = vector.broadcast %cst_34 : f32 to vector<2x1x1xf32>
    %36 = arith.addf %34, %35 : vector<2x1x1xf32>
    %37 = vector.broadcast %32 : vector<2x64x1xf32> to vector<2x64x32xf32>
    %38 = arith.mulf %0, %37 : vector<2x64x32xf32>
    %cst_35 = arith.constant dense<0.000000e+00> : vector<2x32xf32>
    %39 = vector.multi_reduction <add>, %38, %cst_35 [1] : vector<2x64x32xf32> to vector<2x32xf32>
    %40 = vector.shape_cast %39 : vector<2x32xf32> to vector<2x1x32xf32>
    %41 = vector.broadcast %36 : vector<2x1x1xf32> to vector<2x1x32xf32>
    %42 = arith.divf %40, %41 : vector<2x1x32xf32>
    %43 = vector.extract_strided_slice %3 {offsets = [16, 0], sizes = [1, 32], strides = [1, 1]} : vector<18x32xf32> to vector<1x32xf32>
    %44 = vector.extract_strided_slice %3 {offsets = [17, 0], sizes = [1, 1], strides = [1, 1]} : vector<18x32xf32> to vector<1x1xf32>
    %45 = vector.shape_cast %43 : vector<1x32xf32> to vector<1x1x32xf32>
    %46 = vector.broadcast %45 : vector<1x1x32xf32> to vector<2x1x32xf32>
    %47 = arith.mulf %42, %46 : vector<2x1x32xf32>
    %48 = vector.broadcast %47 : vector<2x1x32xf32> to vector<2x64x32xf32>
    %49 = arith.mulf %0, %48 : vector<2x64x32xf32>
    %cst_36 = arith.constant dense<0.000000e+00> : vector<2x64xf32>
    %50 = vector.multi_reduction <add>, %49, %cst_36 [2] : vector<2x64x32xf32> to vector<2x64xf32>
    %51 = vector.broadcast %44 : vector<1x1xf32> to vector<2x64xf32>
    %52 = arith.addf %50, %51 : vector<2x64xf32>
    %53 = arith.negf %52 : vector<2x64xf32>
    %54 = math.exp %53 : vector<2x64xf32>
    %cst_37 = arith.constant 1.000000e+00 : f32
    %55 = vector.broadcast %cst_37 : f32 to vector<2x64xf32>
    %56 = arith.addf %55, %54 : vector<2x64xf32>
    %57 = arith.divf %55, %56 : vector<2x64xf32>
    %c0_38 = arith.constant 0 : index
    %c0_39 = arith.constant 0 : index
    %58 = vector.load %arg7[%c0_38, %c0_39] : memref<2x64xf32, #tpu.memory_space<vmem>>, vector<2x64xf32>
    tpu.vector_store %arg7[%c0_38, %c0_39], %57 {strides = array<i32>} : memref<2x64xf32, #tpu.memory_space<vmem>>, vector<2x64xf32>,
    %59 = tpu.iota {dimensions = array<i32: 1>} : vector<2x64xi32>
    %cst_40 = arith.constant dense<0xFF800000> : vector<2xf32>
    %60 = vector.multi_reduction <maximumf>, %57, %cst_40 [1] : vector<2x64xf32> to vector<2xf32>
    %61 = vector.shape_cast %60 : vector<2xf32> to vector<2x1xf32>
    %62 = vector.broadcast %61 : vector<2x1xf32> to vector<2x64xf32>
    %63 = arith.cmpf oge, %57, %62 : vector<2x64xf32>
    %c64_i32 = arith.constant 64 : i32
    %64 = vector.broadcast %c64_i32 : i32 to vector<2x64xi32>
    %65 = arith.select %63, %59, %64 : vector<2x64xi1>, vector<2x64xi32>
    %cst_41 = arith.constant dense<2147483647> : vector<2xi32>
    %66 = vector.multi_reduction <minsi>, %65, %cst_41 [1] : vector<2x64xi32> to vector<2xi32>
    %67 = vector.shape_cast %66 : vector<2xi32> to vector<2x1xi32>
    %68 = vector.broadcast %67 : vector<2x1xi32> to vector<2x64xi32>
    %69 = arith.cmpi eq, %59, %68 : vector<2x64xi32>
    %70 = arith.extui %69 : vector<2x64xi1> to vector<2x64xi32>
    %71 = arith.sitofp %70 : vector<2x64xi32> to vector<2x64xf32>
    %cst_42 = arith.constant 6.000000e-01 : f32
    %72 = vector.broadcast %cst_42 : f32 to vector<2x1xf32>
    %73 = arith.cmpf ogt, %61, %72 : vector<2x1xf32>
    %74 = arith.extui %73 : vector<2x1xi1> to vector<2x1xi32>
    %75 = arith.sitofp %74 : vector<2x1xi32> to vector<2x1xf32>
    %cst_43 = arith.constant -1.000000e+00 : f32
    %76 = vector.broadcast %cst_43 : f32 to vector<2x64xf32>
    %77 = arith.select %69, %76, %57 : vector<2x64xi1>, vector<2x64xf32>
    %cst_44 = arith.constant dense<0xFF800000> : vector<2xf32>
    %78 = vector.multi_reduction <maximumf>, %77, %cst_44 [1] : vector<2x64xf32> to vector<2xf32>
    %79 = vector.shape_cast %78 : vector<2xf32> to vector<2x1xf32>
    %80 = vector.broadcast %79 : vector<2x1xf32> to vector<2x64xf32>
    %81 = arith.cmpf oge, %77, %80 : vector<2x64xf32>
    %c64_i32_45 = arith.constant 64 : i32
    %82 = vector.broadcast %c64_i32_45 : i32 to vector<2x64xi32>
    %83 = arith.select %81, %59, %82 : vector<2x64xi1>, vector<2x64xi32>
    %cst_46 = arith.constant dense<2147483647> : vector<2xi32>
    %84 = vector.multi_reduction <minsi>, %83, %cst_46 [1] : vector<2x64xi32> to vector<2xi32>
    %85 = vector.shape_cast %84 : vector<2xi32> to vector<2x1xi32>
    %86 = vector.broadcast %85 : vector<2x1xi32> to vector<2x64xi32>
    %87 = arith.cmpi eq, %59, %86 : vector<2x64xi32>
    %88 = arith.extui %87 : vector<2x64xi1> to vector<2x64xi32>
    %89 = arith.sitofp %88 : vector<2x64xi32> to vector<2x64xf32>
    %cst_47 = arith.constant 6.000000e-01 : f32
    %90 = vector.broadcast %cst_47 : f32 to vector<2x1xf32>
    %91 = arith.cmpf ogt, %79, %90 : vector<2x1xf32>
    %92 = arith.extui %91 : vector<2x1xi1> to vector<2x1xi32>
    %93 = arith.sitofp %92 : vector<2x1xi32> to vector<2x1xf32>
    %cst_48 = arith.constant -1.000000e+00 : f32
    %94 = vector.broadcast %cst_48 : f32 to vector<2x64xf32>
    %95 = arith.select %87, %94, %77 : vector<2x64xi1>, vector<2x64xf32>
    %cst_49 = arith.constant dense<0xFF800000> : vector<2xf32>
    %96 = vector.multi_reduction <maximumf>, %95, %cst_49 [1] : vector<2x64xf32> to vector<2xf32>
    %97 = vector.shape_cast %96 : vector<2xf32> to vector<2x1xf32>
    %98 = vector.broadcast %97 : vector<2x1xf32> to vector<2x64xf32>
    %99 = arith.cmpf oge, %95, %98 : vector<2x64xf32>
    %c64_i32_50 = arith.constant 64 : i32
    %100 = vector.broadcast %c64_i32_50 : i32 to vector<2x64xi32>
    %101 = arith.select %99, %59, %100 : vector<2x64xi1>, vector<2x64xi32>
    %cst_51 = arith.constant dense<2147483647> : vector<2xi32>
    %102 = vector.multi_reduction <minsi>, %101, %cst_51 [1] : vector<2x64xi32> to vector<2xi32>
    %103 = vector.shape_cast %102 : vector<2xi32> to vector<2x1xi32>
    %104 = vector.broadcast %103 : vector<2x1xi32> to vector<2x64xi32>
    %105 = arith.cmpi eq, %59, %104 : vector<2x64xi32>
    %106 = arith.extui %105 : vector<2x64xi1> to vector<2x64xi32>
    %107 = arith.sitofp %106 : vector<2x64xi32> to vector<2x64xf32>
    %cst_52 = arith.constant 6.000000e-01 : f32
    %108 = vector.broadcast %cst_52 : f32 to vector<2x1xf32>
    %109 = arith.cmpf ogt, %97, %108 : vector<2x1xf32>
    %110 = arith.extui %109 : vector<2x1xi1> to vector<2x1xi32>
    %111 = arith.sitofp %110 : vector<2x1xi32> to vector<2x1xf32>
    %cst_53 = arith.constant -1.000000e+00 : f32
    %112 = vector.broadcast %cst_53 : f32 to vector<2x64xf32>
    %113 = arith.select %105, %112, %95 : vector<2x64xi1>, vector<2x64xf32>
    %cst_54 = arith.constant dense<0xFF800000> : vector<2xf32>
    %114 = vector.multi_reduction <maximumf>, %113, %cst_54 [1] : vector<2x64xf32> to vector<2xf32>
    %115 = vector.shape_cast %114 : vector<2xf32> to vector<2x1xf32>
    %116 = vector.broadcast %115 : vector<2x1xf32> to vector<2x64xf32>
    %117 = arith.cmpf oge, %113, %116 : vector<2x64xf32>
    %c64_i32_55 = arith.constant 64 : i32
    %118 = vector.broadcast %c64_i32_55 : i32 to vector<2x64xi32>
    %119 = arith.select %117, %59, %118 : vector<2x64xi1>, vector<2x64xi32>
    %cst_56 = arith.constant dense<2147483647> : vector<2xi32>
    %120 = vector.multi_reduction <minsi>, %119, %cst_56 [1] : vector<2x64xi32> to vector<2xi32>
    %121 = vector.shape_cast %120 : vector<2xi32> to vector<2x1xi32>
    %122 = vector.broadcast %121 : vector<2x1xi32> to vector<2x64xi32>
    %123 = arith.cmpi eq, %59, %122 : vector<2x64xi32>
    %124 = arith.extui %123 : vector<2x64xi1> to vector<2x64xi32>
    %125 = arith.sitofp %124 : vector<2x64xi32> to vector<2x64xf32>
    %cst_57 = arith.constant 6.000000e-01 : f32
    %126 = vector.broadcast %cst_57 : f32 to vector<2x1xf32>
    %127 = arith.cmpf ogt, %115, %126 : vector<2x1xf32>
    %128 = arith.extui %127 : vector<2x1xi1> to vector<2x1xi32>
    %129 = arith.sitofp %128 : vector<2x1xi32> to vector<2x1xf32>
    %130 = vector.shape_cast %71 : vector<2x64xf32> to vector<2x1x64xf32>
    %131 = vector.shape_cast %89 : vector<2x64xf32> to vector<2x1x64xf32>
    %132 = vector.shape_cast %107 : vector<2x64xf32> to vector<2x1x64xf32>
    %133 = vector.shape_cast %125 : vector<2x64xf32> to vector<2x1x64xf32>
    %134 = tpu.concatenate %130, %131, %132, %133 in 1 : vector<2x1x64xf32>, vector<2x1x64xf32>, vector<2x1x64xf32>, vector<2x1x64xf32> -> vector<2x4x64xf32>
    %135 = vector.shape_cast %75 : vector<2x1xf32> to vector<2x1x1xf32>
    %136 = vector.shape_cast %93 : vector<2x1xf32> to vector<2x1x1xf32>
    %137 = vector.shape_cast %111 : vector<2x1xf32> to vector<2x1x1xf32>
    %138 = vector.shape_cast %129 : vector<2x1xf32> to vector<2x1x1xf32>
    %139 = tpu.concatenate %135, %136, %137, %138 in 1 : vector<2x1x1xf32>, vector<2x1x1xf32>, vector<2x1x1xf32>, vector<2x1x1xf32> -> vector<2x4x1xf32>
    "tpu.trace_start"() <{level = 10 : i32, message = "bkn,bnd->bkd"}> : () -> ()
    %cst_58 = arith.constant dense<0.000000e+00> : vector<2x4x32xf32>
    %140 = tpu.matmul %134, %0, %cst_58 {dimension_numbers = #tpu.dot_dimension_numbers<[2], [1], [1], [2], [0, 0, 0, 1, 1, 2], [0], [0]>} : vector<2x4x64xf32>, vector<2x64x32xf32>, vector<2x4x32xf32> -> vector<2x4x32xf32>
    "tpu.trace_stop"() : () -> ()
    %141 = vector.broadcast %139 : vector<2x4x1xf32> to vector<2x4x32xf32>
    %142 = arith.mulf %140, %141 : vector<2x4x32xf32>
    %143 = vector.shape_cast %134 : vector<2x4x64xf32> to vector<8x64xf32>
    %cst_59 = arith.constant dense<0.000000e+00> : vector<8x32xf32>
    %144 = tpu.matmul %143, %2, %cst_59 {dimension_numbers = #tpu.dot_dimension_numbers<[1], [0], [0], [1], [0, 0, 1, 1], [], []>} : vector<8x64xf32>, vector<64x32xf32>, vector<8x32xf32> -> vector<8x32xf32>
    %145 = vector.shape_cast %144 : vector<8x32xf32> to vector<2x4x32xf32>
    %146 = vector.shape_cast %142 : vector<2x4x32xf32> to vector<8x32xf32>
    %cst_60 = arith.constant dense<0.000000e+00> : vector<8x32xf32>
    %147 = tpu.matmul %146, %5, %cst_60 {dimension_numbers = #tpu.dot_dimension_numbers<[1], [0], [0], [1], [0, 0, 1, 1], [], []>} : vector<8x32xf32>, vector<32x32xf32>, vector<8x32xf32> -> vector<8x32xf32>
    %148 = vector.extract_strided_slice %3 {offsets = [10, 0], sizes = [1, 32], strides = [1, 1]} : vector<18x32xf32> to vector<1x32xf32>
    %149 = vector.broadcast %148 : vector<1x32xf32> to vector<8x32xf32>
    %150 = arith.addf %147, %149 : vector<8x32xf32>
    %151 = vector.shape_cast %150 : vector<8x32xf32> to vector<2x4x32xf32>
    "tpu.trace_start"() <{level = 10 : i32, message = "bkd,bjd->bkj"}> : () -> ()
    %cst_61 = arith.constant dense<0.000000e+00> : vector<2x4x4xf32>
    %152 = tpu.matmul %151, %142, %cst_61 {dimension_numbers = #tpu.dot_dimension_numbers<[2], [2], [1], [1], [0, 0, 0, 1, 1, 1], [0], [0]>} : vector<2x4x32xf32>, vector<2x4x32xf32>, vector<2x4x4xf32> -> vector<2x4x4xf32>
    "tpu.trace_stop"() : () -> ()
    %cst_62 = arith.constant dense<0xFF800000> : vector<2x4xf32>
    %153 = vector.multi_reduction <maximumf>, %152, %cst_62 [2] : vector<2x4x4xf32> to vector<2x4xf32>
    %154 = vector.shape_cast %153 : vector<2x4xf32> to vector<2x4x1xf32>
    %155 = vector.broadcast %154 : vector<2x4x1xf32> to vector<2x4x4xf32>
    %156 = arith.subf %152, %155 : vector<2x4x4xf32>
    %157 = math.exp %156 : vector<2x4x4xf32>
    %cst_63 = arith.constant dense<0.000000e+00> : vector<2x4xf32>
    %158 = vector.multi_reduction <add>, %157, %cst_63 [2] : vector<2x4x4xf32> to vector<2x4xf32>
    %159 = vector.shape_cast %158 : vector<2x4xf32> to vector<2x4x1xf32>
    %160 = tpu.reciprocal %159 {approx = true} : vector<2x4x1xf32> -> vector<2x4x1xf32>
    %161 = vector.broadcast %160 : vector<2x4x1xf32> to vector<2x4x4xf32>
    %162 = arith.mulf %157, %161 : vector<2x4x4xf32>
    %cst_64 = arith.constant dense<0.000000e+00> : vector<8x32xf32>
    %163 = tpu.matmul %146, %7, %cst_64 {dimension_numbers = #tpu.dot_dimension_numbers<[1], [0], [0], [1], [0, 0, 1, 1], [], []>} : vector<8x32xf32>, vector<32x32xf32>, vector<8x32xf32> -> vector<8x32xf32>
    %164 = vector.shape_cast %163 : vector<8x32xf32> to vector<2x4x32xf32>
    "tpu.trace_start"() <{level = 10 : i32, message = "bkj,bjd->bkd"}> : () -> ()
    %cst_65 = arith.constant dense<0.000000e+00> : vector<2x4x32xf32>
    %165 = tpu.matmul %162, %164, %cst_65 {dimension_numbers = #tpu.dot_dimension_numbers<[2], [1], [1], [2], [0, 0, 0, 1, 1, 2], [0], [0]>} : vector<2x4x4xf32>, vector<2x4x32xf32>, vector<2x4x32xf32> -> vector<2x4x32xf32>
    "tpu.trace_stop"() : () -> ()
    %cst_66 = arith.constant 0.000000e+00 : f32
    %166 = vector.broadcast %cst_66 : f32 to vector<2x4x32xf32>
    %167 = arith.maximumf %165, %166 : vector<2x4x32xf32>
    %168 = vector.shape_cast %167 : vector<2x4x32xf32> to vector<8x32xf32>
    %cst_67 = arith.constant dense<0.000000e+00> : vector<8x32xf32>
    %169 = tpu.matmul %168, %9, %cst_67 {dimension_numbers = #tpu.dot_dimension_numbers<[1], [0], [0], [1], [0, 0, 1, 1], [], []>} : vector<8x32xf32>, vector<32x32xf32>, vector<8x32xf32> -> vector<8x32xf32>
    %170 = vector.shape_cast %169 : vector<8x32xf32> to vector<2x4x32xf32>
    "tpu.trace_start"() <{level = 10 : i32, message = "bkj,bjd->bkd"}> : () -> ()
    %cst_68 = arith.constant dense<0.000000e+00> : vector<2x4x32xf32>
    %171 = tpu.matmul %162, %170, %cst_68 {dimension_numbers = #tpu.dot_dimension_numbers<[2], [1], [1], [2], [0, 0, 0, 1, 1, 2], [0], [0]>} : vector<2x4x4xf32>, vector<2x4x32xf32>, vector<2x4x32xf32> -> vector<2x4x32xf32>
    "tpu.trace_stop"() : () -> ()
    %172 = arith.addf %171, %145 : vector<2x4x32xf32>
    %173 = tpu.iota {dimensions = array<i32: 2>} : vector<1x1x32xi32>
    %c0_i32 = arith.constant 0 : i32
    %174 = vector.broadcast %c0_i32 : i32 to vector<1x1x32xi32>
    %175 = arith.cmpi sge, %173, %174 : vector<1x1x32xi32>
    %c8_i32 = arith.constant 8 : i32
    %176 = vector.broadcast %c8_i32 : i32 to vector<1x1x32xi32>
    %177 = arith.cmpi slt, %173, %176 : vector<1x1x32xi32>
    %178 = arith.andi %175, %177 : vector<1x1x32xi1>
    %179 = arith.extui %178 : vector<1x1x32xi1> to vector<1x1x32xi32>
    %180 = arith.sitofp %179 : vector<1x1x32xi32> to vector<1x1x32xf32>
    %c8_i32_69 = arith.constant 8 : i32
    %181 = vector.broadcast %c8_i32_69 : i32 to vector<1x1x32xi32>
    %182 = arith.cmpi sge, %173, %181 : vector<1x1x32xi32>
    %c16_i32 = arith.constant 16 : i32
    %183 = vector.broadcast %c16_i32 : i32 to vector<1x1x32xi32>
    %184 = arith.cmpi slt, %173, %183 : vector<1x1x32xi32>
    %185 = arith.andi %182, %184 : vector<1x1x32xi1>
    %186 = arith.extui %185 : vector<1x1x32xi1> to vector<1x1x32xi32>
    %187 = arith.sitofp %186 : vector<1x1x32xi32> to vector<1x1x32xf32>
    %c16_i32_70 = arith.constant 16 : i32
    %188 = vector.broadcast %c16_i32_70 : i32 to vector<1x1x32xi32>
    %189 = arith.cmpi sge, %173, %188 : vector<1x1x32xi32>
    %c24_i32 = arith.constant 24 : i32
    %190 = vector.broadcast %c24_i32 : i32 to vector<1x1x32xi32>
    %191 = arith.cmpi slt, %173, %190 : vector<1x1x32xi32>
    %192 = arith.andi %189, %191 : vector<1x1x32xi1>
    %193 = arith.extui %192 : vector<1x1x32xi1> to vector<1x1x32xi32>
    %194 = arith.sitofp %193 : vector<1x1x32xi32> to vector<1x1x32xf32>
    %c24_i32_71 = arith.constant 24 : i32
    %195 = vector.broadcast %c24_i32_71 : i32 to vector<1x1x32xi32>
    %196 = arith.cmpi sge, %173, %195 : vector<1x1x32xi32>
    %c32_i32 = arith.constant 32 : i32
    %197 = vector.broadcast %c32_i32 : i32 to vector<1x1x32xi32>
    %198 = arith.cmpi slt, %173, %197 : vector<1x1x32xi32>
    %199 = arith.andi %196, %198 : vector<1x1x32xi1>
    %200 = arith.extui %199 : vector<1x1x32xi1> to vector<1x1x32xi32>
    %201 = arith.sitofp %200 : vector<1x1x32xi32> to vector<1x1x32xf32>
    %cst_72 = arith.constant dense<0.000000e+00> : vector<2x64xf32>
    %202 = vector.multi_reduction <add>, %0, %cst_72 [2] : vector<2x64x32xf32> to vector<2x64xf32>
    %203 = vector.shape_cast %202 : vector<2x64xf32> to vector<2x64x1xf32>
    %cst_73 = arith.constant 3.200000e+01 : f32
    %204 = vector.broadcast %cst_73 : f32 to vector<2x64x1xf32>
    %205 = arith.divf %203, %204 : vector<2x64x1xf32>
    %206 = vector.broadcast %205 : vector<2x64x1xf32> to vector<2x64x32xf32>
    %207 = arith.subf %0, %206 : vector<2x64x32xf32>
    %208 = arith.mulf %207, %207 : vector<2x64x32xf32>
    %cst_74 = arith.constant dense<0.000000e+00> : vector<2x64xf32>
    %209 = vector.multi_reduction <add>, %208, %cst_74 [2] : vector<2x64x32xf32> to vector<2x64xf32>
    %210 = vector.shape_cast %209 : vector<2x64xf32> to vector<2x64x1xf32>
    %cst_75 = arith.constant 3.200000e+01 : f32
    %211 = vector.broadcast %cst_75 : f32 to vector<2x64x1xf32>
    %212 = arith.divf %210, %211 : vector<2x64x1xf32>
    %213 = vector.broadcast %205 : vector<2x64x1xf32> to vector<2x64x32xf32>
    %214 = arith.subf %0, %213 : vector<2x64x32xf32>
    %cst_76 = arith.constant 9.99999974E-6 : f32
    %215 = vector.broadcast %cst_76 : f32 to vector<2x64x1xf32>
    %216 = arith.addf %212, %215 : vector<2x64x1xf32>
    %217 = math.rsqrt %216 : vector<2x64x1xf32>
    %218 = vector.broadcast %217 : vector<2x64x1xf32> to vector<2x64x32xf32>
    %219 = arith.mulf %214, %218 : vector<2x64x32xf32>
    %220 = vector.extract_strided_slice %3 {offsets = [2, 0], sizes = [1, 32], strides = [1, 1]} : vector<18x32xf32> to vector<1x32xf32>
    %221 = vector.shape_cast %220 : vector<1x32xf32> to vector<1x1x32xf32>
    %222 = vector.broadcast %221 : vector<1x1x32xf32> to vector<2x64x32xf32>
    %223 = arith.mulf %219, %222 : vector<2x64x32xf32>
    %224 = vector.extract_strided_slice %3 {offsets = [3, 0], sizes = [1, 32], strides = [1, 1]} : vector<18x32xf32> to vector<1x32xf32>
    %225 = vector.shape_cast %224 : vector<1x32xf32> to vector<1x1x32xf32>
    %226 = vector.broadcast %225 : vector<1x1x32xf32> to vector<2x64x32xf32>
    %227 = arith.addf %223, %226 : vector<2x64x32xf32>
    %228 = vector.extract_strided_slice %3 {offsets = [4, 0], sizes = [1, 32], strides = [1, 1]} : vector<18x32xf32> to vector<1x32xf32>
    %229 = vector.shape_cast %228 : vector<1x32xf32> to vector<1x1x32xf32>
    %230 = vector.broadcast %229 : vector<1x1x32xf32> to vector<2x64x32xf32>
    %231 = arith.mulf %219, %230 : vector<2x64x32xf32>
    %232 = vector.extract_strided_slice %3 {offsets = [5, 0], sizes = [1, 32], strides = [1, 1]} : vector<18x32xf32> to vector<1x32xf32>
    %233 = vector.shape_cast %232 : vector<1x32xf32> to vector<1x1x32xf32>
    %234 = vector.broadcast %233 : vector<1x1x32xf32> to vector<2x64x32xf32>
    %235 = arith.addf %231, %234 : vector<2x64x32xf32>
    %236 = vector.extract_strided_slice %3 {offsets = [0, 0], sizes = [1, 32], strides = [1, 1]} : vector<18x32xf32> to vector<1x32xf32>
    %237 = vector.extract_strided_slice %3 {offsets = [1, 0], sizes = [1, 32], strides = [1, 1]} : vector<18x32xf32> to vector<1x32xf32>
    %cst_77 = arith.constant dense<0.000000e+00> : vector<2x4xf32>
    %238 = vector.multi_reduction <add>, %172, %cst_77 [2] : vector<2x4x32xf32> to vector<2x4xf32>
    %239 = vector.shape_cast %238 : vector<2x4xf32> to vector<2x4x1xf32>
    %cst_78 = arith.constant 3.200000e+01 : f32
    %240 = vector.broadcast %cst_78 : f32 to vector<2x4x1xf32>
    %241 = arith.divf %239, %240 : vector<2x4x1xf32>
    %242 = vector.broadcast %241 : vector<2x4x1xf32> to vector<2x4x32xf32>
    %243 = arith.subf %172, %242 : vector<2x4x32xf32>
    %244 = arith.mulf %243, %243 : vector<2x4x32xf32>
    %cst_79 = arith.constant dense<0.000000e+00> : vector<2x4xf32>
    %245 = vector.multi_reduction <add>, %244, %cst_79 [2] : vector<2x4x32xf32> to vector<2x4xf32>
    %246 = vector.shape_cast %245 : vector<2x4xf32> to vector<2x4x1xf32>
    %cst_80 = arith.constant 3.200000e+01 : f32
    %247 = vector.broadcast %cst_80 : f32 to vector<2x4x1xf32>
    %248 = arith.divf %246, %247 : vector<2x4x1xf32>
    %249 = vector.broadcast %241 : vector<2x4x1xf32> to vector<2x4x32xf32>
    %250 = arith.subf %172, %249 : vector<2x4x32xf32>
    %cst_81 = arith.constant 9.99999974E-6 : f32
    %251 = vector.broadcast %cst_81 : f32 to vector<2x4x1xf32>
    %252 = arith.addf %248, %251 : vector<2x4x1xf32>
    %253 = math.rsqrt %252 : vector<2x4x1xf32>
    %254 = vector.broadcast %253 : vector<2x4x1xf32> to vector<2x4x32xf32>
    %255 = arith.mulf %250, %254 : vector<2x4x32xf32>
    %256 = vector.shape_cast %236 : vector<1x32xf32> to vector<1x1x32xf32>
    %257 = vector.broadcast %256 : vector<1x1x32xf32> to vector<2x4x32xf32>
    %258 = arith.mulf %255, %257 : vector<2x4x32xf32>
    %259 = vector.shape_cast %237 : vector<1x32xf32> to vector<1x1x32xf32>
    %260 = vector.broadcast %259 : vector<1x1x32xf32> to vector<2x4x32xf32>
    %261 = arith.addf %258, %260 : vector<2x4x32xf32>
    %262 = vector.extract_strided_slice %3 {offsets = [11, 0], sizes = [1, 32], strides = [1, 1]} : vector<18x32xf32> to vector<1x32xf32>
    %263 = vector.shape_cast %261 : vector<2x4x32xf32> to vector<8x32xf32>
    %cst_82 = arith.constant dense<0.000000e+00> : vector<8x32xf32>
    %264 = tpu.matmul %263, %11, %cst_82 {dimension_numbers = #tpu.dot_dimension_numbers<[1], [0], [0], [1], [0, 0, 1, 1], [], []>} : vector<8x32xf32>, vector<32x32xf32>, vector<8x32xf32> -> vector<8x32xf32>
    %cst_83 = arith.constant 0.353553385 : f32
    %265 = vector.broadcast %cst_83 : f32 to vector<8x32xf32>
    %266 = arith.mulf %264, %265 : vector<8x32xf32>
    %267 = vector.shape_cast %266 : vector<8x32xf32> to vector<2x4x32xf32>
    %268 = vector.shape_cast %227 : vector<2x64x32xf32> to vector<128x32xf32>
    %cst_84 = arith.constant dense<0.000000e+00> : vector<128x32xf32>
    %269 = tpu.matmul %268, %13, %cst_84 {dimension_numbers = #tpu.dot_dimension_numbers<[1], [0], [0], [1], [0, 0, 1, 1], [], []>} : vector<128x32xf32>, vector<32x32xf32>, vector<128x32xf32> -> vector<128x32xf32>
    %270 = vector.shape_cast %269 : vector<128x32xf32> to vector<2x64x32xf32>
    %271 = vector.shape_cast %227 : vector<2x64x32xf32> to vector<128x32xf32>
    %cst_85 = arith.constant dense<0.000000e+00> : vector<128x32xf32>
    %272 = tpu.matmul %271, %15, %cst_85 {dimension_numbers = #tpu.dot_dimension_numbers<[1], [0], [0], [1], [0, 0, 1, 1], [], []>} : vector<128x32xf32>, vector<32x32xf32>, vector<128x32xf32> -> vector<128x32xf32>
    %273 = vector.shape_cast %272 : vector<128x32xf32> to vector<2x64x32xf32>
    %cst_86 = arith.constant 0.000000e+00 : f32
    %274 = vector.broadcast %cst_86 : f32 to vector<2x4x32xf32>
    %275 = vector.broadcast %180 : vector<1x1x32xf32> to vector<2x4x32xf32>
    %276 = arith.mulf %267, %275 : vector<2x4x32xf32>
    "tpu.trace_start"() <{level = 10 : i32, message = "bqd,bkd->bqk"}> : () -> ()
    %cst_87 = arith.constant dense<0.000000e+00> : vector<2x4x64xf32>
    %277 = tpu.matmul %276, %270, %cst_87 {dimension_numbers = #tpu.dot_dimension_numbers<[2], [2], [1], [1], [0, 0, 0, 1, 1, 1], [0], [0]>} : vector<2x4x32xf32>, vector<2x64x32xf32>, vector<2x4x64xf32> -> vector<2x4x64xf32>
    "tpu.trace_stop"() : () -> ()
    %cst_88 = arith.constant dense<0xFF800000> : vector<2x4xf32>
    %278 = vector.multi_reduction <maximumf>, %277, %cst_88 [2] : vector<2x4x64xf32> to vector<2x4xf32>
    %279 = vector.shape_cast %278 : vector<2x4xf32> to vector<2x4x1xf32>
    %280 = vector.broadcast %279 : vector<2x4x1xf32> to vector<2x4x64xf32>
    %281 = arith.subf %277, %280 : vector<2x4x64xf32>
    %282 = math.exp %281 : vector<2x4x64xf32>
    %cst_89 = arith.constant dense<0.000000e+00> : vector<2x4xf32>
    %283 = vector.multi_reduction <add>, %282, %cst_89 [2] : vector<2x4x64xf32> to vector<2x4xf32>
    %284 = vector.shape_cast %283 : vector<2x4xf32> to vector<2x4x1xf32>
    %285 = tpu.reciprocal %284 {approx = true} : vector<2x4x1xf32> -> vector<2x4x1xf32>
    %286 = vector.broadcast %285 : vector<2x4x1xf32> to vector<2x4x64xf32>
    %287 = arith.mulf %282, %286 : vector<2x4x64xf32>
    %288 = vector.broadcast %180 : vector<1x1x32xf32> to vector<2x64x32xf32>
    %289 = arith.mulf %273, %288 : vector<2x64x32xf32>
    "tpu.trace_start"() <{level = 10 : i32, message = "bqk,bkd->bqd"}> : () -> ()
    %cst_90 = arith.constant dense<0.000000e+00> : vector<2x4x32xf32>
    %290 = tpu.matmul %287, %289, %cst_90 {dimension_numbers = #tpu.dot_dimension_numbers<[2], [1], [1], [2], [0, 0, 0, 1, 1, 2], [0], [0]>} : vector<2x4x64xf32>, vector<2x64x32xf32>, vector<2x4x32xf32> -> vector<2x4x32xf32>
    "tpu.trace_stop"() : () -> ()
    %291 = arith.addf %274, %290 : vector<2x4x32xf32>
    %292 = vector.broadcast %187 : vector<1x1x32xf32> to vector<2x4x32xf32>
    %293 = arith.mulf %267, %292 : vector<2x4x32xf32>
    "tpu.trace_start"() <{level = 10 : i32, message = "bqd,bkd->bqk"}> : () -> ()
    %cst_91 = arith.constant dense<0.000000e+00> : vector<2x4x64xf32>
    %294 = tpu.matmul %293, %270, %cst_91 {dimension_numbers = #tpu.dot_dimension_numbers<[2], [2], [1], [1], [0, 0, 0, 1, 1, 1], [0], [0]>} : vector<2x4x32xf32>, vector<2x64x32xf32>, vector<2x4x64xf32> -> vector<2x4x64xf32>
    "tpu.trace_stop"() : () -> ()
    %cst_92 = arith.constant dense<0xFF800000> : vector<2x4xf32>
    %295 = vector.multi_reduction <maximumf>, %294, %cst_92 [2] : vector<2x4x64xf32> to vector<2x4xf32>
    %296 = vector.shape_cast %295 : vector<2x4xf32> to vector<2x4x1xf32>
    %297 = vector.broadcast %296 : vector<2x4x1xf32> to vector<2x4x64xf32>
    %298 = arith.subf %294, %297 : vector<2x4x64xf32>
    %299 = math.exp %298 : vector<2x4x64xf32>
    %cst_93 = arith.constant dense<0.000000e+00> : vector<2x4xf32>
    %300 = vector.multi_reduction <add>, %299, %cst_93 [2] : vector<2x4x64xf32> to vector<2x4xf32>
    %301 = vector.shape_cast %300 : vector<2x4xf32> to vector<2x4x1xf32>
    %302 = tpu.reciprocal %301 {approx = true} : vector<2x4x1xf32> -> vector<2x4x1xf32>
    %303 = vector.broadcast %302 : vector<2x4x1xf32> to vector<2x4x64xf32>
    %304 = arith.mulf %299, %303 : vector<2x4x64xf32>
    %305 = vector.broadcast %187 : vector<1x1x32xf32> to vector<2x64x32xf32>
    %306 = arith.mulf %273, %305 : vector<2x64x32xf32>
    "tpu.trace_start"() <{level = 10 : i32, message = "bqk,bkd->bqd"}> : () -> ()
    %cst_94 = arith.constant dense<0.000000e+00> : vector<2x4x32xf32>
    %307 = tpu.matmul %304, %306, %cst_94 {dimension_numbers = #tpu.dot_dimension_numbers<[2], [1], [1], [2], [0, 0, 0, 1, 1, 2], [0], [0]>} : vector<2x4x64xf32>, vector<2x64x32xf32>, vector<2x4x32xf32> -> vector<2x4x32xf32>
    "tpu.trace_stop"() : () -> ()
    %308 = arith.addf %291, %307 : vector<2x4x32xf32>
    %309 = vector.broadcast %194 : vector<1x1x32xf32> to vector<2x4x32xf32>
    %310 = arith.mulf %267, %309 : vector<2x4x32xf32>
    "tpu.trace_start"() <{level = 10 : i32, message = "bqd,bkd->bqk"}> : () -> ()
    %cst_95 = arith.constant dense<0.000000e+00> : vector<2x4x64xf32>
    %311 = tpu.matmul %310, %270, %cst_95 {dimension_numbers = #tpu.dot_dimension_numbers<[2], [2], [1], [1], [0, 0, 0, 1, 1, 1], [0], [0]>} : vector<2x4x32xf32>, vector<2x64x32xf32>, vector<2x4x64xf32> -> vector<2x4x64xf32>
    "tpu.trace_stop"() : () -> ()
    %cst_96 = arith.constant dense<0xFF800000> : vector<2x4xf32>
    %312 = vector.multi_reduction <maximumf>, %311, %cst_96 [2] : vector<2x4x64xf32> to vector<2x4xf32>
    %313 = vector.shape_cast %312 : vector<2x4xf32> to vector<2x4x1xf32>
    %314 = vector.broadcast %313 : vector<2x4x1xf32> to vector<2x4x64xf32>
    %315 = arith.subf %311, %314 : vector<2x4x64xf32>
    %316 = math.exp %315 : vector<2x4x64xf32>
    %cst_97 = arith.constant dense<0.000000e+00> : vector<2x4xf32>
    %317 = vector.multi_reduction <add>, %316, %cst_97 [2] : vector<2x4x64xf32> to vector<2x4xf32>
    %318 = vector.shape_cast %317 : vector<2x4xf32> to vector<2x4x1xf32>
    %319 = tpu.reciprocal %318 {approx = true} : vector<2x4x1xf32> -> vector<2x4x1xf32>
    %320 = vector.broadcast %319 : vector<2x4x1xf32> to vector<2x4x64xf32>
    %321 = arith.mulf %316, %320 : vector<2x4x64xf32>
    %322 = vector.broadcast %194 : vector<1x1x32xf32> to vector<2x64x32xf32>
    %323 = arith.mulf %273, %322 : vector<2x64x32xf32>
    "tpu.trace_start"() <{level = 10 : i32, message = "bqk,bkd->bqd"}> : () -> ()
    %cst_98 = arith.constant dense<0.000000e+00> : vector<2x4x32xf32>
    %324 = tpu.matmul %321, %323, %cst_98 {dimension_numbers = #tpu.dot_dimension_numbers<[2], [1], [1], [2], [0, 0, 0, 1, 1, 2], [0], [0]>} : vector<2x4x64xf32>, vector<2x64x32xf32>, vector<2x4x32xf32> -> vector<2x4x32xf32>
    "tpu.trace_stop"() : () -> ()
    %325 = arith.addf %308, %324 : vector<2x4x32xf32>
    %326 = vector.broadcast %201 : vector<1x1x32xf32> to vector<2x4x32xf32>
    %327 = arith.mulf %267, %326 : vector<2x4x32xf32>
    "tpu.trace_start"() <{level = 10 : i32, message = "bqd,bkd->bqk"}> : () -> ()
    %cst_99 = arith.constant dense<0.000000e+00> : vector<2x4x64xf32>
    %328 = tpu.matmul %327, %270, %cst_99 {dimension_numbers = #tpu.dot_dimension_numbers<[2], [2], [1], [1], [0, 0, 0, 1, 1, 1], [0], [0]>} : vector<2x4x32xf32>, vector<2x64x32xf32>, vector<2x4x64xf32> -> vector<2x4x64xf32>
    "tpu.trace_stop"() : () -> ()
    %cst_100 = arith.constant dense<0xFF800000> : vector<2x4xf32>
    %329 = vector.multi_reduction <maximumf>, %328, %cst_100 [2] : vector<2x4x64xf32> to vector<2x4xf32>
    %330 = vector.shape_cast %329 : vector<2x4xf32> to vector<2x4x1xf32>
    %331 = vector.broadcast %330 : vector<2x4x1xf32> to vector<2x4x64xf32>
    %332 = arith.subf %328, %331 : vector<2x4x64xf32>
    %333 = math.exp %332 : vector<2x4x64xf32>
    %cst_101 = arith.constant dense<0.000000e+00> : vector<2x4xf32>
    %334 = vector.multi_reduction <add>, %333, %cst_101 [2] : vector<2x4x64xf32> to vector<2x4xf32>
    %335 = vector.shape_cast %334 : vector<2x4xf32> to vector<2x4x1xf32>
    %336 = tpu.reciprocal %335 {approx = true} : vector<2x4x1xf32> -> vector<2x4x1xf32>
    %337 = vector.broadcast %336 : vector<2x4x1xf32> to vector<2x4x64xf32>
    %338 = arith.mulf %333, %337 : vector<2x4x64xf32>
    %339 = vector.broadcast %201 : vector<1x1x32xf32> to vector<2x64x32xf32>
    %340 = arith.mulf %273, %339 : vector<2x64x32xf32>
    "tpu.trace_start"() <{level = 10 : i32, message = "bqk,bkd->bqd"}> : () -> ()
    %cst_102 = arith.constant dense<0.000000e+00> : vector<2x4x32xf32>
    %341 = tpu.matmul %338, %340, %cst_102 {dimension_numbers = #tpu.dot_dimension_numbers<[2], [1], [1], [2], [0, 0, 0, 1, 1, 2], [0], [0]>} : vector<2x4x64xf32>, vector<2x64x32xf32>, vector<2x4x32xf32> -> vector<2x4x32xf32>
    "tpu.trace_stop"() : () -> ()
    %342 = arith.addf %325, %341 : vector<2x4x32xf32>
    %343 = vector.shape_cast %342 : vector<2x4x32xf32> to vector<8x32xf32>
    %cst_103 = arith.constant dense<0.000000e+00> : vector<8x32xf32>
    %344 = tpu.matmul %343, %17, %cst_103 {dimension_numbers = #tpu.dot_dimension_numbers<[1], [0], [0], [1], [0, 0, 1, 1], [], []>} : vector<8x32xf32>, vector<32x32xf32>, vector<8x32xf32> -> vector<8x32xf32>
    %345 = vector.broadcast %262 : vector<1x32xf32> to vector<8x32xf32>
    %346 = arith.addf %344, %345 : vector<8x32xf32>
    %347 = vector.shape_cast %346 : vector<8x32xf32> to vector<2x4x32xf32>
    %348 = vector.extract_strided_slice %3 {offsets = [14, 0], sizes = [1, 32], strides = [1, 1]} : vector<18x32xf32> to vector<1x32xf32>
    %349 = vector.shape_cast %348 : vector<1x32xf32> to vector<1x1x32xf32>
    %350 = vector.broadcast %349 : vector<1x1x32xf32> to vector<2x4x32xf32>
    %351 = arith.mulf %350, %347 : vector<2x4x32xf32>
    %352 = arith.addf %172, %351 : vector<2x4x32xf32>
    %353 = vector.extract_strided_slice %3 {offsets = [6, 0], sizes = [1, 32], strides = [1, 1]} : vector<18x32xf32> to vector<1x32xf32>
    %354 = vector.extract_strided_slice %3 {offsets = [7, 0], sizes = [1, 32], strides = [1, 1]} : vector<18x32xf32> to vector<1x32xf32>
    %cst_104 = arith.constant dense<0.000000e+00> : vector<2x4xf32>
    %355 = vector.multi_reduction <add>, %352, %cst_104 [2] : vector<2x4x32xf32> to vector<2x4xf32>
    %356 = vector.shape_cast %355 : vector<2x4xf32> to vector<2x4x1xf32>
    %cst_105 = arith.constant 3.200000e+01 : f32
    %357 = vector.broadcast %cst_105 : f32 to vector<2x4x1xf32>
    %358 = arith.divf %356, %357 : vector<2x4x1xf32>
    %359 = vector.broadcast %358 : vector<2x4x1xf32> to vector<2x4x32xf32>
    %360 = arith.subf %352, %359 : vector<2x4x32xf32>
    %361 = arith.mulf %360, %360 : vector<2x4x32xf32>
    %cst_106 = arith.constant dense<0.000000e+00> : vector<2x4xf32>
    %362 = vector.multi_reduction <add>, %361, %cst_106 [2] : vector<2x4x32xf32> to vector<2x4xf32>
    %363 = vector.shape_cast %362 : vector<2x4xf32> to vector<2x4x1xf32>
    %cst_107 = arith.constant 3.200000e+01 : f32
    %364 = vector.broadcast %cst_107 : f32 to vector<2x4x1xf32>
    %365 = arith.divf %363, %364 : vector<2x4x1xf32>
    %366 = vector.broadcast %358 : vector<2x4x1xf32> to vector<2x4x32xf32>
    %367 = arith.subf %352, %366 : vector<2x4x32xf32>
    %cst_108 = arith.constant 9.99999974E-6 : f32
    %368 = vector.broadcast %cst_108 : f32 to vector<2x4x1xf32>
    %369 = arith.addf %365, %368 : vector<2x4x1xf32>
    %370 = math.rsqrt %369 : vector<2x4x1xf32>
    %371 = vector.broadcast %370 : vector<2x4x1xf32> to vector<2x4x32xf32>
    %372 = arith.mulf %367, %371 : vector<2x4x32xf32>
    %373 = vector.shape_cast %353 : vector<1x32xf32> to vector<1x1x32xf32>
    %374 = vector.broadcast %373 : vector<1x1x32xf32> to vector<2x4x32xf32>
    %375 = arith.mulf %372, %374 : vector<2x4x32xf32>
    %376 = vector.shape_cast %354 : vector<1x32xf32> to vector<1x1x32xf32>
    %377 = vector.broadcast %376 : vector<1x1x32xf32> to vector<2x4x32xf32>
    %378 = arith.addf %375, %377 : vector<2x4x32xf32>
    %379 = vector.extract_strided_slice %3 {offsets = [12, 0], sizes = [1, 32], strides = [1, 1]} : vector<18x32xf32> to vector<1x32xf32>
    %380 = vector.shape_cast %235 : vector<2x64x32xf32> to vector<128x32xf32>
    %cst_109 = arith.constant dense<0.000000e+00> : vector<128x32xf32>
    %381 = tpu.matmul %380, %19, %cst_109 {dimension_numbers = #tpu.dot_dimension_numbers<[1], [0], [0], [1], [0, 0, 1, 1], [], []>} : vector<128x32xf32>, vector<32x32xf32>, vector<128x32xf32> -> vector<128x32xf32>
    %cst_110 = arith.constant 0.353553385 : f32
    %382 = vector.broadcast %cst_110 : f32 to vector<128x32xf32>
    %383 = arith.mulf %381, %382 : vector<128x32xf32>
    %384 = vector.shape_cast %383 : vector<128x32xf32> to vector<2x64x32xf32>
    %385 = vector.shape_cast %378 : vector<2x4x32xf32> to vector<8x32xf32>
    %cst_111 = arith.constant dense<0.000000e+00> : vector<8x32xf32>
    %386 = tpu.matmul %385, %21, %cst_111 {dimension_numbers = #tpu.dot_dimension_numbers<[1], [0], [0], [1], [0, 0, 1, 1], [], []>} : vector<8x32xf32>, vector<32x32xf32>, vector<8x32xf32> -> vector<8x32xf32>
    %387 = vector.shape_cast %386 : vector<8x32xf32> to vector<2x4x32xf32>
    %388 = vector.shape_cast %378 : vector<2x4x32xf32> to vector<8x32xf32>
    %cst_112 = arith.constant dense<0.000000e+00> : vector<8x32xf32>
    %389 = tpu.matmul %388, %23, %cst_112 {dimension_numbers = #tpu.dot_dimension_numbers<[1], [0], [0], [1], [0, 0, 1, 1], [], []>} : vector<8x32xf32>, vector<32x32xf32>, vector<8x32xf32> -> vector<8x32xf32>
    %390 = vector.shape_cast %389 : vector<8x32xf32> to vector<2x4x32xf32>
    %cst_113 = arith.constant 0.000000e+00 : f32
    %391 = vector.broadcast %cst_113 : f32 to vector<2x64x32xf32>
    %392 = vector.broadcast %180 : vector<1x1x32xf32> to vector<2x64x32xf32>
    %393 = arith.mulf %384, %392 : vector<2x64x32xf32>
    "tpu.trace_start"() <{level = 10 : i32, message = "bqd,bkd->bqk"}> : () -> ()
    %cst_114 = arith.constant dense<0.000000e+00> : vector<2x64x4xf32>
    %394 = tpu.matmul %393, %387, %cst_114 {dimension_numbers = #tpu.dot_dimension_numbers<[2], [2], [1], [1], [0, 0, 0, 1, 1, 1], [0], [0]>} : vector<2x64x32xf32>, vector<2x4x32xf32>, vector<2x64x4xf32> -> vector<2x64x4xf32>
    "tpu.trace_stop"() : () -> ()
    %cst_115 = arith.constant dense<0xFF800000> : vector<2x64xf32>
    %395 = vector.multi_reduction <maximumf>, %394, %cst_115 [2] : vector<2x64x4xf32> to vector<2x64xf32>
    %396 = vector.shape_cast %395 : vector<2x64xf32> to vector<2x64x1xf32>
    %397 = vector.broadcast %396 : vector<2x64x1xf32> to vector<2x64x4xf32>
    %398 = arith.subf %394, %397 : vector<2x64x4xf32>
    %399 = math.exp %398 : vector<2x64x4xf32>
    %cst_116 = arith.constant dense<0.000000e+00> : vector<2x64xf32>
    %400 = vector.multi_reduction <add>, %399, %cst_116 [2] : vector<2x64x4xf32> to vector<2x64xf32>
    %401 = vector.shape_cast %400 : vector<2x64xf32> to vector<2x64x1xf32>
    %402 = tpu.reciprocal %401 {approx = true} : vector<2x64x1xf32> -> vector<2x64x1xf32>
    %403 = vector.broadcast %402 : vector<2x64x1xf32> to vector<2x64x4xf32>
    %404 = arith.mulf %399, %403 : vector<2x64x4xf32>
    %405 = vector.broadcast %180 : vector<1x1x32xf32> to vector<2x4x32xf32>
    %406 = arith.mulf %390, %405 : vector<2x4x32xf32>
    "tpu.trace_start"() <{level = 10 : i32, message = "bqk,bkd->bqd"}> : () -> ()
    %cst_117 = arith.constant dense<0.000000e+00> : vector<2x64x32xf32>
    %407 = tpu.matmul %404, %406, %cst_117 {dimension_numbers = #tpu.dot_dimension_numbers<[2], [1], [1], [2], [0, 0, 0, 1, 1, 2], [0], [0]>} : vector<2x64x4xf32>, vector<2x4x32xf32>, vector<2x64x32xf32> -> vector<2x64x32xf32>
    "tpu.trace_stop"() : () -> ()
    %408 = arith.addf %391, %407 : vector<2x64x32xf32>
    %409 = vector.broadcast %187 : vector<1x1x32xf32> to vector<2x64x32xf32>
    %410 = arith.mulf %384, %409 : vector<2x64x32xf32>
    "tpu.trace_start"() <{level = 10 : i32, message = "bqd,bkd->bqk"}> : () -> ()
    %cst_118 = arith.constant dense<0.000000e+00> : vector<2x64x4xf32>
    %411 = tpu.matmul %410, %387, %cst_118 {dimension_numbers = #tpu.dot_dimension_numbers<[2], [2], [1], [1], [0, 0, 0, 1, 1, 1], [0], [0]>} : vector<2x64x32xf32>, vector<2x4x32xf32>, vector<2x64x4xf32> -> vector<2x64x4xf32>
    "tpu.trace_stop"() : () -> ()
    %cst_119 = arith.constant dense<0xFF800000> : vector<2x64xf32>
    %412 = vector.multi_reduction <maximumf>, %411, %cst_119 [2] : vector<2x64x4xf32> to vector<2x64xf32>
    %413 = vector.shape_cast %412 : vector<2x64xf32> to vector<2x64x1xf32>
    %414 = vector.broadcast %413 : vector<2x64x1xf32> to vector<2x64x4xf32>
    %415 = arith.subf %411, %414 : vector<2x64x4xf32>
    %416 = math.exp %415 : vector<2x64x4xf32>
    %cst_120 = arith.constant dense<0.000000e+00> : vector<2x64xf32>
    %417 = vector.multi_reduction <add>, %416, %cst_120 [2] : vector<2x64x4xf32> to vector<2x64xf32>
    %418 = vector.shape_cast %417 : vector<2x64xf32> to vector<2x64x1xf32>
    %419 = tpu.reciprocal %418 {approx = true} : vector<2x64x1xf32> -> vector<2x64x1xf32>
    %420 = vector.broadcast %419 : vector<2x64x1xf32> to vector<2x64x4xf32>
    %421 = arith.mulf %416, %420 : vector<2x64x4xf32>
    %422 = vector.broadcast %187 : vector<1x1x32xf32> to vector<2x4x32xf32>
    %423 = arith.mulf %390, %422 : vector<2x4x32xf32>
    "tpu.trace_start"() <{level = 10 : i32, message = "bqk,bkd->bqd"}> : () -> ()
    %cst_121 = arith.constant dense<0.000000e+00> : vector<2x64x32xf32>
    %424 = tpu.matmul %421, %423, %cst_121 {dimension_numbers = #tpu.dot_dimension_numbers<[2], [1], [1], [2], [0, 0, 0, 1, 1, 2], [0], [0]>} : vector<2x64x4xf32>, vector<2x4x32xf32>, vector<2x64x32xf32> -> vector<2x64x32xf32>
    "tpu.trace_stop"() : () -> ()
    %425 = arith.addf %408, %424 : vector<2x64x32xf32>
    %426 = vector.broadcast %194 : vector<1x1x32xf32> to vector<2x64x32xf32>
    %427 = arith.mulf %384, %426 : vector<2x64x32xf32>
    "tpu.trace_start"() <{level = 10 : i32, message = "bqd,bkd->bqk"}> : () -> ()
    %cst_122 = arith.constant dense<0.000000e+00> : vector<2x64x4xf32>
    %428 = tpu.matmul %427, %387, %cst_122 {dimension_numbers = #tpu.dot_dimension_numbers<[2], [2], [1], [1], [0, 0, 0, 1, 1, 1], [0], [0]>} : vector<2x64x32xf32>, vector<2x4x32xf32>, vector<2x64x4xf32> -> vector<2x64x4xf32>
    "tpu.trace_stop"() : () -> ()
    %cst_123 = arith.constant dense<0xFF800000> : vector<2x64xf32>
    %429 = vector.multi_reduction <maximumf>, %428, %cst_123 [2] : vector<2x64x4xf32> to vector<2x64xf32>
    %430 = vector.shape_cast %429 : vector<2x64xf32> to vector<2x64x1xf32>
    %431 = vector.broadcast %430 : vector<2x64x1xf32> to vector<2x64x4xf32>
    %432 = arith.subf %428, %431 : vector<2x64x4xf32>
    %433 = math.exp %432 : vector<2x64x4xf32>
    %cst_124 = arith.constant dense<0.000000e+00> : vector<2x64xf32>
    %434 = vector.multi_reduction <add>, %433, %cst_124 [2] : vector<2x64x4xf32> to vector<2x64xf32>
    %435 = vector.shape_cast %434 : vector<2x64xf32> to vector<2x64x1xf32>
    %436 = tpu.reciprocal %435 {approx = true} : vector<2x64x1xf32> -> vector<2x64x1xf32>
    %437 = vector.broadcast %436 : vector<2x64x1xf32> to vector<2x64x4xf32>
    %438 = arith.mulf %433, %437 : vector<2x64x4xf32>
    %439 = vector.broadcast %194 : vector<1x1x32xf32> to vector<2x4x32xf32>
    %440 = arith.mulf %390, %439 : vector<2x4x32xf32>
    "tpu.trace_start"() <{level = 10 : i32, message = "bqk,bkd->bqd"}> : () -> ()
    %cst_125 = arith.constant dense<0.000000e+00> : vector<2x64x32xf32>
    %441 = tpu.matmul %438, %440, %cst_125 {dimension_numbers = #tpu.dot_dimension_numbers<[2], [1], [1], [2], [0, 0, 0, 1, 1, 2], [0], [0]>} : vector<2x64x4xf32>, vector<2x4x32xf32>, vector<2x64x32xf32> -> vector<2x64x32xf32>
    "tpu.trace_stop"() : () -> ()
    %442 = arith.addf %425, %441 : vector<2x64x32xf32>
    %443 = vector.broadcast %201 : vector<1x1x32xf32> to vector<2x64x32xf32>
    %444 = arith.mulf %384, %443 : vector<2x64x32xf32>
    "tpu.trace_start"() <{level = 10 : i32, message = "bqd,bkd->bqk"}> : () -> ()
    %cst_126 = arith.constant dense<0.000000e+00> : vector<2x64x4xf32>
    %445 = tpu.matmul %444, %387, %cst_126 {dimension_numbers = #tpu.dot_dimension_numbers<[2], [2], [1], [1], [0, 0, 0, 1, 1, 1], [0], [0]>} : vector<2x64x32xf32>, vector<2x4x32xf32>, vector<2x64x4xf32> -> vector<2x64x4xf32>
    "tpu.trace_stop"() : () -> ()
    %cst_127 = arith.constant dense<0xFF800000> : vector<2x64xf32>
    %446 = vector.multi_reduction <maximumf>, %445, %cst_127 [2] : vector<2x64x4xf32> to vector<2x64xf32>
    %447 = vector.shape_cast %446 : vector<2x64xf32> to vector<2x64x1xf32>
    %448 = vector.broadcast %447 : vector<2x64x1xf32> to vector<2x64x4xf32>
    %449 = arith.subf %445, %448 : vector<2x64x4xf32>
    %450 = math.exp %449 : vector<2x64x4xf32>
    %cst_128 = arith.constant dense<0.000000e+00> : vector<2x64xf32>
    %451 = vector.multi_reduction <add>, %450, %cst_128 [2] : vector<2x64x4xf32> to vector<2x64xf32>
    %452 = vector.shape_cast %451 : vector<2x64xf32> to vector<2x64x1xf32>
    %453 = tpu.reciprocal %452 {approx = true} : vector<2x64x1xf32> -> vector<2x64x1xf32>
    %454 = vector.broadcast %453 : vector<2x64x1xf32> to vector<2x64x4xf32>
    %455 = arith.mulf %450, %454 : vector<2x64x4xf32>
    %456 = vector.broadcast %201 : vector<1x1x32xf32> to vector<2x4x32xf32>
    %457 = arith.mulf %390, %456 : vector<2x4x32xf32>
    "tpu.trace_start"() <{level = 10 : i32, message = "bqk,bkd->bqd"}> : () -> ()
    %cst_129 = arith.constant dense<0.000000e+00> : vector<2x64x32xf32>
    %458 = tpu.matmul %455, %457, %cst_129 {dimension_numbers = #tpu.dot_dimension_numbers<[2], [1], [1], [2], [0, 0, 0, 1, 1, 2], [0], [0]>} : vector<2x64x4xf32>, vector<2x4x32xf32>, vector<2x64x32xf32> -> vector<2x64x32xf32>
    "tpu.trace_stop"() : () -> ()
    %459 = arith.addf %442, %458 : vector<2x64x32xf32>
    %460 = vector.shape_cast %459 : vector<2x64x32xf32> to vector<128x32xf32>
    %cst_130 = arith.constant dense<0.000000e+00> : vector<128x32xf32>
    %461 = tpu.matmul %460, %25, %cst_130 {dimension_numbers = #tpu.dot_dimension_numbers<[1], [0], [0], [1], [0, 0, 1, 1], [], []>} : vector<128x32xf32>, vector<32x32xf32>, vector<128x32xf32> -> vector<128x32xf32>
    %462 = vector.broadcast %379 : vector<1x32xf32> to vector<128x32xf32>
    %463 = arith.addf %461, %462 : vector<128x32xf32>
    %464 = vector.shape_cast %463 : vector<128x32xf32> to vector<2x64x32xf32>
    %465 = vector.extract_strided_slice %3 {offsets = [15, 0], sizes = [1, 32], strides = [1, 1]} : vector<18x32xf32> to vector<1x32xf32>
    %466 = vector.shape_cast %465 : vector<1x32xf32> to vector<1x1x32xf32>
    %467 = vector.broadcast %466 : vector<1x1x32xf32> to vector<2x64x32xf32>
    %468 = arith.mulf %467, %464 : vector<2x64x32xf32>
    %469 = arith.addf %0, %468 : vector<2x64x32xf32>
    %470 = vector.extract_strided_slice %3 {offsets = [8, 0], sizes = [1, 32], strides = [1, 1]} : vector<18x32xf32> to vector<1x32xf32>
    %471 = vector.extract_strided_slice %3 {offsets = [9, 0], sizes = [1, 32], strides = [1, 1]} : vector<18x32xf32> to vector<1x32xf32>
    %cst_131 = arith.constant dense<0.000000e+00> : vector<2x64xf32>
    %472 = vector.multi_reduction <add>, %469, %cst_131 [2] : vector<2x64x32xf32> to vector<2x64xf32>
    %473 = vector.shape_cast %472 : vector<2x64xf32> to vector<2x64x1xf32>
    %cst_132 = arith.constant 3.200000e+01 : f32
    %474 = vector.broadcast %cst_132 : f32 to vector<2x64x1xf32>
    %475 = arith.divf %473, %474 : vector<2x64x1xf32>
    %476 = vector.broadcast %475 : vector<2x64x1xf32> to vector<2x64x32xf32>
    %477 = arith.subf %469, %476 : vector<2x64x32xf32>
    %478 = arith.mulf %477, %477 : vector<2x64x32xf32>
    %cst_133 = arith.constant dense<0.000000e+00> : vector<2x64xf32>
    %479 = vector.multi_reduction <add>, %478, %cst_133 [2] : vector<2x64x32xf32> to vector<2x64xf32>
    %480 = vector.shape_cast %479 : vector<2x64xf32> to vector<2x64x1xf32>
    %cst_134 = arith.constant 3.200000e+01 : f32
    %481 = vector.broadcast %cst_134 : f32 to vector<2x64x1xf32>
    %482 = arith.divf %480, %481 : vector<2x64x1xf32>
    %483 = vector.broadcast %475 : vector<2x64x1xf32> to vector<2x64x32xf32>
    %484 = arith.subf %469, %483 : vector<2x64x32xf32>
    %cst_135 = arith.constant 9.99999974E-6 : f32
    %485 = vector.broadcast %cst_135 : f32 to vector<2x64x1xf32>
    %486 = arith.addf %482, %485 : vector<2x64x1xf32>
    %487 = math.rsqrt %486 : vector<2x64x1xf32>
    %488 = vector.broadcast %487 : vector<2x64x1xf32> to vector<2x64x32xf32>
    %489 = arith.mulf %484, %488 : vector<2x64x32xf32>
    %490 = vector.shape_cast %470 : vector<1x32xf32> to vector<1x1x32xf32>
    %491 = vector.broadcast %490 : vector<1x1x32xf32> to vector<2x64x32xf32>
    %492 = arith.mulf %489, %491 : vector<2x64x32xf32>
    %493 = vector.shape_cast %471 : vector<1x32xf32> to vector<1x1x32xf32>
    %494 = vector.broadcast %493 : vector<1x1x32xf32> to vector<2x64x32xf32>
    %495 = arith.addf %492, %494 : vector<2x64x32xf32>
    %496 = vector.shape_cast %495 : vector<2x64x32xf32> to vector<128x32xf32>
    %cst_136 = arith.constant dense<0.000000e+00> : vector<128x32xf32>
    %497 = tpu.matmul %496, %27, %cst_136 {dimension_numbers = #tpu.dot_dimension_numbers<[1], [0], [0], [1], [0, 0, 1, 1], [], []>} : vector<128x32xf32>, vector<32x32xf32>, vector<128x32xf32> -> vector<128x32xf32>
    %498 = vector.extract_strided_slice %3 {offsets = [13, 0], sizes = [1, 32], strides = [1, 1]} : vector<18x32xf32> to vector<1x32xf32>
    %499 = vector.broadcast %498 : vector<1x32xf32> to vector<128x32xf32>
    %500 = arith.addf %497, %499 : vector<128x32xf32>
    %501 = vector.shape_cast %500 : vector<128x32xf32> to vector<2x64x32xf32>
    %502 = arith.addf %469, %501 : vector<2x64x32xf32>
    %c0_137 = arith.constant 0 : index
    %c0_138 = arith.constant 0 : index
    %c0_139 = arith.constant 0 : index
    %503 = vector.load %arg6[%c0_137, %c0_138, %c0_139] : memref<2x64x32xf32, #tpu.memory_space<vmem>>, vector<2x64x32xf32>
    tpu.vector_store %arg6[%c0_137, %c0_138, %c0_139], %502 {strides = array<i32>} : memref<2x64x32xf32, #tpu.memory_space<vmem>>, vector<2x64x32xf32>,
    return
  }
  func.func @transform_0(%arg0: i32) -> (i32, i32, i32) {
    %c0_i32 = arith.constant 0 : i32
    %c0_i32_0 = arith.constant 0 : i32
    %c0_i32_1 = arith.constant 0 : i32
    %c0_i32_2 = arith.constant 0 : i32
    return %c0_i32, %c0_i32_0, %c0_i32_1 : i32, i32, i32
  }
  func.func @transform_1(%arg0: i32) -> (i32, i32) {
    %c0_i32 = arith.constant 0 : i32
    %c0_i32_0 = arith.constant 0 : i32
    %c0_i32_1 = arith.constant 0 : i32
    return %c0_i32, %c0_i32_0 : i32, i32
  }
  func.func @transform_2(%arg0: i32) -> (i32, i32) {
    %c0_i32 = arith.constant 0 : i32
    %c0_i32_0 = arith.constant 0 : i32
    %c0_i32_1 = arith.constant 0 : i32
    return %c0_i32, %c0_i32_0 : i32, i32
  }
  func.func @transform_3(%arg0: i32) -> (i32, i32, i32) {
    %c0_i32 = arith.constant 0 : i32
    %c0_i32_0 = arith.constant 0 : i32
    %c0_i32_1 = arith.constant 0 : i32
    %c0_i32_2 = arith.constant 0 : i32
    return %c0_i32, %c0_i32_0, %c0_i32_1 : i32, i32, i32
  }
  func.func @transform_4(%arg0: i32) -> (i32, i32) {
    %c0_i32 = arith.constant 0 : i32
    %c0_i32_0 = arith.constant 0 : i32
    %c0_i32_1 = arith.constant 0 : i32
    return %c0_i32, %c0_i32_0 : i32, i32
  }
  func.func @transform_5(%arg0: i32) -> (i32, i32, i32) {
    %c0_i32 = arith.constant 0 : i32
    %c0_i32_0 = arith.constant 0 : i32
    %c0_i32_1 = arith.constant 0 : i32
    %c0_i32_2 = arith.constant 0 : i32
    return %c0_i32, %c0_i32_0, %c0_i32_1 : i32, i32, i32
  }
  func.func @transform_6(%arg0: i32) -> (i32, i32) {
    %c0_i32 = arith.constant 0 : i32
    %c0_i32_0 = arith.constant 0 : i32
    %c0_i32_1 = arith.constant 0 : i32
    return %c0_i32, %c0_i32_0 : i32, i32
  }
}

</mosaic_0001>

<bundles_post_ra>
// kernel: tpu_custom_call.1
= control target key start
LH: loop header
LB: loop body
LE: loop exit
PB: predicated region body
PF: predicated region fallthrough
CT: control target
= control target key end

     0   :  { %12 = vsyncpa [#allocation3], 0  ;;  %s10063_s0 = inlined_call_operand.vmem [shape: f32[2,64,32], index: 0, kind: input, shape index: {}]   ;;  %s10064_s1 = inlined_call_operand.vmem [shape: f32[2,64], index: 1, kind: input, shape index: {}]   ;;  %s10065_s2 = inlined_call_operand.vmem [shape: f32[64,32], index: 2, kind: input, shape index: {}]   ;;  %s10066_s3 = inlined_call_operand.hbm [shape: f32[12,32,32], index: 3, kind: input, shape index: {}]   ;;  %s10067_s4 = inlined_call_operand.vmem [shape: f32[18,32], index: 4, kind: input, shape index: {}]   ;;  %s10068_s5 = inlined_call_operand.vmem [shape: f32[2,64,32], index: 5, kind: output, shape index: {0}]   ;;  %s10069_s6 = inlined_call_operand.hbm [shape: f32[2,64], index: 6, kind: output, shape index: {1}]  }
   0x1   :  { %13 = vsyncpa [#allocation4], 0  ;;  %s24_s23 = sshll.u32 %s10066_s3, 4  ;;  %s6572_s24 = smov [#allocation2]   ;;  %s25_s23 = int_to_ptr.hbm [resolvable:$true] %s24_s23 }
   0x2   :  { %s26_s25 = sshll.u32 %s6572_s24, 4  ;;  %s6573_s26 = smov 128   ;;  %s27_s25 = int_to_ptr.vmem [resolvable:$true] %s26_s25 }
   0x3   :  { %s6574_s27 = smov 8  }
   0x4   :  { %32 = dma.hbm_to_vmem [thread:$0]  %s25_s23, 6144, %s27_s25, [#allocation3], %s6573_s26, %s6573_s26, %s6574_s27  }
   0x5   :  { %6568 = dma.done.wait [#allocation3], 6144  }
   0x6   :  { %6569 = vsyncadd [#allocation3], 4294961152  ;;  %v130_v0 = vlaneseq  ;;  %v55_v3 = vld [vmem:[%s10064_s1] sm:$0x3]  ;;  %v6575_v5 = vmov 0.0   ;;  %v6640_v15 = vld [vmem:[%s10063_s0 + $0x38] sm:$0xff] }
   0x7   :  { %vm126_vm0 = vcmp.gt.f32.partialorder %v55_v3, 0.5  ;;  %v6645_v16 = vld [vmem:[%s10063_s0 + $0x78] sm:$0xff]  ;;  %1141 = vmatpush.msra.mxu0 %v6640_v15  ;;  %v6652_v17 = vld [vmem:[%s10063_s0 + $0x30] sm:$0xff]  ;;  %v6664_v21 = vld [vmem:[%s10063_s0 + $0x28] sm:$0xff]  ;;  %vm10070_vm1 = vcmask 261120   ;;  %s6578_s13 = smov [#allocation5]  }
   0x8   :  { %v131_v1 = vshrl.u32 %v130_v0, 7  ;;  %v5615_v6 = vsel %vm126_vm0, 1.0, %v6575_v5  ;;  %1164 = vmatpush.msra.mxu1 %v6645_v16  ;;  %v6657_v18 = vld [vmem:[%s10063_s0 + $0x70] sm:$0xff]  ;;  %v6669_v22 = vld [vmem:[%s10063_s0 + $0x68] sm:$0xff]  ;;  %v6676_v23 = vld [vmem:[%s10063_s0 + $0x20] sm:$0xff]  ;;  %s5601_s14 = sshll.u32 %s6578_s13, 4  ;;  %s5602_s14 = int_to_ptr.vmem [resolvable:$true] %s5601_s14 }
   0x9   :  { %v129_v7 = vperm.slane %v5615_v6, 0  ;;  %v178_v8 = vperm.slane %v5615_v6, 1  ;;  %1142 = vmatpush.msra.mxu0 %v6652_v17  ;;  %v6681_v24 = vld [vmem:[%s10063_s0 + $0x60] sm:$0xff]  ;;  %v6688_v26 = vld [vmem:[%s10063_s0 + $0x18] sm:$0xff]  ;;  %v6698_v28 = vld [vmem:[%s10063_s0 + $0x10] sm:$0xff] }
   0xa   :  { %5983 = vset.pattern.permute.xlu0 %v131_v1  ;;  %v144_v2 = vadd.s32 16, %v131_v1  ;;  %v6621_v4 = vadd.s32 32, %v131_v1  ;;  %v6625_v10 = vadd.s32 24, %v131_v1  ;;  %v138_v11 = vadd.s32 8, %v131_v1  ;;  %1165 = vmatpush.msra.mxu1 %v6657_v18  ;;  %v6693_v27 = vld [vmem:[%s10063_s0 + $0x58] sm:$0xff]  ;;  %v6705_v31 = vld [vmem:[%s10063_s0 + $0x50] sm:$0xff] }
   0xb   :  { %v5996_v9 = vpack.i.bf16 %v178_v8, %v129_v7  ;;  %v6627_v12 = vadd.s32 40, %v131_v1  ;;  %v6631_v13 = vadd.s32 48, %v131_v1  ;;  %v6633_v14 = vadd.s32 56, %v131_v1  ;;  %1143 = vmatpush.msra.mxu0 %v6664_v21  ;;  %v6710_v32 = vld [vmem:[%s10063_s0] sm:$0xff]  ;;  %v6722_v40 = vld [vmem:[%s10063_s0 + $0x8] sm:$0xff] }
   0xc   :  { %5995 = vset.pattern.permute.xlu1 %v144_v2  ;;  %6007 = vset.pattern.permute.xlu2 %v6621_v4  ;;  %v6715_v33 = vld [vmem:[%s10063_s0 + $0x40] sm:$0xff]  ;;  %v6727_v41 = vld [vmem:[%s10063_s0 + $0x48] sm:$0xff] }
   0xd   :  { %1166 = vmatpush.msra.mxu1 %v6669_v22  ;;  %1144 = vmatpush.msra.mxu0 %v6676_v23 }
   0xf   :  { %1167 = vmatpush.msra.mxu1 %v6681_v24  ;;  %1145 = vmatpush.msra.mxu0 %v6688_v26 }
  0x11   :  { %1168 = vmatpush.msra.mxu1 %v6693_v27  ;;  %1146 = vmatpush.msra.mxu0 %v6698_v28 }
  0x12   :  { %5985 = vperm.xlu0 %5983, %v5996_v9  }
  0x13   :  { %1169 = vmatpush.msra.mxu1 %v6705_v31  ;;  %1147 = vmatpush.msra.mxu0 %v6722_v40 }
  0x14   :  { %5997 = vperm.xlu1 %5995, %v5996_v9   ;;  %6009 = vperm.xlu2 %6007, %v5996_v9  }
  0x15   :  { %1170 = vmatpush.msra.mxu1 %v6727_v41  ;;  %1148 = vmatpush.msra.mxu0 %v6710_v32 }
  0x17   :  { %1171 = vmatpush.msra.mxu1 %v6715_v33 }
  0x1a   :  { %5989 = vset.pattern.permute.xlu0 %v138_v11 }
  0x1c   :  { %6001 = vset.pattern.permute.xlu1 %v6625_v10  ;;  %6013 = vset.pattern.permute.xlu2 %v6627_v12 }
  0x22   :  { %5991 = vperm.xlu0 %5989, %v5996_v9  }
  0x24   :  { %6003 = vperm.xlu1 %6001, %v5996_v9   ;;  %6015 = vperm.xlu2 %6013, %v5996_v9  }
  0x2a   :  { %6033 = vset.pattern.permute.xlu0 %v144_v2 }
  0x2c   :  { %6019 = vset.pattern.permute.xlu1 %v6631_v13  ;;  %6025 = vset.pattern.permute.xlu2 %v6633_v14 }
  0x34   :  { %6021 = vperm.xlu1 %6019, %v5996_v9   ;;  %6027 = vperm.xlu2 %6025, %v5996_v9  }
  0x3c   :  { %6031 = vset.pattern.permute.xlu1 %v131_v1  ;;  %6032 = vset.pattern.permute.xlu2 %v138_v11 }
  0x6e   :  { %v6010_v25 = vpop.permute.xlu2 %6009 }
  0x6f   :  { %v6012_v59 = vunpack.i.h.bf16 %v6010_v25  ;;  %v6011_v60 = vunpack.i.l.bf16 %v6010_v25 }
  0x71   :  { %v259_v11 = vmul.f32 %v6011_v60, %v6676_v23 }
  0x7e   :  { %v6016_v54 = vpop.permute.xlu2 %6015 }
  0x7f   :  { %v6017_v25 = vunpack.i.l.bf16 %v6016_v54 }
  0x84   :  { %v5986_v19 = vpop.permute.xlu0 %5985 }
  0x85   :  { %v5988_v29 = vunpack.i.h.bf16 %v5986_v19  ;;  %v5987_v30 = vunpack.i.l.bf16 %v5986_v19  ;;  %v267_v19 = vmul.f32 %v6012_v59, %v6681_v24 }
  0x86   :  { %v5998_v20 = vpop.permute.xlu1 %5997 }
  0x87   :  { %v5999_v34 = vunpack.i.l.bf16 %v5998_v20  ;;  %v6000_v36 = vunpack.i.h.bf16 %v5998_v20  ;;  %v255_v42 = vmul.f32 %v5987_v30, %v6710_v32  ;;  %v263_v43 = vmul.f32 %v5988_v29, %v6715_v33 }
  0x89   :  { %v257_v46 = vmul.f32 %v5999_v34, %v6698_v28  ;;  %v265_v50 = vmul.f32 %v6000_v36, %v6705_v31  ;;  %v272_v55 = vsel %vm10070_vm1, %v255_v42, 0.0  ;;  %v293_v56 = vsel %vm10070_vm1, %v263_v43, 0.0 }
  0x8a   :  { %v300_v42 = vsel %vm10070_vm1, %v267_v19, 0.0 }
  0x8b   :  { %v275_v63 = vsel %vm10070_vm1, %v257_v46, 0.0  ;;  %v296_v3 = vsel %vm10070_vm1, %v265_v50, 0.0 }
  0x94   :  { %v5992_v35 = vpop.permute.xlu0 %5991 }
  0x95   :  { %v5994_v38 = vunpack.i.h.bf16 %v5992_v35  ;;  %v5993_v39 = vunpack.i.l.bf16 %v5992_v35 }
  0x96   :  { %v6004_v37 = vpop.permute.xlu1 %6003 }
  0x97   :  { %v227_v44 = vadd.f32 %v5993_v39, %v5987_v30  ;;  %v240_v45 = vadd.f32 %v5994_v38, %v5988_v29  ;;  %v6005_v47 = vunpack.i.l.bf16 %v6004_v37  ;;  %v256_v48 = vmul.f32 %v5993_v39, %v6722_v40 }
  0x98   :  { %v264_v49 = vmul.f32 %v5994_v38, %v6727_v41  ;;  %v6006_v51 = vunpack.i.h.bf16 %v6004_v37  ;;  %v6018_v37 = vunpack.i.h.bf16 %v6016_v54  ;;  %v279_v39 = vsel %vm10070_vm1, %v259_v11, 0.0 }
  0x99   :  { %v228_v52 = vadd.f32 %v5999_v34, %v227_v44  ;;  %v241_v53 = vadd.f32 %v6000_v36, %v240_v45  ;;  %v273_v57 = vsel %vm10070_vm1, %v256_v48, 0.0  ;;  %v258_v1 = vmul.f32 %v6005_v47, %v6688_v26  ;;  %v6028_v36 = vpop.permute.xlu2 %6027 }
  0x9a   :  { %v294_v58 = vsel %vm10070_vm1, %v264_v49, 0.0  ;;  %v274_v61 = vadd.f32 %v273_v57, %v272_v55  ;;  %v266_v6 = vmul.f32 %v6006_v51, %v6693_v27  ;;  %v260_v44 = vmul.f32 %v6017_v25, %v6664_v21 }
  0x9b   :  { %v295_v62 = vadd.f32 %v294_v58, %v293_v56  ;;  %v229_v2 = vadd.f32 %v6005_v47, %v228_v52  ;;  %v242_v8 = vadd.f32 %v6006_v51, %v241_v53  ;;  %v277_v20 = vsel %vm10070_vm1, %v258_v1, 0.0 }
  0x9c   :  { %v276_v7 = vadd.f32 %v275_v63, %v274_v61  ;;  %v298_v30 = vsel %vm10070_vm1, %v266_v6, 0.0  ;;  %v6030_v46 = vunpack.i.h.bf16 %v6028_v36  ;;  %v6029_v47 = vunpack.i.l.bf16 %v6028_v36 }
  0x9d   :  { %v297_v9 = vadd.f32 %v296_v3, %v295_v62  ;;  %v230_v29 = vadd.f32 %v6011_v60, %v229_v2  ;;  %v243_v34 = vadd.f32 %v6012_v59, %v242_v8  ;;  %v268_v52 = vmul.f32 %v6018_v37, %v6669_v22 }
  0x9e   :  { %v278_v35 = vadd.f32 %v277_v20, %v276_v7  ;;  %v281_v58 = vsel %vm10070_vm1, %v260_v44, 0.0  ;;  %v262_v59 = vmul.f32 %v6029_v47, %v6640_v15  ;;  %v270_v3 = vmul.f32 %v6030_v46, %v6645_v16 }
  0x9f   :  { %v299_v38 = vadd.f32 %v298_v30, %v297_v9  ;;  %v231_v43 = vadd.f32 %v6017_v25, %v230_v29  ;;  %v244_v48 = vadd.f32 %v6018_v37, %v243_v34  ;;  %v302_v1 = vsel %vm10070_vm1, %v268_v52, 0.0 }
  0xa0   :  { %v280_v49 = vadd.f32 %v279_v39, %v278_v35  ;;  %v285_v11 = vsel %vm10070_vm1, %v262_v59, 0.0  ;;  %v306_v29 = vsel %vm10070_vm1, %v270_v3, 0.0 }
  0xa1   :  { %v301_v53 = vadd.f32 %v300_v42, %v299_v38 }
  0xa2   :  { %v282_v60 = vadd.f32 %v281_v58, %v280_v49 }
  0xa3   :  { %v303_v6 = vadd.f32 %v302_v1, %v301_v53 }
  0xa6   :  { %v6022_v45 = vpop.permute.xlu1 %6021 }
  0xa7   :  { %v6024_v50 = vunpack.i.h.bf16 %v6022_v45  ;;  %v6023_v51 = vunpack.i.l.bf16 %v6022_v45 }
  0xa9   :  { %v232_v55 = vadd.f32 %v6023_v51, %v231_v43  ;;  %v245_v54 = vadd.f32 %v6024_v50, %v244_v48  ;;  %v261_v56 = vmul.f32 %v6023_v51, %v6652_v17  ;;  %v269_v57 = vmul.f32 %v6024_v50, %v6657_v18 }
  0xab   :  { %v283_v61 = vsel %vm10070_vm1, %v261_v56, 0.0  ;;  %v233_v62 = vadd.f32 %v6029_v47, %v232_v55  ;;  %v246_v63 = vadd.f32 %v6030_v46, %v245_v54  ;;  %v304_v2 = vsel %vm10070_vm1, %v269_v57, 0.0 }
  0xac   :  { %v284_v7 = vadd.f32 %v283_v61, %v282_v60  ;;  %v305_v19 = vadd.f32 %v304_v2, %v303_v6 }
  0xad   :  { %v234_v8 = vrot.slane %v233_v62, 4  ;;  %v247_v9 = vrot.slane %v246_v63, 4 }
  0xae   :  { %v286_v35 = vadd.f32 %v285_v11, %v284_v7  ;;  %v307_v38 = vadd.f32 %v306_v29, %v305_v19  ;;  %v66_v29 = vld [vmem:[%s10067_s4 + $0x10] sm:$0x3] }
  0xaf   :  { %v235_v20 = vadd.f32 %v234_v8, %v233_v62  ;;  %v248_v25 = vadd.f32 %v247_v9, %v246_v63 }
  0xb0   :  { %v287_v43 = vrot.slane %v286_v35, 4  ;;  %v308_v46 = vrot.slane %v307_v38, 4 }
  0xb1   :  { %v236_v30 = vrot.slane %v235_v20, 2  ;;  %v249_v34 = vrot.slane %v248_v25, 2 }
  0xb2   :  { %v288_v49 = vadd.f32 %v287_v43, %v286_v35  ;;  %v309_v50 = vadd.f32 %v308_v46, %v307_v38 }
  0xb3   :  { %v237_v36 = vadd.f32 %v236_v30, %v235_v20  ;;  %v250_v37 = vadd.f32 %v249_v34, %v248_v25 }
  0xb4   :  { %v289_v51 = vrot.slane %v288_v49, 2  ;;  %v310_v52 = vrot.slane %v309_v50, 2 }
  0xb5   :  { %v238_v39 = vrot.slane %v237_v36, 1  ;;  %v251_v42 = vrot.slane %v250_v37, 1 }
  0xb6   :  { %v290_v55 = vadd.f32 %v289_v51, %v288_v49  ;;  %v311_v57 = vadd.f32 %v310_v52, %v309_v50 }
  0xb7   :  { %v239_v44 = vadd.f32 %v238_v39, %v237_v36  ;;  %v252_v45 = vadd.f32 %v251_v42, %v250_v37 }
  0xb8   :  { %v291_v60 = vrot.slane %v290_v55, 1  ;;  %v312_v3 = vrot.slane %v311_v57, 1 }
  0xb9   :  { %v253_v47 = vadd.f32 1e-06, %v239_v44  ;;  %v254_v48 = vadd.f32 1e-06, %v252_v45 }
  0xba   :  { %v292_v19 = vadd.f32 %v291_v60, %v290_v55  ;;  %v313_v30 = vadd.f32 %v312_v3, %v311_v57  ;;  %v413_v55 = vrot.slane %v66_v29, 1 }
  0xbb   :  { %6047 = vrcp.f32 %v253_v47  ;;  %v325_v61 = vand.u32 2147483648, %v253_v47  ;;  %v323_v1 = vand.u32 2147483647, %v253_v47  ;;  %v340_v2 = vand.u32 2147483648, %v254_v48 }
  0xbc   :  { %6049 = vrcp.f32 %v254_v48  ;;  %v338_v7 = vand.u32 2147483647, %v254_v48  ;;  %vm319_vm4 = vweird.f32 %v253_v47  ;;  %vm334_vm6 = vweird.f32 %v254_v48  ;;  %5974 = vpush %v413_v55 }
  0xbd   :  { %v326_v9 = vor.u32 1.1754944e-38, %v325_v61  ;;  %vm324_vm7 = vcmp.eq.f32.partialorder %v323_v1, 8.507059e+37  ;;  %v341_v25 = vor.u32 1.1754944e-38, %v340_v2 }
  0xbe   :  { %vm339_vm9 = vcmp.eq.f32.partialorder %v338_v7, 8.507059e+37 }
  0xc1   :  { %v6048_v53 = vpop.eup %6047 }
  0xc2   :  { %v6050_v54 = vpop.eup %6049  ;;  %v315_v56 = vmul.f32 %v6048_v53, %v253_v47  ;;  %vm320_vm2 = vweird.f32 %v6048_v53 }
  0xc3   :  { %v330_v58 = vmul.f32 %v6050_v54, %v254_v48  ;;  %vm335_vm3 = vweird.f32 %v6050_v54  ;;  %vm321_vm5 = vmor %vm319_vm4, %vm320_vm2 }
  0xc4   :  { %v316_v59 = vsub.f32 1.0, %v315_v56  ;;  %vm336_vm8 = vmor %vm334_vm6, %vm335_vm3 }
  0xc5   :  { %v331_v62 = vsub.f32 1.0, %v330_v58 }
  0xc6   :  { %v317_v63 = vmul.f32 %v6048_v53, %v316_v59 }
  0xc7   :  { %v332_v6 = vmul.f32 %v6050_v54, %v331_v62 }
  0xc8   :  { %v318_v8 = vadd.f32 %v6048_v53, %v317_v63 }
  0xc9   :  { %v333_v11 = vadd.f32 %v6050_v54, %v332_v6 }
  0xca   :  { %v322_v20 = vsel %vm321_vm5, %v6048_v53, %v318_v8 }
  0xcb   :  { %v327_v34 = vsel %vm324_vm7, %v326_v9, %v322_v20  ;;  %v337_v35 = vsel %vm336_vm8, %v6050_v54, %v333_v11 }
  0xcc   :  { %v328_v36 = vmul.f32 %v327_v34, %v292_v19  ;;  %v342_v37 = vsel %vm339_vm9, %v341_v25, %v337_v35 }
  0xcd   :  { %v343_v38 = vmul.f32 %v342_v37, %v313_v30 }
  0xce   :  { %v344_v39 = vmul.f32 %v328_v36, %v66_v29 }
  0xcf   :  { %v345_v42 = vmul.f32 %v343_v38, %v66_v29 }
  0xd0   :  { %v346_v43 = vperm.slane %v344_v39, 0 }
  0xd1   :  { %v347_v44 = vperm.slane %v345_v42, 0 }
  0xd2   :  { %v349_v45 = vmul.f32 %v346_v43, %v6722_v40  ;;  %v348_v46 = vmul.f32 %v346_v43, %v6710_v32  ;;  %v350_v52 = vmul.f32 %v346_v43, %v6698_v28  ;;  %v352_v54 = vmul.f32 %v346_v43, %v6676_v23 }
  0xd3   :  { %v356_v47 = vmul.f32 %v347_v44, %v6715_v33  ;;  %v358_v51 = vmul.f32 %v347_v44, %v6705_v31  ;;  %v357_v53 = vmul.f32 %v347_v44, %v6727_v41  ;;  %v359_v56 = vmul.f32 %v347_v44, %v6693_v27 }
  0xd4   :  { %v367_v48 = vsel %vm10070_vm1, %v349_v45, 0.0  ;;  %v364_v49 = vsel %vm10070_vm1, %v348_v46, 0.0  ;;  %v370_v32 = vsel %vm10070_vm1, %v350_v52, 0.0  ;;  %v351_v31 = vmul.f32 %v346_v43, %v6688_v26 }
  0xd5   :  { %v388_v50 = vsel %vm10070_vm1, %v356_v47, 0.0  ;;  %368 = vadd.xlane.f32.xlu1 %v367_v48  ;;  %365 = vadd.xlane.f32.xlu0 %v364_v49  ;;  %v394_v40 = vsel %vm10070_vm1, %v358_v51, 0.0  ;;  %v391_v33 = vsel %vm10070_vm1, %v357_v53, 0.0  ;;  %v376_v28 = vsel %vm10070_vm1, %v352_v54, 0.0 }
  0xd6   :  { %389 = vadd.xlane.f32.xlu2 %v388_v50  ;;  %v397_v41 = vsel %vm10070_vm1, %v359_v56, 0.0  ;;  %v373_v57 = vsel %vm10070_vm1, %v351_v31, 0.0  ;;  %v361_v58 = vmul.f32 %v347_v44, %v6669_v22  ;;  %v353_v59 = vmul.f32 %v346_v43, %v6664_v21 }
  0xd7   :  { %v360_v23 = vmul.f32 %v347_v44, %v6681_v24  ;;  %v355_v61 = vmul.f32 %v346_v43, %v6640_v15  ;;  %v362_v62 = vmul.f32 %v347_v44, %v6657_v18  ;;  %v354_v63 = vmul.f32 %v346_v43, %v6652_v17 }
  0xd8   :  { %v403_v27 = vsel %vm10070_vm1, %v361_v58, 0.0  ;;  %v379_v60 = vsel %vm10070_vm1, %v353_v59, 0.0  ;;  %v363_v1 = vmul.f32 %v347_v44, %v6645_v16  ;;  %v6801_v15 = vand.u32 127, %v130_v0 }
  0xd9   :  { %v400_v26 = vsel %vm10070_vm1, %v360_v23, 0.0  ;;  %v385_v22 = vsel %vm10070_vm1, %v355_v61, 0.0  ;;  %v406_v21 = vsel %vm10070_vm1, %v362_v62, 0.0  ;;  %v382_v24 = vsel %vm10070_vm1, %v354_v63, 0.0 }
  0xda   :  { %v409_v2 = vsel %vm10070_vm1, %v363_v1, 0.0 }
  0xdd   :  { %395 = vadd.xlane.f32.xlu1 %v394_v40  ;;  %371 = vadd.xlane.f32.xlu0 %v370_v32 }
  0xde   :  { %392 = vadd.xlane.f32.xlu2 %v391_v33 }
  0xe5   :  { %377 = vadd.xlane.f32.xlu1 %v376_v28  ;;  %398 = vadd.xlane.f32.xlu0 %v397_v41 }
  0xe6   :  { %374 = vadd.xlane.f32.xlu2 %v373_v57 }
  0xed   :  { %404 = vadd.xlane.f32.xlu1 %v403_v27  ;;  %380 = vadd.xlane.f32.xlu0 %v379_v60  ;;  %s5975_s12 = spop %5974  ;;  %v6863_v60 = vadd.s32 4294967288, %v6801_v15 }
  0xee   :  { %401 = vadd.xlane.f32.xlu2 %v400_v26  ;;  %v6816_v0 = vstv %s5975_s12  ;;  %s5603_s12 = sshll.u32 %s10069_s6, 4  ;;  %s5604_s12 = int_to_ptr.hbm [resolvable:$true] %s5603_s12 }
  0xf5   :  { %386 = vadd.xlane.f32.xlu1 %v385_v22  ;;  %407 = vadd.xlane.f32.xlu0 %v406_v21 }
  0xf6   :  { %383 = vadd.xlane.f32.xlu2 %v382_v24 }
  0xfe   :  { %410 = vadd.xlane.f32.xlu2 %v409_v2 }
 0x109   :  { %844 = vperm.xlu0 %6033, %v6801_v15  }
 0x10e   :  { %832 = vperm.xlu1 %6031, %v6801_v15  }
 0x116   :  { %6034 = vset.pattern.permute.xlu1 %v6625_v10  ;;  %838 = vperm.xlu2 %6032, %v6801_v15  }
 0x11e   :  { %850 = vperm.xlu1 %6034, %v6801_v15   ;;  %6035 = vset.pattern.permute.xlu2 %v6621_v4 }
 0x126   :  { %6036 = vset.pattern.permute.xlu1 %v6627_v12  ;;  %856 = vperm.xlu2 %6035, %v6801_v15  }
 0x12e   :  { %862 = vperm.xlu1 %6036, %v6801_v15   ;;  %6037 = vset.pattern.permute.xlu2 %v6631_v13 }
 0x136   :  { %6038 = vset.pattern.permute.xlu1 %v6633_v14  ;;  %868 = vperm.xlu2 %6037, %v6801_v15  }
 0x13e   :  { %874 = vperm.xlu1 %6038, %v6801_v15  }
 0x148   :  { %v369_v10 = vpop.xlane.xlu1 %368  ;;  %v366_v16 = vpop.xlane.xlu0 %365 }
 0x149   :  { %v390_v4 = vpop.xlane.xlu2 %389  ;;  %v418_v12 = vadd.f32 %v6816_v0, %v369_v10  ;;  %v417_v17 = vadd.f32 %v6816_v0, %v366_v16 }
 0x14a   :  { %v425_v18 = vadd.f32 %v6816_v0, %v390_v4 }
 0x14b   :  { %v5617_v3 = vmul.f32 -1.442695, %v418_v12  ;;  %v5616_v13 = vmul.f32 -1.442695, %v417_v17 }
 0x14c   :  { %v5624_v6 = vmul.f32 -1.442695, %v425_v18 }
 0x14d   :  { %6051 = vpow2.f32 %v5617_v3 }
 0x14e   :  { %6053 = vpow2.f32 %v5624_v6 }
 0x14f   :  { %6055 = vpow2.f32 %v5616_v13 }
 0x150   :  { %v396_v14 = vpop.xlane.xlu1 %395  ;;  %v372_v7 = vpop.xlane.xlu0 %371 }
 0x151   :  { %v393_v8 = vpop.xlane.xlu2 %392  ;;  %v427_v9 = vadd.f32 %v6816_v0, %v396_v14  ;;  %v419_v11 = vadd.f32 %v6816_v0, %v372_v7 }
 0x152   :  { %v426_v19 = vadd.f32 %v6816_v0, %v393_v8 }
 0x153   :  { %v6052_v20 = vpop.eup %6051  ;;  %v5626_v25 = vmul.f32 -1.442695, %v427_v9  ;;  %v5618_v37 = vmul.f32 -1.442695, %v419_v11 }
 0x154   :  { %v6054_v29 = vpop.eup %6053  ;;  %v6824_v30 = vadd.f32 1.0, %v6052_v20  ;;  %v5625_v34 = vmul.f32 -1.442695, %v426_v19 }
 0x155   :  { %v6056_v35 = vpop.eup %6055  ;;  %v6826_v36 = vadd.f32 1.0, %v6054_v29  ;;  %6057 = vpow2.f32 %v5626_v25 }
 0x156   :  { %6059 = vrcp.f32 %v6824_v30  ;;  %v6830_v38 = vadd.f32 1.0, %v6056_v35  ;;  %v521_v40 = vand.u32 2147483647, %v6824_v30  ;;  %v523_v55 = vand.u32 2147483648, %v6824_v30 }
 0x157   :  { %6061 = vrcp.f32 %v6826_v36  ;;  %v628_v41 = vand.u32 2147483648, %v6826_v36  ;;  %v626_v58 = vand.u32 2147483647, %v6826_v36  ;;  %vm622_vm10 = vweird.f32 %v6826_v36 }
 0x158   :  { %6063 = vpow2.f32 %v5625_v34  ;;  %v378_v39 = vpop.xlane.xlu1 %377  ;;  %v399_v56 = vpop.xlane.xlu0 %398  ;;  %v506_v23 = vand.u32 2147483647, %v6830_v38  ;;  %v508_v61 = vand.u32 2147483648, %v6830_v38  ;;  %vm517_vm11 = vweird.f32 %v6824_v30 }
 0x159   :  { %6065 = vpow2.f32 %v5618_v37  ;;  %v375_v42 = vpop.xlane.xlu2 %374  ;;  %v421_v43 = vadd.f32 %v6816_v0, %v378_v39  ;;  %v428_v62 = vadd.f32 %v6816_v0, %v399_v56  ;;  %v629_v24 = vor.u32 1.1754944e-38, %v628_v41 }
 0x15a   :  { %6067 = vrcp.f32 %v6830_v38  ;;  %v420_v45 = vadd.f32 %v6816_v0, %v375_v42  ;;  %vm6873_vm12 = vcmp.eq.f32.partialorder %v521_v40, 8.507059e+37  ;;  %v524_v2 = vor.u32 1.1754944e-38, %v523_v55 }
 0x15b   :  { %v6058_v44 = vpop.eup %6057  ;;  %v5620_v46 = vmul.f32 -1.442695, %v421_v43  ;;  %vm502_vm13 = vweird.f32 %v6830_v38  ;;  %vm6879_vm14 = vcmp.eq.f32.partialorder %v626_v58, 8.507059e+37  ;;  %vm6885_vm0 = vcmp.eq.f32.partialorder %v506_v23, 8.507059e+37 }
 0x15c   :  { %v6835_v47 = vpop.eup %6059  ;;  %v6837_v48 = vadd.f32 1.0, %v6058_v44  ;;  %v5619_v51 = vmul.f32 -1.442695, %v420_v45  ;;  %v509_v13 = vor.u32 1.1754944e-38, %v508_v61  ;;  %v5627_v6 = vmul.f32 -1.442695, %v428_v62 }
 0x15d   :  { %v6839_v49 = vpop.eup %6061  ;;  %v513_v50 = vmul.f32 %v6835_v47, %v6824_v30  ;;  %vm518_vm15 = vweird.f32 %v6835_v47 }
 0x15e   :  { %v6064_v52 = vpop.eup %6063  ;;  %v618_v53 = vmul.f32 %v6839_v49, %v6826_v36  ;;  %6069 = vrcp.f32 %v6837_v48  ;;  %vm623_vm2 = vweird.f32 %v6839_v49  ;;  %vm6900_vm4 = vmor %vm517_vm11, %vm518_vm15  ;;  %vm652_vm5 = vweird.f32 %v6837_v48 }
 0x15f   :  { %v6066_v32 = vpop.eup %6065  ;;  %v514_v33 = vsub.f32 1.0, %v513_v50  ;;  %v6848_v54 = vadd.f32 1.0, %v6064_v52  ;;  %6071 = vpow2.f32 %v5620_v46  ;;  %v656_v20 = vand.u32 2147483647, %v6837_v48  ;;  %vm6911_vm6 = vmor %vm622_vm10, %vm623_vm2 }
 0x160   :  { %v6850_v31 = vpop.eup %6067  ;;  %v619_v28 = vsub.f32 1.0, %v618_v53  ;;  %v6853_v57 = vadd.f32 1.0, %v6066_v32  ;;  %6073 = vpow2.f32 %v5619_v51  ;;  %v658_v25 = vand.u32 2147483648, %v6837_v48  ;;  %v405_v44 = vpop.xlane.xlu1 %404 }
 0x161   :  { %v498_v59 = vmul.f32 %v6850_v31, %v6830_v38  ;;  %6075 = vrcp.f32 %v6848_v54  ;;  %v6860_v27 = vpop.xlane.xlu2 %401  ;;  %v515_v26 = vmul.f32 %v6835_v47, %v514_v33  ;;  %vm503_vm3 = vweird.f32 %v6850_v31  ;;  %v381_v50 = vpop.xlane.xlu0 %380 }
 0x162   :  { %v620_v63 = vmul.f32 %v6839_v49, %v619_v28  ;;  %6077 = vrcp.f32 %v6853_v57  ;;  %vm637_vm7 = vweird.f32 %v6848_v54  ;;  %v641_v30 = vand.u32 2147483647, %v6848_v54  ;;  %vm6927_vm8 = vmor %vm502_vm13, %vm503_vm3 }
 0x163   :  { %v499_v22 = vsub.f32 1.0, %v498_v59  ;;  %v516_v3 = vadd.f32 %v6835_v47, %v515_v26  ;;  %6079 = vpow2.f32 %v5627_v6  ;;  %vm6943_vm9 = vcmp.eq.f32.partialorder %v656_v20, 8.507059e+37 }
 0x164   :  { %v6871_v21 = vpop.eup %6069  ;;  %v621_v7 = vadd.f32 %v6839_v49, %v620_v63  ;;  %v659_v40 = vor.u32 1.1754944e-38, %v658_v25  ;;  %vm6952_vm10 = vcmp.eq.f32.partialorder %v641_v30, 8.507059e+37  ;;  %v538_v58 = vand.u32 2147483648, %v6853_v57 }
 0x165   :  { %v6072_v10 = vpop.eup %6071  ;;  %v500_v4 = vmul.f32 %v6850_v31, %v499_v22  ;;  %v648_v17 = vmul.f32 %v6871_v21, %v6837_v48  ;;  %v520_v39 = vsel %vm6900_vm4, %v6835_v47, %v516_v3  ;;  %v643_v47 = vand.u32 2147483648, %v6848_v54 }
 0x166   :  { %v6074_v18 = vpop.eup %6073  ;;  %v6931_v43 = vadd.f32 1.0, %v6072_v10  ;;  %v625_v45 = vsel %vm6911_vm6, %v6839_v49, %v621_v7  ;;  %v6950_v49 = vsel %vm6873_vm12, %v524_v2, %v520_v39  ;;  %vm653_vm11 = vweird.f32 %v6871_v21 }
 0x167   :  { %v6893_v14 = vpop.eup %6075  ;;  %v501_v8 = vadd.f32 %v6850_v31, %v500_v4  ;;  %v649_v9 = vsub.f32 1.0, %v648_v17  ;;  %v6918_v35 = vadd.f32 1.0, %v6074_v18  ;;  %v6960_v55 = vsel %vm6879_vm14, %v629_v24, %v625_v45  ;;  %vm6974_vm13 = vmor %vm652_vm5, %vm653_vm11 }
 0x168   :  { %v633_v19 = vmul.f32 %v6893_v14, %v6848_v54  ;;  %v6920_v37 = vpop.eup %6077  ;;  %vm638_vm12 = vweird.f32 %v6893_v14  ;;  %v644_v41 = vor.u32 1.1754944e-38, %v643_v47  ;;  %v757_v23 = vperm.slane %v6950_v49, %v6863_v60  ;;  %v387_v7 = vpop.xlane.xlu1 %386 }
 0x169   :  { %v650_v34 = vmul.f32 %v6871_v21, %v649_v9  ;;  %v505_v46 = vsel %vm6927_vm8, %v6850_v31, %v501_v8  ;;  %v528_v38 = vmul.f32 %v6920_v37, %v6853_v57  ;;  %v384_v51 = vpop.xlane.xlu2 %383  ;;  %6081 = vrcp.f32 %v6918_v35  ;;  %v6080_v59 = vpop.eup %6079  ;;  %vm6998_vm15 = vmor %vm637_vm7, %vm638_vm12 }
 0x16a   :  { %v634_v42 = vsub.f32 1.0, %v633_v19  ;;  %v6964_v56 = vsel %vm6885_vm0, %v509_v13, %v505_v46  ;;  %6083 = vrcp.f32 %v6931_v43  ;;  %v536_v61 = vand.u32 2147483647, %v6853_v57  ;;  %v408_v19 = vpop.xlane.xlu0 %407 }
 0x16b   :  { %v651_v33 = vadd.f32 %v6871_v21, %v650_v34  ;;  %v529_v31 = vsub.f32 1.0, %v528_v38  ;;  %v429_v62 = vadd.f32 %v6816_v0, %v6860_v27  ;;  %v430_v63 = vadd.f32 %v6816_v0, %v405_v44 }
 0x16c   :  { %v635_v52 = vmul.f32 %v6893_v14, %v634_v42  ;;  %v784_v22 = vperm.slane %v6960_v55, %v6801_v15  ;;  %v755_v24 = vperm.slane %v6964_v56, %v6801_v15  ;;  %vm532_vm14 = vweird.f32 %v6853_v57 }
 0x16d   :  { %v655_v48 = vsel %vm6974_vm13, %v6871_v21, %v651_v33  ;;  %v6990_v1 = vadd.f32 1.0, %v6080_v59  ;;  %v530_v10 = vmul.f32 %v6920_v37, %v529_v31  ;;  %vm533_vm0 = vweird.f32 %v6920_v37 }
 0x16e   :  { %v636_v28 = vadd.f32 %v6893_v14, %v635_v52  ;;  %v5628_v16 = vmul.f32 -1.442695, %v429_v62  ;;  %v5629_v21 = vmul.f32 -1.442695, %v430_v63  ;;  %v539_v12 = vor.u32 1.1754944e-38, %v538_v58  ;;  %vm7052_vm6 = vmor %vm532_vm14, %vm533_vm0 }
 0x16f   :  { %v6992_v2 = vpop.eup %6081  ;;  %6085 = vrcp.f32 %v6990_v1  ;;  %v7014_v18 = vsel %vm6943_vm9, %v659_v40, %v655_v48  ;;  %v551_v3 = vand.u32 2147483647, %v6918_v35  ;;  %v553_v13 = vand.u32 2147483648, %v6918_v35 }
 0x170   :  { %v640_v4 = vsel %vm6998_vm15, %v6893_v14, %v636_v28  ;;  %v543_v17 = vmul.f32 %v6992_v2, %v6918_v35  ;;  %v7010_v54 = vpop.eup %6083  ;;  %v566_v6 = vand.u32 2147483647, %v6931_v43  ;;  %vm7019_vm2 = vcmp.eq.f32.partialorder %v536_v61, 8.507059e+37 }
 0x171   :  { %vm547_vm3 = vweird.f32 %v6918_v35  ;;  %v558_v9 = vmul.f32 %v7010_v54, %v6931_v43  ;;  %v568_v11 = vand.u32 2147483648, %v6931_v43  ;;  %6087 = vpow2.f32 %v5628_v16  ;;  %v411_v20 = vpop.xlane.xlu2 %410 }
 0x172   :  { %v544_v8 = vsub.f32 1.0, %v543_v17  ;;  %v7029_v25 = vsel %vm6952_vm10, %v644_v41, %v640_v4  ;;  %v531_v29 = vadd.f32 %v6920_v37, %v530_v10  ;;  %6089 = vpow2.f32 %v5629_v21 }
 0x173   :  { %v422_v30 = vadd.f32 %v6816_v0, %v381_v50  ;;  %v559_v39 = vsub.f32 1.0, %v558_v9  ;;  %vm562_vm4 = vweird.f32 %v6931_v43  ;;  %v423_v36 = vadd.f32 %v6816_v0, %v384_v51 }
 0x174   :  { %v545_v34 = vmul.f32 %v6992_v2, %v544_v8  ;;  %v424_v42 = vadd.f32 %v6816_v0, %v387_v7  ;;  %v554_v44 = vor.u32 1.1754944e-38, %v553_v13  ;;  %v431_v46 = vadd.f32 %v6816_v0, %v408_v19 }
 0x175   :  { %v5621_v45 = vmul.f32 -1.442695, %v422_v30  ;;  %v432_v47 = vadd.f32 %v6816_v0, %v411_v20  ;;  %v7039_v38 = vpop.eup %6085  ;;  %v785_v50 = vperm.slane %v7029_v25, %v6863_v60  ;;  %vm7043_vm5 = vcmp.eq.f32.partialorder %v551_v3, 8.507059e+37 }
 0x176   :  { %v560_v53 = vmul.f32 %v7010_v54, %v559_v39  ;;  %v5622_v51 = vmul.f32 -1.442695, %v423_v36  ;;  %v5623_v40 = vmul.f32 -1.442695, %v424_v42  ;;  %v569_v0 = vor.u32 1.1754944e-38, %v568_v11 }
 0x177   :  { %v663_v33 = vmul.f32 %v7039_v38, %v6990_v1  ;;  %6091 = vpow2.f32 %v5621_v45  ;;  %v5630_v31 = vmul.f32 -1.442695, %v431_v46  ;;  %v6088_v28 = vpop.eup %6087  ;;  %v535_v41 = vsel %vm7052_vm6, %v6920_v37, %v531_v29 }
 0x178   :  { %v546_v58 = vadd.f32 %v6992_v2, %v545_v34  ;;  %vm548_vm7 = vweird.f32 %v6992_v2  ;;  %vm7063_vm8 = vcmp.eq.f32.partialorder %v566_v6, 8.507059e+37  ;;  %6093 = vpow2.f32 %v5622_v51  ;;  %v6090_v59 = vpop.eup %6089 }
 0x179   :  { %v664_v26 = vsub.f32 1.0, %v663_v33  ;;  %v7067_v61 = vadd.f32 1.0, %v6088_v28  ;;  %6095 = vpow2.f32 %v5623_v40  ;;  %v5631_v62 = vmul.f32 -1.442695, %v432_v47  ;;  %vm7079_vm10 = vmor %vm547_vm3, %vm548_vm7 }
 0x17a   :  { %v561_v63 = vadd.f32 %v7010_v54, %v560_v53  ;;  %vm563_vm9 = vweird.f32 %v7010_v54  ;;  %v7071_v37 = vadd.f32 1.0, %v6090_v59  ;;  %6097 = vpow2.f32 %v5630_v31 }
 0x17b   :  { %v7075_v48 = vsel %vm7019_vm2, %v539_v12, %v535_v41  ;;  %v665_v10 = vmul.f32 %v7039_v38, %v664_v26  ;;  %v673_v16 = vand.u32 2147483648, %v6990_v1  ;;  %6099 = vrcp.f32 %v7067_v61  ;;  %vm7093_vm12 = vmor %vm562_vm4, %vm563_vm9 }
 0x17c   :  { %v550_v21 = vsel %vm7079_vm10, %v6992_v2, %v546_v58  ;;  %v688_v4 = vand.u32 2147483648, %v7067_v61  ;;  %6101 = vrcp.f32 %v7071_v37  ;;  %vm758_vm11 = vcmask 130112  }
 0x17d   :  { %v6092_v35 = vpop.eup %6091  ;;  %vm667_vm13 = vweird.f32 %v6990_v1  ;;  %vm668_vm14 = vweird.f32 %v7039_v38  ;;  %v671_v17 = vand.u32 2147483647, %v6990_v1  ;;  %6103 = vpow2.f32 %v5631_v62 }
 0x17e   :  { %v6094_v2 = vpop.eup %6093  ;;  %v7101_v3 = vadd.f32 %v7039_v38, %v665_v10  ;;  %v703_v13 = vand.u32 2147483648, %v7071_v37  ;;  %v7104_v6 = vadd.f32 1.0, %v6092_v35  ;;  %v565_v43 = vsel %vm7093_vm12, %v7010_v54, %v561_v63  ;;  %vm7138_vm0 = vmor %vm667_vm13, %vm668_vm14 }
 0x17f   :  { %v6096_v7 = vpop.eup %6095  ;;  %v7109_v14 = vor.u32 1.1754944e-38, %v673_v16  ;;  %v7111_v8 = vadd.f32 1.0, %v6094_v2  ;;  %v7115_v9 = vsel %vm7043_vm5, %v554_v44, %v550_v21  ;;  %v7124_v11 = vsel %vm758_vm11, %v757_v23, %v755_v24 }
 0x180   :  { %v6098_v19 = vpop.eup %6097  ;;  %vm682_vm15 = vweird.f32 %v7067_v61  ;;  %v686_v54 = vand.u32 2147483647, %v7067_v61  ;;  %v7128_v20 = vor.u32 1.1754944e-38, %v688_v4  ;;  %v701_v29 = vand.u32 2147483647, %v7071_v37 }
 0x181   :  { %6105 = vrcp.f32 %v7104_v6  ;;  %v7132_v30 = vpop.eup %6099  ;;  %vm697_vm2 = vweird.f32 %v7071_v37  ;;  %v583_v24 = vand.u32 2147483648, %v7104_v6  ;;  %v7145_v34 = vadd.f32 1.0, %v6096_v7 }
 0x182   :  { %6107 = vrcp.f32 %v7111_v8  ;;  %v7149_v39 = vsel %vm7063_vm8, %v569_v0, %v565_v43  ;;  %v7151_v36 = vpop.eup %6101  ;;  %v670_v1 = vsel %vm7138_vm0, %v7039_v38, %v7101_v3  ;;  %v678_v42 = vmul.f32 %v7132_v30, %v7067_v61 }
 0x183   :  { %v7159_v44 = vor.u32 1.1754944e-38, %v703_v13  ;;  %v7161_v45 = vadd.f32 1.0, %v6098_v19  ;;  %v6104_v46 = vpop.eup %6103  ;;  %vm7163_vm3 = vcmp.eq.f32.partialorder %v671_v17, 8.507059e+37  ;;  %v693_v52 = vmul.f32 %v7151_v36, %v7071_v37 }
 0x184   :  { %v581_v53 = vand.u32 2147483647, %v7104_v6  ;;  %6109 = vrcp.f32 %v7145_v34  ;;  %v7172_v38 = vadd.s32 4294967280, %v6801_v15  ;;  %v679_v51 = vsub.f32 1.0, %v678_v42 }
 0x185   :  { %vm683_vm4 = vweird.f32 %v7132_v30  ;;  %vm7175_vm5 = vcmp.eq.f32.partialorder %v686_v54, 8.507059e+37  ;;  %v598_v32 = vand.u32 2147483648, %v7111_v8  ;;  %6111 = vrcp.f32 %v7161_v45 }
 0x186   :  { %v694_v0 = vsub.f32 1.0, %v693_v52  ;;  %vm698_vm6 = vweird.f32 %v7151_v36  ;;  %vm577_vm7 = vweird.f32 %v7104_v6  ;;  %v7183_v33 = vor.u32 1.1754944e-38, %v583_v24  ;;  %vm7213_vm12 = vmor %vm682_vm15, %vm683_vm4 }
 0x187   :  { %v7185_v31 = vadd.f32 1.0, %v6104_v46  ;;  %vm7187_vm8 = vcmp.eq.f32.partialorder %v701_v29, 8.507059e+37  ;;  %v7191_v41 = vpop.eup %6105  ;;  %v680_v58 = vmul.f32 %v7132_v30, %v679_v51  ;;  %vm592_vm9 = vweird.f32 %v7111_v8  ;;  %vm7225_vm1 = vmor %vm697_vm2, %vm698_vm6 }
 0x188   :  { %v718_v57 = vand.u32 2147483648, %v7161_v45  ;;  %v596_v59 = vand.u32 2147483647, %v7111_v8  ;;  %v613_v26 = vand.u32 2147483648, %v7145_v34  ;;  %v7198_v62 = vpop.eup %6107  ;;  %v695_v63 = vmul.f32 %v7151_v36, %v694_v0 }
 0x189   :  { %v573_v27 = vmul.f32 %v7191_v41, %v7104_v6  ;;  %6113 = vrcp.f32 %v7185_v31  ;;  %v611_v10 = vand.u32 2147483647, %v7145_v34  ;;  %v681_v16 = vadd.f32 %v7132_v30, %v680_v58 }
 0x18a   :  { %v588_v21 = vmul.f32 %v7198_v62, %v7111_v8  ;;  %v599_v4 = vor.u32 1.1754944e-38, %v598_v32  ;;  %vm607_vm10 = vweird.f32 %v7145_v34  ;;  %v6110_v35 = vpop.eup %6109  ;;  %v696_v17 = vadd.f32 %v7151_v36, %v695_v63 }
 0x18b   :  { %v574_v2 = vsub.f32 1.0, %v573_v27  ;;  %vm578_vm13 = vweird.f32 %v7191_v41  ;;  %vm712_vm14 = vweird.f32 %v7161_v45  ;;  %vm593_vm0 = vweird.f32 %v7198_v62  ;;  %v6112_v3 = vpop.eup %6111 }
 0x18c   :  { %v589_v13 = vsub.f32 1.0, %v588_v21  ;;  %v603_v43 = vmul.f32 %v6110_v35, %v7145_v34  ;;  %vm7230_vm15 = vcmp.eq.f32.partialorder %v581_v53, 8.507059e+37  ;;  %vm7234_vm4 = vcmp.eq.f32.partialorder %v596_v59, 8.507059e+37 }
 0x18d   :  { %v614_v54 = vor.u32 1.1754944e-38, %v613_v26  ;;  %v575_v29 = vmul.f32 %v7191_v41, %v574_v2  ;;  %v708_v37 = vmul.f32 %v6112_v3, %v7161_v45  ;;  %vm7240_vm2 = vcmp.eq.f32.partialorder %v611_v10, 8.507059e+37 }
 0x18e   :  { %v685_v24 = vsel %vm7213_vm12, %v7132_v30, %v681_v16  ;;  %v700_v42 = vsel %vm7225_vm1, %v7151_v36, %v696_v17  ;;  %v590_v46 = vmul.f32 %v7198_v62, %v589_v13  ;;  %v604_v52 = vsub.f32 1.0, %v603_v43  ;;  %vm7267_vm1 = vmor %vm577_vm7, %vm578_vm13 }
 0x18f   :  { %vm608_vm6 = vweird.f32 %v6110_v35  ;;  %v7254_v53 = vsel %vm7163_vm3, %v7109_v14, %v670_v1  ;;  %v6114_v51 = vpop.eup %6113  ;;  %v576_v32 = vadd.f32 %v7191_v41, %v575_v29  ;;  %v709_v0 = vsub.f32 1.0, %v708_v37  ;;  %vm7285_vm3 = vmor %vm592_vm9, %vm593_vm0 }
 0x190   :  { %v7260_v30 = vsel %vm7175_vm5, %v7128_v20, %v685_v24  ;;  %v716_v36 = vand.u32 2147483647, %v7161_v45  ;;  %v723_v14 = vmul.f32 %v6114_v51, %v7185_v31  ;;  %v591_v1 = vadd.f32 %v7198_v62, %v590_v46 }
 0x191   :  { %v605_v47 = vmul.f32 %v6110_v35, %v604_v52  ;;  %v7276_v20 = vsel %vm7187_vm8, %v7159_v44, %v700_v42  ;;  %v710_v40 = vmul.f32 %v6112_v3, %v709_v0  ;;  %v580_v59 = vsel %vm7267_vm1, %v7191_v41, %v576_v32  ;;  %vm609_vm8 = vmor %vm607_vm10, %vm608_vm6 }
 0x192   :  { %vm713_vm5 = vweird.f32 %v6112_v3  ;;  %v719_v26 = vor.u32 1.1754944e-38, %v718_v57  ;;  %v724_v63 = vsub.f32 1.0, %v723_v14  ;;  %v595_v44 = vsel %vm7285_vm3, %v7198_v62, %v591_v1 }
 0x193   :  { %v606_v28 = vadd.f32 %v6110_v35, %v605_v47  ;;  %vm7292_vm7 = vcmp.eq.f32.partialorder %v716_v36, 8.507059e+37  ;;  %v711_v8 = vadd.f32 %v6112_v3, %v710_v40  ;;  %vm727_vm9 = vweird.f32 %v7185_v31  ;;  %vm714_vm13 = vmor %vm712_vm14, %vm713_vm5 }
 0x194   :  { %vm728_vm12 = vweird.f32 %v6114_v51  ;;  %v731_v41 = vand.u32 2147483647, %v7185_v31  ;;  %v725_v62 = vmul.f32 %v6114_v51, %v724_v63  ;;  %v733_v10 = vand.u32 2147483648, %v7185_v31 }
 0x195   :  { %v610_v57 = vsel %vm609_vm8, %v6110_v35, %v606_v28  ;;  %v761_v16 = vperm.slane %v7075_v48, %v7172_v38  ;;  %v7309_v34 = vsel %vm7230_vm15, %v7183_v33, %v580_v59  ;;  %v7313_v21 = vsel %vm7234_vm4, %v599_v4, %v595_v44  ;;  %vm729_vm0 = vmor %vm727_vm9, %vm728_vm12  ;;  %v845_v28 = vpop.permute.xlu0 %844 }
 0x196   :  { %v715_v12 = vsel %vm714_vm13, %v6112_v3, %v711_v8  ;;  %vm762_vm10 = vcmask 195712   ;;  %v7317_v45 = vsel %vm7240_vm2, %v614_v54, %v610_v57  ;;  %v726_v17 = vadd.f32 %v6114_v51, %v725_v62  ;;  %v833_v8 = vpop.permute.xlu1 %832  ;;  %v839_v62 = vpop.permute.xlu2 %838 }
 0x197   :  { %v7321_v35 = vsel %vm7292_vm7, %v719_v26, %v715_v12  ;;  %vm732_vm14 = vcmp.eq.f32.partialorder %v731_v41, 8.507059e+37  ;;  %v734_v33 = vor.u32 1.1754944e-38, %v733_v10  ;;  %v763_v4 = vsel %vm762_vm10, %v761_v16, %v7124_v11 }
 0x198   :  { %v7329_v2 = vadd.s32 4294967272, %v6801_v15  ;;  %v7332_v3 = vadd.s32 4294967264, %v6801_v15  ;;  %v730_v61 = vsel %vm729_vm0, %v6114_v51, %v726_v17  ;;  %vm766_vm15 = vcmask 261312  }
 0x199   :  { %v7335_v13 = vadd.s32 4294967256, %v6801_v15  ;;  %v7338_v43 = vadd.s32 4294967248, %v6801_v15  ;;  %vm770_vm4 = vcmask 326912   ;;  %vm774_vm2 = vcmask 392512  }
 0x19a   :  { %v765_v31 = vperm.slane %v7115_v9, %v7329_v2  ;;  %v769_v11 = vperm.slane %v7149_v39, %v7332_v3  ;;  %v7344_v7 = vsel %vm732_vm14, %v734_v33, %v730_v61  ;;  %v7351_v29 = vadd.s32 4294967240, %v6801_v15 }
 0x19b   :  { %v773_v19 = vperm.slane %v7309_v34, %v7335_v13  ;;  %v777_v54 = vperm.slane %v7313_v21, %v7338_v43  ;;  %v786_v23 = vsel %vm758_vm11, %v785_v50, %v784_v22  ;;  %v787_v24 = vperm.slane %v7014_v18, %v7172_v38 }
 0x19c   :  { %v767_v37 = vsel %vm766_vm15, %v765_v31, %v763_v4  ;;  %v789_v42 = vperm.slane %v7254_v53, %v7329_v2  ;;  %vm778_vm6 = vcmask 458112   ;;  %v791_v46 = vperm.slane %v7260_v30, %v7332_v3 }
 0x19d   :  { %v793_v52 = vperm.slane %v7276_v20, %v7335_v13  ;;  %v771_v51 = vsel %vm770_vm4, %v769_v11, %v767_v37  ;;  %v788_v32 = vsel %vm762_vm10, %v787_v24, %v786_v23  ;;  %v795_v22 = vperm.slane %v7321_v35, %v7338_v43 }
 0x19e   :  { %v775_v50 = vsel %vm774_vm2, %v773_v19, %v771_v51  ;;  %v781_v0 = vperm.slane %v7317_v45, %v7351_v29  ;;  %v790_v36 = vsel %vm766_vm15, %v789_v42, %v788_v32  ;;  %v797_v58 = vperm.slane %v7344_v7, %v7351_v29  ;;  %v851_v17 = vpop.permute.xlu1 %850 }
 0x19f   :  { %v779_v14 = vsel %vm778_vm6, %v777_v54, %v775_v50  ;;  %vm782_vm1 = vcmask 523712   ;;  %v792_v1 = vsel %vm770_vm4, %v791_v46, %v790_v36  ;;  %vm799_vm3 = vcmask 1041409  }
 0x1a0   :  { %v794_v47 = vsel %vm774_vm2, %v793_v52, %v792_v1  ;;  %vm802_vm5 = vcmask 517120   ;;  %v783_v59 = vsel %vm782_vm1, %v781_v0, %v779_v14  ;;  %v6576_v44 = vmov 0  }
 0x1a1   :  { %v796_v40 = vsel %vm778_vm6, %v795_v22, %v794_v47  ;;  %6039 = vset.pattern.permute.xlu2 %v6576_v44  ;;  %6041 = vset.pattern.permute.xlu1 %v6576_v44 }
 0x1a2   :  { %v798_v6 = vsel %vm782_vm1, %v797_v58, %v796_v40  ;;  %6040 = vset.pattern.permute.xlu0 %v6576_v44 }
 0x1a3   :  { %v7386_v26 = vsel %vm799_vm3, %v798_v6, %v783_v59 }
 0x1a4   :  { %v804_v63 = vsel %vm802_vm5, %v7386_v26, -inf  ;;  %803 = vst.msk [vmem:[#allocation5] sm:$0x3] %vm802_vm5, %v7386_v26 }
 0x1a5   :  { %805 = vmax.xlane.f32.xlu0 %v804_v63  ;;  %5606 = dma.vmem_to_hbm [thread:$0]  %s5602_s14, 32, %s5604_s12, [#allocation4]  }
 0x218   :  { %v7392_v27 = vpop.xlane.xlu0 %805 }
 0x219   :  { %v808_v41 = vperm.slane %v7392_v27, 0  ;;  %v809_v57 = vperm.slane %v7392_v27, 1 }
 0x21b   :  { %vm820_vm7 = vcmp.ge.f32.partialorder %v6960_v55, %v809_v57  ;;  %vm813_vm8 = vcmp.ge.f32.partialorder %v6950_v49, %v808_v41  ;;  %vm812_vm9 = vcmp.ge.f32.partialorder %v6964_v56, %v808_v41  ;;  %vm814_vm12 = vcmp.ge.f32.partialorder %v7075_v48, %v808_v41  ;;  %v857_v55 = vpop.permute.xlu2 %856 }
 0x21c   :  { %v884_v10 = vsel %vm820_vm7, %v833_v8, 64  ;;  %v877_v16 = vsel %vm813_vm8, %v839_v62, 64  ;;  %v876_v12 = vsel %vm812_vm9, %v833_v8, 64  ;;  %vm815_vm13 = vcmp.ge.f32.partialorder %v7115_v9, %v808_v41 }
 0x21d   :  { %917 = vperm.xlu1 %6041, %v884_v10   ;;  %896 = vperm.xlu0 %6040, %v877_v16   ;;  %vm821_vm14 = vcmp.ge.f32.partialorder %v7029_v25, %v809_v57  ;;  %v878_v33 = vsel %vm814_vm12, %v845_v28, 64  ;;  %v879_v4 = vsel %vm815_vm13, %v851_v17, 64  ;;  %vm823_vm0 = vcmp.ge.f32.partialorder %v7254_v53, %v809_v57  ;;  %v863_v25 = vpop.permute.xlu1 %862 }
 0x21e   :  { %893 = vperm.xlu2 %6039, %v876_v12   ;;  %v885_v49 = vsel %vm821_vm14, %v839_v62, 64  ;;  %vm824_vm7 = vcmp.ge.f32.partialorder %v7260_v30, %v809_v57  ;;  %vm822_vm8 = vcmp.ge.f32.partialorder %v7014_v18, %v809_v57  ;;  %v887_v56 = vsel %vm823_vm0, %v851_v17, 64 }
 0x21f   :  { %v888_v48 = vsel %vm824_vm7, %v857_v55, 64  ;;  %v886_v9 = vsel %vm822_vm8, %v845_v28, 64  ;;  %vm817_vm9 = vcmp.ge.f32.partialorder %v7309_v34, %v808_v41  ;;  %vm818_vm12 = vcmp.ge.f32.partialorder %v7313_v21, %v808_v41 }
 0x220   :  { %vm816_vm13 = vcmp.ge.f32.partialorder %v7149_v39, %v808_v41  ;;  %v881_v31 = vsel %vm817_vm9, %v863_v25, 64  ;;  %vm826_vm14 = vcmp.ge.f32.partialorder %v7321_v35, %v809_v57  ;;  %vm827_vm0 = vcmp.ge.f32.partialorder %v7344_v7, %v809_v57 }
 0x221   :  { %v880_v30 = vsel %vm816_vm13, %v857_v55, 64  ;;  %vm825_vm7 = vcmp.ge.f32.partialorder %v7276_v20, %v809_v57  ;;  %vm819_vm8 = vcmp.ge.f32.partialorder %v7317_v45, %v808_v41 }
 0x222   :  { %v889_v34 = vsel %vm825_vm7, %v863_v25, 64 }
 0x223   :  { %v869_v61 = vpop.permute.xlu2 %868 }
 0x224   :  { %v882_v53 = vsel %vm818_vm12, %v869_v61, 64  ;;  %v890_v11 = vsel %vm826_vm14, %v869_v61, 64  ;;  %vm1097_vm12 = vcmask 1041408   ;;  %vm989_vm14 = vcmp.gt.f32.partialorder %v7392_v27, 0.6 }
 0x225   :  { %899 = vperm.xlu1 %6041, %v878_v33   ;;  %902 = vperm.xlu0 %6040, %v879_v4   ;;  %v875_v18 = vpop.permute.xlu1 %874 }
 0x226   :  { %920 = vperm.xlu2 %6039, %v885_v49   ;;  %v891_v19 = vsel %vm827_vm0, %v875_v18, 64  ;;  %v883_v39 = vsel %vm819_vm8, %v875_v18, 64 }
 0x22d   :  { %926 = vperm.xlu1 %6041, %v887_v56   ;;  %929 = vperm.xlu0 %6040, %v888_v48  }
 0x22e   :  { %923 = vperm.xlu2 %6039, %v886_v9  }
 0x235   :  { %908 = vperm.xlu1 %6041, %v881_v31   ;;  %911 = vperm.xlu0 %6040, %v882_v53  }
 0x236   :  { %905 = vperm.xlu2 %6039, %v880_v30  }
 0x23d   :  { %935 = vperm.xlu1 %6041, %v890_v11   ;;  %938 = vperm.xlu0 %6040, %v891_v19  }
 0x23e   :  { %932 = vperm.xlu2 %6039, %v889_v34  }
 0x246   :  { %914 = vperm.xlu2 %6039, %v883_v39  }
 0x278   :  { %v894_v21 = vpop.permute.xlu2 %893 }
 0x279   :  { %v940_v32 = vperm.slane %v894_v21, %v6801_v15 }
 0x280   :  { %v921_v54 = vpop.permute.xlu2 %920 }
 0x281   :  { %v956_v50 = vperm.slane %v921_v54, %v6863_v60 }
 0x288   :  { %v924_v24 = vpop.permute.xlu2 %923 }
 0x289   :  { %v958_v59 = vperm.slane %v924_v24, %v7172_v38 }
 0x28f   :  { %v918_v37 = vpop.permute.xlu1 %917  ;;  %v897_v23 = vpop.permute.xlu0 %896 }
 0x290   :  { %v906_v7 = vpop.permute.xlu2 %905  ;;  %v941_v52 = vperm.slane %v897_v23, %v6863_v60  ;;  %v955_v45 = vperm.slane %v918_v37, %v6801_v15 }
 0x291   :  { %v947_v60 = vperm.slane %v906_v7, %v7332_v3 }
 0x292   :  { %v942_v0 = vsel %vm758_vm11, %v941_v52, %v940_v32  ;;  %v957_v14 = vsel %vm758_vm11, %v956_v50, %v955_v45 }
 0x293   :  { %v959_v44 = vsel %vm762_vm10, %v958_v59, %v957_v14 }
 0x297   :  { %v900_v35 = vpop.permute.xlu1 %899  ;;  %v903_v42 = vpop.permute.xlu0 %902 }
 0x298   :  { %v943_v51 = vperm.slane %v900_v35, %v7172_v38  ;;  %v933_v22 = vpop.permute.xlu2 %932  ;;  %v945_v36 = vperm.slane %v903_v42, %v7329_v2 }
 0x299   :  { %v964_v10 = vperm.slane %v933_v22, %v7335_v13 }
 0x29a   :  { %v944_v58 = vsel %vm762_vm10, %v943_v51, %v942_v0 }
 0x29b   :  { %v946_v6 = vsel %vm766_vm15, %v945_v36, %v944_v58 }
 0x29c   :  { %v948_v41 = vsel %vm770_vm4, %v947_v60, %v946_v6 }
 0x29f   :  { %v927_v46 = vpop.permute.xlu1 %926  ;;  %v930_v20 = vpop.permute.xlu0 %929 }
 0x2a0   :  { %v960_v1 = vperm.slane %v927_v46, %v7329_v2  ;;  %v962_v28 = vperm.slane %v930_v20, %v7332_v3  ;;  %v915_v62 = vpop.permute.xlu2 %914 }
 0x2a1   :  { %v953_v4 = vperm.slane %v915_v62, %v7351_v29 }
 0x2a2   :  { %v961_v8 = vsel %vm766_vm15, %v960_v1, %v959_v44 }
 0x2a3   :  { %v963_v38 = vsel %vm770_vm4, %v962_v28, %v961_v8 }
 0x2a4   :  { %v965_v49 = vsel %vm774_vm2, %v964_v10, %v963_v38 }
 0x2a7   :  { %v909_v47 = vpop.permute.xlu1 %908  ;;  %v912_v40 = vpop.permute.xlu0 %911 }
 0x2a8   :  { %v949_v63 = vperm.slane %v909_v47, %v7335_v13  ;;  %v951_v2 = vperm.slane %v912_v40, %v7338_v43 }
 0x2aa   :  { %v950_v57 = vsel %vm774_vm2, %v949_v63, %v948_v41 }
 0x2ab   :  { %v952_v17 = vsel %vm778_vm6, %v951_v2, %v950_v57 }
 0x2ac   :  { %v954_v56 = vsel %vm782_vm1, %v953_v4, %v952_v17 }
 0x2af   :  { %v936_v16 = vpop.permute.xlu1 %935  ;;  %v939_v12 = vpop.permute.xlu0 %938 }
 0x2b0   :  { %v966_v33 = vperm.slane %v936_v16, %v7338_v43  ;;  %v968_v3 = vperm.slane %v939_v12, %v7351_v29 }
 0x2b2   :  { %v967_v55 = vsel %vm778_vm6, %v966_v33, %v965_v49  ;;  %vm1094_vm6 = vcmask 1040384  }
 0x2b3   :  { %v969_v48 = vsel %vm782_vm1, %v968_v3, %v967_v55 }
 0x2b4   :  { %v970_v13 = vsel %vm799_vm3, %v969_v48, %v954_v56 }
 0x2b5   :  { %v971_v9 = vsel %vm802_vm5, %v970_v13, 2147483647 }
 0x2b6   :  { %v973_v25 = vshra.s32 %v971_v9, 16  ;;  %v972_v43 = vand.u32 65535, %v971_v9  ;;  %v5633_v9 = vsel %vm989_vm14, 1.0, %v6575_v5 }
 0x2b8   :  { %v975_v61 = vcvt.s32.f32 %v973_v25  ;;  %v974_v53 = vcvt.s32.f32 %v972_v43 }
 0x2ba   :  { %976 = vmin.xlane.f32.xlu1 %v975_v61 }
 0x32d   :  { %v977_v31 = vpop.xlane.xlu1 %976 }
 0x32e   :  { %vm978_vm11 = vcmp.eq.f32.partialorder %v975_v61, %v977_v31  ;;  %v983_v30 = vcvt.f32.s32 %v977_v31  ;;  %v1104_v31 = vperm.slane %v5633_v9, 0 }
 0x32f   :  { %v979_v29 = vsel %vm978_vm11, %v974_v53, inf  ;;  %vm1100_vm11 = vcmask 1042432  }
 0x330   :  { %980 = vmin.xlane.f32.xlu2 %v979_v29  ;;  %v984_v11 = vshll.u32 %v983_v30, 16 }
 0x3a3   :  { %v981_v18 = vpop.xlane.xlu2 %980 }
 0x3a4   :  { %v982_v19 = vcvt.f32.s32 %v981_v18  ;;  %v1105_v18 = vperm.slane %v5633_v9, 1  ;;  %v72_v9 = vld [vmem:[#allocation2 + $0x20] sm:$0xff] }
 0x3a6   :  { %v985_v34 = vadd.s32 %v984_v11, %v982_v19 }
 0x3a8   :  { %vm986_vm10 = vcmp.eq.s32.totalorder %v6801_v15, %v985_v34 }
 0x3a9   :  { %v992_v39 = vsel %vm986_vm10, -1.0, %v7386_v26  ;;  %v5632_v22 = vsel %vm986_vm10, 1.0, %v6575_v5 }
 0x3aa   :  { %v993_v21 = vsel %vm802_vm5, %v992_v39, -inf  ;;  %v1074_v1 = vrot.slane %v5632_v22, 1 }
 0x3ab   :  { %994 = vmax.xlane.f32.xlu0 %v993_v21 }
 0x41e   :  { %v7449_v54 = vpop.xlane.xlu0 %994 }
 0x41f   :  { %vm996_vm15 = vcmp.ge.f32.partialorder %v992_v39, %v7449_v54  ;;  %vm1016_vm13 = vcmp.gt.f32.partialorder %v7449_v54, 0.6 }
 0x420   :  { %v997_v37 = vsel %vm996_vm15, %v6801_v15, 64  ;;  %v5635_v13 = vsel %vm1016_vm13, 1.0, %v6575_v5  ;;  %vm1129_vm15 = vcmask 523264   ;;  %vm1351_vm13 = vcmask 1043456  }
 0x421   :  { %v998_v23 = vsel %vm802_vm5, %v997_v37, 2147483647  ;;  %v1109_v61 = vperm.slane %v5635_v13, 0  ;;  %v1110_v43 = vperm.slane %v5635_v13, 1  ;;  %v73_v13 = vld [vmem:[#allocation2 + $0x28] sm:$0xff] }
 0x422   :  { %v1000_v24 = vshra.s32 %v998_v23, 16  ;;  %v999_v42 = vand.u32 65535, %v998_v23 }
 0x423   :  { %v1123_v19 = vsel %vm1094_vm6, %v1104_v31, %v1109_v61  ;;  %v1124_v54 = vsel %vm1094_vm6, %v1105_v18, %v1110_v43 }
 0x424   :  { %v1002_v35 = vcvt.s32.f32 %v1000_v24  ;;  %v1001_v46 = vcvt.s32.f32 %v999_v42 }
 0x426   :  { %1003 = vmin.xlane.f32.xlu1 %v1002_v35 }
 0x499   :  { %v1004_v7 = vpop.xlane.xlu1 %1003 }
 0x49a   :  { %vm1005_vm4 = vcmp.eq.f32.partialorder %v1002_v35, %v1004_v7  ;;  %v1010_v26 = vcvt.f32.s32 %v1004_v7 }
 0x49b   :  { %v1006_v20 = vsel %vm1005_vm4, %v1001_v46, inf  ;;  %vm10127_vm4 = vcmask 261120  }
 0x49c   :  { %1007 = vmin.xlane.f32.xlu2 %v1006_v20  ;;  %v1011_v51 = vshll.u32 %v1010_v26, 16 }
 0x50f   :  { %v1008_v52 = vpop.xlane.xlu2 %1007 }
 0x510   :  { %v1009_v32 = vcvt.f32.s32 %v1008_v52 }
 0x512   :  { %v1012_v45 = vadd.s32 %v1011_v51, %v1009_v32  ;;  %v63_v32 = vld [vmem:[%s10065_s2 + $0x38] sm:$0xff] }
 0x513   :  { %1202 = vmatpush.msra.mxu2 %v63_v32 }
 0x514   :  { %vm1013_vm2 = vcmp.eq.s32.totalorder %v6801_v15, %v1012_v45  ;;  %v62_v45 = vld [vmem:[%s10065_s2 + $0x30] sm:$0xff] }
 0x515   :  { %v1019_v50 = vsel %vm1013_vm2, -1.0, %v992_v39  ;;  %v5634_v0 = vsel %vm1013_vm2, 1.0, %v6575_v5  ;;  %1203 = vmatpush.msra.mxu2 %v62_v45  ;;  %vm10128_vm2 = vmmov %vm10127_vm4 }
 0x516   :  { %v1020_v36 = vsel %vm802_vm5, %v1019_v50, -inf  ;;  %v1077_v58 = vrot.slane %v5634_v0, 1  ;;  %v1082_v14 = vperm.slane %v5634_v0, 0  ;;  %v59_v0 = vld [vmem:[%s10065_s2 + $0x18] sm:$0xff] }
 0x517   :  { %1021 = vmax.xlane.f32.xlu0 %v1020_v36  ;;  %v58_v36 = vld [vmem:[%s10065_s2 + $0x10] sm:$0xff] }
 0x518   :  { %v1083_v47 = vperm.slane %v1077_v58, 0  ;;  %v1095_v40 = vsel %vm1094_vm6, %v5632_v22, %v1082_v14  ;;  %v61_v22 = vld [vmem:[%s10065_s2 + $0x28] sm:$0xff]  ;;  %v70_v58 = vld [vmem:[#allocation2 + $0x18] sm:$0xff]  ;;  %v69_v14 = vld [vmem:[#allocation2 + $0x10] sm:$0xff] }
 0x519   :  { %1204 = vmatpush.msra.mxu2 %v61_v22  ;;  %1238 = vmatpush.msra.mxu3 %v70_v58  ;;  %v6487_v58 = vld [vmem:[%s10063_s0 + $0x10] sm:$0xff] }
 0x51a   :  { %v1096_v59 = vsel %vm1094_vm6, %v1074_v1, %v1083_v47  ;;  %v57_v1 = vld [vmem:[%s10065_s2 + $0x8] sm:$0xff]  ;;  %v56_v47 = vld [vmem:[%s10065_s2] sm:$0xff]  ;;  %vm10129_vm6 = vmmov %vm10128_vm2 }
 0x51b   :  { %1239 = vmatpush.msra.mxu3 %v69_v14 }
 0x58a   :  { %v1022_v6 = vpop.xlane.xlu0 %1021 }
 0x58b   :  { %vm1023_vm1 = vcmp.ge.f32.partialorder %v1019_v50, %v1022_v6  ;;  %vm1043_vm0 = vcmp.gt.f32.partialorder %v1022_v6, 0.6 }
 0x58c   :  { %v1024_v63 = vsel %vm1023_vm1, %v6801_v15, 64  ;;  %v5637_v25 = vsel %vm1043_vm0, 1.0, %v6575_v5  ;;  %vm10130_vm1 = vmmov %vm10128_vm2 }
 0x58d   :  { %v1025_v60 = vsel %vm802_vm5, %v1024_v63, 2147483647  ;;  %v1114_v53 = vperm.slane %v5637_v25, 0  ;;  %v1115_v29 = vperm.slane %v5637_v25, 1  ;;  %v65_v25 = vld [vmem:[%s10067_s4 + $0x8] sm:$0xff]  ;;  %vm10133_vm14 = vmmov %vm10130_vm1 }
 0x58e   :  { %v1027_v44 = vshra.s32 %v1025_v60, 16  ;;  %v1026_v8 = vand.u32 65535, %v1025_v60  ;;  %v1217_v61 = vperm.slane %v65_v25, 2  ;;  %vm10134_vm0 = vmmov %vm10130_vm1 }
 0x58f   :  { %v1125_v23 = vsel %vm1097_vm12, %v1123_v19, %v1114_v53  ;;  %v1126_v24 = vsel %vm1097_vm12, %v1124_v54, %v1115_v29 }
 0x590   :  { %v1029_v28 = vcvt.s32.f32 %v1027_v44  ;;  %v1028_v2 = vcvt.s32.f32 %v1026_v8 }
 0x592   :  { %1030 = vmin.xlane.f32.xlu1 %v1029_v28 }
 0x605   :  { %v1031_v41 = vpop.xlane.xlu1 %1030 }
 0x606   :  { %vm1032_vm3 = vcmp.eq.f32.partialorder %v1029_v28, %v1031_v41  ;;  %v1037_v38 = vcvt.f32.s32 %v1031_v41 }
 0x607   :  { %v1033_v57 = vsel %vm1032_vm3, %v1028_v2, inf  ;;  %vm10131_vm3 = vmmov %vm10130_vm1 }
 0x608   :  { %1034 = vmin.xlane.f32.xlu2 %v1033_v57  ;;  %v1038_v10 = vshll.u32 %v1037_v38, 16 }
 0x67b   :  { %v1035_v62 = vpop.xlane.xlu2 %1034 }
 0x67c   :  { %v1036_v16 = vcvt.f32.s32 %v1035_v62  ;;  %v68_v62 = vld [vmem:[#allocation2 + $0x8] sm:$0xff] }
 0x67d   :  { %1240 = vmatpush.msra.mxu3 %v68_v62 }
 0x67e   :  { %v1039_v12 = vadd.s32 %v1038_v10, %v1036_v16  ;;  %v67_v10 = vld [vmem:[#allocation2] sm:$0xff] }
 0x67f   :  { %1241 = vmatpush.msra.mxu3 %v67_v10 }
 0x680   :  { %vm1040_vm9 = vcmp.eq.s32.totalorder %v6801_v15, %v1039_v12 }
 0x681   :  { %v1046_v17 = vsel %vm1040_vm9, -1.0, %v1019_v50  ;;  %v5636_v33 = vsel %vm1040_vm9, 1.0, %v6575_v5  ;;  %v60_v50 = vld [vmem:[%s10065_s2 + $0x20] sm:$0xff]  ;;  %vm10132_vm9 = vmmov %vm10130_vm1 }
 0x682   :  { %v1047_v3 = vsel %vm802_vm5, %v1046_v17, -inf  ;;  %v1079_v4 = vrot.slane %v5636_v33, 1  ;;  %v1086_v49 = vperm.slane %v5636_v33, 0  ;;  %1205 = vmatpush.msra.mxu2 %v60_v50 }
 0x683   :  { %1048 = vmax.xlane.f32.xlu0 %v1047_v3 }
 0x684   :  { %v1087_v55 = vperm.slane %v1079_v4, 0  ;;  %v7468_v56 = vsel %vm1097_vm12, %v1095_v40, %v1086_v49  ;;  %1206 = vmatpush.msra.mxu2 %v59_v0 }
 0x686   :  { %v7471_v48 = vsel %vm1097_vm12, %v1096_v59, %v1087_v55  ;;  %1207 = vmatpush.msra.mxu2 %v58_v36  ;;  %vm1296_vm12 = vcmask 27648  }
 0x688   :  { %1208 = vmatpush.msra.mxu2 %v57_v1  ;;  %v80_v1 = vld [vmem:[#allocation2 + $0x58] sm:$0xff] }
 0x689   :  { %1421 = vmatpush.msrb.mxu0 %v80_v1 }
 0x68a   :  { %1209 = vmatpush.msra.mxu2 %v56_v47  ;;  %v79_v47 = vld [vmem:[#allocation2 + $0x50] sm:$0xff] }
 0x68b   :  { %1422 = vmatpush.msrb.mxu0 %v79_v47 }
 0x6f6   :  { %v1049_v30 = vpop.xlane.xlu0 %1048 }
 0x6f7   :  { %vm1050_vm7 = vcmp.ge.f32.partialorder %v1046_v17, %v1049_v30  ;;  %vm1070_vm8 = vcmp.gt.f32.partialorder %v1049_v30, 0.6 }
 0x6f8   :  { %v5639_v11 = vsel %vm1070_vm8, 1.0, %v6575_v5  ;;  %v1051_v27 = vsel %vm1050_vm7, %v6801_v15, 64  ;;  %vm1347_vm7 = vcmask 31744   ;;  %vm10135_vm8 = vmmov %vm10134_vm0 }
 0x6f9   :  { %v1119_v34 = vperm.slane %v5639_v11, 0  ;;  %v1120_v39 = vperm.slane %v5639_v11, 1  ;;  %v1052_v21 = vsel %vm802_vm5, %v1051_v27, 2147483647  ;;  %v1501_v14 = vsel %vm10135_vm8, %v6487_v58, 0.0  ;;  %vm10146_vm8 = vmmov %vm10134_vm0 }
 0x6fa   :  { %v1054_v37 = vshra.s32 %v1052_v21, 16  ;;  %v1053_v20 = vand.u32 65535, %v1052_v21 }
 0x6fb   :  { %v1127_v35 = vsel %vm1100_vm11, %v1125_v23, %v1119_v34  ;;  %v1128_v42 = vsel %vm1100_vm11, %v1126_v24, %v1120_v39 }
 0x6fc   :  { %v1056_v7 = vcvt.s32.f32 %v1054_v37  ;;  %v6042_v46 = vpack.i.bf16 %v1128_v42, %v1127_v35  ;;  %v1055_v52 = vcvt.s32.f32 %v1053_v20  ;;  %v6485_v20 = vld [vmem:[%s10063_s0] sm:$0xff] }
 0x6fe   :  { %1057 = vmin.xlane.f32.xlu1 %v1056_v7  ;;  %6043 = vperm.xlu0 %6040, %v6042_v46  }
 0x770   :  { %v6044_v16 = vpop.permute.xlu0 %6043 }
 0x771   :  { %v1058_v26 = vpop.xlane.xlu1 %1057  ;;  %v6045_v12 = vunpack.i.l.bf16 %v6044_v16  ;;  %v6046_v33 = vunpack.i.h.bf16 %v6044_v16 }
 0x772   :  { %vm1059_vm10 = vcmp.eq.f32.partialorder %v1056_v7, %v1058_v26  ;;  %v1064_v40 = vcvt.f32.s32 %v1058_v26  ;;  %v1495_v26 = vsel %vm10133_vm14, %v6485_v20, 0.0  ;;  %vm10145_vm14 = vmmov %vm10134_vm0 }
 0x773   :  { %v1060_v51 = vsel %vm1059_vm10, %v1055_v52, inf  ;;  %v6486_v52 = vld [vmem:[%s10063_s0 + $0x8] sm:$0xff]  ;;  %vm10137_vm10 = vmmov %vm10134_vm0 }
 0x774   :  { %1061 = vmin.xlane.f32.xlu2 %v1060_v51  ;;  %v1065_v6 = vshll.u32 %v1064_v40, 16  ;;  %v1498_v51 = vsel %vm10134_vm0, %v6486_v52, 0.0  ;;  %v78_v40 = vld [vmem:[#allocation2 + $0x48] sm:$0xff] }
 0x775   :  { %1499 = vadd.xlane.f32.xlu0 %v1498_v51  ;;  %1423 = vmatpush.msrb.mxu0 %v78_v40 }
 0x7e7   :  { %v1062_v59 = vpop.xlane.xlu2 %1061 }
 0x7e8   :  { %v1063_v63 = vcvt.f32.s32 %v1062_v59  ;;  %v77_v59 = vld [vmem:[#allocation2 + $0x40] sm:$0xff] }
 0x7e9   :  { %1424 = vmatpush.msrb.mxu0 %v77_v59 }
 0x7ea   :  { %v1066_v60 = vadd.s32 %v1065_v6, %v1063_v63  ;;  %v6488_v6 = vld [vmem:[%s10063_s0 + $0x18] sm:$0xff] }
 0x7ec   :  { %vm1067_vm5 = vcmp.eq.s32.totalorder %v6801_v15, %v1066_v60  ;;  %v7562_v60 = vld [vmem:[%s10063_s0 + $0x20] sm:$0xff] }
 0x7ed   :  { %v5638_v44 = vsel %vm1067_vm5, 1.0, %v6575_v5  ;;  %vm10138_vm5 = vmmov %vm10134_vm0 }
 0x7ee   :  { %v1090_v28 = vperm.slane %v5638_v44, 0  ;;  %v1081_v8 = vrot.slane %v5638_v44, 1  ;;  %v1507_v44 = vsel %vm10137_vm10, %v7562_v60, 0.0  ;;  %vm10148_vm10 = vmmov %vm10134_vm0 }
 0x7f0   :  { %v1101_v41 = vsel %vm1100_vm11, %v7468_v56, %v1090_v28  ;;  %v1091_v2 = vperm.slane %v1081_v8, 0  ;;  %v75_v56 = vld [vmem:[#allocation2 + $0x38] sm:$0xff]  ;;  %v6577_v28 = vmov 32.0   ;;  %v6490_v8 = vld [vmem:[%s10063_s0 + $0x28] sm:$0xff] }
 0x7f1   :  { %5640 = vmatmul.msk.f32.vlgmr.msra.gmra.mxu0 %vm1129_vm15, %v1101_v41  ;;  %1188 = vst [vmem:[#allocation1] ss:$2 sm:$0xff] %v1101_v41  ;;  %v1510_v41 = vsel %vm10138_vm5, %v6490_v8, 0.0 }
 0x7f2   :  { %v1102_v57 = vsel %vm1100_vm11, %v7471_v48, %v1091_v2  ;;  %v74_v48 = vld [vmem:[#allocation2 + $0x30] sm:$0xff]  ;;  %vm10136_vm11 = vmmov %vm10134_vm0 }
 0x7f3   :  { %5641 = vmatmul.msk.f32.vlgmr.msra.gmra.mxu1 %vm1129_vm15, %v1102_v57  ;;  %1190 = vst [vmem:[#allocation1 + $0x1] ss:$2 sm:$0xff] %v1102_v57  ;;  %v1504_v63 = vsel %vm10136_vm11, %v6488_v6, 0.0  ;;  %vm10147_vm11 = vmmov %vm10134_vm0 }
 0x7fa   :  { %v1191_v38 = vld.sshfl [vmem:[#allocation1] sm:$0xff pattern:$0x75316420] }
 0x7fb   :  { %5642 = vmatmul.msk.f32.vlgmr.msra.gmra.mxu2 %vm1129_vm15, %v1191_v38 }
 0x86e   :  { %v1150_v17 = vpop.f32.mrf.mxu0 }
 0x86f   :  { %v1186_v3 = vmul.f32 %v6045_v12, %v1150_v17  ;;  %v1500_v17 = vpop.xlane.xlu0 %1499 }
 0x870   :  { %v1173_v4 = vpop.f32.mrf.mxu1 }
 0x871   :  { %1220 = vst [vmem:[#allocation1] ss:$2 sm:$0xff] %v1186_v3  ;;  %v1187_v49 = vmul.f32 %v6046_v33, %v1173_v4  ;;  %5644 = vmatpush.xpose.msk.msrb.mxu3 %vm10127_vm4, %v1186_v3  ;;  %v7575_v33 = vld [vmem:[%s10063_s0 + $0x30] sm:$0xff] }
 0x873   :  { %1222 = vst [vmem:[#allocation1 + $0x1] ss:$2 sm:$0xff] %v1187_v49  ;;  %5646 = vmatpush.xpose.msk.msrb.mxu1 %vm10128_vm2, %v1187_v49  ;;  %vm10139_vm2 = vmmov %vm10134_vm0 }
 0x877   :  { %1337 = vmatpush.msra.mxu1 %v75_v56 }
 0x879   :  { %1338 = vmatpush.msra.mxu1 %v74_v48 }
 0x87a   :  { %v1223_v55 = vld.sshfl [vmem:[#allocation1] sm:$0xff pattern:$0x75316420] }
 0x87b   :  { %1321 = vst [vmem:[#allocation1 + $0x1] ss:$2 sm:$0xff] %v1187_v49  ;;  %5643 = vmatmul.msk.f32.vlgmr.msra.gmra.mxu3 %vm10129_vm6, %v1223_v55  ;;  %1339 = vmatpush.msra.mxu1 %v73_v13  ;;  %vm10140_vm6 = vmmov %vm10134_vm0 }
 0x87c   :  { %1319 = vst [vmem:[#allocation1] ss:$2 sm:$0xff] %v1186_v3  ;;  %v1513_v3 = vsel %vm10139_vm2, %v7575_v33, 0.0 }
 0x87d   :  { %1340 = vmatpush.msra.mxu1 %v72_v9 }
 0x87e   :  { %v7570_v10 = vpop.f32.mrf.mxu2 }
 0x883   :  { %v1322_v29 = vld.sshfl [vmem:[#allocation1] sm:$0xff pattern:$0x75316420] }
 0x8fe   :  { %v1243_v43 = vpop.f32.mrf.mxu3 }
 0x8ff   :  { %v1244_v31 = vadd.f32 %v1243_v43, %v1217_v61 }
 0x901   :  { %v1247_v53 = vrot.slane %v1244_v31, 4  ;;  %5645 = vmatmul.msk.f32.vlgmr.msrb.gmra.mxu3 %vm10130_vm1, %v1244_v31  ;;  %v7592_v31 = vld [vmem:[%s10063_s0 + $0x38] sm:$0xff]  ;;  %vm10141_vm1 = vmmov %vm10134_vm0 }
 0x903   :  { %5647 = vmatmul.msk.f32.vlgmr.msrb.gmra.mxu1 %vm10131_vm3, %v1247_v53  ;;  %v1516_v53 = vsel %vm10140_vm6, %v7592_v31, 0.0  ;;  %vm10142_vm3 = vmmov %vm10134_vm0 }
 0x904   :  { %vm10149_vm6 = vmmov %vm10134_vm0 }
 0x90b   :  { %5648 = vmatmul.msk.f32.vlgmr.msra.gmra.mxu1 %vm10132_vm9, %v1322_v29  ;;  %vm10143_vm9 = vmmov %vm10134_vm0 }
 0x980   :  { %v1293_v30 = vpop.f32.mrf.mxu1 }
 0x981   :  { %v1300_v18 = vsel %vm1296_vm12, %v1293_v30, -inf }
 0x982   :  { %1301 = vmax.xlane.f32.xlu2 %v1300_v18 }
 0x984   :  { %v1269_v11 = vpop.f32.mrf.mxu3 }
 0x985   :  { %v1297_v27 = vsel %vm1296_vm12, %v1269_v11, -inf }
 0x986   :  { %1298 = vmax.xlane.f32.xlu1 %v1297_v27  ;;  %v7604_v27 = vld [vmem:[%s10063_s0 + $0x68] sm:$0xff] }
 0x988   :  { %v1342_v19 = vpop.f32.mrf.mxu1 }
 0x989   :  { %v1346_v34 = vrot.slane %v1342_v19, 4  ;;  %5649 = vmatpush.msk.msrb.mxu2 %vm1351_vm13, %v1342_v19 }
 0x98b   :  { %5651 = vmatpush.msk.msra.mxu3 %vm1351_vm13, %v1346_v34 }
 0x9f5   :  { %v1302_v39 = vpop.xlane.xlu2 %1301 }
 0x9f6   :  { %v1304_v21 = vsub.f32 %v1293_v30, %v1302_v39 }
 0x9f8   :  { %v1307_v54 = vmul.f32 1.442695, %v1304_v21 }
 0x9f9   :  { %v1299_v37 = vpop.xlane.xlu1 %1298 }
 0x9fa   :  { %6115 = vpow2.f32 %v1307_v54  ;;  %v1303_v23 = vsub.f32 %v1269_v11, %v1299_v37 }
 0x9fc   :  { %v1305_v24 = vmul.f32 1.442695, %v1303_v23 }
 0x9fe   :  { %6117 = vpow2.f32 %v1305_v24 }
 0xa00   :  { %v6116_v35 = vpop.eup %6115 }
 0xa01   :  { %v1312_v42 = vsel %vm1296_vm12, %v6116_v35, 0.0 }
 0xa02   :  { %1313 = vadd.xlane.f32.xlu2 %v1312_v42 }
 0xa04   :  { %v6118_v7 = vpop.eup %6117 }
 0xa05   :  { %v1309_v46 = vsel %vm1296_vm12, %v6118_v7, 0.0  ;;  %vm10144_vm12 = vmmov %vm10134_vm0 }
 0xa06   :  { %1310 = vadd.xlane.f32.xlu1 %v1309_v46  ;;  %v1534_v19 = vsel %vm10144_vm12, %v7604_v27, 0.0  ;;  %v7622_v46 = vld [vmem:[%s10063_s0 + $0x60] sm:$0xff] }
 0xa07   :  { %1535 = vadd.xlane.f32.xlu0 %v1534_v19 }
 0xa0a   :  { %1502 = vadd.xlane.f32.xlu2 %v1501_v14 }
 0xa0e   :  { %1496 = vadd.xlane.f32.xlu1 %v1495_v26 }
 0xa12   :  { %1508 = vadd.xlane.f32.xlu2 %v1507_v44 }
 0xa16   :  { %1505 = vadd.xlane.f32.xlu1 %v1504_v63 }
 0xa1e   :  { %1511 = vadd.xlane.f32.xlu1 %v1510_v41 }
 0xa26   :  { %1514 = vadd.xlane.f32.xlu1 %v1513_v3 }
 0xa2e   :  { %1517 = vadd.xlane.f32.xlu1 %v1516_v53 }
 0xa75   :  { %v1314_v32 = vpop.xlane.xlu2 %1313 }
 0xa76   :  { %6119 = vrcp.f32 %v1314_v32 }
 0xa79   :  { %v1311_v45 = vpop.xlane.xlu1 %1310 }
 0xa7a   :  { %6121 = vrcp.f32 %v1311_v45  ;;  %v1536_v19 = vpop.xlane.xlu0 %1535 }
 0xa7b   :  { %6123 = vrcp.f32 %v6577_v28 }
 0xa7c   :  { %v6120_v22 = vpop.eup %6119 }
 0xa7d   :  { %v7543_v50 = vmul.f32 %v6120_v22, %v6116_v35  ;;  %v1503_v34 = vpop.xlane.xlu2 %1502 }
 0xa7f   :  { %5652 = vmatmul.msk.f32.vlgmr.msra.gmra.mxu3 %vm1347_vm7, %v7543_v50 }
 0xa80   :  { %v6122_v0 = vpop.eup %6121 }
 0xa81   :  { %v7547_v36 = vmul.f32 %v6122_v0, %v6118_v7  ;;  %v6124_v2 = vpop.eup %6123  ;;  %v1497_v12 = vpop.xlane.xlu1 %1496 }
 0xa82   :  { %v1544_v57 = vmul.f32 32.0, %v6124_v2  ;;  %vm1548_vm4 = vweird.f32 %v6124_v2 }
 0xa83   :  { %5650 = vmatmul.msk.f32.vlgmr.msrb.gmra.mxu2 %vm1347_vm7, %v7547_v36 }
 0xa84   :  { %v1545_v38 = vsub.f32 1.0, %v1544_v57 }
 0xa85   :  { %v1509_v7 = vpop.xlane.xlu2 %1508 }
 0xa86   :  { %v1546_v62 = vmul.f32 %v6124_v2, %v1545_v38 }
 0xa88   :  { %v1547_v16 = vadd.f32 %v6124_v2, %v1546_v62 }
 0xa89   :  { %v1506_v23 = vpop.xlane.xlu1 %1505 }
 0xa8a   :  { %v7579_v4 = vsel %vm1548_vm4, %v6124_v2, %v1547_v16  ;;  %v7653_v16 = vld [vmem:[%s10067_s4] sm:$0xff] }
 0xa8b   :  { %v1550_v55 = vmul.f32 %v7579_v4, %v1497_v12  ;;  %v1551_v56 = vmul.f32 %v7579_v4, %v1500_v17  ;;  %v1552_v39 = vmul.f32 %v7579_v4, %v1503_v34  ;;  %v1553_v24 = vmul.f32 %v7579_v4, %v1506_v23 }
 0xa8c   :  { %v1554_v26 = vmul.f32 %v7579_v4, %v1509_v7  ;;  %v7656_v17 = vperm.slane %v7653_v16, 2  ;;  %v7671_v53 = vperm.slane %v7653_v16, 3 }
 0xa8d   :  { %v7583_v13 = vsub.f32 %v6485_v20, %v1550_v55  ;;  %v7585_v25 = vsub.f32 %v6486_v52, %v1551_v56  ;;  %v7609_v21 = vsub.f32 %v6487_v58, %v1552_v39  ;;  %v7615_v35 = vsub.f32 %v6488_v6, %v1553_v24 }
 0xa8e   :  { %v1531_v20 = vsel %vm10134_vm0, %v7622_v46, 0.0  ;;  %v7629_v32 = vsub.f32 %v7562_v60, %v1554_v26  ;;  %v1563_v39 = vmul.f32 %v7579_v4, %v1536_v19 }
 0xa8f   :  { %v1582_v61 = vmul.f32 %v7583_v13, %v7583_v13  ;;  %v1583_v30 = vmul.f32 %v7585_v25, %v7585_v25  ;;  %v1584_v54 = vmul.f32 %v7609_v21, %v7609_v21  ;;  %v1585_v42 = vmul.f32 %v7615_v35, %v7615_v35 }
 0xa90   :  { %v1586_v22 = vmul.f32 %v7629_v32, %v7629_v32  ;;  %v7682_v23 = vsub.f32 %v7604_v27, %v1563_v39 }
 0xa91   :  { %v1598_v29 = vsel %vm10141_vm1, %v1582_v61, 0.0  ;;  %v1601_v18 = vsel %vm10142_vm3, %v1583_v30, 0.0  ;;  %v1604_v37 = vsel %vm10145_vm14, %v1584_v54, 0.0  ;;  %v1512_v52 = vpop.xlane.xlu1 %1511  ;;  %v1607_v51 = vsel %vm10146_vm8, %v1585_v42, 0.0  ;;  %v7666_v61 = vld [vmem:[%s10063_s0 + $0x58] sm:$0xff]  ;;  %vm10150_vm1 = vmmov %vm10134_vm0 }
 0xa92   :  { %1599 = vadd.xlane.f32.xlu2 %v1598_v29  ;;  %1605 = vadd.xlane.f32.xlu1 %v1604_v37  ;;  %v1555_v45 = vmul.f32 %v7579_v4, %v1512_v52  ;;  %v1610_v58 = vsel %vm10147_vm11, %v1586_v22, 0.0  ;;  %v88_v29 = vld [vmem:[#allocation2 + $0x88] sm:$0xff]  ;;  %v1595_v7 = vmul.f32 %v7682_v23, %v7682_v23  ;;  %vm10151_vm14 = vmmov %vm10134_vm0 }
 0xa93   :  { %1608 = vadd.xlane.f32.xlu0 %v1607_v51 }
 0xa94   :  { %v7634_v0 = vsub.f32 %v6490_v8, %v1555_v45  ;;  %v1637_v52 = vsel %vm10151_vm14, %v1595_v7, 0.0 }
 0xa96   :  { %v1587_v14 = vmul.f32 %v7634_v0, %v7634_v0 }
 0xa98   :  { %v1613_v1 = vsel %vm10148_vm10, %v1587_v14, 0.0 }
 0xa9a   :  { %1602 = vadd.xlane.f32.xlu2 %v1601_v18  ;;  %v87_v18 = vld [vmem:[#allocation2 + $0x80] sm:$0xff] }
 0xa9b   :  { %1611 = vadd.xlane.f32.xlu0 %v1610_v58 }
 0xaa2   :  { %1532 = vadd.xlane.f32.xlu2 %v1531_v20 }
 0xaa3   :  { %1614 = vadd.xlane.f32.xlu0 %v1613_v1 }
 0xb02   :  { %v1396_v49 = vpop.f32.mrf.mxu3 }
 0xb03   :  { %v1400_v48 = vmax.f32 %v1396_v49, 0.0 }
 0xb05   :  { %1405 = vst [vmem:[#allocation1 + $0x1] ss:$2 sm:$0xff] %v1400_v48  ;;  %v1600_v59 = vpop.xlane.xlu2 %1599  ;;  %v90_v48 = vld [vmem:[#allocation2 + $0x98] sm:$0xff] }
 0xb06   :  { %v1371_v9 = vpop.f32.mrf.mxu2  ;;  %v1646_v6 = vmul.f32 %v1600_v59, %v7579_v4  ;;  %2065 = vmatpush.msra.mxu0 %v90_v48  ;;  %v1609_v1 = vpop.xlane.xlu0 %1608 }
 0xb07   :  { %v1399_v43 = vmax.f32 %v1371_v9, 0.0  ;;  %v89_v9 = vld [vmem:[#allocation2 + $0x90] sm:$0xff] }
 0xb08   :  { %v1662_v63 = vadd.f32 1e-05, %v1646_v6  ;;  %2066 = vmatpush.msra.mxu0 %v89_v9 }
 0xb09   :  { %1403 = vst [vmem:[#allocation1] ss:$2 sm:$0xff] %v1399_v43  ;;  %v1528_v43 = vsel %vm10149_vm6, %v7666_v61, 0.0 }
 0xb0a   :  { %6125 = vrsqrt.f32 %v1662_v63  ;;  %vm1684_vm5 = vweird.f32 %v1662_v63  ;;  %1529 = vadd.xlane.f32.xlu0 %v1528_v43  ;;  %2067 = vmatpush.msra.mxu0 %v88_v29 }
 0xb0c   :  { %2068 = vmatpush.msra.mxu0 %v87_v18 }
 0xb0d   :  { %v1603_v28 = vpop.xlane.xlu2 %1602 }
 0xb0e   :  { %v1647_v41 = vmul.f32 %v1603_v28, %v7579_v4  ;;  %v1612_v6 = vpop.xlane.xlu0 %1611 }
 0xb10   :  { %v1406_v11 = vld.sshfl [vmem:[#allocation1] sm:$0xff pattern:$0x75316420]  ;;  %v6126_v60 = vpop.eup %6125  ;;  %v1663_v57 = vadd.f32 1e-05, %v1647_v41 }
 0xb11   :  { %5653 = vmatmul.msk.f32.vlgmr.msrb.gmra.mxu0 %vm10143_vm9, %v1406_v11  ;;  %v1679_v44 = vmul.f32 %v6126_v60, %v1662_v63  ;;  %vm1685_vm4 = vweird.f32 %v6126_v60  ;;  %v1650_v63 = vmul.f32 %v1612_v6, %v7579_v4  ;;  %v6496_v6 = vld [vmem:[%s10063_s0 + $0x40] sm:$0xff] }
 0xb12   :  { %6127 = vrsqrt.f32 %v1663_v57  ;;  %vm1686_vm2 = vmor %vm1684_vm5, %vm1685_vm4  ;;  %vm1694_vm3 = vweird.f32 %v1663_v57  ;;  %1638 = vadd.xlane.f32.xlu0 %v1637_v52 }
 0xb13   :  { %v1680_v8 = vmul.f32 %v6126_v60, %v1679_v44  ;;  %vm10152_vm5 = vmmov %vm10134_vm0 }
 0xb15   :  { %v1681_v2 = vmul.f32 0.5, %v1680_v8  ;;  %v1666_v8 = vadd.f32 1e-05, %v1650_v63  ;;  %v1519_v63 = vsel %vm10152_vm5, %v6496_v6, 0.0 }
 0xb17   :  { %v1682_v38 = vsub.f32 1.5, %v1681_v2 }
 0xb18   :  { %v6128_v62 = vpop.eup %6127 }
 0xb19   :  { %v1689_v49 = vmul.f32 %v6128_v62, %v1663_v57  ;;  %vm1695_vm9 = vweird.f32 %v6128_v62 }
 0xb1a   :  { %vm1696_vm12 = vmor %vm1694_vm3, %vm1695_vm9 }
 0xb1b   :  { %v1690_v56 = vmul.f32 %v6128_v62, %v1689_v49 }
 0xb1d   :  { %v1691_v30 = vmul.f32 0.5, %v1690_v56 }
 0xb1f   :  { %v1692_v34 = vsub.f32 1.5, %v1691_v30 }
 0xb21   :  { %v1693_v54 = vmul.f32 %v6128_v62, %v1692_v34 }
 0xb23   :  { %v1697_v20 = vsel %vm1696_vm12, %v6128_v62, %v1693_v54  ;;  %v1615_v62 = vpop.xlane.xlu0 %1614  ;;  %vm10153_vm12 = vmmov %vm10134_vm0 }
 0xb24   :  { %v7688_v26 = vmul.f32 %v1697_v20, %v7585_v25  ;;  %v1649_v25 = vmul.f32 %v1609_v1, %v7579_v4 }
 0xb26   :  { %v1856_v51 = vmul.f32 %v7656_v17, %v7688_v26 }
 0xb28   :  { %v7694_v27 = vadd.f32 %v7671_v53, %v1856_v51 }
 0xb8e   :  { %v1426_v47 = vpop.f32.mrf.mxu0 }
 0xb8f   :  { %v1430_v40 = vrot.slane %v1426_v47, 4  ;;  %5654 = vmatpush.msk.msrb.mxu1 %vm1351_vm13, %v1426_v47 }
 0xb90   :  { %5655 = vmatmul.msk.f32.vlgmr.msrb.gmra.mxu1 %vm1347_vm7, %v7547_v36  ;;  %v1683_v36 = vmul.f32 %v6126_v60, %v1682_v38 }
 0xb91   :  { %5656 = vmatpush.msk.msra.mxu2 %vm1351_vm13, %v1430_v40  ;;  %5970 = vmatpush.msra.mxu1 %v90_v48  ;;  %v1665_v40 = vadd.f32 1e-05, %v1649_v25  ;;  %v1215_v25 = vrot.slane %v7570_v10, 4 }
 0xb92   :  { %5657 = vmatmul.msk.f32.vlgmr.msra.gmra.mxu2 %vm1347_vm7, %v7543_v50  ;;  %v7648_v50 = vpop.xlane.xlu1 %1514  ;;  %v1687_v12 = vsel %vm1686_vm2, %v6126_v60, %v1683_v36 }
 0xb93   :  { %v7659_v3 = vmul.f32 %v1687_v12, %v7583_v13  ;;  %5971 = vmatpush.msra.mxu1 %v89_v9  ;;  %v1651_v12 = vmul.f32 %v1615_v62, %v7579_v4  ;;  %vm1714_vm4 = vweird.f32 %v1665_v40 }
 0xb95   :  { %v1855_v55 = vmul.f32 %v7656_v17, %v7659_v3  ;;  %5972 = vmatpush.msra.mxu1 %v88_v29 }
 0xb97   :  { %v7676_v11 = vadd.f32 %v7671_v53, %v1855_v55  ;;  %5973 = vmatpush.msra.mxu1 %v87_v18  ;;  %v1667_v55 = vadd.f32 1e-05, %v1651_v12  ;;  %v6499_v12 = vld [vmem:[%s10063_s0 + $0x50] sm:$0xff] }
 0xb99   :  { %5663 = vmatmul.msk.f32.vlgmr.msra.gmra.mxu0 %vm10150_vm1, %v7676_v11  ;;  %vm1724_vm1 = vweird.f32 %v1666_v8  ;;  %vm1734_vm14 = vweird.f32 %v1667_v55 }
 0xb9a   :  { %v7673_v13 = vpop.xlane.xlu1 %1517 }
 0xba1   :  { %5664 = vmatmul.msk.f32.gmra.mxu0 %vm10134_vm0, %v7694_v27 }
 0xba2   :  { %v1606_v37 = vpop.xlane.xlu1 %1605 }
 0xba3   :  { %v1648_v24 = vmul.f32 %v1606_v37, %v7579_v4 }
 0xba5   :  { %v1664_v42 = vadd.f32 1e-05, %v1648_v24 }
 0xba7   :  { %6129 = vrsqrt.f32 %v1664_v42  ;;  %vm1704_vm8 = vweird.f32 %v1664_v42 }
 0xba8   :  { %6131 = vrsqrt.f32 %v1665_v40 }
 0xba9   :  { %6133 = vrsqrt.f32 %v1666_v8 }
 0xbaa   :  { %6135 = vrsqrt.f32 %v1667_v55 }
 0xbad   :  { %v6130_v45 = vpop.eup %6129 }
 0xbae   :  { %v1699_v22 = vmul.f32 %v6130_v45, %v1664_v42  ;;  %vm1705_vm11 = vweird.f32 %v6130_v45  ;;  %v6132_v28 = vpop.eup %6131 }
 0xbaf   :  { %vm1706_vm10 = vmor %vm1704_vm8, %vm1705_vm11  ;;  %v1709_v41 = vmul.f32 %v6132_v28, %v1665_v40  ;;  %v6134_v49 = vpop.eup %6133  ;;  %vm1715_vm2 = vweird.f32 %v6132_v28  ;;  %vm1922_vm8 = vcmask 257024  }
 0xbb0   :  { %v1700_v58 = vmul.f32 %v6130_v45, %v1699_v22  ;;  %v1719_v56 = vmul.f32 %v6134_v49, %v1666_v8  ;;  %vm1716_vm6 = vmor %vm1714_vm4, %vm1715_vm2  ;;  %v6136_v19 = vpop.eup %6135  ;;  %vm1725_vm3 = vweird.f32 %v6134_v49  ;;  %v6498_v8 = vld [vmem:[%s10063_s0 + $0x70] sm:$0xff] }
 0xbb1   :  { %v1710_v57 = vmul.f32 %v6132_v28, %v1709_v41  ;;  %v1729_v34 = vmul.f32 %v6136_v19, %v1667_v55  ;;  %vm1726_vm9 = vmor %vm1724_vm1, %vm1725_vm3  ;;  %vm1735_vm0 = vweird.f32 %v6136_v19  ;;  %v1533_v55 = vpop.xlane.xlu2 %1532 }
 0xbb2   :  { %v1701_v14 = vmul.f32 0.5, %v1700_v58  ;;  %v1720_v9 = vmul.f32 %v6134_v49, %v1719_v56  ;;  %vm1736_vm11 = vmor %vm1734_vm14, %vm1735_vm0 }
 0xbb3   :  { %v1711_v36 = vmul.f32 0.5, %v1710_v57  ;;  %v1730_v37 = vmul.f32 %v6136_v19, %v1729_v34  ;;  %vm10155_vm4 = vmmov %vm10152_vm5  ;;  %v1557_v57 = vmul.f32 %v7579_v4, %v7673_v13  ;;  %v1562_v13 = vmul.f32 %v7579_v4, %v1533_v55 }
 0xbb4   :  { %v1702_v47 = vsub.f32 1.5, %v1701_v14  ;;  %v1721_v43 = vmul.f32 0.5, %v1720_v9  ;;  %vm10156_vm2 = vmmov %vm10155_vm4 }
 0xbb5   :  { %v1731_v42 = vmul.f32 0.5, %v1730_v37  ;;  %v7771_v62 = vsub.f32 %v7592_v31, %v1557_v57  ;;  %vm10158_vm1 = vmmov %vm10156_vm2  ;;  %v7789_v9 = vsub.f32 %v7622_v46, %v1562_v13 }
 0xbb6   :  { %v1703_v59 = vmul.f32 %v6130_v45, %v1702_v47  ;;  %v1722_v30 = vsub.f32 1.5, %v1721_v43  ;;  %vm10159_vm3 = vmmov %vm10158_vm1 }
 0xbb7   :  { %v1594_v43 = vmul.f32 %v7789_v9, %v7789_v9  ;;  %vm10162_vm14 = vmmov %vm10158_vm1 }
 0xbb8   :  { %v1707_v60 = vsel %vm1706_vm10, %v6130_v45, %v1703_v59  ;;  %v1723_v54 = vmul.f32 %v6134_v49, %v1722_v30  ;;  %vm10154_vm10 = vmmov %vm10152_vm5 }
 0xbb9   :  { %v7701_v44 = vmul.f32 %v1707_v60, %v7609_v21  ;;  %v1712_v21 = vsub.f32 1.5, %v1711_v36  ;;  %vm10163_vm0 = vmmov %vm10158_vm1 }
 0xbba   :  { %v1727_v7 = vsel %vm1726_vm9, %v6134_v49, %v1723_v54  ;;  %v6500_v49 = vld [vmem:[%s10063_s0 + $0x78] sm:$0xff]  ;;  %vm10160_vm9 = vmmov %vm10158_vm1 }
 0xbbb   :  { %v1857_v2 = vmul.f32 %v7656_v17, %v7701_v44  ;;  %v1713_v48 = vmul.f32 %v6132_v28, %v1712_v21  ;;  %v7722_v20 = vmul.f32 %v1727_v7, %v7629_v32  ;;  %v1525_v21 = vsel %vm10158_vm1, %v6499_v12, 0.0 }
 0xbbd   :  { %v7706_v38 = vadd.f32 %v7671_v53, %v1857_v2  ;;  %v1717_v29 = vsel %vm1716_vm6, %v6132_v28, %v1713_v48  ;;  %v1859_v52 = vmul.f32 %v7656_v17, %v7722_v20  ;;  %vm10157_vm6 = vmmov %vm10156_vm2  ;;  %v1556_v2 = vmul.f32 %v7579_v4, %v7648_v50 }
 0xbbe   :  { %v7712_v18 = vmul.f32 %v1717_v29, %v7615_v35  ;;  %v1732_v35 = vsub.f32 1.5, %v1731_v42  ;;  %v1537_v41 = vsel %vm10157_vm6, %v6498_v8, 0.0  ;;  %v1540_v50 = vsel %vm10159_vm3, %v6500_v49, 0.0 }
 0xbbf   :  { %5665 = vmatmul.msk.f32.gmra.mxu0 %vm10152_vm5, %v7706_v38  ;;  %v7730_v58 = vadd.f32 %v7671_v53, %v1859_v52  ;;  %v7768_v36 = vsub.f32 %v7575_v33, %v1556_v2  ;;  %v1589_v33 = vmul.f32 %v7771_v62, %v7771_v62  ;;  %v1634_v29 = vsel %vm10162_vm14, %v1594_v43, 0.0  ;;  %vm10166_vm5 = vmmov %vm10163_vm0 }
 0xbc0   :  { %v1858_v39 = vmul.f32 %v7656_v17, %v7712_v18  ;;  %v1733_v45 = vmul.f32 %v6136_v19, %v1732_v35 }
 0xbc1   :  { %v1588_v31 = vmul.f32 %v7768_v36, %v7768_v36  ;;  %v1619_v56 = vsel %vm10160_vm9, %v1589_v33, 0.0 }
 0xbc2   :  { %v7717_v24 = vadd.f32 %v7671_v53, %v1858_v39  ;;  %v1737_v32 = vsel %vm1736_vm11, %v6136_v19, %v1733_v45  ;;  %vm10164_vm11 = vmmov %vm10163_vm0 }
 0xbc3   :  { %v7737_v1 = vmul.f32 %v1737_v32, %v7634_v0 }
 0xbc5   :  { %v1860_v47 = vmul.f32 %v7656_v17, %v7737_v1 }
 0xbc7   :  { %5666 = vmatmul.msk.f32.gmra.mxu0 %vm10153_vm12, %v7717_v24  ;;  %v7749_v60 = vadd.f32 %v7671_v53, %v1860_v47  ;;  %vm10161_vm12 = vmmov %vm10158_vm1 }
 0xbc8   :  { %v1616_v48 = vsel %vm10161_vm12, %v1588_v31, 0.0 }
 0xbcf   :  { %5667 = vmatmul.msk.f32.gmra.mxu0 %vm10154_vm10, %v7730_v58  ;;  %vm10165_vm10 = vmmov %vm10163_vm0 }
 0xbd7   :  { %5668 = vmatmul.msk.f32.gmra.mxu0 %vm10155_vm4, %v7749_v60  ;;  %vm10167_vm4 = vmmov %vm10163_vm0 }
 0xc0d   :  { %v1450_v51 = vpop.f32.mrf.mxu1 }
 0xc0e   :  { %v7727_v22 = vadd.f32 %v1450_v51, %v7570_v10  ;;  %v6497_v10 = vld [vmem:[%s10063_s0 + $0x48] sm:$0xff]  ;;  %v1530_v51 = vpop.xlane.xlu0 %1529 }
 0xc0f   :  { %v1522_v28 = vsel %vm10156_vm2, %v6497_v10, 0.0  ;;  %vm10168_vm2 = vmmov %vm10163_vm0 }
 0xc10   :  { %v1923_v14 = vsel %vm1922_vm8, %v7727_v22, 0.0 }
 0xc11   :  { %1924 = vadd.xlane.f32.xlu2 %v1923_v14 }
 0xc15   :  { %v1472_v40 = vpop.f32.mrf.mxu2 }
 0xc16   :  { %v7742_v59 = vadd.f32 %v1472_v40, %v1215_v25 }
 0xc18   :  { %v1926_v0 = vsel %vm1922_vm8, %v7742_v59, 0.0 }
 0xc19   :  { %1520 = vadd.xlane.f32.xlu2 %v1519_v63  ;;  %1927 = vadd.xlane.f32.xlu1 %v1926_v0  ;;  %v1561_v63 = vmul.f32 %v7579_v4, %v1530_v51 }
 0xc1b   :  { %v7822_v2 = vsub.f32 %v7666_v61, %v1561_v63 }
 0xc1d   :  { %v1593_v13 = vmul.f32 %v7822_v2, %v7822_v2 }
 0xc21   :  { %1523 = vadd.xlane.f32.xlu2 %v1522_v28  ;;  %1538 = vadd.xlane.f32.xlu1 %v1537_v41 }
 0xc29   :  { %1526 = vadd.xlane.f32.xlu2 %v1525_v21  ;;  %1541 = vadd.xlane.f32.xlu1 %v1540_v50  ;;  %v1639_v50 = vpop.xlane.xlu0 %1638 }
 0xc31   :  { %1620 = vadd.xlane.f32.xlu2 %v1619_v56  ;;  %1617 = vadd.xlane.f32.xlu1 %v1616_v48  ;;  %v1659_v56 = vmul.f32 %v1639_v50, %v7579_v4 }
 0xc39   :  { %1635 = vadd.xlane.f32.xlu1 %v1634_v29 }
 0xc84   :  { %v1925_v30 = vpop.xlane.xlu2 %1924 }
 0xc85   :  { %v1929_v19 = vmul.f32 %v1925_v30, %v7579_v4  ;;  %v1631_v30 = vsel %vm10166_vm5, %v1593_v13, 0.0 }
 0xc87   :  { %v7796_v34 = vsub.f32 %v7727_v22, %v1929_v19 }
 0xc89   :  { %v1933_v39 = vmul.f32 %v7796_v34, %v7796_v34 }
 0xc8b   :  { %v1935_v46 = vsel %vm1922_vm8, %v1933_v39, 0.0  ;;  %v1675_v39 = vadd.f32 1e-05, %v1659_v56 }
 0xc8c   :  { %v1928_v54 = vpop.xlane.xlu1 %1927  ;;  %1936 = vadd.xlane.f32.xlu2 %v1935_v46  ;;  %v1521_v37 = vpop.xlane.xlu2 %1520 }
 0xc8d   :  { %v1930_v42 = vmul.f32 %v1928_v54, %v7579_v4  ;;  %v1558_v7 = vmul.f32 %v7579_v4, %v1521_v37  ;;  %6137 = vrsqrt.f32 %v1675_v39 }
 0xc8f   :  { %v7804_v35 = vsub.f32 %v7742_v59, %v1930_v42  ;;  %v7806_v52 = vsub.f32 %v6496_v6, %v1558_v7 }
 0xc91   :  { %v1934_v45 = vmul.f32 %v7804_v35, %v7804_v35  ;;  %v1590_v14 = vmul.f32 %v7806_v52, %v7806_v52 }
 0xc93   :  { %v1938_v32 = vsel %vm1922_vm8, %v1934_v45, 0.0  ;;  %v1622_v25 = vsel %vm10163_vm0, %v1590_v14, 0.0  ;;  %v6138_v45 = vpop.eup %6137 }
 0xc94   :  { %v1539_v47 = vpop.xlane.xlu1 %1538  ;;  %1939 = vadd.xlane.f32.xlu1 %v1938_v32  ;;  %1623 = vadd.xlane.f32.xlu0 %v1622_v25  ;;  %v1524_v40 = vpop.xlane.xlu2 %1523  ;;  %vm1815_vm5 = vweird.f32 %v6138_v45 }
 0xc95   :  { %v1564_v6 = vmul.f32 %v7579_v4, %v1539_v47  ;;  %v1559_v0 = vmul.f32 %v7579_v4, %v1524_v40  ;;  %v1809_v47 = vmul.f32 %v6138_v45, %v1675_v39 }
 0xc97   :  { %v7817_v28 = vsub.f32 %v6498_v8, %v1564_v6  ;;  %v7819_v41 = vsub.f32 %v6497_v10, %v1559_v0 }
 0xc99   :  { %v1596_v57 = vmul.f32 %v7817_v28, %v7817_v28  ;;  %v1591_v21 = vmul.f32 %v7819_v41, %v7819_v41 }
 0xc9b   :  { %v1640_v55 = vsel %vm10164_vm11, %v1596_v57, 0.0  ;;  %v1625_v33 = vsel %vm10165_vm10, %v1591_v21, 0.0  ;;  %v1810_v21 = vmul.f32 %v6138_v45, %v1809_v47  ;;  %vm1814_vm10 = vweird.f32 %v1675_v39 }
 0xc9c   :  { %v1542_v31 = vpop.xlane.xlu1 %1541  ;;  %1641 = vadd.xlane.f32.xlu2 %v1640_v55  ;;  %1626 = vadd.xlane.f32.xlu1 %v1625_v33  ;;  %v1527_v8 = vpop.xlane.xlu2 %1526 }
 0xc9d   :  { %v1565_v10 = vmul.f32 %v7579_v4, %v1542_v31  ;;  %v1560_v61 = vmul.f32 %v7579_v4, %v1527_v8 }
 0xc9f   :  { %v7835_v48 = vsub.f32 %v6500_v49, %v1565_v10  ;;  %v7837_v43 = vsub.f32 %v6499_v12, %v1560_v61  ;;  %v1811_v10 = vmul.f32 0.5, %v1810_v21  ;;  %v7890_v21 = vpop.f32.mrf.mxu0 }
 0xca1   :  { %v1597_v29 = vmul.f32 %v7835_v48, %v7835_v48  ;;  %v1592_v19 = vmul.f32 %v7837_v43, %v7837_v43 }
 0xca3   :  { %v1643_v46 = vsel %vm10167_vm4, %v1597_v29, 0.0  ;;  %v1628_v54 = vsel %vm10168_vm2, %v1592_v19, 0.0  ;;  %vm1816_vm2 = vmor %vm1814_vm10, %vm1815_vm5 }
 0xca4   :  { %v1618_v37 = vpop.xlane.xlu1 %1617  ;;  %1644 = vadd.xlane.f32.xlu0 %v1643_v46  ;;  %1632 = vadd.xlane.f32.xlu1 %v1631_v30  ;;  %v1621_v49 = vpop.xlane.xlu2 %1620  ;;  %v1812_v46 = vsub.f32 1.5, %v1811_v10 }
 0xca5   :  { %v1652_v12 = vmul.f32 %v1618_v37, %v7579_v4  ;;  %1629 = vadd.xlane.f32.xlu2 %v1628_v54  ;;  %v1653_v42 = vmul.f32 %v1621_v49, %v7579_v4 }
 0xca7   :  { %v1668_v7 = vadd.f32 1e-05, %v1652_v12  ;;  %v1669_v51 = vadd.f32 1e-05, %v1653_v42 }
 0xca9   :  { %6139 = vrsqrt.f32 %v1668_v7  ;;  %vm1744_vm6 = vweird.f32 %v1668_v7  ;;  %vm1754_vm3 = vweird.f32 %v1669_v51 }
 0xcaa   :  { %6141 = vrsqrt.f32 %v1669_v51 }
 0xcac   :  { %v1636_v14 = vpop.xlane.xlu1 %1635 }
 0xcad   :  { %v1658_v32 = vmul.f32 %v1636_v14, %v7579_v4  ;;  %v1813_v14 = vmul.f32 %v6138_v45, %v1812_v46 }
 0xcaf   :  { %v6140_v25 = vpop.eup %6139  ;;  %v1674_v40 = vadd.f32 1e-05, %v1658_v32  ;;  %v1817_v47 = vsel %vm1816_vm2, %v6138_v45, %v1813_v14 }
 0xcb0   :  { %v6142_v63 = vpop.eup %6141  ;;  %v1739_v6 = vmul.f32 %v6140_v25, %v1668_v7  ;;  %vm1745_vm1 = vweird.f32 %v6140_v25 }
 0xcb1   :  { %v1749_v0 = vmul.f32 %v6142_v63, %v1669_v51  ;;  %6143 = vrsqrt.f32 %v1674_v40  ;;  %vm1755_vm9 = vweird.f32 %v6142_v63  ;;  %vm1746_vm12 = vmor %vm1744_vm6, %vm1745_vm1  ;;  %vm1804_vm0 = vweird.f32 %v1674_v40 }
 0xcb2   :  { %v1740_v57 = vmul.f32 %v6140_v25, %v1739_v6  ;;  %vm1756_vm14 = vmor %vm1754_vm3, %vm1755_vm9  ;;  %vm10169_vm6 = vcmask 261120   ;;  %v7876_v6 = vmul.f32 %v1817_v47, %v7682_v23 }
 0xcb3   :  { %v1750_v50 = vmul.f32 %v6142_v63, %v1749_v0  ;;  %vm10170_vm1 = vmmov %vm10169_vm6 }
 0xcb4   :  { %v1741_v55 = vmul.f32 0.5, %v1740_v57  ;;  %vm10171_vm3 = vmmov %vm10170_vm1 }
 0xcb5   :  { %v1751_v33 = vmul.f32 0.5, %v1750_v50  ;;  %vm10172_vm9 = vmmov %vm10170_vm1 }
 0xcb6   :  { %v1742_v31 = vsub.f32 1.5, %v1741_v55 }
 0xcb7   :  { %v6144_v8 = vpop.eup %6143  ;;  %v1752_v61 = vsub.f32 1.5, %v1751_v33 }
 0xcb8   :  { %v1743_v13 = vmul.f32 %v6140_v25, %v1742_v31  ;;  %v1799_v56 = vmul.f32 %v6144_v8, %v1674_v40  ;;  %vm1805_vm11 = vweird.f32 %v6144_v8 }
 0xcb9   :  { %v1753_v29 = vmul.f32 %v6142_v63, %v1752_v61  ;;  %vm1806_vm4 = vmor %vm1804_vm0, %vm1805_vm11 }
 0xcba   :  { %v1800_v30 = vmul.f32 %v6144_v8, %v1799_v56  ;;  %v1747_v19 = vsel %vm1746_vm12, %v6140_v25, %v1743_v13 }
 0xcbb   :  { %v7850_v54 = vmul.f32 %v1747_v19, %v7768_v36  ;;  %v1757_v49 = vsel %vm1756_vm14, %v6142_v63, %v1753_v29  ;;  %v85_v29 = vld [vmem:[#allocation2 + $0x78] sm:$0xff] }
 0xcbc   :  { %v1801_v37 = vmul.f32 0.5, %v1800_v30  ;;  %v7858_v51 = vmul.f32 %v1757_v49, %v7771_v62  ;;  %v84_v30 = vld [vmem:[#allocation2 + $0x70] sm:$0xff]  ;;  %1993 = vmatpush.msrb.mxu3 %v85_v29  ;;  %v83_v49 = vld [vmem:[#allocation2 + $0x68] sm:$0xff]  ;;  %v95_v29 = vld [vmem:[#allocation2 + $0xb8] sm:$0xff] }
 0xcbd   :  { %v1861_v12 = vmul.f32 %v7656_v17, %v7850_v54  ;;  %2130 = vmatpush.msrb.mxu1 %v95_v29 }
 0xcbe   :  { %v1802_v42 = vsub.f32 1.5, %v1801_v37  ;;  %v1862_v39 = vmul.f32 %v7656_v17, %v7858_v51  ;;  %1994 = vmatpush.msrb.mxu3 %v84_v30  ;;  %v94_v30 = vld [vmem:[#allocation2 + $0xb0] sm:$0xff] }
 0xcbf   :  { %v7855_v7 = vadd.f32 %v7671_v53, %v1861_v12  ;;  %v7900_v12 = vpop.f32.mrf.mxu0  ;;  %2131 = vmatpush.msrb.mxu1 %v94_v30 }
 0xcc0   :  { %v1803_v36 = vmul.f32 %v6144_v8, %v1802_v42  ;;  %v7870_v62 = vadd.f32 %v7671_v53, %v1862_v39  ;;  %1995 = vmatpush.msrb.mxu3 %v83_v49 }
 0xcc1   :  { %5669 = vmatmul.msk.f32.gmra.mxu0 %vm10169_vm6, %v7855_v7 }
 0xcc2   :  { %v1807_v32 = vsel %vm1806_vm4, %v6144_v8, %v1803_v36 }
 0xcc3   :  { %v7863_v25 = vmul.f32 %v1807_v32, %v7789_v9  ;;  %v1868_v9 = vmul.f32 %v7656_v17, %v7876_v6  ;;  %v82_v32 = vld [vmem:[#allocation2 + $0x60] sm:$0xff] }
 0xcc4   :  { %1996 = vmatpush.msrb.mxu3 %v82_v32 }
 0xcc5   :  { %v1867_v40 = vmul.f32 %v7656_v17, %v7863_v25  ;;  %v7885_v45 = vadd.f32 %v7671_v53, %v1868_v9 }
 0xcc7   :  { %v7873_v63 = vadd.f32 %v7671_v53, %v1867_v40 }
 0xcc9   :  { %5670 = vmatmul.msk.f32.gmra.mxu0 %vm10170_vm1, %v7870_v62  ;;  %5675 = vmatmul.msk.f32.vlgmr.msra.gmra.mxu1 %vm10171_vm3, %v7873_v63 }
 0xcd1   :  { %5676 = vmatmul.msk.f32.gmra.mxu1 %vm10172_vm9, %v7885_v45 }
 0xcff   :  { %v1937_v0 = vpop.xlane.xlu2 %1936 }
 0xd00   :  { %v1941_v57 = vmul.f32 %v1937_v0, %v7579_v4 }
 0xd02   :  { %v1943_v23 = vadd.f32 1e-05, %v1941_v57 }
 0xd04   :  { %6145 = vrsqrt.f32 %v1943_v23  ;;  %vm1951_vm14 = vweird.f32 %v1943_v23 }
 0xd07   :  { %v1940_v50 = vpop.xlane.xlu1 %1939  ;;  %v1624_v55 = vpop.xlane.xlu0 %1623 }
 0xd08   :  { %v1942_v33 = vmul.f32 %v1940_v50, %v7579_v4  ;;  %v1654_v31 = vmul.f32 %v1624_v55, %v7579_v4  ;;  %v1967_v50 = vperm.slane %v7653_v16, 0 }
 0xd0a   :  { %v6146_v8 = vpop.eup %6145  ;;  %v7894_v10 = vadd.f32 1e-05, %v1942_v33  ;;  %v7896_v61 = vadd.f32 1e-05, %v1654_v31 }
 0xd0b   :  { %v1946_v13 = vmul.f32 %v6146_v8, %v1943_v23  ;;  %vm1952_vm12 = vweird.f32 %v6146_v8 }
 0xd0c   :  { %6147 = vrsqrt.f32 %v7894_v10  ;;  %vm1953_vm0 = vmor %vm1951_vm14, %vm1952_vm12  ;;  %vm1961_vm11 = vweird.f32 %v7894_v10  ;;  %vm1764_vm5 = vweird.f32 %v7896_v61 }
 0xd0d   :  { %v1947_v56 = vmul.f32 %v6146_v8, %v1946_v13  ;;  %6149 = vrsqrt.f32 %v7896_v61  ;;  %v1970_v13 = vperm.slane %v7653_v16, 1  ;;  %v93_v16 = vld [vmem:[#allocation2 + $0xa8] sm:$0xff] }
 0xd0e   :  { %2132 = vmatpush.msrb.mxu1 %v93_v16 }
 0xd0f   :  { %v1948_v19 = vmul.f32 0.5, %v1947_v56  ;;  %v1627_v46 = vpop.xlane.xlu1 %1626  ;;  %v1642_v37 = vpop.xlane.xlu2 %1641 }
 0xd10   :  { %v1655_v42 = vmul.f32 %v1627_v46, %v7579_v4  ;;  %v1660_v14 = vmul.f32 %v1642_v37, %v7579_v4 }
 0xd11   :  { %v1949_v36 = vsub.f32 1.5, %v1948_v19 }
 0xd12   :  { %v6148_v39 = vpop.eup %6147  ;;  %v7904_v47 = vadd.f32 1e-05, %v1655_v42  ;;  %v7906_v40 = vadd.f32 1e-05, %v1660_v14 }
 0xd13   :  { %v7908_v9 = vpop.eup %6149  ;;  %v1950_v0 = vmul.f32 %v6146_v8, %v1949_v36  ;;  %v1956_v57 = vmul.f32 %v6148_v39, %v7894_v10  ;;  %vm1962_vm10 = vweird.f32 %v6148_v39 }
 0xd14   :  { %v1759_v55 = vmul.f32 %v7908_v9, %v7896_v61  ;;  %6151 = vrsqrt.f32 %v7904_v47  ;;  %vm1765_vm4 = vweird.f32 %v7908_v9  ;;  %vm1963_vm2 = vmor %vm1961_vm11, %vm1962_vm10  ;;  %vm1774_vm1 = vweird.f32 %v7904_v47 }
 0xd15   :  { %v1954_v33 = vsel %vm1953_vm0, %v6146_v8, %v1950_v0  ;;  %v1957_v31 = vmul.f32 %v6148_v39, %v1956_v57  ;;  %6153 = vrsqrt.f32 %v7906_v40  ;;  %v7924_v57 = vpop.f32.mrf.mxu0  ;;  %vm1766_vm6 = vmor %vm1764_vm5, %vm1765_vm4  ;;  %vm1824_vm14 = vweird.f32 %v7906_v40 }
 0xd16   :  { %v1965_v56 = vmul.f32 %v1954_v33, %v7796_v34  ;;  %v1760_v23 = vmul.f32 %v7908_v9, %v1759_v55  ;;  %vm10173_vm11 = vcmask 261120  }
 0xd17   :  { %v1958_v19 = vmul.f32 0.5, %v1957_v31  ;;  %v1645_v46 = vpop.xlane.xlu0 %1644  ;;  %v1633_v37 = vpop.xlane.xlu1 %1632 }
 0xd18   :  { %v1968_v49 = vmul.f32 %v1967_v50, %v1965_v56  ;;  %v1761_v42 = vmul.f32 0.5, %v1760_v23  ;;  %v1661_v8 = vmul.f32 %v1645_v46, %v7579_v4  ;;  %v1657_v14 = vmul.f32 %v1633_v37, %v7579_v4  ;;  %v1630_v36 = vpop.xlane.xlu2 %1629  ;;  %v92_v23 = vld [vmem:[#allocation2 + $0xa0] sm:$0xff] }
 0xd19   :  { %v1959_v32 = vsub.f32 1.5, %v1958_v19  ;;  %v1656_v34 = vmul.f32 %v1630_v36, %v7579_v4  ;;  %2133 = vmatpush.msrb.mxu1 %v92_v23 }
 0xd1a   :  { %v6152_v0 = vpop.eup %6151  ;;  %v1971_v55 = vadd.f32 %v1970_v13, %v1968_v49  ;;  %v1762_v33 = vsub.f32 1.5, %v1761_v42  ;;  %v7926_v31 = vadd.f32 1e-05, %v1661_v8  ;;  %v7928_v56 = vadd.f32 1e-05, %v1657_v14 }
 0xd1b   :  { %v6154_v29 = vpop.eup %6153  ;;  %v1960_v46 = vmul.f32 %v6148_v39, %v1959_v32  ;;  %v1769_v19 = vmul.f32 %v6152_v0, %v7904_v47  ;;  %v7932_v37 = vadd.f32 1e-05, %v1656_v34  ;;  %vm1775_vm3 = vweird.f32 %v6152_v0 }
 0xd1c   :  { %1975 = vst [vmem:[#allocation1] ss:$2 sm:$0xff] %v1971_v55  ;;  %v1763_v30 = vmul.f32 %v7908_v9, %v1762_v33  ;;  %v1819_v49 = vmul.f32 %v6154_v29, %v7906_v40  ;;  %6155 = vrsqrt.f32 %v7926_v31  ;;  %vm1825_vm9 = vweird.f32 %v6154_v29  ;;  %vm1776_vm12 = vmor %vm1774_vm1, %vm1775_vm3 }
 0xd1d   :  { %v1964_v42 = vsel %vm1963_vm2, %v6148_v39, %v1960_v46  ;;  %v1770_v8 = vmul.f32 %v6152_v0, %v1769_v19  ;;  %6157 = vrsqrt.f32 %v7928_v56  ;;  %vm1826_vm0 = vmor %vm1824_vm14, %vm1825_vm9  ;;  %vm1834_vm10 = vweird.f32 %v7926_v31 }
 0xd1e   :  { %v1966_v14 = vmul.f32 %v1964_v42, %v7804_v35  ;;  %v1820_v36 = vmul.f32 %v6154_v29, %v1819_v49  ;;  %6159 = vrsqrt.f32 %v7932_v37  ;;  %v1767_v16 = vsel %vm1766_vm6, %v7908_v9, %v1763_v30  ;;  %v7950_v35 = vpop.f32.mrf.mxu0  ;;  %vm10174_vm9 = vmmov %vm10173_vm11 }
 0xd1f   :  { %v1771_v10 = vmul.f32 0.5, %v1770_v8  ;;  %v7947_v55 = vmul.f32 %v1767_v16, %v7806_v52  ;;  %vm1794_vm5 = vweird.f32 %v7928_v56  ;;  %vm1784_vm6 = vweird.f32 %v7932_v37  ;;  %vm10175_vm14 = vmmov %vm10174_vm9 }
 0xd20   :  { %v1969_v32 = vmul.f32 %v1967_v50, %v1966_v14  ;;  %v1821_v34 = vmul.f32 0.5, %v1820_v36 }
 0xd21   :  { %v1772_v39 = vsub.f32 1.5, %v1771_v10  ;;  %v1863_v46 = vmul.f32 %v7656_v17, %v7947_v55 }
 0xd22   :  { %v6156_v33 = vpop.eup %6155  ;;  %v1972_v61 = vadd.f32 %v1970_v13, %v1969_v32  ;;  %v1822_v23 = vsub.f32 1.5, %v1821_v34 }
 0xd23   :  { %v6158_v19 = vpop.eup %6157  ;;  %v1773_v9 = vmul.f32 %v6152_v0, %v1772_v39  ;;  %v1829_v50 = vmul.f32 %v6156_v33, %v7926_v31  ;;  %v7958_v49 = vadd.f32 %v7671_v53, %v1863_v46  ;;  %vm1835_vm4 = vweird.f32 %v6156_v33 }
 0xd24   :  { %v6160_v30 = vpop.eup %6159  ;;  %1977 = vst [vmem:[#allocation1 + $0x1] ss:$2 sm:$0xff] %v1972_v61  ;;  %v1823_v52 = vmul.f32 %v6154_v29, %v1822_v23  ;;  %v1789_v47 = vmul.f32 %v6158_v19, %v7928_v56  ;;  %vm1795_vm2 = vweird.f32 %v6158_v19  ;;  %vm1836_vm3 = vmor %vm1834_vm10, %vm1835_vm4 }
 0xd25   :  { %v1830_v13 = vmul.f32 %v6156_v33, %v1829_v50  ;;  %v1779_v42 = vmul.f32 %v6160_v30, %v7932_v37  ;;  %v1777_v8 = vsel %vm1776_vm12, %v6152_v0, %v1773_v9  ;;  %5671 = vmatmul.msk.f32.gmra.mxu0 %vm10173_vm11, %v7958_v49  ;;  %vm1785_vm1 = vweird.f32 %v6160_v30  ;;  %vm1796_vm12 = vmor %vm1794_vm5, %vm1795_vm2 }
 0xd26   :  { %v1790_v14 = vmul.f32 %v6158_v19, %v1789_v47  ;;  %v7964_v36 = vmul.f32 %v1777_v8, %v7819_v41  ;;  %v1827_v10 = vsel %vm1826_vm0, %v6154_v29, %v1823_v52  ;;  %v7980_v52 = vpop.f32.mrf.mxu0  ;;  %vm1786_vm0 = vmor %vm1784_vm6, %vm1785_vm1 }
 0xd27   :  { %v1831_v16 = vmul.f32 0.5, %v1830_v13  ;;  %v1780_v40 = vmul.f32 %v6160_v30, %v1779_v42  ;;  %v7967_v32 = vmul.f32 %v1827_v10, %v7817_v28  ;;  %vm10176_vm11 = vmmov %vm10174_vm9 }
 0xd28   :  { %v1791_v34 = vmul.f32 0.5, %v1790_v14  ;;  %v1864_v0 = vmul.f32 %v7656_v17, %v7964_v36  ;;  %vm10177_vm10 = vmmov %vm10174_vm9 }
 0xd29   :  { %v1832_v39 = vsub.f32 1.5, %v1831_v16  ;;  %v1781_v61 = vmul.f32 0.5, %v1780_v40  ;;  %v1869_v41 = vmul.f32 %v7656_v17, %v7967_v32  ;;  %vm10178_vm5 = vmmov %vm10174_vm9 }
 0xd2a   :  { %v1792_v29 = vsub.f32 1.5, %v1791_v34  ;;  %v1881_v28 = vadd.f32 %v7671_v53, %v1864_v0  ;;  %vm10179_vm4 = vmmov %vm10178_vm5 }
 0xd2b   :  { %v1833_v23 = vmul.f32 %v6156_v33, %v1832_v39  ;;  %v1782_v46 = vsub.f32 1.5, %v1781_v61  ;;  %v1978_v9 = vld.sshfl [vmem:[#allocation1] sm:$0xff pattern:$0x75316420]  ;;  %v7978_v50 = vadd.f32 %v7671_v53, %v1869_v41  ;;  %vm10180_vm2 = vmmov %vm10179_vm4 }
 0xd2c   :  { %5662 = vmatmul.msk.f32.vlgmr.msrb.gmra.mxu3 %vm10174_vm9, %v1978_v9  ;;  %v1793_v47 = vmul.f32 %v6158_v19, %v1792_v29  ;;  %vm10181_vm6 = vmmov %vm10180_vm2 }
 0xd2d   :  { %v1783_v13 = vmul.f32 %v6160_v30, %v1782_v46  ;;  %5677 = vmatmul.msk.f32.gmra.mxu1 %vm10175_vm14, %v7978_v50  ;;  %v1837_v42 = vsel %vm1836_vm3, %v6156_v33, %v1833_v23  ;;  %5672 = vmatmul.msk.f32.gmra.mxu0 %vm10176_vm11, %v1881_v28  ;;  %vm10182_vm1 = vmmov %vm10180_vm2 }
 0xd2e   :  { %v7993_v8 = vmul.f32 %v1837_v42, %v7835_v48  ;;  %v1797_v10 = vsel %vm1796_vm12, %v6158_v19, %v1793_v47  ;;  %v8008_v48 = vpop.f32.mrf.mxu0  ;;  %vm10183_vm3 = vmmov %vm10182_vm1 }
 0xd2f   :  { %v1787_v31 = vsel %vm1786_vm0, %v6160_v30, %v1783_v13  ;;  %v8005_v40 = vmul.f32 %v1797_v10, %v7822_v2  ;;  %vm10184_vm9 = vmmov %vm10182_vm1 }
 0xd30   :  { %v7996_v14 = vmul.f32 %v1787_v31, %v7837_v43  ;;  %v1870_v56 = vmul.f32 %v7656_v17, %v7993_v8  ;;  %vm10185_vm12 = vmmov %vm10182_vm1 }
 0xd31   :  { %v1866_v43 = vmul.f32 %v7656_v17, %v8005_v40  ;;  %vm10186_vm14 = vmmov %vm10182_vm1 }
 0xd32   :  { %v1865_v16 = vmul.f32 %v7656_v17, %v7996_v14  ;;  %v1887_v33 = vadd.f32 %v7671_v53, %v1870_v56  ;;  %vm10187_vm0 = vmmov %vm10182_vm1 }
 0xd33   :  { %v1883_v19 = vadd.f32 %v7671_v53, %v1866_v43  ;;  %vm10188_vm11 = vmmov %vm10187_vm0 }
 0xd34   :  { %v1882_v37 = vadd.f32 %v7671_v53, %v1865_v16 }
 0xd35   :  { %5678 = vmatmul.msk.f32.gmra.mxu1 %vm10177_vm10, %v1887_v33  ;;  %vm10189_vm10 = vmmov %vm10187_vm0 }
 0xd36   :  { %5673 = vmatmul.msk.f32.gmra.mxu0 %vm10178_vm5, %v1882_v37  ;;  %vm10190_vm5 = vmmov %vm10187_vm0 }
 0xd3d   :  { %5679 = vmatmul.msk.f32.vlgmr.msrb.gmra.mxu1 %vm10179_vm4, %v7676_v11  ;;  %vm10191_vm4 = vmmov %vm10187_vm0 }
 0xd3e   :  { %5674 = vmatmul.msk.f32.gmra.mxu0 %vm10180_vm2, %v1883_v19  ;;  %v8017_v30 = vpop.f32.mrf.mxu0  ;;  %vm10192_vm2 = vmmov %vm10187_vm0 }
 0xd45   :  { %5680 = vmatmul.msk.f32.gmra.mxu1 %vm10181_vm6, %v7694_v27  ;;  %vm10193_vm6 = vmmov %vm10187_vm0 }
 0xd46   :  { %v8021_v2 = vpop.f32.mrf.mxu0  ;;  %v8072_v17 = vpop.f32.mrf.mxu1 }
 0xd47   :  { %5695 = vmatpush.xpose.msk.msra.mxu3 %vm10182_vm1, %v8021_v2  ;;  %5713 = vmatpush.xpose.msk.msrb.mxu2 %vm10183_vm3, %v8021_v2  ;;  %vm10194_vm1 = vmmov %vm10187_vm0 }
 0xd48   :  { %vm10195_vm3 = vmmov %vm10187_vm0 }
 0xd4b   :  { %5696 = vmatpush.xpose.msk.msra.mxu3 %vm10184_vm9, %v8017_v30  ;;  %5714 = vmatpush.xpose.msk.msrb.mxu2 %vm10185_vm12, %v8017_v30  ;;  %vm10196_vm9 = vmmov %vm10187_vm0 }
 0xd4c   :  { %vm10197_vm12 = vmmov %vm10187_vm0 }
 0xd4d   :  { %5681 = vmatmul.msk.f32.gmra.mxu1 %vm10186_vm14, %v7706_v38  ;;  %vm10198_vm14 = vmmov %vm10187_vm0 }
 0xd4e   :  { %v8076_v53 = vpop.f32.mrf.mxu1 }
 0xd4f   :  { %5697 = vmatpush.xpose.msk.msra.mxu3 %vm10187_vm0, %v8008_v48  ;;  %5715 = vmatpush.xpose.msk.msrb.mxu2 %vm10188_vm11, %v8008_v48  ;;  %vm10199_vm11 = vmmov %vm10187_vm0 }
 0xd53   :  { %5698 = vmatpush.xpose.msk.msra.mxu3 %vm10189_vm10, %v7980_v52  ;;  %5716 = vmatpush.xpose.msk.msrb.mxu2 %vm10190_vm5, %v7980_v52  ;;  %vm10200_vm10 = vmmov %vm10187_vm0 }
 0xd54   :  { %vm10201_vm5 = vmmov %vm10187_vm0 }
 0xd55   :  { %5682 = vmatmul.msk.f32.gmra.mxu1 %vm10191_vm4, %v7717_v24  ;;  %vm10202_vm4 = vmmov %vm10187_vm0 }
 0xd57   :  { %5699 = vmatpush.xpose.msk.msra.mxu3 %vm10192_vm2, %v7950_v35  ;;  %5717 = vmatpush.xpose.msk.msrb.mxu2 %vm10193_vm6, %v7950_v35  ;;  %vm10203_vm2 = vmmov %vm10187_vm0 }
 0xd58   :  { %vm10204_vm6 = vmmov %vm10187_vm0 }
 0xd5b   :  { %5700 = vmatpush.xpose.msk.msra.mxu3 %vm10194_vm1, %v7924_v57  ;;  %5718 = vmatpush.xpose.msk.msrb.mxu2 %vm10195_vm3, %v7924_v57  ;;  %vm10205_vm1 = vmmov %vm10187_vm0 }
 0xd5c   :  { %vm10206_vm3 = vmmov %vm10187_vm0 }
 0xd5d   :  { %5683 = vmatmul.msk.f32.gmra.mxu1 %vm10196_vm9, %v7730_v58  ;;  %vm10207_vm9 = vmmov %vm10187_vm0 }
 0xd5f   :  { %5701 = vmatpush.xpose.msk.msra.mxu3 %vm10197_vm12, %v7900_v12  ;;  %5719 = vmatpush.xpose.msk.msrb.mxu2 %vm10198_vm14, %v7900_v12  ;;  %vm10208_vm12 = vmmov %vm10187_vm0  ;;  %vm1480_vm14 = vcmp.ge.s32.totalorder %v6801_v15, 8 }
 0xd63   :  { %5702 = vmatpush.xpose.msk.msra.mxu3 %vm10187_vm0, %v7890_v21  ;;  %5720 = vmatpush.xpose.msk.msrb.mxu2 %vm10199_vm11, %v7890_v21  ;;  %vm1481_vm0 = vcmp.lt.s32.totalorder %v6801_v15, 16  ;;  %vm1476_vm11 = vcmp.lt.s32.totalorder %v6801_v15, 8 }
 0xd64   :  { %v8092_v24 = vsel %vm1476_vm11, 1.0, %v6575_v5 }
 0xd65   :  { %5684 = vmatmul.msk.f32.gmra.mxu1 %vm10200_vm10, %v7749_v60  ;;  %vm1482_vm10 = vmand %vm1480_vm14, %vm1481_vm0 }
 0xd66   :  { %v8095_v58 = vsel %vm1482_vm10, 1.0, %v6575_v5  ;;  %vm10216_vm14 = vmmov %vm10205_vm1 }
 0xd67   :  { %vm10217_vm0 = vmmov %vm10205_vm1 }
 0xd68   :  { %vm10218_vm11 = vmmov %vm10217_vm0 }
 0xd69   :  { %vm10219_vm10 = vmmov %vm10217_vm0 }
 0xd6d   :  { %5685 = vmatmul.msk.f32.gmra.mxu1 %vm10201_vm5, %v7855_v7  ;;  %vm10209_vm5 = vmmov %vm10205_vm1 }
 0xd75   :  { %5686 = vmatmul.msk.f32.gmra.mxu1 %vm10202_vm4, %v7870_v62  ;;  %vm10210_vm4 = vmmov %vm10205_vm1 }
 0xd7d   :  { %5687 = vmatmul.msk.f32.gmra.mxu1 %vm10203_vm2, %v7958_v49  ;;  %vm10211_vm2 = vmmov %vm10205_vm1 }
 0xd85   :  { %5688 = vmatmul.msk.f32.gmra.mxu1 %vm10204_vm6, %v1881_v28  ;;  %vm10212_vm6 = vmmov %vm10205_vm1 }
 0xd8d   :  { %5689 = vmatmul.msk.f32.gmra.mxu1 %vm10205_vm1, %v1882_v37 }
 0xd95   :  { %5690 = vmatmul.msk.f32.gmra.mxu1 %vm10206_vm3, %v1883_v19  ;;  %vm10213_vm3 = vmmov %vm10205_vm1 }
 0xd9d   :  { %5691 = vmatmul.msk.f32.gmra.mxu1 %vm10207_vm9, %v7873_v63  ;;  %vm10214_vm9 = vmmov %vm10205_vm1 }
 0xda2   :  { %v8078_v11 = vpop.f32.mrf.mxu0 }
 0xda5   :  { %5692 = vmatmul.msk.f32.gmra.mxu1 %vm10208_vm12, %v7885_v45  ;;  %vm10215_vm12 = vmmov %vm10205_vm1 }
 0xdaa   :  { %v8084_v27 = vpop.f32.mrf.mxu1  ;;  %v8089_v38 = vpop.f32.mrf.mxu0 }
 0xdad   :  { %5693 = vmatmul.msk.f32.gmra.mxu1 %vm10209_vm5, %v7978_v50  ;;  %vm10220_vm5 = vmmov %vm10217_vm0 }
 0xdaf   :  { %v1998_v60 = vpop.f32.mrf.mxu3 }
 0xdb0   :  { %v8097_v7 = vmul.f32 0.35355338, %v1998_v60 }
 0xdb2   :  { %v8099_v62 = vpop.f32.mrf.mxu1  ;;  %v2183_v63 = vmul.f32 %v8092_v24, %v8097_v7  ;;  %v2318_v45 = vmul.f32 %v8095_v58, %v8097_v7  ;;  %v8133_v41 = vrot.slane %v8097_v7, 4 }
 0xdb3   :  { %5704 = vmatpush.xpose.msk.msrb.mxu3 %vm10210_vm4, %v8099_v62  ;;  %v8112_v49 = vpop.f32.mrf.mxu0  ;;  %vm10221_vm4 = vmmov %vm10217_vm0 }
 0xdb4   :  { %5703 = vmatmul.msk.f32.vlgmr.msra.gmra.mxu3 %vm10211_vm2, %v2183_v63  ;;  %5721 = vmatmul.msk.f32.vlgmr.msrb.gmra.mxu2 %vm10212_vm6, %v2318_v45  ;;  %v2184_v29 = vmul.f32 %v8092_v24, %v8133_v41  ;;  %vm10222_vm2 = vmmov %vm10217_vm0  ;;  %v2319_v50 = vmul.f32 %v8095_v58, %v8133_v41 }
 0xdb5   :  { %5694 = vmatmul.msk.f32.gmra.mxu1 %vm10205_vm1, %v1887_v33  ;;  %vm10223_vm6 = vmmov %vm10217_vm0 }
 0xdb6   :  { %vm10224_vm1 = vmmov %vm10217_vm0 }
 0xdb7   :  { %5705 = vmatpush.xpose.msk.msrb.mxu3 %vm10213_vm3, %v8084_v27  ;;  %vm10225_vm3 = vmmov %vm10217_vm0 }
 0xdba   :  { %v8114_v34 = vpop.f32.mrf.mxu1 }
 0xdbb   :  { %5706 = vmatpush.xpose.msk.msrb.mxu3 %vm10214_vm9, %v8076_v53  ;;  %v8120_v0 = vpop.f32.mrf.mxu0  ;;  %vm10226_vm9 = vmmov %vm10217_vm0 }
 0xdbf   :  { %5707 = vmatpush.xpose.msk.msrb.mxu3 %vm10215_vm12, %v8072_v17  ;;  %vm10227_vm12 = vmmov %vm10217_vm0 }
 0xdc2   :  { %v8122_v39 = vpop.f32.mrf.mxu1 }
 0xdc3   :  { %5708 = vmatpush.xpose.msk.msrb.mxu3 %vm10216_vm14, %v8120_v0  ;;  %vm1485_vm14 = vcmp.ge.s32.totalorder %v6801_v15, 16 }
 0xdc7   :  { %5709 = vmatpush.xpose.msk.msrb.mxu3 %vm10217_vm0, %v8112_v49  ;;  %vm1486_vm0 = vcmp.lt.s32.totalorder %v6801_v15, 24 }
 0xdca   :  { %v8128_v61 = vpop.f32.mrf.mxu1 }
 0xdcb   :  { %5710 = vmatpush.xpose.msk.msrb.mxu3 %vm10218_vm11, %v8089_v38  ;;  %vm10228_vm11 = vmmov %vm10224_vm1  ;;  %v2390_v45 = vmul.f32 %v8095_v58, %v8128_v61 }
 0xdcf   :  { %5711 = vmatpush.xpose.msk.msrb.mxu3 %vm10219_vm10, %v8078_v11  ;;  %vm1487_vm10 = vmand %vm1485_vm14, %vm1486_vm0 }
 0xdd0   :  { %v8166_v47 = vsel %vm1487_vm10, 1.0, %v6575_v5  ;;  %vm10232_vm14 = vmmov %vm10225_vm3 }
 0xdd1   :  { %vm10233_vm0 = vmmov %vm10225_vm3 }
 0xdd2   :  { %v8141_v28 = vpop.f32.mrf.mxu1  ;;  %5712 = vmatmul.msk.f32.vlgmr.msrb.gmra.mxu3 %vm10221_vm4, %v2184_v29  ;;  %vm1490_vm4 = vcmp.ge.s32.totalorder %v6801_v15, 24  ;;  %v2568_v29 = vmul.f32 %v8166_v47, %v8128_v61  ;;  %vm10235_vm10 = vmmov %vm10233_vm0 }
 0xdd3   :  { %5722 = vmatpush.xpose.msk.msra.mxu3 %vm10220_vm5, %v8099_v62  ;;  %vm10229_vm5 = vmmov %vm10224_vm1  ;;  %v2391_v60 = vmul.f32 %v8095_v58, %v8141_v28  ;;  %v2569_v63 = vmul.f32 %v8166_v47, %v8141_v28 }
 0xdd7   :  { %5723 = vmatpush.xpose.msk.msra.mxu3 %vm10222_vm2, %v8084_v27  ;;  %vm1491_vm2 = vcmp.lt.s32.totalorder %v6801_v15, 32  ;;  %v2389_v15 = vmul.f32 %v8095_v58, %v8122_v39 }
 0xdda   :  { %v8148_v23 = vpop.f32.mrf.mxu1 }
 0xddb   :  { %5724 = vmatpush.xpose.msk.msra.mxu3 %vm10223_vm6, %v8076_v53  ;;  %v2392_v37 = vmul.f32 %v8095_v58, %v8148_v23  ;;  %v2570_v43 = vmul.f32 %v8166_v47, %v8148_v23  ;;  %vm1492_vm6 = vmand %vm1490_vm4, %vm1491_vm2 }
 0xddc   :  { %vm10237_vm4 = vmmov %vm10233_vm0 }
 0xddd   :  { %vm10238_vm2 = vmmov %vm10233_vm0 }
 0xddf   :  { %5725 = vmatpush.xpose.msk.msra.mxu3 %vm10224_vm1, %v8072_v17  ;;  %vm2279_vm1 = vcmask 519168  }
 0xde2   :  { %v2150_v46 = vpop.f32.mrf.mxu1 }
 0xde3   :  { %5726 = vmatpush.xpose.msk.msra.mxu3 %vm10225_vm3, %v8120_v0  ;;  %v2393_v16 = vmul.f32 %v8095_v58, %v2150_v46  ;;  %v2571_v33 = vmul.f32 %v8166_v47, %v2150_v46 }
 0xde7   :  { %5727 = vmatpush.xpose.msk.msra.mxu3 %vm10226_vm9, %v8112_v49  ;;  %vm10230_vm9 = vmmov %vm10225_vm3 }
 0xdea   :  { %v2153_v9 = vpop.f32.mrf.mxu1 }
 0xdeb   :  { %5728 = vmatpush.xpose.msk.msra.mxu3 %vm10227_vm12, %v8089_v38  ;;  %v2394_v56 = vmul.f32 %v8095_v58, %v2153_v9  ;;  %v2572_v10 = vmul.f32 %v8166_v47, %v2153_v9  ;;  %vm10231_vm12 = vmmov %vm10225_vm3 }
 0xdef   :  { %5729 = vmatpush.xpose.msk.msra.mxu3 %vm10228_vm11, %v8078_v11  ;;  %vm10234_vm11 = vmmov %vm10233_vm0 }
 0xdf2   :  { %5730 = vmatmul.msk.f32.vlgmr.msra.gmra.mxu3 %vm10229_vm5, %v2319_v50  ;;  %v2156_v13 = vpop.f32.mrf.mxu1  ;;  %v2567_v50 = vmul.f32 %v8166_v47, %v8122_v39  ;;  %vm10236_vm5 = vmmov %vm10233_vm0 }
 0xdf3   :  { %v2395_v42 = vmul.f32 %v8095_v58, %v2156_v13  ;;  %v2573_v31 = vmul.f32 %v8166_v47, %v2156_v13 }
 0xdf5   :  { %2415 = vmatpush.msra.mxu2 %v2395_v42  ;;  %2593 = vmatpush.msrb.mxu0 %v2573_v31  ;;  %v8195_v42 = vsel %vm1492_vm6, 1.0, %v6575_v5  ;;  %v2388_v31 = vmul.f32 %v8095_v58, %v8114_v34  ;;  %v2308_v5 = vmul.f32 %v8092_v24, %v2153_v9  ;;  %vm10239_vm6 = vmmov %vm10233_vm0 }
 0xdf7   :  { %2416 = vmatpush.msra.mxu2 %v2394_v56  ;;  %2594 = vmatpush.msrb.mxu0 %v2572_v10  ;;  %v2566_v56 = vmul.f32 %v8166_v47, %v8114_v34 }
 0xdf9   :  { %2417 = vmatpush.msra.mxu2 %v2393_v16  ;;  %2595 = vmatpush.msrb.mxu0 %v2571_v33  ;;  %v2309_v16 = vmul.f32 %v8092_v24, %v2156_v13  ;;  %v2707_v33 = vmul.f32 %v8195_v42, %v2156_v13  ;;  %v2704_v13 = vmul.f32 %v8195_v42, %v8148_v23 }
 0xdfa   :  { %v8178_v19 = vpop.f32.mrf.mxu1 }
 0xdfb   :  { %2418 = vmatpush.msra.mxu2 %v2392_v37  ;;  %2596 = vmatpush.msrb.mxu0 %v2570_v43  ;;  %v2706_v37 = vmul.f32 %v8195_v42, %v2153_v9  ;;  %v2307_v43 = vmul.f32 %v8092_v24, %v2150_v46  ;;  %v2305_v9 = vmul.f32 %v8092_v24, %v8141_v28 }
 0xdfd   :  { %2419 = vmatpush.msra.mxu2 %v2391_v60  ;;  %2597 = vmatpush.msrb.mxu0 %v2569_v63  ;;  %v2705_v60 = vmul.f32 %v8195_v42, %v2150_v46  ;;  %v2306_v63 = vmul.f32 %v8092_v24, %v8148_v23  ;;  %v2304_v46 = vmul.f32 %v8092_v24, %v8128_v61 }
 0xdfe   :  { %v2303_v23 = vmul.f32 %v8092_v24, %v8122_v39 }
 0xdff   :  { %2420 = vmatpush.msra.mxu2 %v2390_v45  ;;  %2598 = vmatpush.msrb.mxu0 %v2568_v29  ;;  %v2703_v29 = vmul.f32 %v8195_v42, %v8141_v28  ;;  %v2302_v28 = vmul.f32 %v8092_v24, %v8114_v34 }
 0xe01   :  { %2421 = vmatpush.msra.mxu2 %v2389_v15  ;;  %2599 = vmatpush.msrb.mxu0 %v2567_v50  ;;  %v2702_v15 = vmul.f32 %v8195_v42, %v8128_v61  ;;  %v2701_v50 = vmul.f32 %v8195_v42, %v8122_v39 }
 0xe02   :  { %v8201_v10 = vpop.f32.mrf.mxu1 }
 0xe03   :  { %2422 = vmatpush.msra.mxu2 %v2388_v31  ;;  %2600 = vmatpush.msrb.mxu0 %v2566_v56  ;;  %v2700_v31 = vmul.f32 %v8195_v42, %v8114_v34 }
 0xe05   :  { %2461 = vmatpush.msrb.mxu2 %v2309_v16  ;;  %2727 = vmatpush.msra.mxu0 %v2707_v33 }
 0xe07   :  { %2462 = vmatpush.msrb.mxu2 %v2308_v5  ;;  %2728 = vmatpush.msra.mxu0 %v2706_v37 }
 0xe09   :  { %2463 = vmatpush.msrb.mxu2 %v2307_v43  ;;  %2729 = vmatpush.msra.mxu0 %v2705_v60 }
 0xe0a   :  { %v8213_v45 = vpop.f32.mrf.mxu1 }
 0xe0b   :  { %2464 = vmatpush.msrb.mxu2 %v2306_v63  ;;  %2730 = vmatpush.msra.mxu0 %v2704_v13 }
 0xe0d   :  { %2465 = vmatpush.msrb.mxu2 %v2305_v9  ;;  %2731 = vmatpush.msra.mxu0 %v2703_v29 }
 0xe0f   :  { %2466 = vmatpush.msrb.mxu2 %v2304_v46  ;;  %2732 = vmatpush.msra.mxu0 %v2702_v15 }
 0xe11   :  { %2467 = vmatpush.msrb.mxu2 %v2303_v23  ;;  %2733 = vmatpush.msra.mxu0 %v2701_v50 }
 0xe12   :  { %v8231_v56 = vpop.f32.mrf.mxu1 }
 0xe13   :  { %2468 = vmatpush.msrb.mxu2 %v2302_v28  ;;  %2734 = vmatpush.msra.mxu0 %v2700_v31  ;;  %v2399_v50 = vmul.f32 %v8095_v58, %v8231_v56  ;;  %v2577_v28 = vmul.f32 %v8166_v47, %v8231_v56  ;;  %v2398_v31 = vmul.f32 %v8095_v58, %v8213_v45 }
 0xe1a   :  { %v2171_v61 = vpop.f32.mrf.mxu1 }
 0xe1b   :  { %v2400_v15 = vmul.f32 %v8095_v58, %v2171_v61  ;;  %v2578_v23 = vmul.f32 %v8166_v47, %v2171_v61 }
 0xe22   :  { %v2174_v16 = vpop.f32.mrf.mxu1 }
 0xe23   :  { %v2401_v13 = vmul.f32 %v8095_v58, %v2174_v16  ;;  %v2579_v9 = vmul.f32 %v8166_v47, %v2174_v16 }
 0xe2a   :  { %v2177_v33 = vpop.f32.mrf.mxu1 }
 0xe2b   :  { %v2402_v43 = vmul.f32 %v8095_v58, %v2177_v33  ;;  %v2580_v60 = vmul.f32 %v8166_v47, %v2177_v33 }
 0xe32   :  { %v2180_v5 = vpop.f32.mrf.mxu1 }
 0xe33   :  { %v2403_v37 = vmul.f32 %v8095_v58, %v2180_v5  ;;  %v2581_v39 = vmul.f32 %v8166_v47, %v2180_v5 }
 0xe35   :  { %2438 = vmatpush.msrb.mxu3 %v2403_v37  ;;  %2616 = vmatpush.msra.mxu1 %v2581_v39  ;;  %v2576_v37 = vmul.f32 %v8166_v47, %v8213_v45  ;;  %v2397_v39 = vmul.f32 %v8095_v58, %v8201_v10 }
 0xe37   :  { %2439 = vmatpush.msrb.mxu3 %v2402_v43  ;;  %2617 = vmatpush.msra.mxu1 %v2580_v60  ;;  %v8237_v34 = vpop.f32.mrf.mxu3  ;;  %v8239_v63 = vpop.f32.mrf.mxu2  ;;  %v2575_v43 = vmul.f32 %v8166_v47, %v8201_v10  ;;  %v2396_v60 = vmul.f32 %v8095_v58, %v8178_v19 }
 0xe38   :  { %v2366_v29 = vsel %vm2279_vm1, %v8239_v63, -inf  ;;  %v2280_v46 = vsel %vm2279_vm1, %v8237_v34, -inf }
 0xe39   :  { %2440 = vmatpush.msrb.mxu3 %v2401_v13  ;;  %2618 = vmatpush.msra.mxu1 %v2579_v9  ;;  %v2574_v13 = vmul.f32 %v8166_v47, %v8178_v19  ;;  %v2317_v9 = vmul.f32 %v8092_v24, %v2180_v5 }
 0xe3a   :  { %2367 = vmax.xlane.f32.xlu0 %v2366_v29  ;;  %2281 = vmax.xlane.f32.xlu1 %v2280_v46  ;;  %v2715_v29 = vmul.f32 %v8195_v42, %v2180_v5  ;;  %v2316_v46 = vmul.f32 %v8092_v24, %v2177_v33  ;;  %v2712_v5 = vmul.f32 %v8195_v42, %v2171_v61 }
 0xe3b   :  { %2441 = vmatpush.msrb.mxu3 %v2400_v15  ;;  %2619 = vmatpush.msra.mxu1 %v2578_v23  ;;  %v2714_v15 = vmul.f32 %v8195_v42, %v2177_v33  ;;  %v2315_v23 = vmul.f32 %v8092_v24, %v2174_v16  ;;  %v2711_v33 = vmul.f32 %v8195_v42, %v8231_v56 }
 0xe3d   :  { %2442 = vmatpush.msrb.mxu3 %v2399_v50  ;;  %2620 = vmatpush.msra.mxu1 %v2577_v28  ;;  %v2713_v50 = vmul.f32 %v8195_v42, %v2174_v16  ;;  %v2314_v28 = vmul.f32 %v8092_v24, %v2171_v61  ;;  %v2710_v16 = vmul.f32 %v8195_v42, %v8213_v45 }
 0xe3e   :  { %v2311_v61 = vmul.f32 %v8092_v24, %v8201_v10 }
 0xe3f   :  { %2443 = vmatpush.msrb.mxu3 %v2398_v31  ;;  %2621 = vmatpush.msra.mxu1 %v2576_v37  ;;  %v2313_v31 = vmul.f32 %v8092_v24, %v8231_v56  ;;  %v2312_v37 = vmul.f32 %v8092_v24, %v8213_v45  ;;  %v2310_v56 = vmul.f32 %v8092_v24, %v8178_v19 }
 0xe41   :  { %2444 = vmatpush.msrb.mxu3 %v2397_v39  ;;  %2622 = vmatpush.msra.mxu1 %v2575_v43  ;;  %v2709_v39 = vmul.f32 %v8195_v42, %v8201_v10  ;;  %v2708_v43 = vmul.f32 %v8195_v42, %v8178_v19 }
 0xe43   :  { %2445 = vmatpush.msrb.mxu3 %v2396_v60  ;;  %2623 = vmatpush.msra.mxu1 %v2574_v13 }
 0xe45   :  { %2484 = vmatpush.msra.mxu3 %v2317_v9  ;;  %2750 = vmatpush.msrb.mxu1 %v2715_v29 }
 0xe47   :  { %2485 = vmatpush.msra.mxu3 %v2316_v46  ;;  %2751 = vmatpush.msrb.mxu1 %v2714_v15 }
 0xe49   :  { %2486 = vmatpush.msra.mxu3 %v2315_v23  ;;  %2752 = vmatpush.msrb.mxu1 %v2713_v50 }
 0xe4b   :  { %2487 = vmatpush.msra.mxu3 %v2314_v28  ;;  %2753 = vmatpush.msrb.mxu1 %v2712_v5 }
 0xe4d   :  { %2488 = vmatpush.msra.mxu3 %v2313_v31  ;;  %2754 = vmatpush.msrb.mxu1 %v2711_v33 }
 0xe4f   :  { %2489 = vmatpush.msra.mxu3 %v2312_v37  ;;  %2755 = vmatpush.msrb.mxu1 %v2710_v16 }
 0xe51   :  { %2490 = vmatpush.msra.mxu3 %v2311_v61  ;;  %2756 = vmatpush.msrb.mxu1 %v2709_v39 }
 0xe53   :  { %2491 = vmatpush.msra.mxu3 %v2310_v56  ;;  %2757 = vmatpush.msrb.mxu1 %v2708_v43 }
 0xe55   :  { %v2276_v60 = vpop.f32.mrf.mxu3 }
 0xe56   :  { %v2283_v45 = vsel %vm2279_vm1, %v2276_v60, -inf }
 0xe57   :  { %2284 = vmax.xlane.f32.xlu0 %v2283_v45 }
 0xe75   :  { %v2363_v13 = vpop.f32.mrf.mxu3 }
 0xe76   :  { %v2369_v9 = vsel %vm2279_vm1, %v2363_v13, -inf }
 0xe77   :  { %2370 = vmax.xlane.f32.xlu2 %v2369_v9 }
 0xead   :  { %v2368_v29 = vpop.xlane.xlu0 %2367  ;;  %v2282_v10 = vpop.xlane.xlu1 %2281 }
 0xeae   :  { %v2372_v46 = vsub.f32 %v8239_v63, %v2368_v29  ;;  %v2286_v15 = vsub.f32 %v8237_v34, %v2282_v10 }
 0xeb0   :  { %v2374_v23 = vmul.f32 1.442695, %v2372_v46  ;;  %v2288_v50 = vmul.f32 1.442695, %v2286_v15  ;;  %v2496_v15 = vmul.f32 %v8166_v47, %v8097_v7 }
 0xeb2   :  { %6161 = vpow2.f32 %v2374_v23 }
 0xeb3   :  { %6163 = vpow2.f32 %v2288_v50 }
 0xeb8   :  { %v6162_v19 = vpop.eup %6161 }
 0xeb9   :  { %v6164_v28 = vpop.eup %6163  ;;  %v2378_v5 = vsel %vm2279_vm1, %v6162_v19, 0.0 }
 0xeba   :  { %2379 = vadd.xlane.f32.xlu2 %v2378_v5  ;;  %v2292_v31 = vsel %vm2279_vm1, %v6164_v28, 0.0 }
 0xebb   :  { %2293 = vadd.xlane.f32.xlu0 %v2292_v31 }
 0xeca   :  { %v2285_v33 = vpop.xlane.xlu0 %2284 }
 0xecb   :  { %v2287_v37 = vsub.f32 %v2276_v60, %v2285_v33 }
 0xecd   :  { %v2290_v16 = vmul.f32 1.442695, %v2287_v37 }
 0xecf   :  { %6165 = vpow2.f32 %v2290_v16 }
 0xed5   :  { %v6166_v61 = vpop.eup %6165 }
 0xed6   :  { %v2295_v63 = vsel %vm2279_vm1, %v6166_v61, 0.0 }
 0xed7   :  { %2296 = vadd.xlane.f32.xlu2 %v2295_v63 }
 0xeea   :  { %v2371_v34 = vpop.xlane.xlu2 %2370 }
 0xeeb   :  { %v2373_v39 = vsub.f32 %v2363_v13, %v2371_v34 }
 0xeed   :  { %v2376_v56 = vmul.f32 1.442695, %v2373_v39 }
 0xeef   :  { %6167 = vpow2.f32 %v2376_v56 }
 0xef5   :  { %v6168_v43 = vpop.eup %6167 }
 0xef6   :  { %v2381_v45 = vsel %vm2279_vm1, %v6168_v43, 0.0 }
 0xef7   :  { %2382 = vadd.xlane.f32.xlu1 %v2381_v45 }
 0xf2d   :  { %v2380_v9 = vpop.xlane.xlu2 %2379 }
 0xf2e   :  { %6169 = vrcp.f32 %v2380_v9  ;;  %v2294_v29 = vpop.xlane.xlu0 %2293 }
 0xf2f   :  { %6171 = vrcp.f32 %v2294_v29 }
 0xf34   :  { %v6170_v10 = vpop.eup %6169 }
 0xf35   :  { %v2386_v60 = vmul.f32 %v6170_v10, %v6162_v19  ;;  %v6172_v46 = vpop.eup %6171 }
 0xf36   :  { %v2300_v13 = vmul.f32 %v6172_v46, %v6164_v28 }
 0xf37   :  { %5731 = vmatmul.msk.f32.vlgmr.msra.gmra.mxu2 %vm1129_vm15, %v2386_v60 }
 0xf38   :  { %5735 = vmatpush.xpose.msk.msra.mxu2 %vm10225_vm3, %v8021_v2  ;;  %vm10240_vm3 = vmmov %vm10233_vm0 }
 0xf3c   :  { %5736 = vmatpush.xpose.msk.msra.mxu2 %vm10230_vm9, %v8017_v30  ;;  %vm10241_vm9 = vmmov %vm10233_vm0 }
 0xf3f   :  { %5733 = vmatmul.msk.f32.vlgmr.msrb.gmra.mxu2 %vm1129_vm15, %v2300_v13 }
 0xf40   :  { %5737 = vmatpush.xpose.msk.msra.mxu2 %vm10231_vm12, %v8008_v48  ;;  %vm10242_vm12 = vmmov %vm10233_vm0 }
 0xf44   :  { %5738 = vmatpush.xpose.msk.msra.mxu2 %vm10232_vm14, %v7980_v52  ;;  %vm10243_vm14 = vmmov %vm10233_vm0 }
 0xf48   :  { %5739 = vmatpush.xpose.msk.msra.mxu2 %vm10233_vm0, %v7950_v35 }
 0xf4c   :  { %5740 = vmatpush.xpose.msk.msra.mxu2 %vm10234_vm11, %v7924_v57  ;;  %vm10244_vm11 = vmmov %vm10233_vm0 }
 0xf50   :  { %5741 = vmatpush.xpose.msk.msra.mxu2 %vm10235_vm10, %v7900_v12  ;;  %vm10245_vm10 = vmmov %vm10233_vm0 }
 0xf54   :  { %5742 = vmatpush.xpose.msk.msra.mxu2 %vm10236_vm5, %v7890_v21  ;;  %vm10246_vm5 = vmmov %vm10233_vm0 }
 0xf57   :  { %5743 = vmatmul.msk.f32.vlgmr.msra.gmra.mxu2 %vm10238_vm2, %v2496_v15  ;;  %vm10248_vm2 = vmmov %vm10233_vm0 }
 0xf58   :  { %5755 = vmatpush.xpose.msk.msrb.mxu2 %vm10237_vm4, %v8021_v2  ;;  %v2297_v2 = vpop.xlane.xlu2 %2296  ;;  %vm10247_vm4 = vmmov %vm10233_vm0 }
 0xf5c   :  { %5756 = vmatpush.xpose.msk.msrb.mxu2 %vm10239_vm6, %v8017_v30  ;;  %vm10249_vm6 = vmmov %vm10233_vm0 }
 0xf60   :  { %5757 = vmatpush.xpose.msk.msrb.mxu2 %vm10240_vm3, %v8008_v48  ;;  %vm10250_vm3 = vmmov %vm10233_vm0 }
 0xf64   :  { %5758 = vmatpush.xpose.msk.msrb.mxu2 %vm10241_vm9, %v7980_v52  ;;  %vm10251_vm9 = vmmov %vm10233_vm0 }
 0xf68   :  { %5759 = vmatpush.xpose.msk.msrb.mxu2 %vm10242_vm12, %v7950_v35  ;;  %v2630_v35 = vmul.f32 %v8195_v42, %v8097_v7  ;;  %vm10252_vm12 = vmmov %vm10233_vm0 }
 0xf6a   :  { %v2383_v23 = vpop.xlane.xlu1 %2382 }
 0xf6b   :  { %6173 = vrcp.f32 %v2383_v23 }
 0xf6c   :  { %5760 = vmatpush.xpose.msk.msrb.mxu2 %vm10243_vm14, %v7924_v57  ;;  %6175 = vrcp.f32 %v2297_v2  ;;  %vm10253_vm14 = vmmov %vm10233_vm0  ;;  %v2631_v57 = vmul.f32 %v8195_v42, %v8133_v41 }
 0xf70   :  { %5761 = vmatpush.xpose.msk.msrb.mxu2 %vm10233_vm0, %v7900_v12 }
 0xf71   :  { %v6174_v50 = vpop.eup %6173 }
 0xf72   :  { %v2387_v30 = vmul.f32 %v6174_v50, %v6168_v43  ;;  %v6176_v52 = vpop.eup %6175 }
 0xf73   :  { %v2301_v12 = vmul.f32 %v6176_v52, %v6166_v61 }
 0xf74   :  { %5762 = vmatpush.xpose.msk.msrb.mxu2 %vm10244_vm11, %v7890_v21  ;;  %5732 = vmatmul.msk.f32.vlgmr.msrb.gmra.mxu3 %vm1129_vm15, %v2387_v30  ;;  %v2497_v21 = vmul.f32 %v8166_v47, %v8133_v41  ;;  %vm10254_vm11 = vmmov %vm10233_vm0 }
 0xf75   :  { %5744 = vmatpush.xpose.msk.msrb.mxu3 %vm10245_vm10, %v8099_v62  ;;  %vm10255_vm10 = vmmov %vm10233_vm0 }
 0xf77   :  { %5763 = vmatmul.msk.f32.vlgmr.msrb.gmra.mxu2 %vm10246_vm5, %v2630_v35  ;;  %vm10256_vm5 = vmmov %vm10233_vm0 }
 0xf79   :  { %5745 = vmatpush.xpose.msk.msrb.mxu3 %vm10247_vm4, %v8084_v27  ;;  %vm10257_vm4 = vmmov %vm10233_vm0 }
 0xf7c   :  { %5734 = vmatmul.msk.f32.vlgmr.msra.gmra.mxu3 %vm1129_vm15, %v2301_v12 }
 0xf7d   :  { %5746 = vmatpush.xpose.msk.msrb.mxu3 %vm10248_vm2, %v8076_v53  ;;  %vm10258_vm2 = vmmov %vm10233_vm0 }
 0xf81   :  { %5747 = vmatpush.xpose.msk.msrb.mxu3 %vm10249_vm6, %v8072_v17  ;;  %vm10259_vm6 = vmmov %vm10233_vm0 }
 0xf85   :  { %5748 = vmatpush.xpose.msk.msrb.mxu3 %vm10250_vm3, %v8120_v0  ;;  %vm10260_vm3 = vmmov %vm10233_vm0 }
 0xf89   :  { %5749 = vmatpush.xpose.msk.msrb.mxu3 %vm10251_vm9, %v8112_v49  ;;  %vm10261_vm9 = vmmov %vm10233_vm0 }
 0xf8d   :  { %5750 = vmatpush.xpose.msk.msrb.mxu3 %vm10252_vm12, %v8089_v38  ;;  %vm10262_vm12 = vmmov %vm10233_vm0 }
 0xf91   :  { %5751 = vmatpush.xpose.msk.msrb.mxu3 %vm10253_vm14, %v8078_v11  ;;  %vm10264_vm14 = vmmov %vm10233_vm0 }
 0xf94   :  { %5752 = vmatmul.msk.f32.vlgmr.msrb.gmra.mxu3 %vm10254_vm11, %v2497_v21  ;;  %vm10266_vm11 = vmmov %vm10233_vm0 }
 0xf95   :  { %5764 = vmatpush.xpose.msk.msra.mxu3 %vm10233_vm0, %v8099_v62 }
 0xf99   :  { %5765 = vmatpush.xpose.msk.msra.mxu3 %vm10255_vm10, %v8084_v27  ;;  %vm10267_vm10 = vmmov %vm10233_vm0 }
 0xf9d   :  { %5766 = vmatpush.xpose.msk.msra.mxu3 %vm10256_vm5, %v8076_v53  ;;  %vm10268_vm5 = vmmov %vm10233_vm0 }
 0xfa1   :  { %5767 = vmatpush.xpose.msk.msra.mxu3 %vm10257_vm4, %v8072_v17  ;;  %vm10269_vm4 = vmmov %vm10233_vm0 }
 0xfa5   :  { %5768 = vmatpush.xpose.msk.msra.mxu3 %vm10258_vm2, %v8120_v0  ;;  %vm10270_vm2 = vmmov %vm10233_vm0 }
 0xfa9   :  { %5769 = vmatpush.xpose.msk.msra.mxu3 %vm10259_vm6, %v8112_v49  ;;  %vm10271_vm6 = vmmov %vm10233_vm0 }
 0xfad   :  { %5770 = vmatpush.xpose.msk.msra.mxu3 %vm10260_vm3, %v8089_v38  ;;  %vm10272_vm3 = vmmov %vm10233_vm0 }
 0xfb1   :  { %5771 = vmatpush.xpose.msk.msra.mxu3 %vm10261_vm9, %v8078_v11  ;;  %vm10273_vm9 = vmmov %vm10233_vm0 }
 0xfb4   :  { %5772 = vmatmul.msk.f32.vlgmr.msra.gmra.mxu3 %vm10262_vm12, %v2631_v57  ;;  %vm10274_vm12 = vmmov %vm10233_vm0 }
 0xfba   :  { %v8377_v48 = vpop.f32.mrf.mxu2 }
 0xfc2   :  { %v8379_v17 = vpop.f32.mrf.mxu2 }
 0xfda   :  { %v2518_v53 = vpop.f32.mrf.mxu2 }
 0xfdb   :  { %v2544_v27 = vsel %vm2279_vm1, %v2518_v53, -inf }
 0xfdc   :  { %2545 = vmax.xlane.f32.xlu1 %v2544_v27  ;;  %v104_v27 = vld [vmem:[#allocation2 + $0xf0] sm:$0xff] }
 0xff7   :  { %v8383_v38 = vpop.f32.mrf.mxu3 }
 0xffa   :  { %v2652_v7 = vpop.f32.mrf.mxu2 }
 0xffb   :  { %v2678_v62 = vsel %vm2279_vm1, %v2652_v7, -inf }
 0xffc   :  { %2679 = vmax.xlane.f32.xlu2 %v2678_v62  ;;  %v102_v62 = vld [vmem:[#allocation2 + $0xe0] sm:$0xff] }
 0xfff   :  { %v8385_v11 = vpop.f32.mrf.mxu3 }
0x1017   :  { %v2541_v49 = vpop.f32.mrf.mxu3 }
0x1018   :  { %v2547_v0 = vsel %vm2279_vm1, %v2541_v49, -inf }
0x1019   :  { %2548 = vmax.xlane.f32.xlu0 %v2547_v0 }
0x1037   :  { %v2675_v41 = vpop.f32.mrf.mxu3 }
0x1038   :  { %v2681_v19 = vsel %vm2279_vm1, %v2675_v41, -inf }
0x1039   :  { %2682 = vmax.xlane.f32.xlu1 %v2681_v19 }
0x104f   :  { %v2546_v28 = vpop.xlane.xlu1 %2545 }
0x1050   :  { %v2550_v5 = vsub.f32 %v2518_v53, %v2546_v28  ;;  %v105_v53 = vld [vmem:[#allocation2 + $0xf8] sm:$0xff] }
0x1052   :  { %v2552_v31 = vmul.f32 1.442695, %v2550_v5 }
0x1054   :  { %6177 = vpow2.f32 %v2552_v31 }
0x105a   :  { %v6178_v33 = vpop.eup %6177 }
0x105b   :  { %v2556_v37 = vsel %vm2279_vm1, %v6178_v33, 0.0 }
0x105c   :  { %2557 = vadd.xlane.f32.xlu0 %v2556_v37 }
0x106f   :  { %v2680_v16 = vpop.xlane.xlu2 %2679 }
0x1070   :  { %v2684_v61 = vsub.f32 %v2652_v7, %v2680_v16  ;;  %v103_v7 = vld [vmem:[#allocation2 + $0xe8] sm:$0xff] }
0x1072   :  { %v2686_v63 = vmul.f32 1.442695, %v2684_v61 }
0x1074   :  { %6179 = vpow2.f32 %v2686_v63 }
0x107a   :  { %v6180_v34 = vpop.eup %6179 }
0x107b   :  { %v2690_v39 = vsel %vm2279_vm1, %v6180_v34, 0.0 }
0x107c   :  { %2691 = vadd.xlane.f32.xlu1 %v2690_v39 }
0x108c   :  { %v2549_v56 = vpop.xlane.xlu0 %2548 }
0x108d   :  { %v2551_v43 = vsub.f32 %v2541_v49, %v2549_v56 }
0x108f   :  { %v2554_v45 = vmul.f32 1.442695, %v2551_v43 }
0x1091   :  { %6181 = vpow2.f32 %v2554_v45 }
0x1097   :  { %v6182_v9 = vpop.eup %6181 }
0x1098   :  { %v2559_v29 = vsel %vm2279_vm1, %v6182_v9, 0.0 }
0x1099   :  { %2560 = vadd.xlane.f32.xlu2 %v2559_v29 }
0x10ac   :  { %v2683_v10 = vpop.xlane.xlu1 %2682 }
0x10ad   :  { %v2685_v60 = vsub.f32 %v2675_v41, %v2683_v10  ;;  %v8399_v41 = vld [vmem:[%s10067_s4] sm:$0xff] }
0x10ae   :  { %v8402_v19 = vperm.slane %v8399_v41, 4  ;;  %v8406_v5 = vperm.slane %v8399_v41, 5 }
0x10af   :  { %v2688_v46 = vmul.f32 1.442695, %v2685_v60 }
0x10b0   :  { %v1889_v31 = vmul.f32 %v8402_v19, %v7659_v3  ;;  %v1890_v37 = vmul.f32 %v8402_v19, %v7688_v26  ;;  %v1891_v61 = vmul.f32 %v8402_v19, %v7701_v44  ;;  %v1892_v3 = vmul.f32 %v8402_v19, %v7712_v18 }
0x10b1   :  { %6183 = vpow2.f32 %v2688_v46  ;;  %v1893_v26 = vmul.f32 %v8402_v19, %v7722_v20  ;;  %v1894_v44 = vmul.f32 %v8402_v19, %v7737_v1  ;;  %v1895_v18 = vmul.f32 %v8402_v19, %v7850_v54 }
0x10b2   :  { %v1907_v16 = vadd.f32 %v8406_v5, %v1890_v37  ;;  %v1908_v63 = vadd.f32 %v8406_v5, %v1891_v61  ;;  %v1896_v20 = vmul.f32 %v8402_v19, %v7858_v51  ;;  %v2471_v1 = vadd.f32 %v8379_v17, %v8377_v48 }
0x10b3   :  { %v1910_v39 = vadd.f32 %v8406_v5, %v1893_v26  ;;  %v1911_v56 = vadd.f32 %v8406_v5, %v1894_v44  ;;  %v1912_v43 = vadd.f32 %v8406_v5, %v1895_v18  ;;  %v1897_v10 = vmul.f32 %v8402_v19, %v7947_v55  ;;  %v109_v18 = vld [vmem:[#allocation2 + $0x110] sm:$0xff] }
0x10b4   :  { %v1898_v51 = vmul.f32 %v8402_v19, %v7964_v36  ;;  %v1899_v48 = vmul.f32 %v8402_v19, %v7996_v14  ;;  %v1900_v55 = vmul.f32 %v8402_v19, %v8005_v40  ;;  %v99_v36 = vld [vmem:[#allocation2 + $0xd0] sm:$0xff]  ;;  %v1902_v40 = vmul.f32 %v8402_v19, %v7876_v6 }
0x10b5   :  { %v1914_v46 = vadd.f32 %v8406_v5, %v1897_v10  ;;  %v107_v10 = vld [vmem:[#allocation2 + $0x100] sm:$0xff] }
0x10b6   :  { %v1916_v17 = vadd.f32 %v8406_v5, %v1899_v48 }
0x10b7   :  { %v6184_v13 = vpop.eup %6183 }
0x10b8   :  { %v2693_v15 = vsel %vm2279_vm1, %v6184_v13, 0.0  ;;  %vm10263_vm1 = vmmov %vm10233_vm0 }
0x10b9   :  { %2694 = vadd.xlane.f32.xlu0 %v2693_v15  ;;  %v1917_v15 = vadd.f32 %v8406_v5, %v1900_v55 }
0x10cf   :  { %v2558_v23 = vpop.xlane.xlu0 %2557 }
0x10d0   :  { %6185 = vrcp.f32 %v2558_v23  ;;  %v100_v23 = vld [vmem:[#allocation2 + $0xd8] sm:$0xff] }
0x10d6   :  { %v6186_v2 = vpop.eup %6185 }
0x10d7   :  { %v2564_v50 = vmul.f32 %v6186_v2, %v6178_v33  ;;  %v1906_v33 = vadd.f32 %v8406_v5, %v1889_v31  ;;  %v1901_v2 = vmul.f32 %v8402_v19, %v7863_v25 }
0x10d9   :  { %5753 = vmatmul.msk.f32.vlgmr.msrb.gmra.mxu0 %vm1129_vm15, %v2564_v50  ;;  %v98_v50 = vld [vmem:[#allocation2 + $0xc8] sm:$0xff]  ;;  %v1918_v14 = vadd.f32 %v8406_v5, %v1901_v2 }
0x10da   :  { %2785 = vmatpush.msrb.mxu0 %v100_v23 }
0x10dc   :  { %2786 = vmatpush.msrb.mxu0 %v99_v36 }
0x10de   :  { %2787 = vmatpush.msrb.mxu0 %v98_v50 }
0x10ef   :  { %v2692_v30 = vpop.xlane.xlu1 %2691 }
0x10f0   :  { %6187 = vrcp.f32 %v2692_v30  ;;  %v97_v30 = vld [vmem:[#allocation2 + $0xc0] sm:$0xff] }
0x10f1   :  { %2788 = vmatpush.msrb.mxu0 %v97_v30 }
0x10f6   :  { %v6188_v35 = vpop.eup %6187 }
0x10f7   :  { %v2698_v52 = vmul.f32 %v6188_v35, %v6180_v34  ;;  %v1909_v34 = vadd.f32 %v8406_v5, %v1892_v3  ;;  %v1919_v35 = vadd.f32 %v8406_v5, %v1902_v40 }
0x10f9   :  { %5773 = vmatmul.msk.f32.vlgmr.msra.gmra.mxu0 %vm1129_vm15, %v2698_v52  ;;  %v1903_v52 = vmul.f32 %v8402_v19, %v7967_v32 }
0x110c   :  { %v2561_v12 = vpop.xlane.xlu2 %2560 }
0x110d   :  { %6189 = vrcp.f32 %v2561_v12  ;;  %v1920_v12 = vadd.f32 %v8406_v5, %v1903_v52 }
0x1113   :  { %v6190_v21 = vpop.eup %6189 }
0x1114   :  { %v2565_v57 = vmul.f32 %v6190_v21, %v6182_v9  ;;  %v1913_v9 = vadd.f32 %v8406_v5, %v1896_v20  ;;  %v2494_v21 = vadd.f32 %v8385_v11, %v8383_v38 }
0x1116   :  { %5754 = vmatmul.msk.f32.vlgmr.msra.gmra.mxu1 %vm1129_vm15, %v2565_v57  ;;  %v1904_v57 = vmul.f32 %v8402_v19, %v7993_v8 }
0x1117   :  { %2911 = vmatpush.msra.mxu1 %v105_v53 }
0x1119   :  { %2912 = vmatpush.msra.mxu1 %v104_v27 }
0x111b   :  { %2913 = vmatpush.msra.mxu1 %v103_v7  ;;  %v1921_v7 = vadd.f32 %v8406_v5, %v1904_v57 }
0x111d   :  { %2914 = vmatpush.msra.mxu1 %v102_v62  ;;  %v6502_v62 = vld [vmem:[%s10067_s4 + $0x8] sm:$0xff] }
0x111e   :  { %v2796_v38 = vperm.slane %v6502_v62, 6 }
0x112c   :  { %v2695_v49 = vpop.xlane.xlu0 %2694 }
0x112d   :  { %6191 = vrcp.f32 %v2695_v49  ;;  %v2764_v49 = vperm.slane %v6502_v62, 3 }
0x1133   :  { %v6192_v0 = vpop.eup %6191 }
0x1134   :  { %v2699_v28 = vmul.f32 %v6192_v0, %v6184_v13  ;;  %v1915_v13 = vadd.f32 %v8406_v5, %v1898_v51  ;;  %v113_v51 = vld [vmem:[#allocation2 + $0x128] sm:$0xff] }
0x1136   :  { %5774 = vmatmul.msk.f32.vlgmr.msrb.gmra.mxu1 %vm1129_vm15, %v2699_v28  ;;  %vm10265_vm15 = vmmov %vm10233_vm0 }
0x113e   :  { %5776 = vmatmul.msk.f32.vlgmr.msra.gmra.mxu1 %vm10263_vm1, %v1906_v33  ;;  %vm10275_vm1 = vmmov %vm10233_vm0 }
0x1146   :  { %5777 = vmatmul.msk.f32.gmra.mxu1 %vm10264_vm14, %v1907_v16  ;;  %vm10276_vm14 = vmmov %vm10233_vm0 }
0x114e   :  { %5778 = vmatmul.msk.f32.gmra.mxu1 %vm10265_vm15, %v1908_v63  ;;  %vm10277_vm15 = vmmov %vm10233_vm0 }
0x1156   :  { %5779 = vmatmul.msk.f32.gmra.mxu1 %vm10233_vm0, %v1909_v34  ;;  %v2602_v45 = vpop.f32.mrf.mxu0 }
0x1157   :  { %v2628_v29 = vadd.f32 %v2602_v45, %v2471_v1  ;;  %v108_v45 = vld [vmem:[#allocation2 + $0x108] sm:$0xff] }
0x115e   :  { %5780 = vmatmul.msk.f32.gmra.mxu1 %vm10266_vm11, %v1910_v39 }
0x1166   :  { %5781 = vmatmul.msk.f32.gmra.mxu1 %vm10267_vm10, %v1911_v56 }
0x116e   :  { %5782 = vmatmul.msk.f32.gmra.mxu1 %vm10268_vm5, %v1912_v43 }
0x1176   :  { %5783 = vmatmul.msk.f32.gmra.mxu1 %vm10269_vm4, %v1913_v9  ;;  %v2736_v54 = vpop.f32.mrf.mxu0 }
0x1177   :  { %v2762_v60 = vadd.f32 %v2736_v54, %v2628_v29 }
0x1179   :  { %2767 = vst [vmem:[#allocation1] ss:$2 sm:$0xff] %v2762_v60  ;;  %v115_v60 = vld [vmem:[#allocation2 + $0x138] sm:$0xff] }
0x117a   :  { %3028 = vmatpush.msra.mxu2 %v115_v60 }
0x117e   :  { %5784 = vmatmul.msk.f32.gmra.mxu1 %vm10270_vm2, %v1914_v46  ;;  %v114_v46 = vld [vmem:[#allocation2 + $0x130] sm:$0xff] }
0x117f   :  { %3029 = vmatpush.msra.mxu2 %v114_v46 }
0x1181   :  { %3030 = vmatpush.msra.mxu2 %v113_v51 }
0x1186   :  { %5785 = vmatmul.msk.f32.gmra.mxu1 %vm10271_vm6, %v1915_v13  ;;  %vm10278_vm6 = vmmov %vm10233_vm0 }
0x118e   :  { %5786 = vmatmul.msk.f32.gmra.mxu1 %vm10272_vm3, %v1916_v17  ;;  %v112_v17 = vld [vmem:[#allocation2 + $0x120] sm:$0xff]  ;;  %vm10279_vm3 = vmmov %vm10233_vm0 }
0x118f   :  { %3031 = vmatpush.msra.mxu2 %v112_v17 }
0x1193   :  { %v2625_v25 = vpop.f32.mrf.mxu1 }
0x1194   :  { %v2629_v53 = vadd.f32 %v2625_v25, %v2494_v21 }
0x1196   :  { %5787 = vmatmul.msk.f32.gmra.mxu1 %vm10273_vm9, %v1917_v15  ;;  %vm10280_vm9 = vmmov %vm10233_vm0 }
0x119e   :  { %5788 = vmatmul.msk.f32.gmra.mxu1 %vm10274_vm12, %v1918_v14  ;;  %vm10281_vm12 = vmmov %vm10233_vm0 }
0x11a6   :  { %5789 = vmatmul.msk.f32.gmra.mxu1 %vm10275_vm1, %v1919_v35  ;;  %v2845_v35 = vperm.slane %v8399_v41, 6  ;;  %vm10282_vm1 = vmmov %vm10233_vm0 }
0x11ae   :  { %5790 = vmatmul.msk.f32.gmra.mxu1 %vm10276_vm14, %v1920_v12  ;;  %v2848_v12 = vperm.slane %v8399_v41, 7  ;;  %vm10283_vm14 = vmmov %vm10233_vm0 }
0x11b3   :  { %v2759_v6 = vpop.f32.mrf.mxu1 }
0x11b4   :  { %v2763_v27 = vadd.f32 %v2759_v6, %v2629_v53 }
0x11b6   :  { %2769 = vst [vmem:[#allocation1 + $0x1] ss:$2 sm:$0xff] %v2763_v27  ;;  %5791 = vmatmul.msk.f32.gmra.mxu1 %vm10277_vm15, %v1921_v7  ;;  %vm10284_vm15 = vmmov %vm10233_vm0 }
0x11bd   :  { %v2770_v32 = vld.sshfl [vmem:[#allocation1] sm:$0xff pattern:$0x75316420] }
0x11be   :  { %5775 = vmatmul.msk.f32.vlgmr.msrb.gmra.mxu0 %vm10233_vm0, %v2770_v32 }
0x123b   :  { %v2790_v11 = vpop.f32.mrf.mxu0 }
0x123c   :  { %v2791_v0 = vadd.f32 %v2790_v11, %v2764_v49 }
0x123e   :  { %v2794_v8 = vrot.slane %v2791_v0, 4  ;;  %v2797_v19 = vmul.f32 %v2796_v38, %v2791_v0 }
0x1240   :  { %v2799_v28 = vadd.f32 %v2797_v19, %v7727_v22  ;;  %v2798_v31 = vmul.f32 %v2796_v38, %v2794_v8  ;;  %v2916_v38 = vpop.f32.mrf.mxu1 }
0x1242   :  { %v2801_v5 = vsel %vm1922_vm8, %v2799_v28, 0.0  ;;  %v2800_v33 = vadd.f32 %v2798_v31, %v7742_v59  ;;  %v110_v59 = vld [vmem:[#allocation2 + $0x118] sm:$0xff] }
0x1243   :  { %2802 = vadd.xlane.f32.xlu2 %v2801_v5  ;;  %3000 = vmatpush.msra.mxu0 %v110_v59 }
0x1244   :  { %v2804_v37 = vsel %vm1922_vm8, %v2800_v33, 0.0 }
0x1245   :  { %2805 = vadd.xlane.f32.xlu1 %v2804_v37  ;;  %3001 = vmatpush.msra.mxu0 %v109_v18  ;;  %v8500_v37 = vmul.f32 0.35355338, %v2916_v38 }
0x1247   :  { %3002 = vmatpush.msra.mxu0 %v108_v45 }
0x1248   :  { %v2919_v41 = vpop.f32.mrf.mxu1 }
0x1249   :  { %3003 = vmatpush.msra.mxu0 %v107_v10 }
0x1250   :  { %v2922_v11 = vpop.f32.mrf.mxu1 }
0x1258   :  { %v2925_v0 = vpop.f32.mrf.mxu1 }
0x1259   :  { %v8576_v17 = vmul.f32 0.35355338, %v2925_v0 }
0x1260   :  { %v2928_v8 = vpop.f32.mrf.mxu1 }
0x1268   :  { %v8494_v19 = vpop.f32.mrf.mxu1 }
0x12b6   :  { %v2803_v16 = vpop.xlane.xlu2 %2802 }
0x12b7   :  { %v2807_v61 = vmul.f32 %v2803_v16, %v7579_v4 }
0x12b8   :  { %v2806_v63 = vpop.xlane.xlu1 %2805 }
0x12b9   :  { %v2809_v3 = vsub.f32 %v2799_v28, %v2807_v61  ;;  %v2808_v34 = vmul.f32 %v2806_v63, %v7579_v4  ;;  %v8496_v28 = vpop.f32.mrf.mxu1 }
0x12bb   :  { %v2810_v26 = vsub.f32 %v2800_v33, %v2808_v34  ;;  %v2811_v39 = vmul.f32 %v2809_v3, %v2809_v3  ;;  %v3367_v34 = vmul.f32 %v8095_v58, %v8500_v37 }
0x12bd   :  { %v2813_v22 = vsel %vm1922_vm8, %v2811_v39, 0.0  ;;  %v2812_v44 = vmul.f32 %v2810_v26, %v2810_v26 }
0x12be   :  { %2814 = vadd.xlane.f32.xlu0 %v2813_v22  ;;  %v8525_v22 = vmul.f32 0.35355338, %v2919_v41 }
0x12bf   :  { %v2816_v56 = vsel %vm1922_vm8, %v2812_v44, 0.0 }
0x12c0   :  { %2817 = vadd.xlane.f32.xlu2 %v2816_v56  ;;  %v3040_v56 = vmul.f32 %v8092_v24, %v8525_v22  ;;  %v3368_v59 = vmul.f32 %v8095_v58, %v8525_v22 }
0x12c1   :  { %v8498_v31 = vpop.f32.mrf.mxu1 }
0x12c2   :  { %v8631_v41 = vmul.f32 0.35355338, %v8498_v31 }
0x12c4   :  { %v3046_v0 = vmul.f32 %v8092_v24, %v8631_v41 }
0x12c9   :  { %v2940_v5 = vpop.f32.mrf.mxu1 }
0x12ca   :  { %v8502_v16 = vmul.f32 0.35355338, %v2940_v5 }
0x12cc   :  { %v3047_v39 = vmul.f32 %v8092_v24, %v8502_v16 }
0x12d1   :  { %v2943_v33 = vpop.f32.mrf.mxu1 }
0x12d2   :  { %v8528_v44 = vmul.f32 0.35355338, %v2943_v33 }
0x12d4   :  { %v3048_v18 = vmul.f32 %v8092_v24, %v8528_v44  ;;  %v3376_v5 = vmul.f32 %v8095_v58, %v8528_v44 }
0x1331   :  { %v2815_v43 = vpop.xlane.xlu0 %2814 }
0x1332   :  { %v2819_v20 = vmul.f32 %v2815_v43, %v7579_v4 }
0x1333   :  { %v2818_v9 = vpop.xlane.xlu2 %2817 }
0x1334   :  { %v2821_v1 = vadd.f32 1e-05, %v2819_v20  ;;  %v2820_v29 = vmul.f32 %v2818_v9, %v7579_v4  ;;  %v8539_v20 = vmul.f32 0.35355338, %v2922_v11 }
0x1336   :  { %6193 = vrsqrt.f32 %v2821_v1  ;;  %v2822_v54 = vadd.f32 1e-05, %v2820_v29  ;;  %vm2829_vm11 = vweird.f32 %v2821_v1  ;;  %v3041_v51 = vmul.f32 %v8092_v24, %v8539_v20 }
0x1338   :  { %6195 = vrsqrt.f32 %v2822_v54  ;;  %vm2839_vm4 = vweird.f32 %v2822_v54 }
0x133c   :  { %v6194_v13 = vpop.eup %6193 }
0x133d   :  { %v2824_v48 = vmul.f32 %v6194_v13, %v2821_v1  ;;  %vm2830_vm8 = vweird.f32 %v6194_v13 }
0x133e   :  { %v6196_v55 = vpop.eup %6195  ;;  %vm2831_vm5 = vmor %vm2829_vm11, %vm2830_vm8 }
0x133f   :  { %v2825_v15 = vmul.f32 %v6194_v13, %v2824_v48  ;;  %v2834_v23 = vmul.f32 %v6196_v55, %v2822_v54  ;;  %vm2840_vm10 = vweird.f32 %v6196_v55  ;;  %vm10285_vm8 = vmmov %vm10233_vm0 }
0x1340   :  { %vm2841_vm2 = vmor %vm2839_vm4, %vm2840_vm10 }
0x1341   :  { %v2826_v36 = vmul.f32 0.5, %v2825_v15  ;;  %v2835_v2 = vmul.f32 %v6196_v55, %v2834_v23  ;;  %vm10286_vm11 = vmmov %vm10233_vm0  ;;  %v3042_v23 = vmul.f32 %v8092_v24, %v8576_v17 }
0x1342   :  { %vm10287_vm10 = vmmov %vm10233_vm0 }
0x1343   :  { %v2827_v50 = vsub.f32 1.5, %v2826_v36  ;;  %v2836_v14 = vmul.f32 0.5, %v2835_v2  ;;  %vm10289_vm4 = vmmov %vm10233_vm0  ;;  %v3370_v36 = vmul.f32 %v8095_v58, %v8576_v17 }
0x1345   :  { %v2828_v30 = vmul.f32 %v6194_v13, %v2827_v50  ;;  %v2837_v40 = vsub.f32 1.5, %v2836_v14  ;;  %v8589_v50 = vmul.f32 0.35355338, %v2928_v8  ;;  %v3374_v8 = vmul.f32 %v8095_v58, %v8631_v41 }
0x1347   :  { %v2832_v52 = vsel %vm2831_vm5, %v6194_v13, %v2828_v30  ;;  %v2838_v25 = vmul.f32 %v6196_v55, %v2837_v40  ;;  %vm10288_vm5 = vmmov %vm10233_vm0  ;;  %v3369_v13 = vmul.f32 %v8095_v58, %v8539_v20  ;;  %v3043_v40 = vmul.f32 %v8092_v24, %v8589_v50 }
0x1348   :  { %v2843_v21 = vmul.f32 %v2832_v52, %v2809_v3  ;;  %v3039_v3 = vmul.f32 %v8092_v24, %v8500_v37 }
0x1349   :  { %v2842_v57 = vsel %vm2841_vm2, %v6196_v55, %v2838_v25  ;;  %vm10290_vm2 = vmmov %vm10233_vm0  ;;  %v8603_v25 = vmul.f32 0.35355338, %v8494_v19 }
0x134a   :  { %v2846_v53 = vmul.f32 %v2845_v35, %v2843_v21  ;;  %v2844_v6 = vmul.f32 %v2842_v57, %v2810_v26  ;;  %v2946_v26 = vpop.f32.mrf.mxu1 }
0x134b   :  { %v8541_v45 = vmul.f32 0.35355338, %v2946_v26  ;;  %v3044_v57 = vmul.f32 %v8092_v24, %v8603_v25 }
0x134c   :  { %v2849_v27 = vadd.f32 %v2848_v12, %v2846_v53  ;;  %v2847_v7 = vmul.f32 %v2845_v35, %v2844_v6  ;;  %v3371_v35 = vmul.f32 %v8095_v58, %v8589_v50  ;;  %v3372_v53 = vmul.f32 %v8095_v58, %v8603_v25 }
0x134d   :  { %v3049_v48 = vmul.f32 %v8092_v24, %v8541_v45 }
0x134e   :  { %2982 = vst [vmem:[#allocation1] ss:$2 sm:$0xff] %v2849_v27  ;;  %v2850_v32 = vadd.f32 %v2848_v12, %v2847_v7 }
0x1350   :  { %2984 = vst [vmem:[#allocation1 + $0x1] ss:$2 sm:$0xff] %v2850_v32 }
0x1352   :  { %v2949_v43 = vpop.f32.mrf.mxu1 }
0x1353   :  { %v8578_v15 = vmul.f32 0.35355338, %v2949_v43 }
0x1355   :  { %v3050_v2 = vmul.f32 %v8092_v24, %v8578_v15  ;;  %v3378_v33 = vmul.f32 %v8095_v58, %v8578_v15 }
0x1357   :  { %v2985_v62 = vld.sshfl [vmem:[#allocation1] sm:$0xff pattern:$0x75316420] }
0x1358   :  { %5792 = vmatmul.msk.f32.vlgmr.msra.gmra.mxu0 %vm10278_vm6, %v2985_v62  ;;  %3010 = vst [vmem:[#allocation1] ss:$2 sm:$0xff] %v2849_v27  ;;  %vm10291_vm6 = vmmov %vm10233_vm0  ;;  %v8617_v27 = vmul.f32 0.35355338, %v8496_v28  ;;  %v3375_v28 = vmul.f32 %v8095_v58, %v8502_v16 }
0x1359   :  { %3012 = vst [vmem:[#allocation1 + $0x1] ss:$2 sm:$0xff] %v2850_v32 }
0x135a   :  { %v2952_v55 = vpop.f32.mrf.mxu1  ;;  %v3045_v32 = vmul.f32 %v8092_v24, %v8617_v27  ;;  %v3373_v62 = vmul.f32 %v8095_v58, %v8617_v27 }
0x135b   :  { %v8591_v14 = vmul.f32 0.35355338, %v2952_v55 }
0x135d   :  { %v3051_v52 = vmul.f32 %v8092_v24, %v8591_v14 }
0x1360   :  { %v3013_v49 = vld.sshfl [vmem:[#allocation1] sm:$0xff pattern:$0x75316420] }
0x1361   :  { %5793 = vmatmul.msk.f32.vlgmr.msra.gmra.mxu2 %vm10279_vm3, %v3013_v49  ;;  %vm10292_vm3 = vmmov %vm10233_vm0 }
0x1362   :  { %v2955_v30 = vpop.f32.mrf.mxu1 }
0x1363   :  { %v8605_v12 = vmul.f32 0.35355338, %v2955_v30 }
0x1365   :  { %v3052_v6 = vmul.f32 %v8092_v24, %v8605_v12 }
0x136a   :  { %v2958_v21 = vpop.f32.mrf.mxu1 }
0x136b   :  { %v8619_v7 = vmul.f32 0.35355338, %v2958_v21 }
0x136d   :  { %v3053_v49 = vmul.f32 %v8092_v24, %v8619_v7  ;;  %v3381_v26 = vmul.f32 %v8095_v58, %v8619_v7 }
0x1372   :  { %v2961_v38 = vpop.f32.mrf.mxu1 }
0x1373   :  { %v8633_v11 = vmul.f32 0.35355338, %v2961_v38 }
0x1375   :  { %v3054_v19 = vmul.f32 %v8092_v24, %v8633_v11 }
0x13d5   :  { %v8504_v61 = vpop.f32.mrf.mxu0 }
0x13d6   :  { %v8507_v63 = vrot.slane %v8504_v61, 4  ;;  %5794 = vmatpush.xpose.msk.msrb.mxu3 %vm10280_vm9, %v8504_v61  ;;  %5812 = vmatpush.xpose.msk.msrb.mxu2 %vm10281_vm12, %v8504_v61  ;;  %vm10293_vm9 = vmmov %vm10233_vm0 }
0x13d7   :  { %vm10294_vm12 = vmmov %vm10233_vm0 }
0x13d8   :  { %5803 = vmatpush.xpose.msk.msrb.mxu0 %vm10282_vm1, %v8507_v63  ;;  %vm10295_vm1 = vmmov %vm10233_vm0 }
0x13d9   :  { %5795 = vmatmul.msk.f32.vlgmr.msrb.gmra.mxu3 %vm10284_vm15, %v3039_v3  ;;  %5813 = vmatmul.msk.f32.vlgmr.msrb.gmra.mxu2 %vm10233_vm0, %v3367_v34  ;;  %vm10297_vm15 = vmmov %vm10233_vm0  ;;  %v3379_v3 = vmul.f32 %v8095_v58, %v8591_v14  ;;  %v3380_v34 = vmul.f32 %v8095_v58, %v8605_v12 }
0x13da   :  { %5821 = vmatpush.xpose.msk.msra.mxu3 %vm10283_vm14, %v8507_v63  ;;  %vm10296_vm14 = vmmov %vm10233_vm0 }
0x13db   :  { %5804 = vmatmul.msk.f32.vlgmr.msrb.gmra.mxu0 %vm10285_vm8, %v3047_v39  ;;  %vm10298_vm8 = vmmov %vm10233_vm0  ;;  %v3382_v39 = vmul.f32 %v8095_v58, %v8633_v11 }
0x13e1   :  { %5796 = vmatmul.msk.f32.gmra.mxu3 %vm10286_vm11, %v3040_v56  ;;  %5814 = vmatmul.msk.f32.gmra.mxu2 %vm10287_vm10, %v3368_v59  ;;  %vm10299_vm11 = vmmov %vm10233_vm0 }
0x13e2   :  { %vm10300_vm10 = vmmov %vm10233_vm0 }
0x13e3   :  { %5805 = vmatmul.msk.f32.gmra.mxu0 %vm10288_vm5, %v3048_v18  ;;  %vm10301_vm5 = vmmov %vm10233_vm0 }
0x13e4   :  { %v8543_v9 = vpop.f32.mrf.mxu2 }
0x13e5   :  { %v8546_v1 = vrot.slane %v8543_v9, 4  ;;  %v3365_v29 = vmul.f32 %v8092_v24, %v8543_v9  ;;  %v3689_v10 = vmul.f32 %v8095_v58, %v8543_v9  ;;  %v4285_v54 = vmul.f32 %v8166_v47, %v8543_v9 }
0x13e7   :  { %5830 = vmatpush.msk.msra.mxu0 %vm1351_vm13, %v3689_v10  ;;  %5848 = vmatpush.msk.msrb.mxu1 %vm1351_vm13, %v3365_v29  ;;  %v3690_v60 = vmul.f32 %v8095_v58, %v8546_v1  ;;  %v3366_v46 = vmul.f32 %v8092_v24, %v8546_v1  ;;  %v4286_v31 = vmul.f32 %v8166_v47, %v8546_v1 }
0x13e8   :  { %v3377_v24 = vmul.f32 %v8095_v58, %v8541_v45 }
0x13e9   :  { %5866 = vmatpush.xpose.msk.msrb.mxu0 %vm10289_vm4, %v8504_v61  ;;  %5884 = vmatpush.msk.msra.mxu1 %vm1351_vm13, %v4285_v54  ;;  %vm10302_vm4 = vmmov %vm10233_vm0 }
0x13ea   :  { %5839 = vmatpush.msk.msra.mxu2 %vm1351_vm13, %v3690_v60  ;;  %5857 = vmatpush.msk.msrb.mxu3 %vm1351_vm13, %v3366_v46 }
0x13eb   :  { %5797 = vmatmul.msk.f32.gmra.mxu3 %vm10290_vm2, %v3041_v51  ;;  %5815 = vmatmul.msk.f32.gmra.mxu2 %vm10291_vm6, %v3369_v13  ;;  %vm10303_vm2 = vmmov %vm10233_vm0 }
0x13ec   :  { %5875 = vmatpush.xpose.msk.msrb.mxu2 %vm10292_vm3, %v8507_v63  ;;  %5806 = vmatmul.msk.f32.gmra.mxu0 %vm10293_vm9, %v3049_v48  ;;  %vm10304_vm6 = vmmov %vm10233_vm0 }
0x13ed   :  { %vm10305_vm3 = vmmov %vm10233_vm0 }
0x13ee   :  { %vm10306_vm9 = vmmov %vm10233_vm0 }
0x13f3   :  { %5798 = vmatmul.msk.f32.gmra.mxu3 %vm10294_vm12, %v3042_v23  ;;  %5816 = vmatmul.msk.f32.gmra.mxu2 %vm10295_vm1, %v3370_v36  ;;  %vm10307_vm12 = vmmov %vm10233_vm0 }
0x13f4   :  { %5807 = vmatmul.msk.f32.gmra.mxu0 %vm10296_vm14, %v3050_v2  ;;  %vm10308_vm1 = vmmov %vm10233_vm0 }
0x13f5   :  { %vm10309_vm14 = vmmov %vm10233_vm0 }
0x13fb   :  { %5799 = vmatmul.msk.f32.gmra.mxu3 %vm10297_vm15, %v3043_v40  ;;  %5817 = vmatmul.msk.f32.gmra.mxu2 %vm10233_vm0, %v3371_v35  ;;  %vm10310_vm15 = vmmov %vm10233_vm0 }
0x13fc   :  { %5808 = vmatmul.msk.f32.gmra.mxu0 %vm10298_vm8, %v3051_v52  ;;  %vm10311_vm8 = vmmov %vm10233_vm0 }
0x1403   :  { %5800 = vmatmul.msk.f32.gmra.mxu3 %vm10299_vm11, %v3044_v57  ;;  %5818 = vmatmul.msk.f32.gmra.mxu2 %vm10300_vm10, %v3372_v53  ;;  %vm10312_vm11 = vmmov %vm10233_vm0 }
0x1404   :  { %5809 = vmatmul.msk.f32.gmra.mxu0 %vm10301_vm5, %v3052_v6  ;;  %vm10313_vm10 = vmmov %vm10233_vm0 }
0x1405   :  { %vm10314_vm5 = vmmov %vm10233_vm0 }
0x140b   :  { %5801 = vmatmul.msk.f32.gmra.mxu3 %vm10302_vm4, %v3045_v32  ;;  %5819 = vmatmul.msk.f32.gmra.mxu2 %vm10303_vm2, %v3373_v62  ;;  %vm10315_vm4 = vmmov %vm10233_vm0 }
0x140c   :  { %5810 = vmatmul.msk.f32.gmra.mxu0 %vm10304_vm6, %v3053_v49  ;;  %vm10316_vm2 = vmmov %vm10233_vm0 }
0x140d   :  { %vm10317_vm6 = vmmov %vm10233_vm0 }
0x1413   :  { %5802 = vmatmul.msk.f32.gmra.mxu3 %vm10305_vm3, %v3046_v0  ;;  %5820 = vmatmul.msk.f32.gmra.mxu2 %vm10306_vm9, %v3374_v8  ;;  %vm10318_vm3 = vmmov %vm10233_vm0 }
0x1414   :  { %5811 = vmatmul.msk.f32.gmra.mxu0 %vm10307_vm12, %v3054_v19  ;;  %vm10319_vm9 = vmmov %vm10233_vm0 }
0x1415   :  { %vm10320_vm12 = vmmov %vm10233_vm0 }
0x141b   :  { %5822 = vmatmul.msk.f32.vlgmr.msra.gmra.mxu3 %vm10308_vm1, %v3375_v28  ;;  %vm10321_vm1 = vmmov %vm10233_vm0 }
0x141c   :  { %5893 = vmatpush.msk.msra.mxu3 %vm1351_vm13, %v4286_v31 }
0x1423   :  { %5823 = vmatmul.msk.f32.gmra.mxu3 %vm10309_vm14, %v3376_v5  ;;  %vm10322_vm14 = vmmov %vm10233_vm0 }
0x142b   :  { %5824 = vmatmul.msk.f32.gmra.mxu3 %vm10310_vm15, %v3377_v24  ;;  %vm10323_vm15 = vmmov %vm10233_vm0 }
0x1433   :  { %5825 = vmatmul.msk.f32.gmra.mxu3 %vm10233_vm0, %v3378_v33 }
0x143b   :  { %5826 = vmatmul.msk.f32.gmra.mxu3 %vm10311_vm8, %v3379_v3  ;;  %vm10324_vm8 = vmmov %vm10233_vm0 }
0x1443   :  { %5827 = vmatmul.msk.f32.gmra.mxu3 %vm10312_vm11, %v3380_v34  ;;  %vm10325_vm11 = vmmov %vm10233_vm0 }
0x144b   :  { %5828 = vmatmul.msk.f32.gmra.mxu3 %vm10313_vm10, %v3381_v26  ;;  %vm10326_vm10 = vmmov %vm10233_vm0 }
0x1453   :  { %5829 = vmatmul.msk.f32.gmra.mxu3 %vm10314_vm5, %v3382_v39  ;;  %vm10327_vm5 = vmmov %vm10233_vm0 }
0x145c   :  { %v8671_v56 = vpop.f32.mrf.mxu3  ;;  %v3424_v59 = vpop.f32.mrf.mxu2 }
0x145d   :  { %v3513_v18 = vsel %vm1347_vm7, %v3424_v59, -inf }
0x145e   :  { %3514 = vmax.xlane.f32.xlu1 %v3513_v18 }
0x1464   :  { %v8674_v43 = vpop.f32.mrf.mxu3  ;;  %v3427_v29 = vpop.f32.mrf.mxu2 }
0x1465   :  { %v3516_v10 = vsel %vm1347_vm7, %v3427_v29, -inf }
0x1466   :  { %3517 = vmax.xlane.f32.xlu0 %v3516_v10 }
0x146e   :  { %v8677_v54 = vpop.f32.mrf.mxu3  ;;  %v3430_v60 = vpop.f32.mrf.mxu2 }
0x146f   :  { %v3519_v46 = vsel %vm1347_vm7, %v3430_v60, -inf }
0x1470   :  { %3520 = vmax.xlane.f32.xlu2 %v3519_v46 }
0x1476   :  { %v8680_v58 = vpop.f32.mrf.mxu3  ;;  %v3433_v51 = vpop.f32.mrf.mxu2 }
0x1477   :  { %v3522_v13 = vsel %vm1347_vm7, %v3433_v51, -inf }
0x1478   :  { %3523 = vmax.xlane.f32.xlu1 %v3522_v13 }
0x147e   :  { %v8683_v48 = vpop.f32.mrf.mxu3  ;;  %v3436_v55 = vpop.f32.mrf.mxu2 }
0x147f   :  { %v3525_v23 = vsel %vm1347_vm7, %v3436_v55, -inf }
0x1480   :  { %3526 = vmax.xlane.f32.xlu0 %v3525_v23 }
0x1486   :  { %v8686_v36 = vpop.f32.mrf.mxu3  ;;  %v3439_v2 = vpop.f32.mrf.mxu2 }
0x1487   :  { %v3528_v30 = vsel %vm1347_vm7, %v3439_v2, -inf }
0x1488   :  { %3529 = vmax.xlane.f32.xlu2 %v3528_v30 }
0x148e   :  { %v8689_v40 = vpop.f32.mrf.mxu3  ;;  %v8691_v35 = vpop.f32.mrf.mxu2 }
0x148f   :  { %v3531_v52 = vsel %vm1347_vm7, %v8691_v35, -inf }
0x1490   :  { %3532 = vmax.xlane.f32.xlu1 %v3531_v52 }
0x1496   :  { %v8695_v21 = vpop.f32.mrf.mxu3  ;;  %v8697_v57 = vpop.f32.mrf.mxu2 }
0x1497   :  { %v3534_v53 = vsel %vm1347_vm7, %v8697_v57, -inf }
0x1498   :  { %3535 = vmax.xlane.f32.xlu1 %v3534_v53 }
0x149e   :  { %v8701_v6 = vpop.f32.mrf.mxu3 }
0x149f   :  { %v3537_v32 = vsel %vm1347_vm7, %v8701_v6, -inf }
0x14a0   :  { %3538 = vmax.xlane.f32.xlu0 %v3537_v32 }
0x14a6   :  { %v8705_v62 = vpop.f32.mrf.mxu3 }
0x14a7   :  { %v3540_v49 = vsel %vm1347_vm7, %v8705_v62, -inf }
0x14a8   :  { %3541 = vmax.xlane.f32.xlu0 %v3540_v49 }
0x14ae   :  { %v8709_v38 = vpop.f32.mrf.mxu3 }
0x14af   :  { %v3543_v0 = vsel %vm1347_vm7, %v8709_v38, -inf }
0x14b0   :  { %3544 = vmax.xlane.f32.xlu1 %v3543_v0 }
0x14b6   :  { %v8717_v26 = vpop.f32.mrf.mxu3 }
0x14b7   :  { %v3546_v52 = vsel %vm1347_vm7, %v8717_v26, -inf }
0x14be   :  { %v8725_v23 = vpop.f32.mrf.mxu3 }
0x14d1   :  { %v3515_v8 = vpop.xlane.xlu1 %3514 }
0x14d2   :  { %v3561_v19 = vsub.f32 %v3424_v59, %v3515_v8  ;;  %v3549_v8 = vsel %vm1347_vm7, %v8725_v23, -inf }
0x14d4   :  { %v3577_v28 = vmul.f32 1.442695, %v3561_v19  ;;  %v8737_v19 = vpop.f32.mrf.mxu3 }
0x14d6   :  { %6197 = vpow2.f32 %v3577_v28 }
0x14d9   :  { %v3518_v31 = vpop.xlane.xlu0 %3517 }
0x14da   :  { %v3562_v5 = vsub.f32 %v3427_v29, %v3518_v31 }
0x14dc   :  { %v8713_v24 = vpop.eup %6197  ;;  %v3579_v33 = vmul.f32 1.442695, %v3562_v5 }
0x14dd   :  { %v3609_v3 = vsel %vm1347_vm7, %v8713_v24, 0.0 }
0x14de   :  { %6199 = vpow2.f32 %v3579_v33  ;;  %3610 = vadd.xlane.f32.xlu2 %v3609_v3  ;;  %v3552_v3 = vsel %vm1347_vm7, %v8737_v19, -inf }
0x14e3   :  { %v3521_v34 = vpop.xlane.xlu2 %3520 }
0x14e4   :  { %v3563_v39 = vsub.f32 %v3430_v60, %v3521_v34  ;;  %v8719_v18 = vpop.eup %6199  ;;  %v8745_v34 = vpop.f32.mrf.mxu3 }
0x14e5   :  { %v3612_v59 = vsel %vm1347_vm7, %v8719_v18, 0.0 }
0x14e6   :  { %v3581_v10 = vmul.f32 1.442695, %v3563_v39  ;;  %3613 = vadd.xlane.f32.xlu2 %v3612_v59 }
0x14e8   :  { %6201 = vpow2.f32 %v3581_v10 }
0x14eb   :  { %v3524_v29 = vpop.xlane.xlu1 %3523 }
0x14ec   :  { %v3564_v46 = vsub.f32 %v3433_v51, %v3524_v29 }
0x14ee   :  { %v8723_v13 = vpop.eup %6201  ;;  %v3583_v30 = vmul.f32 1.442695, %v3564_v46  ;;  %3547 = vmax.xlane.f32.xlu2 %v3546_v52  ;;  %v3555_v46 = vsel %vm1347_vm7, %v8745_v34, -inf  ;;  %v8754_v52 = vpop.f32.mrf.mxu3 }
0x14ef   :  { %v3615_v60 = vsel %vm1347_vm7, %v8723_v13, 0.0 }
0x14f0   :  { %6203 = vpow2.f32 %v3583_v30  ;;  %3616 = vadd.xlane.f32.xlu0 %v3615_v60 }
0x14f3   :  { %v3527_v53 = vpop.xlane.xlu0 %3526 }
0x14f4   :  { %v3565_v32 = vsub.f32 %v3436_v55, %v3527_v53 }
0x14f6   :  { %v8731_v49 = vpop.eup %6203  ;;  %v3585_v0 = vmul.f32 1.442695, %v3565_v32 }
0x14f7   :  { %v3618_v51 = vsel %vm1347_vm7, %v8731_v49, 0.0 }
0x14f8   :  { %6205 = vpow2.f32 %v3585_v0  ;;  %3619 = vadd.xlane.f32.xlu1 %v3618_v51  ;;  %3550 = vmax.xlane.f32.xlu0 %v3549_v8  ;;  %v3558_v0 = vsel %vm1347_vm7, %v8754_v52, -inf }
0x14fb   :  { %v3530_v28 = vpop.xlane.xlu2 %3529 }
0x14fc   :  { %v3566_v31 = vsub.f32 %v3439_v2, %v3530_v28 }
0x14fe   :  { %v8739_v5 = vpop.eup %6205  ;;  %v3587_v33 = vmul.f32 1.442695, %v3566_v31 }
0x14ff   :  { %v3621_v55 = vsel %vm1347_vm7, %v8739_v5, 0.0 }
0x1500   :  { %6207 = vpow2.f32 %v3587_v33  ;;  %3622 = vadd.xlane.f32.xlu2 %v3621_v55  ;;  %3553 = vmax.xlane.f32.xlu1 %v3552_v3 }
0x1503   :  { %v3533_v39 = vpop.xlane.xlu1 %3532 }
0x1504   :  { %v3567_v10 = vsub.f32 %v8691_v35, %v3533_v39 }
0x1506   :  { %v8748_v59 = vpop.eup %6207  ;;  %v3589_v2 = vmul.f32 1.442695, %v3567_v10 }
0x1507   :  { %v3624_v29 = vsel %vm1347_vm7, %v8748_v59, 0.0 }
0x1508   :  { %6209 = vpow2.f32 %v3589_v2  ;;  %3625 = vadd.xlane.f32.xlu0 %v3624_v29  ;;  %3556 = vmax.xlane.f32.xlu2 %v3555_v46 }
0x150b   :  { %v3536_v30 = vpop.xlane.xlu1 %3535 }
0x150c   :  { %v3568_v60 = vsub.f32 %v8697_v57, %v3536_v30 }
0x150e   :  { %v8757_v53 = vpop.eup %6209  ;;  %v3591_v35 = vmul.f32 1.442695, %v3568_v60 }
0x150f   :  { %v3627_v32 = vsel %vm1347_vm7, %v8757_v53, 0.0 }
0x1510   :  { %6211 = vpow2.f32 %v3591_v35  ;;  %3628 = vadd.xlane.f32.xlu1 %v3627_v32  ;;  %3559 = vmax.xlane.f32.xlu2 %v3558_v0 }
0x1513   :  { %v3539_v51 = vpop.xlane.xlu0 %3538 }
0x1514   :  { %v3569_v8 = vsub.f32 %v8701_v6, %v3539_v51 }
0x1516   :  { %v8764_v28 = vpop.eup %6211  ;;  %v3593_v31 = vmul.f32 1.442695, %v3569_v8 }
0x1517   :  { %v3630_v57 = vsel %vm1347_vm7, %v8764_v28, 0.0 }
0x1518   :  { %6213 = vpow2.f32 %v3593_v31  ;;  %3631 = vadd.xlane.f32.xlu1 %v3630_v57 }
0x151b   :  { %v3542_v33 = vpop.xlane.xlu0 %3541 }
0x151c   :  { %v3570_v55 = vsub.f32 %v8705_v62, %v3542_v33 }
0x151e   :  { %v8769_v3 = vpop.eup %6213  ;;  %v3595_v39 = vmul.f32 1.442695, %v3570_v55 }
0x151f   :  { %v3633_v10 = vsel %vm1347_vm7, %v8769_v3, 0.0 }
0x1520   :  { %6215 = vpow2.f32 %v3595_v39  ;;  %3634 = vadd.xlane.f32.xlu0 %v3633_v10 }
0x1523   :  { %v3545_v6 = vpop.xlane.xlu1 %3544 }
0x1524   :  { %v3571_v2 = vsub.f32 %v8709_v38, %v3545_v6 }
0x1526   :  { %v8774_v29 = vpop.eup %6215  ;;  %v3597_v46 = vmul.f32 1.442695, %v3571_v2 }
0x1527   :  { %v3636_v30 = vsel %vm1347_vm7, %v8774_v29, 0.0 }
0x1528   :  { %6217 = vpow2.f32 %v3597_v46  ;;  %3637 = vadd.xlane.f32.xlu0 %v3636_v30 }
0x152e   :  { %v8778_v62 = vpop.eup %6217 }
0x152f   :  { %v3639_v60 = vsel %vm1347_vm7, %v8778_v62, 0.0 }
0x1530   :  { %3640 = vadd.xlane.f32.xlu2 %v3639_v60 }
0x1551   :  { %v3611_v35 = vpop.xlane.xlu2 %3610 }
0x1552   :  { %6219 = vrcp.f32 %v3611_v35 }
0x1558   :  { %v6220_v32 = vpop.eup %6219 }
0x1559   :  { %v3673_v0 = vmul.f32 %v6220_v32, %v8713_v24  ;;  %v3614_v38 = vpop.xlane.xlu2 %3613 }
0x155a   :  { %6221 = vrcp.f32 %v3614_v38 }
0x155b   :  { %5831 = vmatmul.msk.f32.vlgmr.msra.gmra.mxu0 %vm1347_vm7, %v3673_v0 }
0x155c   :  { %5902 = vmatpush.xpose.msk.msra.mxu0 %vm10315_vm4, %v8504_v61  ;;  %vm10328_vm4 = vmmov %vm10233_vm0 }
0x1560   :  { %v6222_v51 = vpop.eup %6221 }
0x1561   :  { %v3548_v8 = vpop.xlane.xlu2 %3547  ;;  %v3674_v31 = vmul.f32 %v6222_v51, %v8719_v18 }
0x1562   :  { %v3572_v33 = vsub.f32 %v8717_v26, %v3548_v8 }
0x1563   :  { %v3617_v57 = vpop.xlane.xlu0 %3616  ;;  %5832 = vmatmul.msk.f32.gmra.mxu0 %vm1347_vm7, %v3674_v31 }
0x1564   :  { %6223 = vrcp.f32 %v3617_v57  ;;  %v3599_v55 = vmul.f32 1.442695, %v3572_v33 }
0x1566   :  { %6225 = vpow2.f32 %v3599_v55 }
0x156a   :  { %v6224_v24 = vpop.eup %6223 }
0x156b   :  { %v3620_v39 = vpop.xlane.xlu1 %3619  ;;  %v3551_v10 = vpop.xlane.xlu0 %3550  ;;  %v3675_v6 = vmul.f32 %v6224_v24, %v8723_v13 }
0x156c   :  { %6227 = vrcp.f32 %v3620_v39  ;;  %v3573_v61 = vsub.f32 %v8725_v23, %v3551_v10  ;;  %v8791_v2 = vpop.eup %6225 }
0x156d   :  { %5833 = vmatmul.msk.f32.gmra.mxu0 %vm1347_vm7, %v3675_v6  ;;  %v3642_v26 = vsel %vm1347_vm7, %v8791_v2, 0.0 }
0x156e   :  { %v3601_v18 = vmul.f32 1.442695, %v3573_v61  ;;  %3643 = vadd.xlane.f32.xlu1 %v3642_v26 }
0x1570   :  { %6229 = vpow2.f32 %v3601_v18  ;;  %v3189_v18 = vsel %vm1347_vm7, %v8671_v56, -inf }
0x1572   :  { %v6228_v46 = vpop.eup %6227 }
0x1573   :  { %v3623_v30 = vpop.xlane.xlu2 %3622  ;;  %v3554_v60 = vpop.xlane.xlu1 %3553  ;;  %v3676_v35 = vmul.f32 %v6228_v46, %v8731_v49 }
0x1574   :  { %6231 = vrcp.f32 %v3623_v30  ;;  %v3574_v13 = vsub.f32 %v8737_v19, %v3554_v60  ;;  %v8819_v46 = vpop.f32.mrf.mxu0  ;;  %v3192_v60 = vsel %vm1347_vm7, %v8674_v43, -inf }
0x1575   :  { %5834 = vmatmul.msk.f32.gmra.mxu0 %vm1347_vm7, %v3676_v35  ;;  %v3198_v35 = vsel %vm1347_vm7, %v8680_v58, -inf }
0x1576   :  { %v8799_v23 = vpop.eup %6229  ;;  %v3603_v32 = vmul.f32 1.442695, %v3574_v13 }
0x1577   :  { %v3645_v0 = vsel %vm1347_vm7, %v8799_v23, 0.0 }
0x1578   :  { %6233 = vpow2.f32 %v3603_v32  ;;  %3646 = vadd.xlane.f32.xlu0 %v3645_v0 }
0x157a   :  { %v6232_v38 = vpop.eup %6231 }
0x157b   :  { %v3626_v51 = vpop.xlane.xlu0 %3625  ;;  %v3557_v8 = vpop.xlane.xlu2 %3556  ;;  %v3677_v31 = vmul.f32 %v6232_v38, %v8739_v5 }
0x157c   :  { %6235 = vrcp.f32 %v3626_v51  ;;  %v3575_v49 = vsub.f32 %v8745_v34, %v3557_v8  ;;  %v8832_v38 = vpop.f32.mrf.mxu0  ;;  %v3201_v51 = vsel %vm1347_vm7, %v8683_v48, -inf  ;;  %v3207_v8 = vsel %vm1347_vm7, %v8689_v40, -inf }
0x157d   :  { %5835 = vmatmul.msk.f32.gmra.mxu0 %vm1347_vm7, %v3677_v31  ;;  %v3195_v31 = vsel %vm1347_vm7, %v8677_v54, -inf }
0x157e   :  { %v8806_v19 = vpop.eup %6233  ;;  %v3605_v57 = vmul.f32 1.442695, %v3575_v49 }
0x157f   :  { %v3648_v33 = vsel %vm1347_vm7, %v8806_v19, 0.0 }
0x1580   :  { %6237 = vpow2.f32 %v3605_v57  ;;  %3649 = vadd.xlane.f32.xlu2 %v3648_v33 }
0x1582   :  { %v6236_v55 = vpop.eup %6235 }
0x1583   :  { %v3629_v24 = vpop.xlane.xlu1 %3628  ;;  %v3560_v39 = vpop.xlane.xlu2 %3559  ;;  %v3678_v10 = vmul.f32 %v6236_v55, %v8748_v59 }
0x1584   :  { %6239 = vrcp.f32 %v3629_v24  ;;  %v3576_v5 = vsub.f32 %v8754_v52, %v3560_v39  ;;  %v8848_v55 = vpop.f32.mrf.mxu0  ;;  %v3213_v24 = vsel %vm1347_vm7, %v8819_v46, -inf  ;;  %v3204_v39 = vsel %vm1347_vm7, %v8686_v36, -inf }
0x1585   :  { %5836 = vmatmul.msk.f32.gmra.mxu0 %vm1347_vm7, %v3678_v10 }
0x1586   :  { %v8813_v34 = vpop.eup %6237  ;;  %v3607_v6 = vmul.f32 1.442695, %v3576_v5 }
0x1587   :  { %v3651_v61 = vsel %vm1347_vm7, %v8813_v34, 0.0 }
0x1588   :  { %6241 = vpow2.f32 %v3607_v6  ;;  %3652 = vadd.xlane.f32.xlu1 %v3651_v61  ;;  %3190 = vmax.xlane.f32.xlu2 %v3189_v18  ;;  %v3964_v6 = vmul.f32 %v8166_v47, %v8525_v22  ;;  %v3210_v61 = vsel %vm1347_vm7, %v8695_v21, -inf }
0x158a   :  { %v6240_v26 = vpop.eup %6239 }
0x158b   :  { %v3632_v59 = vpop.xlane.xlu1 %3631  ;;  %v3679_v52 = vmul.f32 %v6240_v26, %v8757_v53 }
0x158c   :  { %6243 = vrcp.f32 %v3632_v59  ;;  %v8863_v18 = vpop.f32.mrf.mxu0  ;;  %v3965_v59 = vmul.f32 %v8166_v47, %v8539_v20 }
0x158d   :  { %5837 = vmatmul.msk.f32.gmra.mxu0 %vm1347_vm7, %v3679_v52  ;;  %v3219_v52 = vsel %vm1347_vm7, %v8848_v55, -inf }
0x158e   :  { %v8823_v30 = vpop.eup %6241 }
0x158f   :  { %v3654_v13 = vsel %vm1347_vm7, %v8823_v30, 0.0 }
0x1590   :  { %3193 = vmax.xlane.f32.xlu1 %v3192_v60  ;;  %3199 = vmax.xlane.f32.xlu2 %v3198_v35  ;;  %v3966_v35 = vmul.f32 %v8166_v47, %v8576_v17 }
0x1591   :  { %3655 = vadd.xlane.f32.xlu0 %v3654_v13  ;;  %v3967_v13 = vmul.f32 %v8166_v47, %v8589_v50 }
0x1592   :  { %v6244_v32 = vpop.eup %6243 }
0x1593   :  { %v3635_v0 = vpop.xlane.xlu0 %3634  ;;  %v3680_v53 = vmul.f32 %v6244_v32, %v8764_v28  ;;  %v3963_v28 = vmul.f32 %v8166_v47, %v8500_v37 }
0x1594   :  { %6245 = vrcp.f32 %v3635_v0  ;;  %v8872_v60 = vpop.f32.mrf.mxu0 }
0x1595   :  { %5838 = vmatmul.msk.f32.gmra.mxu0 %vm1347_vm7, %v3680_v53  ;;  %v3225_v0 = vsel %vm1347_vm7, %v8872_v60, -inf  ;;  %v3968_v53 = vmul.f32 %v8166_v47, %v8603_v25 }
0x1598   :  { %3202 = vmax.xlane.f32.xlu1 %v3201_v51  ;;  %3208 = vmax.xlane.f32.xlu2 %v3207_v8 }
0x1599   :  { %3196 = vmax.xlane.f32.xlu0 %v3195_v31  ;;  %v3969_v31 = vmul.f32 %v8166_v47, %v8617_v27 }
0x159a   :  { %v6246_v49 = vpop.eup %6245 }
0x159b   :  { %v3681_v57 = vmul.f32 %v6246_v49, %v8769_v3  ;;  %v3638_v33 = vpop.xlane.xlu0 %3637 }
0x159c   :  { %6247 = vrcp.f32 %v3638_v33  ;;  %v8881_v32 = vpop.f32.mrf.mxu0 }
0x159d   :  { %5840 = vmatmul.msk.f32.vlgmr.msra.gmra.mxu2 %vm1347_vm7, %v3681_v57  ;;  %5867 = vmatmul.msk.f32.vlgmr.msrb.gmra.mxu0 %vm10316_vm2, %v3963_v28  ;;  %v3228_v8 = vsel %vm1347_vm7, %v8881_v32, -inf  ;;  %v3970_v57 = vmul.f32 %v8166_v47, %v8631_v41  ;;  %vm10329_vm2 = vmmov %vm10233_vm0 }
0x159e   :  { %5911 = vmatpush.xpose.msk.msra.mxu2 %vm10317_vm6, %v8507_v63  ;;  %v3216_v63 = vsel %vm1347_vm7, %v8832_v38, -inf  ;;  %vm10330_vm6 = vmmov %vm10233_vm0 }
0x15a0   :  { %3214 = vmax.xlane.f32.xlu2 %v3213_v24  ;;  %v4439_v24 = vmul.f32 %v8195_v42, %v8500_v37  ;;  %v4441_v37 = vmul.f32 %v8195_v42, %v8539_v20 }
0x15a1   :  { %3205 = vmax.xlane.f32.xlu0 %v3204_v39 }
0x15a2   :  { %v6248_v3 = vpop.eup %6247 }
0x15a3   :  { %v3641_v10 = vpop.xlane.xlu2 %3640  ;;  %v3682_v5 = vmul.f32 %v6248_v3, %v8774_v29 }
0x15a4   :  { %6249 = vrcp.f32 %v3641_v10  ;;  %v8889_v51 = vpop.f32.mrf.mxu0  ;;  %v4440_v10 = vmul.f32 %v8195_v42, %v8525_v22 }
0x15a5   :  { %5841 = vmatmul.msk.f32.gmra.mxu2 %vm1347_vm7, %v3682_v5  ;;  %5868 = vmatmul.msk.f32.gmra.mxu0 %vm10318_vm3, %v3964_v6  ;;  %v3231_v49 = vsel %vm1347_vm7, %v8889_v51, -inf  ;;  %vm10331_vm3 = vmmov %vm10233_vm0 }
0x15a8   :  { %3217 = vmax.xlane.f32.xlu2 %v3216_v63 }
0x15a9   :  { %3211 = vmax.xlane.f32.xlu0 %v3210_v61 }
0x15aa   :  { %v6250_v26 = vpop.eup %6249 }
0x15ab   :  { %v3683_v29 = vmul.f32 %v6250_v26, %v8778_v62  ;;  %v3222_v62 = vsel %vm1347_vm7, %v8863_v18, -inf }
0x15ac   :  { %v8898_v28 = vpop.f32.mrf.mxu0 }
0x15ad   :  { %5842 = vmatmul.msk.f32.gmra.mxu2 %vm1347_vm7, %v3683_v29  ;;  %5869 = vmatmul.msk.f32.gmra.mxu0 %vm10319_vm9, %v3965_v59  ;;  %vm10332_vm9 = vmmov %vm10233_vm0 }
0x15b0   :  { %3220 = vmax.xlane.f32.xlu2 %v3219_v52  ;;  %v4442_v52 = vmul.f32 %v8195_v42, %v8576_v17 }
0x15b5   :  { %5870 = vmatmul.msk.f32.gmra.mxu0 %vm10320_vm12, %v3966_v35  ;;  %vm10333_vm12 = vmmov %vm10233_vm0 }
0x15b8   :  { %3223 = vmax.xlane.f32.xlu2 %v3222_v62 }
0x15bd   :  { %5871 = vmatmul.msk.f32.gmra.mxu0 %vm10321_vm1, %v3967_v13  ;;  %vm10334_vm1 = vmmov %vm10233_vm0 }
0x15c0   :  { %3226 = vmax.xlane.f32.xlu2 %v3225_v0  ;;  %v4443_v0 = vmul.f32 %v8195_v42, %v8589_v50 }
0x15c5   :  { %5872 = vmatmul.msk.f32.gmra.mxu0 %vm10322_vm14, %v3968_v53  ;;  %vm10335_vm14 = vmmov %vm10233_vm0 }
0x15c8   :  { %3229 = vmax.xlane.f32.xlu2 %v3228_v8 }
0x15cd   :  { %5873 = vmatmul.msk.f32.gmra.mxu0 %vm10323_vm15, %v3969_v31  ;;  %vm10336_vm15 = vmmov %vm10233_vm0 }
0x15d0   :  { %3232 = vmax.xlane.f32.xlu2 %v3231_v49 }
0x15d5   :  { %5874 = vmatmul.msk.f32.gmra.mxu0 %vm10233_vm0, %v3970_v57 }
0x15d8   :  { %v8903_v33 = vpop.f32.mrf.mxu0 }
0x15dd   :  { %5903 = vmatmul.msk.f32.vlgmr.msra.gmra.mxu0 %vm10324_vm8, %v4439_v24  ;;  %vm10337_vm8 = vmmov %vm10233_vm0 }
0x15e0   :  { %v8908_v39 = vpop.f32.mrf.mxu0 }
0x15e1   :  { %v3644_v3 = vpop.xlane.xlu1 %3643 }
0x15e2   :  { %6251 = vrcp.f32 %v3644_v3 }
0x15e5   :  { %5904 = vmatmul.msk.f32.gmra.mxu0 %vm10325_vm11, %v4440_v10  ;;  %vm10338_vm11 = vmmov %vm10233_vm0 }
0x15e8   :  { %v6252_v5 = vpop.eup %6251 }
0x15e9   :  { %v3684_v63 = vmul.f32 %v6252_v5, %v8791_v2 }
0x15ea   :  { %v8913_v6 = vpop.f32.mrf.mxu0 }
0x15eb   :  { %v3647_v61 = vpop.xlane.xlu0 %3646  ;;  %5843 = vmatmul.msk.f32.gmra.mxu2 %vm1347_vm7, %v3684_v63 }
0x15ec   :  { %6253 = vrcp.f32 %v3647_v61 }
0x15ed   :  { %5905 = vmatmul.msk.f32.gmra.mxu0 %vm10326_vm10, %v4441_v37  ;;  %vm10339_vm10 = vmmov %vm10233_vm0 }
0x15f2   :  { %v6254_v26 = vpop.eup %6253  ;;  %v8920_v29 = vpop.f32.mrf.mxu0 }
0x15f3   :  { %v3650_v22 = vpop.xlane.xlu2 %3649  ;;  %v3685_v59 = vmul.f32 %v6254_v26, %v8799_v23 }
0x15f4   :  { %6255 = vrcp.f32 %v3650_v22 }
0x15f5   :  { %5844 = vmatmul.msk.f32.gmra.mxu2 %vm1347_vm7, %v3685_v59  ;;  %5906 = vmatmul.msk.f32.gmra.mxu0 %vm10327_vm5, %v4442_v52  ;;  %vm10340_vm5 = vmmov %vm10233_vm0 }
0x15fa   :  { %v6256_v20 = vpop.eup %6255  ;;  %v8927_v2 = vpop.f32.mrf.mxu0 }
0x15fb   :  { %v3653_v35 = vpop.xlane.xlu1 %3652  ;;  %v3191_v62 = vpop.xlane.xlu2 %3190  ;;  %v3686_v13 = vmul.f32 %v6256_v20, %v8806_v19  ;;  %v4444_v19 = vmul.f32 %v8195_v42, %v8603_v25 }
0x15fc   :  { %6257 = vrcp.f32 %v3653_v35  ;;  %v3237_v23 = vsub.f32 %v8671_v56, %v3191_v62  ;;  %v3971_v35 = vmul.f32 %v8166_v47, %v8502_v16 }
0x15fd   :  { %5845 = vmatmul.msk.f32.gmra.mxu2 %vm1347_vm7, %v3686_v13  ;;  %5907 = vmatmul.msk.f32.gmra.mxu0 %vm10328_vm4, %v4443_v0  ;;  %vm10341_vm4 = vmmov %vm10233_vm0 }
0x15fe   :  { %v3253_v17 = vmul.f32 1.442695, %v3237_v23 }
0x1600   :  { %6259 = vpow2.f32 %v3253_v17 }
0x1602   :  { %v6258_v53 = vpop.eup %6257  ;;  %v8935_v8 = vpop.f32.mrf.mxu0 }
0x1603   :  { %v3194_v31 = vpop.xlane.xlu1 %3193  ;;  %v3200_v49 = vpop.xlane.xlu2 %3199  ;;  %v3687_v57 = vmul.f32 %v6258_v53, %v8813_v34 }
0x1604   :  { %v3238_v50 = vsub.f32 %v8674_v43, %v3194_v31  ;;  %v3656_v24 = vpop.xlane.xlu0 %3655  ;;  %v4445_v43 = vmul.f32 %v8195_v42, %v8617_v27  ;;  %v3240_v22 = vsub.f32 %v8680_v58, %v3200_v49 }
0x1605   :  { %6261 = vrcp.f32 %v3656_v24  ;;  %5846 = vmatmul.msk.f32.gmra.mxu2 %vm1347_vm7, %v3687_v57  ;;  %5908 = vmatmul.msk.f32.gmra.mxu0 %vm10329_vm2, %v4444_v19  ;;  %v3972_v57 = vmul.f32 %v8166_v47, %v8528_v44  ;;  %vm10342_vm2 = vmmov %vm10233_vm0 }
0x1606   :  { %v8943_v56 = vpop.eup %6259  ;;  %v3255_v3 = vmul.f32 1.442695, %v3238_v50  ;;  %v3259_v20 = vmul.f32 1.442695, %v3240_v22 }
0x1607   :  { %v3285_v10 = vsel %vm1347_vm7, %v8943_v56, 0.0 }
0x1608   :  { %6263 = vpow2.f32 %v3255_v3  ;;  %3286 = vadd.xlane.f32.xlu1 %v3285_v10 }
0x160a   :  { %v8947_v34 = vpop.f32.mrf.mxu0 }
0x160b   :  { %v6262_v5 = vpop.eup %6261  ;;  %v3209_v25 = vpop.xlane.xlu2 %3208 }
0x160c   :  { %v3197_v63 = vpop.xlane.xlu0 %3196  ;;  %v3688_v61 = vmul.f32 %v6262_v5, %v8823_v30  ;;  %v3203_v62 = vpop.xlane.xlu1 %3202 }
0x160d   :  { %v3239_v37 = vsub.f32 %v8677_v54, %v3197_v63  ;;  %5909 = vmatmul.msk.f32.gmra.mxu0 %vm10330_vm6, %v4445_v43  ;;  %v4446_v54 = vmul.f32 %v8195_v42, %v8631_v41  ;;  %v3241_v23 = vsub.f32 %v8683_v48, %v3203_v62  ;;  %v3973_v63 = vmul.f32 %v8166_v47, %v8541_v45  ;;  %vm10343_vm6 = vmmov %vm10233_vm0 }
0x160e   :  { %v8954_v26 = vpop.eup %6263  ;;  %5847 = vmatmul.msk.f32.gmra.mxu2 %vm1347_vm7, %v3688_v61  ;;  %v3974_v62 = vmul.f32 %v8166_v47, %v8578_v15 }
0x160f   :  { %v3257_v59 = vmul.f32 1.442695, %v3239_v37  ;;  %v3288_v52 = vsel %vm1347_vm7, %v8954_v26, 0.0  ;;  %v3261_v53 = vmul.f32 1.442695, %v3241_v23 }
0x1610   :  { %3289 = vadd.xlane.f32.xlu1 %v3288_v52 }
0x1611   :  { %6265 = vpow2.f32 %v3257_v59 }
0x1612   :  { %v8960_v27 = vpop.f32.mrf.mxu0  ;;  %6267 = vpow2.f32 %v3259_v20 }
0x1613   :  { %v3215_v30 = vpop.xlane.xlu2 %3214 }
0x1614   :  { %v3245_v13 = vsub.f32 %v8819_v46, %v3215_v30  ;;  %v3206_v46 = vpop.xlane.xlu0 %3205 }
0x1615   :  { %5910 = vmatmul.msk.f32.gmra.mxu0 %vm10331_vm3, %v4446_v54  ;;  %v3242_v24 = vsub.f32 %v8686_v36, %v3206_v46  ;;  %v3243_v36 = vsub.f32 %v8689_v40, %v3209_v25  ;;  %vm10344_vm3 = vmmov %vm10233_vm0 }
0x1616   :  { %v3269_v58 = vmul.f32 1.442695, %v3245_v13  ;;  %5876 = vmatmul.msk.f32.vlgmr.msrb.gmra.mxu2 %vm10332_vm9, %v3971_v35  ;;  %vm10345_vm9 = vmmov %vm10233_vm0 }
0x1617   :  { %v8969_v0 = vpop.eup %6265  ;;  %v3263_v5 = vmul.f32 1.442695, %v3242_v24  ;;  %v3265_v20 = vmul.f32 1.442695, %v3243_v36  ;;  %v3977_v36 = vmul.f32 %v8166_v47, %v8619_v7 }
0x1618   :  { %6269 = vpow2.f32 %v3269_v58  ;;  %v3291_v41 = vsel %vm1347_vm7, %v8969_v0, 0.0  ;;  %v8979_v19 = vpop.eup %6267 }
0x1619   :  { %3292 = vadd.xlane.f32.xlu1 %v3291_v41  ;;  %6271 = vpow2.f32 %v3261_v53 }
0x161a   :  { %v8974_v17 = vpop.f32.mrf.mxu0 }
0x161b   :  { %v3218_v31 = vpop.xlane.xlu2 %3217 }
0x161c   :  { %v3246_v49 = vsub.f32 %v8832_v38, %v3218_v31  ;;  %v3294_v38 = vsel %vm1347_vm7, %v8979_v19, 0.0  ;;  %v3212_v54 = vpop.xlane.xlu0 %3211 }
0x161d   :  { %v3244_v13 = vsub.f32 %v8695_v21, %v3212_v54 }
0x161e   :  { %v8981_v50 = vpop.eup %6269  ;;  %v3271_v48 = vmul.f32 1.442695, %v3246_v49  ;;  %5877 = vmatmul.msk.f32.gmra.mxu2 %vm10333_vm12, %v3972_v57  ;;  %v3976_v57 = vmul.f32 %v8166_v47, %v8605_v12  ;;  %vm10346_vm12 = vmmov %vm10233_vm0 }
0x161f   :  { %v3309_v3 = vsel %vm1347_vm7, %v8981_v50, 0.0  ;;  %v8993_v61 = vpop.eup %6271  ;;  %v3267_v41 = vmul.f32 1.442695, %v3244_v13  ;;  %v4447_v13 = vmul.f32 %v8195_v42, %v8502_v16 }
0x1620   :  { %6273 = vpow2.f32 %v3271_v48  ;;  %3310 = vadd.xlane.f32.xlu0 %v3309_v3  ;;  %v3297_v59 = vsel %vm1347_vm7, %v8993_v61, 0.0  ;;  %v4109_v3 = vsel %vm1347_vm7, %v8974_v17, -inf }
0x1621   :  { %3295 = vadd.xlane.f32.xlu1 %v3294_v38  ;;  %6275 = vpow2.f32 %v3263_v5 }
0x1622   :  { %v8989_v10 = vpop.f32.mrf.mxu0  ;;  %6277 = vpow2.f32 %v3265_v20  ;;  %v3978_v20 = vmul.f32 %v8166_v47, %v8633_v11 }
0x1623   :  { %v3221_v43 = vpop.xlane.xlu2 %3220 }
0x1624   :  { %v3247_v24 = vsub.f32 %v8848_v55, %v3221_v43  ;;  %v4112_v55 = vsel %vm1347_vm7, %v8989_v10, -inf  ;;  %v3234_v43 = vsel %vm1347_vm7, %v8898_v28, -inf }
0x1626   :  { %v8995_v37 = vpop.eup %6273  ;;  %5878 = vmatmul.msk.f32.gmra.mxu2 %vm10334_vm1, %v3973_v63  ;;  %v3273_v63 = vmul.f32 1.442695, %v3247_v24  ;;  %v4449_v24 = vmul.f32 %v8195_v42, %v8541_v45  ;;  %v4451_v45 = vmul.f32 %v8195_v42, %v8591_v14  ;;  %vm10348_vm1 = vmmov %vm10233_vm0 }
0x1627   :  { %v3312_v22 = vsel %vm1347_vm7, %v8995_v37, 0.0  ;;  %v9008_v40 = vpop.eup %6275 }
0x1628   :  { %3313 = vadd.xlane.f32.xlu2 %v3312_v22  ;;  %v3300_v58 = vsel %vm1347_vm7, %v9008_v40, 0.0  ;;  %v9018_v53 = vpop.eup %6277 }
0x1629   :  { %3298 = vadd.xlane.f32.xlu1 %v3297_v59  ;;  %v3303_v46 = vsel %vm1347_vm7, %v9018_v53, 0.0 }
0x162a   :  { %v9003_v52 = vpop.f32.mrf.mxu0 }
0x162b   :  { %v3224_v30 = vpop.xlane.xlu2 %3223  ;;  %v4115_v54 = vsel %vm1347_vm7, %v9003_v52, -inf }
0x162c   :  { %v3248_v35 = vsub.f32 %v8863_v18, %v3224_v30  ;;  %v3975_v18 = vmul.f32 %v8166_v47, %v8591_v14  ;;  %v4761_v14 = vmul.f32 %v8195_v42, %v8543_v9  ;;  %v4454_v9 = vmul.f32 %v8195_v42, %v8633_v11 }
0x162e   :  { %v3275_v25 = vmul.f32 1.442695, %v3248_v35  ;;  %5879 = vmatmul.msk.f32.gmra.mxu2 %vm10335_vm14, %v3974_v62  ;;  %vm10349_vm14 = vmmov %vm10233_vm0 }
0x1630   :  { %6279 = vpow2.f32 %v3275_v25  ;;  %v9063_v25 = vpop.f32.mrf.mxu2 }
0x1631   :  { %3301 = vadd.xlane.f32.xlu1 %v3300_v58  ;;  %6281 = vpow2.f32 %v3267_v41 }
0x1632   :  { %v9014_v23 = vpop.f32.mrf.mxu0  ;;  %6283 = vpow2.f32 %v3273_v63 }
0x1633   :  { %v4118_v47 = vsel %vm1347_vm7, %v9014_v23, -inf }
0x1636   :  { %v9020_v31 = vpop.eup %6279  ;;  %5880 = vmatmul.msk.f32.gmra.mxu2 %vm10336_vm15, %v3975_v18  ;;  %v4448_v18 = vmul.f32 %v8195_v42, %v8528_v44  ;;  %vm10350_vm15 = vmmov %vm10233_vm0 }
0x1637   :  { %v3318_v21 = vsel %vm1347_vm7, %v9020_v31, 0.0  ;;  %v9031_v48 = vpop.eup %6281 }
0x1638   :  { %3319 = vadd.xlane.f32.xlu0 %v3318_v21  ;;  %v3306_v38 = vsel %vm1347_vm7, %v9031_v48, 0.0  ;;  %v9054_v30 = vpop.eup %6283  ;;  %v9076_v21 = vpop.f32.mrf.mxu2 }
0x1639   :  { %3304 = vadd.xlane.f32.xlu1 %v3303_v46  ;;  %v3315_v35 = vsel %vm1347_vm7, %v9054_v30, 0.0 }
0x163a   :  { %v9027_v49 = vpop.f32.mrf.mxu0 }
0x163b   :  { %v4121_v16 = vsel %vm1347_vm7, %v9027_v49, -inf }
0x163e   :  { %5881 = vmatmul.msk.f32.gmra.mxu2 %vm10233_vm0, %v3976_v57 }
0x1640   :  { %4110 = vmax.xlane.f32.xlu0 %v4109_v3  ;;  %v9088_v44 = vpop.f32.mrf.mxu2 }
0x1641   :  { %3307 = vadd.xlane.f32.xlu1 %v3306_v38  ;;  %v4450_v38 = vmul.f32 %v8195_v42, %v8578_v15  ;;  %v4452_v15 = vmul.f32 %v8195_v42, %v8605_v12 }
0x1642   :  { %v9039_v5 = vpop.f32.mrf.mxu0 }
0x1643   :  { %v4124_v3 = vsel %vm1347_vm7, %v9039_v5, -inf }
0x1646   :  { %5882 = vmatmul.msk.f32.gmra.mxu2 %vm10337_vm8, %v3977_v36  ;;  %vm10351_vm8 = vmmov %vm10233_vm0 }
0x1648   :  { %4113 = vmax.xlane.f32.xlu0 %v4112_v55 }
0x1649   :  { %3235 = vmax.xlane.f32.xlu1 %v3234_v43 }
0x164a   :  { %v9048_v22 = vpop.f32.mrf.mxu0 }
0x164b   :  { %v4127_v59 = vsel %vm1347_vm7, %v9048_v22, -inf }
0x164c   :  { %4128 = vmax.xlane.f32.xlu2 %v4127_v59  ;;  %v9107_v59 = vpop.xlane.xlu2 %3226 }
0x164e   :  { %5883 = vmatmul.msk.f32.gmra.mxu2 %vm10338_vm11, %v3978_v20  ;;  %vm10352_vm11 = vmmov %vm10233_vm0 }
0x1650   :  { %4116 = vmax.xlane.f32.xlu0 %v4115_v54 }
0x1651   :  { %3316 = vadd.xlane.f32.xlu1 %v3315_v35 }
0x1652   :  { %v9061_v62 = vpop.f32.mrf.mxu0 }
0x1653   :  { %v4130_v58 = vsel %vm1347_vm7, %v9061_v62, -inf }
0x1656   :  { %5912 = vmatmul.msk.f32.vlgmr.msra.gmra.mxu2 %vm10339_vm10, %v4447_v13  ;;  %vm10354_vm10 = vmmov %vm10233_vm0 }
0x1658   :  { %4119 = vmax.xlane.f32.xlu0 %v4118_v47  ;;  %v4453_v47 = vmul.f32 %v8195_v42, %v8619_v7 }
0x1659   :  { %4131 = vmax.xlane.f32.xlu1 %v4130_v58  ;;  %v9121_v58 = vpop.xlane.xlu2 %3229 }
0x165a   :  { %v9072_v41 = vpop.f32.mrf.mxu0 }
0x165b   :  { %v4585_v36 = vsel %vm1347_vm7, %v9072_v41, -inf }
0x165e   :  { %5913 = vmatmul.msk.f32.gmra.mxu2 %vm10340_vm5, %v4448_v18  ;;  %vm10355_vm5 = vmmov %vm10233_vm0 }
0x1660   :  { %4122 = vmax.xlane.f32.xlu0 %v4121_v16 }
0x1662   :  { %v9081_v46 = vpop.f32.mrf.mxu0 }
0x1663   :  { %v4588_v57 = vsel %vm1347_vm7, %v9081_v46, -inf }
0x1664   :  { %4589 = vmax.xlane.f32.xlu2 %v4588_v57 }
0x1666   :  { %5914 = vmatmul.msk.f32.gmra.mxu2 %vm10341_vm4, %v4449_v24  ;;  %v9130_v24 = vpop.xlane.xlu2 %3232  ;;  %vm10356_vm4 = vmmov %vm10233_vm0 }
0x1668   :  { %4125 = vmax.xlane.f32.xlu0 %v4124_v3 }
0x166e   :  { %5915 = vmatmul.msk.f32.gmra.mxu2 %vm10342_vm2, %v4450_v38  ;;  %v9095_v63 = vpop.f32.mrf.mxu2  ;;  %vm10357_vm2 = vmmov %vm10233_vm0 }
0x1670   :  { %4586 = vmax.xlane.f32.xlu0 %v4585_v36 }
0x1676   :  { %5916 = vmatmul.msk.f32.gmra.mxu2 %vm10343_vm6, %v4451_v45  ;;  %vm10358_vm6 = vmmov %vm10233_vm0 }
0x1678   :  { %v9102_v55 = vpop.f32.mrf.mxu2 }
0x167b   :  { %v3287_v43 = vpop.xlane.xlu1 %3286 }
0x167c   :  { %6285 = vrcp.f32 %v3287_v43 }
0x167e   :  { %5917 = vmatmul.msk.f32.gmra.mxu2 %vm10344_vm3, %v4452_v15  ;;  %vm10359_vm3 = vmmov %vm10233_vm0 }
0x1680   :  { %v9109_v20 = vpop.f32.mrf.mxu2 }
0x1682   :  { %v6286_v54 = vpop.eup %6285 }
0x1683   :  { %v3349_v35 = vmul.f32 %v6286_v54, %v8943_v56  ;;  %v3290_v13 = vpop.xlane.xlu1 %3289 }
0x1684   :  { %6287 = vrcp.f32 %v3290_v13 }
0x1685   :  { %5849 = vmatmul.msk.f32.vlgmr.msrb.gmra.mxu1 %vm1347_vm7, %v3349_v35 }
0x1686   :  { %5918 = vmatmul.msk.f32.gmra.mxu2 %vm10345_vm9, %v4453_v47  ;;  %5920 = vmatpush.msk.msrb.mxu1 %vm1351_vm13, %v4761_v14  ;;  %vm10360_vm9 = vmmov %vm10233_vm0 }
0x1688   :  { %v9119_v12 = vpop.f32.mrf.mxu2 }
0x168a   :  { %v6288_v18 = vpop.eup %6287 }
0x168b   :  { %v3350_v56 = vmul.f32 %v6288_v18, %v8954_v26 }
0x168c   :  { %v3293_v16 = vpop.xlane.xlu1 %3292 }
0x168d   :  { %6289 = vrcp.f32 %v3293_v16  ;;  %5850 = vmatmul.msk.f32.gmra.mxu1 %vm1347_vm7, %v3350_v56 }
0x168e   :  { %5919 = vmatmul.msk.f32.gmra.mxu2 %vm10346_vm12, %v4454_v9  ;;  %vm10361_vm12 = vmmov %vm10233_vm0 }
0x1691   :  { %v9128_v7 = vpop.f32.mrf.mxu2 }
0x1693   :  { %v6290_v57 = vpop.eup %6289  ;;  %v3311_v3 = vpop.xlane.xlu0 %3310 }
0x1694   :  { %v3296_v38 = vpop.xlane.xlu1 %3295  ;;  %6291 = vrcp.f32 %v3311_v3  ;;  %v3351_v36 = vmul.f32 %v6290_v57, %v8969_v0  ;;  %v4762_v0 = vmul.f32 %v8195_v42, %v8546_v1 }
0x1695   :  { %6293 = vrcp.f32 %v3296_v38 }
0x1696   :  { %5851 = vmatmul.msk.f32.gmra.mxu1 %vm1347_vm7, %v3351_v36 }
0x1699   :  { %v9134_v26 = vpop.f32.mrf.mxu2 }
0x169a   :  { %v6292_v11 = vpop.eup %6291  ;;  %v4133_v45 = vsel %vm1347_vm7, %v9134_v26, -inf }
0x169b   :  { %v6294_v43 = vpop.eup %6293  ;;  %v3357_v15 = vmul.f32 %v6292_v11, %v8981_v50  ;;  %4134 = vmax.xlane.f32.xlu0 %v4133_v45  ;;  %v3314_v54 = vpop.xlane.xlu2 %3313 }
0x169c   :  { %v3299_v35 = vpop.xlane.xlu1 %3298  ;;  %6295 = vrcp.f32 %v3314_v54  ;;  %v3352_v13 = vmul.f32 %v6294_v43, %v8979_v19 }
0x169d   :  { %6297 = vrcp.f32 %v3299_v35  ;;  %5858 = vmatmul.msk.f32.vlgmr.msrb.gmra.mxu3 %vm1347_vm7, %v3357_v15 }
0x169e   :  { %5852 = vmatmul.msk.f32.gmra.mxu1 %vm1347_vm7, %v3352_v13  ;;  %5929 = vmatpush.msk.msrb.mxu3 %vm1351_vm13, %v4762_v0  ;;  %vm10347_vm13 = vmmov %vm10233_vm0 }
0x16a1   :  { %v9145_v14 = vpop.f32.mrf.mxu2 }
0x16a2   :  { %v6296_v47 = vpop.eup %6295  ;;  %v4136_v50 = vsel %vm1347_vm7, %v9145_v14, -inf }
0x16a3   :  { %v6298_v18 = vpop.eup %6297  ;;  %4137 = vmax.xlane.f32.xlu2 %v4136_v50  ;;  %v3358_v19 = vmul.f32 %v6296_v47, %v8995_v37 }
0x16a4   :  { %v3302_v56 = vpop.xlane.xlu1 %3301  ;;  %v3353_v42 = vmul.f32 %v6298_v18, %v8993_v61  ;;  %v9159_v61 = vpop.f32.mrf.mxu0 }
0x16a5   :  { %6299 = vrcp.f32 %v3302_v56  ;;  %5859 = vmatmul.msk.f32.gmra.mxu3 %vm1347_vm7, %v3358_v19  ;;  %v4591_v37 = vsel %vm1347_vm7, %v9159_v61, -inf }
0x16a6   :  { %5853 = vmatmul.msk.f32.gmra.mxu1 %vm1347_vm7, %v3353_v42 }
0x16a9   :  { %v9153_v1 = vpop.f32.mrf.mxu2 }
0x16aa   :  { %v4139_v16 = vsel %vm1347_vm7, %v9153_v1, -inf }
0x16ab   :  { %v6300_v9 = vpop.eup %6299  ;;  %4140 = vmax.xlane.f32.xlu1 %v4139_v16  ;;  %v3320_v57 = vpop.xlane.xlu0 %3319 }
0x16ac   :  { %v3305_v3 = vpop.xlane.xlu1 %3304  ;;  %v3354_v38 = vmul.f32 %v6300_v9, %v9008_v40 }
0x16ad   :  { %6301 = vrcp.f32 %v3305_v3 }
0x16ae   :  { %5854 = vmatmul.msk.f32.gmra.mxu1 %vm1347_vm7, %v3354_v38 }
0x16b3   :  { %v6302_v36 = vpop.eup %6301  ;;  %4592 = vmax.xlane.f32.xlu1 %v4591_v37  ;;  %v4111_v11 = vpop.xlane.xlu0 %4110 }
0x16b4   :  { %v3308_v45 = vpop.xlane.xlu1 %3307  ;;  %v4157_v43 = vsub.f32 %v8974_v17, %v4111_v11  ;;  %v3355_v15 = vmul.f32 %v6302_v36, %v9018_v53  ;;  %v3249_v17 = vsub.f32 %v8872_v60, %v9107_v59  ;;  %v3250_v59 = vsub.f32 %v8881_v32, %v9121_v58  ;;  %v9190_v11 = vpop.f32.mrf.mxu0 }
0x16b5   :  { %6303 = vrcp.f32 %v3308_v45 }
0x16b6   :  { %v4173_v54 = vmul.f32 1.442695, %v4157_v43  ;;  %5855 = vmatmul.msk.f32.gmra.mxu1 %vm1347_vm7, %v3355_v15  ;;  %v3277_v19 = vmul.f32 1.442695, %v3249_v17  ;;  %v3251_v43 = vsub.f32 %v8889_v51, %v9130_v24 }
0x16b8   :  { %6305 = vpow2.f32 %v4173_v54  ;;  %v4594_v54 = vsel %vm1347_vm7, %v9190_v11, -inf  ;;  %v3281_v51 = vmul.f32 1.442695, %v3251_v43 }
0x16bb   :  { %v6304_v40 = vpop.eup %6303  ;;  %v4114_v35 = vpop.xlane.xlu0 %4113 }
0x16bc   :  { %v4158_v13 = vsub.f32 %v8989_v10, %v4114_v35  ;;  %v9167_v0 = vpop.xlane.xlu1 %3235  ;;  %v3356_v47 = vmul.f32 %v6304_v40, %v9031_v48  ;;  %v9177_v10 = vpop.f32.mrf.mxu2 }
0x16bd   :  { %v4142_v9 = vsel %vm1347_vm7, %v9177_v10, -inf }
0x16be   :  { %v9170_v50 = vpop.eup %6305  ;;  %v4175_v18 = vmul.f32 1.442695, %v4158_v13  ;;  %5856 = vmatmul.msk.f32.gmra.mxu1 %vm1347_vm7, %v3356_v47 }
0x16bf   :  { %v4205_v53 = vsel %vm1347_vm7, %v9170_v50, 0.0 }
0x16c0   :  { %6307 = vpow2.f32 %v4175_v18  ;;  %4206 = vadd.xlane.f32.xlu0 %v4205_v53 }
0x16c3   :  { %v4117_v56 = vpop.xlane.xlu0 %4116 }
0x16c4   :  { %v4159_v42 = vsub.f32 %v9003_v52, %v4117_v56  ;;  %v3317_v48 = vpop.xlane.xlu1 %3316  ;;  %v3279_v52 = vmul.f32 1.442695, %v3250_v59  ;;  %v9205_v40 = vpop.f32.mrf.mxu2  ;;  %v3252_v59 = vsub.f32 %v8898_v28, %v9167_v0 }
0x16c5   :  { %6309 = vrcp.f32 %v3317_v48  ;;  %v4145_v53 = vsel %vm1347_vm7, %v9205_v40, -inf  ;;  %v4129_v56 = vpop.xlane.xlu2 %4128 }
0x16c6   :  { %v9180_v16 = vpop.eup %6307  ;;  %6311 = vpow2.f32 %v3277_v19  ;;  %v4177_v60 = vmul.f32 1.442695, %v4159_v42  ;;  %v3283_v28 = vmul.f32 1.442695, %v3252_v59 }
0x16c7   :  { %v4208_v3 = vsel %vm1347_vm7, %v9180_v16, 0.0 }
0x16c8   :  { %6313 = vpow2.f32 %v4177_v60  ;;  %4143 = vmax.xlane.f32.xlu0 %v4142_v9  ;;  %4209 = vadd.xlane.f32.xlu2 %v4208_v3  ;;  %v4163_v3 = vsub.f32 %v9048_v22, %v4129_v56 }
0x16c9   :  { %6315 = vrcp.f32 %v3320_v57 }
0x16ca   :  { %6317 = vpow2.f32 %v3279_v52  ;;  %v4185_v0 = vmul.f32 1.442695, %v4163_v3 }
0x16cb   :  { %v6310_v38 = vpop.eup %6309  ;;  %v4120_v37 = vpop.xlane.xlu0 %4119 }
0x16cc   :  { %v9188_v36 = vpop.eup %6311  ;;  %v4160_v45 = vsub.f32 %v9014_v23, %v4120_v37  ;;  %v3359_v32 = vmul.f32 %v6310_v38, %v9054_v30 }
0x16cd   :  { %v3321_v57 = vsel %vm1347_vm7, %v9188_v36, 0.0 }
0x16ce   :  { %v9194_v58 = vpop.eup %6313  ;;  %v4179_v15 = vmul.f32 1.442695, %v4160_v45  ;;  %5860 = vmatmul.msk.f32.gmra.mxu3 %vm1347_vm7, %v3359_v32  ;;  %v9234_v45 = vpop.f32.mrf.mxu0 }
0x16cf   :  { %v4211_v23 = vsel %vm1347_vm7, %v9194_v58, 0.0  ;;  %v6316_v30 = vpop.eup %6315  ;;  %v4132_v32 = vpop.xlane.xlu1 %4131 }
0x16d0   :  { %6319 = vpow2.f32 %v4179_v15  ;;  %3322 = vadd.xlane.f32.xlu2 %v3321_v57  ;;  %4595 = vmax.xlane.f32.xlu0 %v4594_v54  ;;  %v3360_v13 = vmul.f32 %v6316_v30, %v9020_v31  ;;  %v9209_v47 = vpop.eup %6317  ;;  %v4164_v15 = vsub.f32 %v9061_v62, %v4132_v32  ;;  %v4597_v54 = vsel %vm1347_vm7, %v9234_v45, -inf }
0x16d1   :  { %4212 = vadd.xlane.f32.xlu1 %v4211_v23  ;;  %6321 = vpow2.f32 %v3281_v51  ;;  %v3324_v31 = vsel %vm1347_vm7, %v9209_v47, 0.0 }
0x16d2   :  { %v4187_v51 = vmul.f32 1.442695, %v4164_v15 }
0x16d3   :  { %v4123_v24 = vpop.xlane.xlu0 %4122 }
0x16d4   :  { %v4161_v35 = vsub.f32 %v9027_v49, %v4123_v24  ;;  %v9220_v49 = vpop.f32.mrf.mxu2 }
0x16d6   :  { %v9211_v17 = vpop.eup %6319  ;;  %v4181_v18 = vmul.f32 1.442695, %v4161_v35  ;;  %5861 = vmatmul.msk.f32.gmra.mxu3 %vm1347_vm7, %v3360_v13  ;;  %v9249_v30 = vpop.f32.mrf.mxu0 }
0x16d7   :  { %v4214_v19 = vsel %vm1347_vm7, %v9211_v17, 0.0  ;;  %v9222_v48 = vpop.eup %6321 }
0x16d8   :  { %6323 = vpow2.f32 %v4181_v18  ;;  %4146 = vmax.xlane.f32.xlu2 %v4145_v53  ;;  %4215 = vadd.xlane.f32.xlu0 %v4214_v19  ;;  %v3327_v37 = vsel %vm1347_vm7, %v9222_v48, 0.0  ;;  %v4600_v18 = vsel %vm1347_vm7, %v9249_v30, -inf }
0x16d9   :  { %3325 = vadd.xlane.f32.xlu1 %v3324_v31 }
0x16db   :  { %v4126_v42 = vpop.xlane.xlu0 %4125 }
0x16dc   :  { %v4162_v60 = vsub.f32 %v9039_v5, %v4126_v42  ;;  %v4148_v5 = vsel %vm1347_vm7, %v9220_v49, -inf  ;;  %v9238_v22 = vpop.f32.mrf.mxu2 }
0x16dd   :  { %v4151_v57 = vsel %vm1347_vm7, %v9238_v22, -inf }
0x16de   :  { %v9227_v9 = vpop.eup %6323  ;;  %v4183_v38 = vmul.f32 1.442695, %v4162_v60  ;;  %v9263_v19 = vpop.f32.mrf.mxu0 }
0x16df   :  { %v4217_v52 = vsel %vm1347_vm7, %v9227_v9, 0.0  ;;  %v4603_v31 = vsel %vm1347_vm7, %v9263_v19, -inf }
0x16e0   :  { %6325 = vpow2.f32 %v4183_v38  ;;  %4218 = vadd.xlane.f32.xlu2 %v4217_v52  ;;  %3328 = vadd.xlane.f32.xlu0 %v3327_v37  ;;  %v4590_v52 = vpop.xlane.xlu2 %4589 }
0x16e1   :  { %4149 = vmax.xlane.f32.xlu1 %v4148_v5  ;;  %6327 = vpow2.f32 %v3283_v28 }
0x16e2   :  { %6329 = vpow2.f32 %v4185_v0 }
0x16e3   :  { %6331 = vpow2.f32 %v4187_v51  ;;  %v4587_v3 = vpop.xlane.xlu0 %4586 }
0x16e4   :  { %v9269_v42 = vpop.f32.mrf.mxu2  ;;  %v4633_v28 = vsub.f32 %v9072_v41, %v4587_v3 }
0x16e5   :  { %v4154_v60 = vsel %vm1347_vm7, %v9269_v42, -inf }
0x16e6   :  { %v9240_v43 = vpop.eup %6325  ;;  %v9273_v59 = vpop.f32.mrf.mxu0  ;;  %v4649_v32 = vmul.f32 1.442695, %v4633_v28 }
0x16e7   :  { %v4220_v23 = vsel %vm1347_vm7, %v9240_v43, 0.0  ;;  %v9251_v24 = vpop.eup %6327  ;;  %v4606_v38 = vsel %vm1347_vm7, %v9273_v59, -inf }
0x16e8   :  { %4152 = vmax.xlane.f32.xlu0 %v4151_v57  ;;  %4598 = vmax.xlane.f32.xlu2 %v4597_v54  ;;  %v9253_v35 = vpop.eup %6329  ;;  %v3330_v13 = vsel %vm1347_vm7, %v9251_v24, 0.0 }
0x16e9   :  { %4221 = vadd.xlane.f32.xlu1 %v4220_v23  ;;  %v4223_v62 = vsel %vm1347_vm7, %v9253_v35, 0.0  ;;  %v9261_v53 = vpop.eup %6331  ;;  %v4634_v23 = vsub.f32 %v9081_v46, %v4590_v52 }
0x16ea   :  { %v4226_v56 = vsel %vm1347_vm7, %v9261_v53, 0.0 }
0x16eb   :  { %v4651_v41 = vmul.f32 1.442695, %v4634_v23 }
0x16ec   :  { %v9283_v51 = vpop.f32.mrf.mxu2 }
0x16f0   :  { %4224 = vadd.xlane.f32.xlu0 %v4223_v62  ;;  %3331 = vadd.xlane.f32.xlu2 %v3330_v13 }
0x16f1   :  { %4601 = vmax.xlane.f32.xlu1 %v4600_v18 }
0x16f4   :  { %v9296_v3 = vpop.f32.mrf.mxu2 }
0x16f8   :  { %4604 = vmax.xlane.f32.xlu0 %v4603_v31  ;;  %4227 = vadd.xlane.f32.xlu2 %v4226_v56 }
0x1700   :  { %4155 = vmax.xlane.f32.xlu2 %v4154_v60 }
0x1708   :  { %4607 = vmax.xlane.f32.xlu2 %v4606_v38 }
0x170e   :  { %v4135_v37 = vpop.xlane.xlu0 %4134 }
0x170f   :  { %v4165_v5 = vsub.f32 %v9134_v26, %v4135_v37 }
0x1711   :  { %v4189_v0 = vmul.f32 1.442695, %v4165_v5 }
0x1713   :  { %6333 = vpow2.f32 %v4189_v0  ;;  %v4609_v0 = vsel %vm1347_vm7, %v9283_v51, -inf }
0x1714   :  { %6335 = vpow2.f32 %v4649_v32 }
0x1716   :  { %v4138_v15 = vpop.xlane.xlu2 %4137 }
0x1717   :  { %v4166_v57 = vsub.f32 %v9145_v14, %v4138_v15  ;;  %v9309_v15 = vpop.f32.mrf.mxu2 }
0x1719   :  { %v9280_v54 = vpop.eup %6333  ;;  %v4191_v62 = vmul.f32 1.442695, %v4166_v57 }
0x171a   :  { %v4229_v13 = vsel %vm1347_vm7, %v9280_v54, 0.0  ;;  %v9287_v18 = vpop.eup %6335 }
0x171b   :  { %6337 = vpow2.f32 %v4191_v62  ;;  %4230 = vadd.xlane.f32.xlu1 %v4229_v13  ;;  %v4681_v60 = vsel %vm1347_vm7, %v9287_v18, 0.0 }
0x171c   :  { %6339 = vpow2.f32 %v4651_v41 }
0x171e   :  { %v4141_v26 = vpop.xlane.xlu1 %4140 }
0x171f   :  { %v4167_v31 = vsub.f32 %v9153_v1, %v4141_v26  ;;  %v9317_v13 = vpop.f32.mrf.mxu2  ;;  %v4615_v26 = vsel %vm1347_vm7, %v9309_v15, -inf }
0x1721   :  { %v9290_v14 = vpop.eup %6337  ;;  %v4193_v56 = vmul.f32 1.442695, %v4167_v31 }
0x1722   :  { %v4232_v46 = vsel %vm1347_vm7, %v9290_v14, 0.0  ;;  %v9298_v52 = vpop.eup %6339 }
0x1723   :  { %6341 = vpow2.f32 %v4193_v56  ;;  %4233 = vadd.xlane.f32.xlu0 %v4232_v46  ;;  %4682 = vadd.xlane.f32.xlu1 %v4681_v60  ;;  %v4684_v28 = vsel %vm1347_vm7, %v9298_v52, 0.0 }
0x1726   :  { %v4593_v38 = vpop.xlane.xlu1 %4592 }
0x1727   :  { %v4635_v1 = vsub.f32 %v9159_v61, %v4593_v38  ;;  %v4612_v61 = vsel %vm1347_vm7, %v9296_v3, -inf }
0x1729   :  { %v9301_v37 = vpop.eup %6341  ;;  %v4653_v5 = vmul.f32 1.442695, %v4635_v1  ;;  %v9324_v1 = vpop.f32.mrf.mxu2 }
0x172a   :  { %v4235_v32 = vsel %vm1347_vm7, %v9301_v37, 0.0 }
0x172b   :  { %6343 = vpow2.f32 %v4653_v5  ;;  %4685 = vadd.xlane.f32.xlu0 %v4684_v28  ;;  %4610 = vmax.xlane.f32.xlu1 %v4609_v0  ;;  %v4618_v5 = vsel %vm1347_vm7, %v9317_v13, -inf }
0x172c   :  { %4236 = vadd.xlane.f32.xlu2 %v4235_v32 }
0x1731   :  { %v9311_v57 = vpop.eup %6343 }
0x1732   :  { %v4687_v23 = vsel %vm1347_vm7, %v9311_v57, 0.0 }
0x1733   :  { %4613 = vmax.xlane.f32.xlu1 %v4612_v61  ;;  %4688 = vadd.xlane.f32.xlu0 %v4687_v23  ;;  %v4207_v62 = vpop.xlane.xlu0 %4206 }
0x1734   :  { %6345 = vrcp.f32 %v4207_v62 }
0x173a   :  { %v6346_v41 = vpop.eup %6345 }
0x173b   :  { %v4269_v31 = vmul.f32 %v6346_v41, %v9170_v50  ;;  %4616 = vmax.xlane.f32.xlu1 %v4615_v26  ;;  %v4144_v56 = vpop.xlane.xlu0 %4143  ;;  %v4210_v60 = vpop.xlane.xlu2 %4209  ;;  %v4621_v26 = vsel %vm1347_vm7, %v9324_v1, -inf }
0x173c   :  { %v4168_v46 = vsub.f32 %v9177_v10, %v4144_v56  ;;  %6347 = vrcp.f32 %v4210_v60 }
0x173d   :  { %5885 = vmatmul.msk.f32.vlgmr.msra.gmra.mxu1 %vm1347_vm7, %v4269_v31 }
0x173e   :  { %v4195_v38 = vmul.f32 1.442695, %v4168_v46 }
0x1740   :  { %6349 = vpow2.f32 %v4195_v38 }
0x1742   :  { %v6348_v28 = vpop.eup %6347 }
0x1743   :  { %4619 = vmax.xlane.f32.xlu1 %v4618_v5  ;;  %v4596_v0 = vpop.xlane.xlu0 %4595  ;;  %v3323_v32 = vpop.xlane.xlu2 %3322  ;;  %v4270_v10 = vmul.f32 %v6348_v28, %v9180_v16 }
0x1744   :  { %v4636_v50 = vsub.f32 %v9190_v11, %v4596_v0  ;;  %v4213_v61 = vpop.xlane.xlu1 %4212  ;;  %6351 = vrcp.f32 %v3323_v32  ;;  %v9337_v11 = vpop.f32.mrf.mxu2 }
0x1745   :  { %6353 = vrcp.f32 %v4213_v61  ;;  %5886 = vmatmul.msk.f32.gmra.mxu1 %vm1347_vm7, %v4270_v10 }
0x1746   :  { %v9330_v23 = vpop.eup %6349  ;;  %v4655_v62 = vmul.f32 1.442695, %v4636_v50 }
0x1747   :  { %v4238_v41 = vsel %vm1347_vm7, %v9330_v23, 0.0 }
0x1748   :  { %6355 = vpow2.f32 %v4655_v62  ;;  %4239 = vadd.xlane.f32.xlu2 %v4238_v41 }
0x174a   :  { %v6352_v31 = vpop.eup %6351 }
0x174b   :  { %4622 = vmax.xlane.f32.xlu1 %v4621_v26  ;;  %v4216_v16 = vpop.xlane.xlu0 %4215  ;;  %v6354_v56 = vpop.eup %6353  ;;  %v3361_v38 = vmul.f32 %v6352_v31, %v9188_v36  ;;  %v4624_v36 = vsel %vm1347_vm7, %v9337_v11, -inf }
0x174c   :  { %v4147_v46 = vpop.xlane.xlu2 %4146  ;;  %6357 = vrcp.f32 %v4216_v16  ;;  %v3326_v60 = vpop.xlane.xlu1 %3325  ;;  %v4271_v28 = vmul.f32 %v6354_v56, %v9194_v58 }
0x174d   :  { %v4169_v5 = vsub.f32 %v9205_v40, %v4147_v46  ;;  %6359 = vrcp.f32 %v3326_v60  ;;  %5862 = vmatmul.msk.f32.gmra.mxu3 %vm1347_vm7, %v3361_v38  ;;  %v9352_v31 = vpop.f32.mrf.mxu2 }
0x174e   :  { %v9342_v0 = vpop.eup %6355  ;;  %5887 = vmatmul.msk.f32.gmra.mxu1 %vm1347_vm7, %v4271_v28 }
0x174f   :  { %v4197_v32 = vmul.f32 1.442695, %v4169_v5  ;;  %v4690_v50 = vsel %vm1347_vm7, %v9342_v0, 0.0 }
0x1750   :  { %4691 = vadd.xlane.f32.xlu0 %v4690_v50 }
0x1751   :  { %6361 = vpow2.f32 %v4197_v32 }
0x1752   :  { %v6358_v61 = vpop.eup %6357 }
0x1753   :  { %v6360_v40 = vpop.eup %6359  ;;  %4625 = vmax.xlane.f32.xlu1 %v4624_v36  ;;  %v3329_v10 = vpop.xlane.xlu0 %3328  ;;  %v4272_v58 = vmul.f32 %v6358_v61, %v9211_v17 }
0x1754   :  { %v4219_v62 = vpop.xlane.xlu2 %4218  ;;  %6363 = vrcp.f32 %v3329_v10  ;;  %v4150_v41 = vpop.xlane.xlu1 %4149  ;;  %v3362_v26 = vmul.f32 %v6360_v40, %v9209_v47  ;;  %v4627_v47 = vsel %vm1347_vm7, %v9352_v31, -inf }
0x1755   :  { %6365 = vrcp.f32 %v4219_v62  ;;  %v4170_v16 = vsub.f32 %v9220_v49, %v4150_v41 }
0x1756   :  { %5863 = vmatmul.msk.f32.gmra.mxu3 %vm1347_vm7, %v3362_v26  ;;  %5888 = vmatmul.msk.f32.gmra.mxu1 %vm1347_vm7, %v4272_v58  ;;  %v9370_v58 = vpop.f32.mrf.mxu2 }
0x1757   :  { %v9356_v56 = vpop.eup %6361  ;;  %v4199_v46 = vmul.f32 1.442695, %v4170_v16 }
0x1758   :  { %v4241_v17 = vsel %vm1347_vm7, %v9356_v56, 0.0 }
0x1759   :  { %6367 = vpow2.f32 %v4199_v46  ;;  %4242 = vadd.xlane.f32.xlu2 %v4241_v17 }
0x175a   :  { %v6364_v60 = vpop.eup %6363 }
0x175b   :  { %v6366_v38 = vpop.eup %6365  ;;  %4628 = vmax.xlane.f32.xlu1 %v4627_v47  ;;  %v4153_v5 = vpop.xlane.xlu0 %4152  ;;  %v3363_v49 = vmul.f32 %v6364_v60, %v9222_v48 }
0x175c   :  { %v4171_v28 = vsub.f32 %v9238_v22, %v4153_v5  ;;  %v4599_v32 = vpop.xlane.xlu2 %4598  ;;  %v4222_v50 = vpop.xlane.xlu1 %4221  ;;  %v4273_v61 = vmul.f32 %v6366_v38, %v9227_v9  ;;  %v4630_v9 = vsel %vm1347_vm7, %v9370_v58, -inf }
0x175d   :  { %v4637_v36 = vsub.f32 %v9234_v45, %v4599_v32  ;;  %6369 = vrcp.f32 %v4222_v50 }
0x175e   :  { %v4201_v40 = vmul.f32 1.442695, %v4171_v28  ;;  %5864 = vmatmul.msk.f32.gmra.mxu3 %vm1347_vm7, %v3363_v49  ;;  %5889 = vmatmul.msk.f32.gmra.mxu1 %vm1347_vm7, %v4273_v61  ;;  %v9388_v28 = vpop.f32.mrf.mxu1 }
0x175f   :  { %v9368_v10 = vpop.eup %6367  ;;  %v4657_v62 = vmul.f32 1.442695, %v4637_v36 }
0x1760   :  { %6371 = vpow2.f32 %v4201_v40  ;;  %v4244_v48 = vsel %vm1347_vm7, %v9368_v10, 0.0 }
0x1761   :  { %6373 = vpow2.f32 %v4657_v62  ;;  %4245 = vadd.xlane.f32.xlu2 %v4244_v48 }
0x1763   :  { %v6370_v45 = vpop.eup %6369  ;;  %4631 = vmax.xlane.f32.xlu1 %v4630_v9  ;;  %v4225_v22 = vpop.xlane.xlu0 %4224 }
0x1764   :  { %6375 = vrcp.f32 %v4225_v22  ;;  %v3332_v41 = vpop.xlane.xlu2 %3331  ;;  %v4602_v26 = vpop.xlane.xlu1 %4601  ;;  %v4274_v16 = vmul.f32 %v6370_v45, %v9240_v43 }
0x1765   :  { %6377 = vrcp.f32 %v3332_v41  ;;  %v4638_v46 = vsub.f32 %v9249_v30, %v4602_v26 }
0x1766   :  { %v9379_v17 = vpop.eup %6371  ;;  %5890 = vmatmul.msk.f32.gmra.mxu1 %vm1347_vm7, %v4274_v16  ;;  %v9400_v45 = vpop.f32.mrf.mxu1 }
0x1767   :  { %v9381_v60 = vpop.eup %6373  ;;  %v4659_v47 = vmul.f32 1.442695, %v4638_v46  ;;  %v4247_v38 = vsel %vm1347_vm7, %v9379_v17, 0.0 }
0x1768   :  { %v4693_v5 = vsel %vm1347_vm7, %v9381_v60, 0.0 }
0x1769   :  { %6379 = vpow2.f32 %v4659_v47  ;;  %4694 = vadd.xlane.f32.xlu0 %v4693_v5  ;;  %4248 = vadd.xlane.f32.xlu2 %v4247_v38 }
0x176a   :  { %v6376_v43 = vpop.eup %6375 }
0x176b   :  { %v6378_v49 = vpop.eup %6377  ;;  %v4605_v30 = vpop.xlane.xlu0 %4604  ;;  %v4275_v32 = vmul.f32 %v6376_v43, %v9253_v35 }
0x176c   :  { %v4639_v50 = vsub.f32 %v9263_v19, %v4605_v30  ;;  %v4228_v61 = vpop.xlane.xlu2 %4227  ;;  %v3364_v36 = vmul.f32 %v6378_v49, %v9251_v24 }
0x176d   :  { %6381 = vrcp.f32 %v4228_v61 }
0x176e   :  { %v4661_v40 = vmul.f32 1.442695, %v4639_v50  ;;  %5865 = vmatmul.msk.f32.gmra.mxu3 %vm1347_vm7, %v3364_v36  ;;  %5891 = vmatmul.msk.f32.gmra.mxu1 %vm1347_vm7, %v4275_v32 }
0x176f   :  { %v9394_v62 = vpop.eup %6379 }
0x1770   :  { %6383 = vpow2.f32 %v4661_v40  ;;  %v4696_v48 = vsel %vm1347_vm7, %v9394_v62, 0.0 }
0x1771   :  { %4697 = vadd.xlane.f32.xlu0 %v4696_v48 }
0x1773   :  { %v6382_v9 = vpop.eup %6381 }
0x1774   :  { %v4156_v35 = vpop.xlane.xlu2 %4155  ;;  %v4276_v19 = vmul.f32 %v6382_v9, %v9261_v53  ;;  %v9411_v53 = vpop.f32.mrf.mxu1 }
0x1775   :  { %v4172_v24 = vsub.f32 %v9269_v42, %v4156_v35 }
0x1776   :  { %v9403_v22 = vpop.eup %6383  ;;  %5892 = vmatmul.msk.f32.gmra.mxu1 %vm1347_vm7, %v4276_v19 }
0x1777   :  { %v4203_v41 = vmul.f32 1.442695, %v4172_v24  ;;  %v4699_v26 = vsel %vm1347_vm7, %v9403_v22, 0.0 }
0x1779   :  { %6385 = vpow2.f32 %v4203_v41  ;;  %4700 = vadd.xlane.f32.xlu0 %v4699_v26 }
0x177c   :  { %v4608_v16 = vpop.xlane.xlu2 %4607  ;;  %v9419_v49 = vpop.f32.mrf.mxu1 }
0x177d   :  { %v4640_v46 = vsub.f32 %v9273_v59, %v4608_v16 }
0x177f   :  { %v9409_v47 = vpop.eup %6385  ;;  %v4663_v38 = vmul.f32 1.442695, %v4640_v46 }
0x1780   :  { %v4250_v42 = vsel %vm1347_vm7, %v9409_v47, 0.0 }
0x1781   :  { %6387 = vpow2.f32 %v4663_v38  ;;  %4251 = vadd.xlane.f32.xlu2 %v4250_v42 }
0x1784   :  { %v9421_v59 = vpop.f32.mrf.mxu1 }
0x1787   :  { %v9415_v5 = vpop.eup %6387 }
0x1788   :  { %v4702_v43 = vsel %vm1347_vm7, %v9415_v5, 0.0 }
0x1789   :  { %4703 = vadd.xlane.f32.xlu0 %v4702_v43 }
0x178c   :  { %v9425_v48 = vpop.f32.mrf.mxu1 }
0x178e   :  { %v4231_v30 = vpop.xlane.xlu1 %4230 }
0x178f   :  { %6389 = vrcp.f32 %v4231_v30 }
0x1795   :  { %v6390_v32 = vpop.eup %6389 }
0x1796   :  { %v4277_v50 = vmul.f32 %v6390_v32, %v9280_v54  ;;  %v4234_v61 = vpop.xlane.xlu0 %4233  ;;  %v4683_v36 = vpop.xlane.xlu1 %4682 }
0x1797   :  { %6391 = vrcp.f32 %v4234_v61  ;;  %v9435_v32 = vpop.f32.mrf.mxu1 }
0x1798   :  { %6393 = vrcp.f32 %v4683_v36  ;;  %5894 = vmatmul.msk.f32.vlgmr.msra.gmra.mxu3 %vm1347_vm7, %v4277_v50 }
0x179d   :  { %v6392_v40 = vpop.eup %6391 }
0x179e   :  { %v6394_v9 = vpop.eup %6393  ;;  %v4686_v35 = vpop.xlane.xlu0 %4685  ;;  %v4278_v24 = vmul.f32 %v6392_v40, %v9290_v14 }
0x179f   :  { %v4611_v19 = vpop.xlane.xlu1 %4610  ;;  %v4745_v41 = vmul.f32 %v6394_v9, %v9287_v18  ;;  %6395 = vrcp.f32 %v4686_v35  ;;  %v4237_v26 = vpop.xlane.xlu2 %4236 }
0x17a0   :  { %v4641_v54 = vsub.f32 %v9283_v51, %v4611_v19  ;;  %6397 = vrcp.f32 %v4237_v26  ;;  %5895 = vmatmul.msk.f32.gmra.mxu3 %vm1347_vm7, %v4278_v24  ;;  %v9448_v35 = vpop.f32.mrf.mxu1 }
0x17a1   :  { %5921 = vmatmul.msk.f32.vlgmr.msrb.gmra.mxu1 %vm1347_vm7, %v4745_v41 }
0x17a2   :  { %v4665_v16 = vmul.f32 1.442695, %v4641_v54 }
0x17a4   :  { %6399 = vpow2.f32 %v4665_v16 }
0x17a5   :  { %v6396_v46 = vpop.eup %6395 }
0x17a6   :  { %v6398_v38 = vpop.eup %6397  ;;  %v4689_v42 = vpop.xlane.xlu0 %4688  ;;  %v4746_v30 = vmul.f32 %v6396_v46, %v9298_v52 }
0x17a7   :  { %v4614_v43 = vpop.xlane.xlu1 %4613  ;;  %6401 = vrcp.f32 %v4689_v42  ;;  %v4279_v14 = vmul.f32 %v6398_v38, %v9301_v37 }
0x17a8   :  { %v4642_v18 = vsub.f32 %v9296_v3, %v4614_v43 }
0x17a9   :  { %5896 = vmatmul.msk.f32.gmra.mxu3 %vm1347_vm7, %v4279_v14  ;;  %5922 = vmatmul.msk.f32.gmra.mxu1 %vm1347_vm7, %v4746_v30 }
0x17aa   :  { %v9437_v51 = vpop.eup %6399  ;;  %v4667_v50 = vmul.f32 1.442695, %v4642_v18 }
0x17ab   :  { %v4705_v61 = vsel %vm1347_vm7, %v9437_v51, 0.0 }
0x17ac   :  { %6403 = vpow2.f32 %v4667_v50  ;;  %4706 = vadd.xlane.f32.xlu2 %v4705_v61 }
0x17ad   :  { %v6402_v52 = vpop.eup %6401 }
0x17ae   :  { %v4747_v3 = vmul.f32 %v6402_v52, %v9311_v57  ;;  %v120_v52 = vld [vmem:[#allocation2 + $0x158] sm:$0xff] }
0x17af   :  { %v4617_v36 = vpop.xlane.xlu1 %4616  ;;  %4976 = vmatpush.msrb.mxu0 %v120_v52 }
0x17b0   :  { %v4643_v37 = vsub.f32 %v9309_v15, %v4617_v36 }
0x17b1   :  { %5923 = vmatmul.msk.f32.gmra.mxu1 %vm1347_vm7, %v4747_v3 }
0x17b2   :  { %v9445_v40 = vpop.eup %6403  ;;  %v4669_v9 = vmul.f32 1.442695, %v4643_v37 }
0x17b3   :  { %v4708_v19 = vsel %vm1347_vm7, %v9445_v40, 0.0 }
0x17b4   :  { %6405 = vpow2.f32 %v4669_v9  ;;  %4709 = vadd.xlane.f32.xlu0 %v4708_v19 }
0x17b7   :  { %v4620_v24 = vpop.xlane.xlu1 %4619 }
0x17b8   :  { %v4644_v41 = vsub.f32 %v9317_v13, %v4620_v24 }
0x17ba   :  { %v9453_v26 = vpop.eup %6405  ;;  %v4671_v57 = vmul.f32 1.442695, %v4644_v41  ;;  %v9455_v54 = vpop.f32.mrf.mxu1 }
0x17bb   :  { %v4711_v15 = vsel %vm1347_vm7, %v9453_v26, 0.0  ;;  %v4240_v16 = vpop.xlane.xlu2 %4239 }
0x17bc   :  { %6407 = vpow2.f32 %v4671_v57  ;;  %4712 = vadd.xlane.f32.xlu2 %v4711_v15 }
0x17bd   :  { %6409 = vrcp.f32 %v4240_v16 }
0x17bf   :  { %v4623_v46 = vpop.xlane.xlu1 %4622 }
0x17c0   :  { %v4645_v38 = vsub.f32 %v9324_v1, %v4623_v46 }
0x17c2   :  { %v9460_v42 = vpop.eup %6407  ;;  %v4673_v43 = vmul.f32 1.442695, %v4645_v38  ;;  %v9464_v18 = vpop.f32.mrf.mxu1  ;;  %v3881_v38 = vadd.f32 %v9419_v49, %v8920_v29 }
0x17c3   :  { %v6410_v30 = vpop.eup %6409  ;;  %v4714_v13 = vsel %vm1347_vm7, %v9460_v42, 0.0  ;;  %v4692_v14 = vpop.xlane.xlu0 %4691 }
0x17c4   :  { %6411 = vpow2.f32 %v4673_v43  ;;  %4715 = vadd.xlane.f32.xlu1 %v4714_v13  ;;  %v4280_v50 = vmul.f32 %v6410_v30, %v9330_v23 }
0x17c5   :  { %6413 = vrcp.f32 %v4692_v14  ;;  %v119_v14 = vld [vmem:[#allocation2 + $0x150] sm:$0xff] }
0x17c6   :  { %5897 = vmatmul.msk.f32.gmra.mxu3 %vm1347_vm7, %v4280_v50  ;;  %4977 = vmatpush.msrb.mxu0 %v119_v14 }
0x17c7   :  { %v4626_v61 = vpop.xlane.xlu1 %4625 }
0x17c8   :  { %v4646_v1 = vsub.f32 %v9337_v11, %v4626_v61 }
0x17ca   :  { %v9469_v36 = vpop.eup %6411  ;;  %v4675_v3 = vmul.f32 1.442695, %v4646_v1 }
0x17cb   :  { %v6414_v37 = vpop.eup %6413  ;;  %v4717_v9 = vsel %vm1347_vm7, %v9469_v36, 0.0  ;;  %v9474_v23 = vpop.f32.mrf.mxu1 }
0x17cc   :  { %6415 = vpow2.f32 %v4675_v3  ;;  %4718 = vadd.xlane.f32.xlu0 %v4717_v9  ;;  %v4748_v19 = vmul.f32 %v6414_v37, %v9342_v0  ;;  %v4243_v24 = vpop.xlane.xlu2 %4242 }
0x17cd   :  { %6417 = vrcp.f32 %v4243_v24 }
0x17ce   :  { %5924 = vmatmul.msk.f32.gmra.mxu1 %vm1347_vm7, %v4748_v19 }
0x17cf   :  { %v4629_v11 = vpop.xlane.xlu1 %4628 }
0x17d0   :  { %v4647_v41 = vsub.f32 %v9352_v31, %v4629_v11 }
0x17d2   :  { %v9478_v57 = vpop.eup %6415  ;;  %v4677_v15 = vmul.f32 1.442695, %v4647_v41 }
0x17d3   :  { %v4720_v16 = vsel %vm1347_vm7, %v9478_v57, 0.0  ;;  %v6418_v46 = vpop.eup %6417  ;;  %v4340_v0 = vpop.f32.mrf.mxu1 }
0x17d4   :  { %6419 = vpow2.f32 %v4677_v15  ;;  %4721 = vadd.xlane.f32.xlu2 %v4720_v16  ;;  %v4246_v43 = vpop.xlane.xlu2 %4245  ;;  %v4281_v30 = vmul.f32 %v6418_v46, %v9356_v56  ;;  %v9485_v13 = vadd.f32 %v4340_v0, %v3881_v38  ;;  %v3884_v56 = vadd.f32 %v9421_v59, %v8927_v2  ;;  %v118_v38 = vld [vmem:[#allocation2 + $0x148] sm:$0xff]  ;;  %v117_v0 = vld [vmem:[#allocation2 + $0x140] sm:$0xff] }
0x17d5   :  { %6421 = vrcp.f32 %v4246_v43  ;;  %v3887_v2 = vadd.f32 %v9425_v48, %v8935_v8  ;;  %4978 = vmatpush.msrb.mxu0 %v118_v38  ;;  %v3890_v48 = vadd.f32 %v9435_v32, %v8947_v34 }
0x17d6   :  { %5898 = vmatmul.msk.f32.gmra.mxu3 %vm1347_vm7, %v4281_v30 }
0x17d7   :  { %v4632_v31 = vpop.xlane.xlu1 %4631  ;;  %4979 = vmatpush.msrb.mxu0 %v117_v0 }
0x17d8   :  { %v4648_v50 = vsub.f32 %v9370_v58, %v4632_v31 }
0x17da   :  { %v9489_v61 = vpop.eup %6419  ;;  %v4679_v1 = vmul.f32 1.442695, %v4648_v50 }
0x17db   :  { %v4723_v29 = vsel %vm1347_vm7, %v9489_v61, 0.0  ;;  %v6422_v49 = vpop.eup %6421  ;;  %v4343_v52 = vpop.f32.mrf.mxu1 }
0x17dc   :  { %6423 = vpow2.f32 %v4679_v1  ;;  %4724 = vadd.xlane.f32.xlu1 %v4723_v29  ;;  %v4695_v3 = vpop.xlane.xlu0 %4694  ;;  %v4282_v37 = vmul.f32 %v6422_v49, %v9368_v10  ;;  %v9496_v9 = vadd.f32 %v4343_v52, %v3884_v56  ;;  %v4249_v58 = vpop.xlane.xlu2 %4248 }
0x17dd   :  { %6425 = vrcp.f32 %v4695_v3  ;;  %v9527_v56 = vpop.f32.mrf.mxu3 }
0x17de   :  { %6427 = vrcp.f32 %v4249_v58  ;;  %5899 = vmatmul.msk.f32.gmra.mxu3 %vm1347_vm7, %v4282_v37 }
0x17e2   :  { %v9499_v19 = vpop.eup %6423 }
0x17e3   :  { %v4726_v24 = vsel %vm1347_vm7, %v9499_v19, 0.0  ;;  %v6426_v11 = vpop.eup %6425  ;;  %v4346_v41 = vpop.f32.mrf.mxu1 }
0x17e4   :  { %4727 = vadd.xlane.f32.xlu0 %v4726_v24  ;;  %v6428_v59 = vpop.eup %6427  ;;  %v4698_v10 = vpop.xlane.xlu0 %4697  ;;  %v4749_v15 = vmul.f32 %v6426_v11, %v9381_v60  ;;  %v9506_v16 = vadd.f32 %v4346_v41, %v3887_v2 }
0x17e5   :  { %6429 = vrcp.f32 %v4698_v10  ;;  %v4283_v46 = vmul.f32 %v6428_v59, %v9379_v17  ;;  %v9533_v24 = vpop.f32.mrf.mxu3 }
0x17e6   :  { %5925 = vmatmul.msk.f32.gmra.mxu1 %vm1347_vm7, %v4749_v15 }
0x17e7   :  { %5900 = vmatmul.msk.f32.gmra.mxu3 %vm1347_vm7, %v4283_v46 }
0x17eb   :  { %v6430_v8 = vpop.eup %6429  ;;  %v4349_v43 = vpop.f32.mrf.mxu1 }
0x17ec   :  { %v4701_v30 = vpop.xlane.xlu0 %4700  ;;  %v4750_v60 = vmul.f32 %v6430_v8, %v9394_v62  ;;  %v9514_v31 = vadd.f32 %v4349_v43, %v3890_v48 }
0x17ed   :  { %6431 = vrcp.f32 %v4701_v30 }
0x17ee   :  { %5926 = vmatmul.msk.f32.gmra.mxu1 %vm1347_vm7, %v4750_v60 }
0x17f3   :  { %v6432_v17 = vpop.eup %6431  ;;  %v9523_v49 = vpop.f32.mrf.mxu1 }
0x17f4   :  { %v4252_v14 = vpop.xlane.xlu2 %4251  ;;  %v4751_v50 = vmul.f32 %v6432_v17, %v9403_v22  ;;  %v3872_v22 = vadd.f32 %v9388_v28, %v8903_v33 }
0x17f5   :  { %6433 = vrcp.f32 %v4252_v14 }
0x17f6   :  { %5927 = vmatmul.msk.f32.gmra.mxu1 %vm1347_vm7, %v4751_v50  ;;  %v4423_v52 = vadd.f32 %v9455_v54, %v3872_v22  ;;  %v3878_v54 = vadd.f32 %v9411_v53, %v8913_v6 }
0x17fb   :  { %v6434_v1 = vpop.eup %6433 }
0x17fc   :  { %v4704_v29 = vpop.xlane.xlu0 %4703  ;;  %v4284_v34 = vmul.f32 %v6434_v1, %v9409_v47 }
0x17fd   :  { %6435 = vrcp.f32 %v4704_v29 }
0x17fe   :  { %5901 = vmatmul.msk.f32.gmra.mxu3 %vm1347_vm7, %v4284_v34 }
0x1803   :  { %v6436_v62 = vpop.eup %6435 }
0x1804   :  { %v4752_v32 = vmul.f32 %v6436_v62, %v9415_v5  ;;  %v3875_v5 = vadd.f32 %v9400_v45, %v8908_v39  ;;  %v9541_v39 = vpop.f32.mrf.mxu3  ;;  %v4425_v45 = vadd.f32 %v9474_v23, %v3878_v54 }
0x1806   :  { %5928 = vmatmul.msk.f32.gmra.mxu1 %vm1347_vm7, %v4752_v32  ;;  %v4424_v11 = vadd.f32 %v9464_v18, %v3875_v5 }
0x180c   :  { %v9548_v6 = vpop.f32.mrf.mxu3 }
0x181e   :  { %v4807_v3 = vpop.f32.mrf.mxu1 }
0x181f   :  { %v4707_v37 = vpop.xlane.xlu2 %4706  ;;  %v4899_v47 = vadd.f32 %v4807_v3, %v4423_v52 }
0x1820   :  { %6437 = vrcp.f32 %v4707_v37 }
0x1821   :  { %5938 = vmatmul.msk.f32.vlgmr.msrb.gmra.mxu0 %vm10347_vm13, %v4899_v47  ;;  %vm10362_vm13 = vmmov %vm10233_vm0 }
0x1826   :  { %v6438_v58 = vpop.eup %6437  ;;  %v4810_v28 = vpop.f32.mrf.mxu1 }
0x1827   :  { %v4753_v33 = vmul.f32 %v6438_v58, %v9437_v51  ;;  %v4710_v2 = vpop.xlane.xlu0 %4709  ;;  %v4900_v59 = vadd.f32 %v4810_v28, %v4424_v11  ;;  %v3893_v11 = vadd.f32 %v9448_v35, %v8960_v27 }
0x1828   :  { %6439 = vrcp.f32 %v4710_v2 }
0x1829   :  { %5930 = vmatmul.msk.f32.vlgmr.msrb.gmra.mxu3 %vm1347_vm7, %v4753_v33  ;;  %5939 = vmatmul.msk.f32.gmra.mxu0 %vm10348_vm1, %v4900_v59  ;;  %vm10363_vm1 = vmmov %vm10233_vm0 }
0x182e   :  { %v6440_v41 = vpop.eup %6439  ;;  %v4813_v10 = vpop.f32.mrf.mxu1 }
0x182f   :  { %v4713_v18 = vpop.xlane.xlu2 %4712  ;;  %v4754_v51 = vmul.f32 %v6440_v41, %v9445_v40  ;;  %v4901_v15 = vadd.f32 %v4813_v10, %v4425_v45  ;;  %v9552_v40 = vpop.f32.mrf.mxu3  ;;  %v6504_v10 = vld [vmem:[%s10063_s0] sm:$0xff] }
0x1830   :  { %6441 = vrcp.f32 %v4713_v18 }
0x1831   :  { %5931 = vmatmul.msk.f32.gmra.mxu3 %vm1347_vm7, %v4754_v51  ;;  %5940 = vmatmul.msk.f32.gmra.mxu0 %vm10349_vm14, %v4901_v15  ;;  %vm10364_vm14 = vmmov %vm10233_vm0 }
0x1836   :  { %v6442_v46 = vpop.eup %6441 }
0x1837   :  { %v4716_v38 = vpop.xlane.xlu1 %4715  ;;  %v4755_v0 = vmul.f32 %v6442_v46, %v9453_v26  ;;  %v9557_v26 = vpop.f32.mrf.mxu3 }
0x1838   :  { %6443 = vrcp.f32 %v4716_v38  ;;  %v3940_v38 = vadd.f32 %v9527_v56, %v9063_v25  ;;  %v3943_v56 = vadd.f32 %v9533_v24, %v9076_v21  ;;  %v3946_v21 = vadd.f32 %v9541_v39, %v9088_v44 }
0x1839   :  { %5932 = vmatmul.msk.f32.gmra.mxu3 %vm1347_vm7, %v4755_v0 }
0x183e   :  { %v6444_v53 = vpop.eup %6443 }
0x183f   :  { %v4719_v23 = vpop.xlane.xlu0 %4718  ;;  %v4756_v8 = vmul.f32 %v6444_v53, %v9460_v42  ;;  %v9563_v1 = vpop.f32.mrf.mxu3 }
0x1840   :  { %6445 = vrcp.f32 %v4719_v23  ;;  %v6505_v23 = vld [vmem:[%s10063_s0 + $0x8] sm:$0xff] }
0x1841   :  { %5933 = vmatmul.msk.f32.gmra.mxu3 %vm1347_vm7, %v4756_v8 }
0x1846   :  { %v6446_v48 = vpop.eup %6445 }
0x1847   :  { %v4722_v43 = vpop.xlane.xlu2 %4721  ;;  %v4757_v30 = vmul.f32 %v6446_v48, %v9469_v36  ;;  %v9567_v62 = vpop.f32.mrf.mxu3 }
0x1848   :  { %6447 = vrcp.f32 %v4722_v43 }
0x1849   :  { %5934 = vmatmul.msk.f32.gmra.mxu3 %vm1347_vm7, %v4757_v30 }
0x184b   :  { %v4816_v60 = vpop.f32.mrf.mxu1 }
0x184c   :  { %v4902_v17 = vadd.f32 %v4816_v60, %v9485_v13 }
0x184e   :  { %v6448_v14 = vpop.eup %6447  ;;  %5941 = vmatmul.msk.f32.gmra.mxu0 %vm10350_vm15, %v4902_v17  ;;  %vm10365_vm15 = vmmov %vm10233_vm0 }
0x184f   :  { %v4725_v42 = vpop.xlane.xlu1 %4724  ;;  %v4758_v50 = vmul.f32 %v6448_v14, %v9478_v57  ;;  %v4399_v57 = vpop.f32.mrf.mxu3 }
0x1850   :  { %6449 = vrcp.f32 %v4725_v42  ;;  %v4431_v53 = vadd.f32 %v4399_v57, %v3940_v38  ;;  %v6506_v42 = vld [vmem:[%s10063_s0 + $0x10] sm:$0xff]  ;;  %v3949_v57 = vadd.f32 %v9548_v6, %v9095_v63  ;;  %v6507_v63 = vld [vmem:[%s10063_s0 + $0x18] sm:$0xff] }
0x1851   :  { %5935 = vmatmul.msk.f32.gmra.mxu3 %vm1347_vm7, %v4758_v50 }
0x1856   :  { %v6450_v36 = vpop.eup %6449 }
0x1857   :  { %v4728_v29 = vpop.xlane.xlu0 %4727  ;;  %v4759_v34 = vmul.f32 %v6450_v36, %v9489_v61  ;;  %v4402_v61 = vpop.f32.mrf.mxu3 }
0x1858   :  { %6451 = vrcp.f32 %v4728_v29  ;;  %v4432_v14 = vadd.f32 %v4402_v61, %v3943_v56 }
0x1859   :  { %5936 = vmatmul.msk.f32.gmra.mxu3 %vm1347_vm7, %v4759_v34 }
0x185e   :  { %v6452_v13 = vpop.eup %6451 }
0x185f   :  { %v4760_v32 = vmul.f32 %v6452_v13, %v9499_v19  ;;  %v4405_v19 = vpop.f32.mrf.mxu3 }
0x1860   :  { %v4433_v24 = vadd.f32 %v4405_v19, %v3946_v21 }
0x1861   :  { %5937 = vmatmul.msk.f32.gmra.mxu3 %vm1347_vm7, %v4760_v32  ;;  %vm10353_vm7 = vmmov %vm10233_vm0 }
0x1863   :  { %v4819_v22 = vpop.f32.mrf.mxu1 }
0x1864   :  { %v4903_v52 = vadd.f32 %v4819_v22, %v9496_v9  ;;  %v4430_v9 = vadd.f32 %v9523_v49, %v3893_v11 }
0x1866   :  { %5942 = vmatmul.msk.f32.gmra.mxu0 %vm10233_vm0, %v4903_v52 }
0x1867   :  { %v4408_v58 = vpop.f32.mrf.mxu3 }
0x1868   :  { %v4434_v22 = vadd.f32 %v4408_v58, %v3949_v57  ;;  %v3955_v58 = vadd.f32 %v9557_v26, %v9109_v20  ;;  %v3961_v20 = vadd.f32 %v9567_v62, %v9128_v7 }
0x186b   :  { %v4822_v3 = vpop.f32.mrf.mxu1 }
0x186c   :  { %v4904_v37 = vadd.f32 %v4822_v3, %v9506_v16 }
0x186e   :  { %5943 = vmatmul.msk.f32.gmra.mxu0 %vm10351_vm8, %v4904_v37  ;;  %v3952_v37 = vadd.f32 %v9552_v40, %v9102_v55  ;;  %vm10366_vm8 = vmmov %vm10233_vm0 }
0x186f   :  { %v4411_v16 = vpop.f32.mrf.mxu3 }
0x1870   :  { %v4435_v61 = vadd.f32 %v4411_v16, %v3952_v37 }
0x1873   :  { %v4825_v47 = vpop.f32.mrf.mxu1 }
0x1874   :  { %v4905_v5 = vadd.f32 %v4825_v47, %v9514_v31  ;;  %v9586_v31 = vld [vmem:[%s10067_s4 + $0x8] sm:$0xff] }
0x1875   :  { %v9589_v54 = vperm.slane %v9586_v31, 4  ;;  %v9592_v27 = vperm.slane %v9586_v31, 7 }
0x1876   :  { %5944 = vmatmul.msk.f32.gmra.mxu0 %vm10352_vm11, %v4905_v5  ;;  %vm10367_vm11 = vmmov %vm10233_vm0 }
0x1877   :  { %v4414_v2 = vpop.f32.mrf.mxu3 }
0x1878   :  { %v4436_v40 = vadd.f32 %v4414_v2, %v3955_v58 }
0x187f   :  { %v9581_v59 = vpop.f32.mrf.mxu3 }
0x1883   :  { %v4828_v33 = vpop.f32.mrf.mxu1 }
0x1884   :  { %v4906_v28 = vadd.f32 %v4828_v33, %v4430_v9  ;;  %v3958_v33 = vadd.f32 %v9563_v1, %v9119_v12  ;;  %v6508_v12 = vld [vmem:[%s10063_s0 + $0x20] sm:$0xff] }
0x1886   :  { %5945 = vmatmul.msk.f32.gmra.mxu0 %vm10353_vm7, %v4906_v28  ;;  %v4437_v28 = vadd.f32 %v9581_v59, %v3958_v33  ;;  %vm10368_vm7 = vmmov %vm10233_vm0  ;;  %v6513_v33 = vld [vmem:[%s10063_s0 + $0x48] sm:$0xff] }
0x1887   :  { %v4420_v45 = vpop.f32.mrf.mxu3 }
0x1888   :  { %v4438_v26 = vadd.f32 %v4420_v45, %v3961_v20 }
0x189e   :  { %v4981_v35 = vpop.f32.mrf.mxu0 }
0x189f   :  { %v4982_v49 = vadd.f32 %v4981_v35, %v9589_v54 }
0x18a1   :  { %v5030_v41 = vmul.f32 %v9592_v27, %v4982_v49 }
0x18a3   :  { %v9599_v18 = vadd.f32 %v6504_v10, %v5030_v41 }
0x18a5   :  { %v5062_v51 = vsel %vm10354_vm10, %v9599_v18, 0.0  ;;  %vm10369_vm10 = vmmov %vm10233_vm0 }
0x18a6   :  { %v4984_v15 = vpop.f32.mrf.mxu0  ;;  %5063 = vadd.xlane.f32.xlu2 %v5062_v51 }
0x18a7   :  { %v4985_v46 = vadd.f32 %v4984_v15, %v9589_v54  ;;  %v6509_v15 = vld [vmem:[%s10063_s0 + $0x28] sm:$0xff] }
0x18a9   :  { %v5031_v0 = vmul.f32 %v9592_v27, %v4985_v46 }
0x18ab   :  { %v9610_v8 = vadd.f32 %v6505_v23, %v5031_v0 }
0x18ac   :  { %v4875_v48 = vpop.f32.mrf.mxu3 }
0x18ad   :  { %v4907_v43 = vadd.f32 %v4875_v48, %v4431_v53  ;;  %v5065_v30 = vsel %vm10355_vm5, %v9610_v8, 0.0  ;;  %v6510_v48 = vld [vmem:[%s10063_s0 + $0x30] sm:$0xff]  ;;  %vm10370_vm5 = vmmov %vm10233_vm0 }
0x18ae   :  { %v4987_v60 = vpop.f32.mrf.mxu0  ;;  %5066 = vadd.xlane.f32.xlu1 %v5065_v30 }
0x18af   :  { %5946 = vmatmul.msk.f32.gmra.mxu0 %vm10356_vm4, %v4907_v43  ;;  %v4988_v25 = vadd.f32 %v4987_v60, %v9589_v54  ;;  %vm10371_vm4 = vmmov %vm10233_vm0 }
0x18b1   :  { %v5032_v17 = vmul.f32 %v9592_v27, %v4988_v25 }
0x18b3   :  { %v9622_v50 = vadd.f32 %v6506_v42, %v5032_v17 }
0x18b4   :  { %v4878_v36 = vpop.f32.mrf.mxu3 }
0x18b5   :  { %v4908_v29 = vadd.f32 %v4878_v36, %v4432_v14  ;;  %v5068_v34 = vsel %vm10357_vm2, %v9622_v50, 0.0  ;;  %vm10372_vm2 = vmmov %vm10233_vm0 }
0x18b6   :  { %5069 = vadd.xlane.f32.xlu0 %v5068_v34 }
0x18b7   :  { %5947 = vmatmul.msk.f32.gmra.mxu0 %vm10358_vm6, %v4908_v29  ;;  %vm10373_vm6 = vmmov %vm10233_vm0 }
0x18bc   :  { %v4881_v13 = vpop.f32.mrf.mxu3 }
0x18bd   :  { %v4909_v32 = vadd.f32 %v4881_v13, %v4433_v24  ;;  %v6511_v24 = vld [vmem:[%s10063_s0 + $0x38] sm:$0xff] }
0x18bf   :  { %5948 = vmatmul.msk.f32.gmra.mxu0 %vm10359_vm3, %v4909_v32  ;;  %vm10374_vm3 = vmmov %vm10233_vm0 }
0x18c4   :  { %v4884_v52 = vpop.f32.mrf.mxu3 }
0x18c5   :  { %v4910_v3 = vadd.f32 %v4884_v52, %v4434_v22 }
0x18c7   :  { %5949 = vmatmul.msk.f32.gmra.mxu0 %vm10360_vm9, %v4910_v3  ;;  %vm10375_vm9 = vmmov %vm10233_vm0 }
0x18cb   :  { %v4990_v47 = vpop.f32.mrf.mxu0 }
0x18cc   :  { %v4887_v5 = vpop.f32.mrf.mxu3  ;;  %v4991_v44 = vadd.f32 %v4990_v47, %v9589_v54 }
0x18cd   :  { %v4911_v39 = vadd.f32 %v4887_v5, %v4435_v61 }
0x18ce   :  { %v5033_v19 = vmul.f32 %v9592_v27, %v4991_v44 }
0x18cf   :  { %5950 = vmatmul.msk.f32.gmra.mxu0 %vm10361_vm12, %v4911_v39  ;;  %vm10376_vm12 = vmmov %vm10233_vm0 }
0x18d0   :  { %v9641_v6 = vadd.f32 %v6507_v63, %v5033_v19  ;;  %v6512_v19 = vld [vmem:[%s10063_s0 + $0x40] sm:$0xff] }
0x18d2   :  { %v5071_v55 = vsel %vm10362_vm13, %v9641_v6, 0.0  ;;  %vm10377_vm13 = vmmov %vm10233_vm0 }
0x18d3   :  { %5072 = vadd.xlane.f32.xlu2 %v5071_v55 }
0x18d4   :  { %v4890_v11 = vpop.f32.mrf.mxu3 }
0x18d5   :  { %v4912_v9 = vadd.f32 %v4890_v11, %v4436_v40 }
0x18d7   :  { %5951 = vmatmul.msk.f32.gmra.mxu0 %vm10363_vm1, %v4912_v9  ;;  %vm10378_vm1 = vmmov %vm10233_vm0 }
0x18dc   :  { %v4893_v16 = vpop.f32.mrf.mxu3 }
0x18dd   :  { %v4913_v35 = vadd.f32 %v4893_v16, %v4437_v28 }
0x18df   :  { %5952 = vmatmul.msk.f32.gmra.mxu0 %vm10364_vm14, %v4913_v35  ;;  %vm10379_vm14 = vmmov %vm10233_vm0 }
0x18e3   :  { %v4993_v2 = vpop.f32.mrf.mxu0 }
0x18e4   :  { %v4896_v49 = vpop.f32.mrf.mxu3  ;;  %v4994_v10 = vadd.f32 %v4993_v2, %v9589_v54 }
0x18e5   :  { %v4914_v41 = vadd.f32 %v4896_v49, %v4438_v26 }
0x18e6   :  { %v5034_v51 = vmul.f32 %v9592_v27, %v4994_v10 }
0x18e7   :  { %5953 = vmatmul.msk.f32.gmra.mxu0 %vm10365_vm15, %v4914_v41  ;;  %vm10380_vm15 = vmmov %vm10233_vm0 }
0x18e8   :  { %v9660_v1 = vadd.f32 %v6508_v12, %v5034_v51  ;;  %v6514_v12 = vld [vmem:[%s10063_s0 + $0x50] sm:$0xff] }
0x18ea   :  { %v5074_v59 = vsel %vm10233_vm0, %v9660_v1, 0.0 }
0x18eb   :  { %v4996_v7 = vpop.f32.mrf.mxu0  ;;  %5075 = vadd.xlane.f32.xlu1 %v5074_v59 }
0x18ec   :  { %v4997_v62 = vadd.f32 %v4996_v7, %v9589_v54 }
0x18ee   :  { %v5035_v45 = vmul.f32 %v9592_v27, %v4997_v62 }
0x18f0   :  { %v9669_v46 = vadd.f32 %v6509_v15, %v5035_v45 }
0x18f2   :  { %v5077_v38 = vsel %vm10366_vm8, %v9669_v46, 0.0  ;;  %vm10381_vm8 = vmmov %vm10233_vm0 }
0x18f3   :  { %v4999_v0 = vpop.f32.mrf.mxu0  ;;  %5078 = vadd.xlane.f32.xlu0 %v5077_v38 }
0x18f4   :  { %v5000_v53 = vadd.f32 %v4999_v0, %v9589_v54 }
0x18f6   :  { %v5036_v23 = vmul.f32 %v9592_v27, %v5000_v53 }
0x18f8   :  { %v9678_v43 = vadd.f32 %v6510_v48, %v5036_v23 }
0x18fa   :  { %v5080_v30 = vsel %vm10367_vm11, %v9678_v43, 0.0 }
0x18fb   :  { %5081 = vadd.xlane.f32.xlu1 %v5080_v30 }
0x1903   :  { %v5002_v60 = vpop.f32.mrf.mxu0 }
0x1904   :  { %v5003_v17 = vadd.f32 %v5002_v60, %v9589_v54 }
0x1906   :  { %v5037_v36 = vmul.f32 %v9592_v27, %v5003_v17 }
0x1908   :  { %v9695_v13 = vadd.f32 %v6511_v24, %v5037_v36 }
0x190a   :  { %v5083_v22 = vsel %vm10369_vm10, %v9695_v13, 0.0 }
0x1919   :  { %v5064_v25 = vpop.xlane.xlu2 %5063 }
0x191a   :  { %v5110_v56 = vmul.f32 %v5064_v25, %v7579_v4 }
0x191c   :  { %v9685_v14 = vsub.f32 %v9599_v18, %v5110_v56  ;;  %v6515_v56 = vld [vmem:[%s10063_s0 + $0x58] sm:$0xff] }
0x191e   :  { %v5142_v42 = vmul.f32 %v9685_v14, %v9685_v14 }
0x1920   :  { %v5158_v29 = vsel %vm10368_vm7, %v5142_v42, 0.0 }
0x1921   :  { %5159 = vadd.xlane.f32.xlu2 %v5158_v29  ;;  %v5067_v34 = vpop.xlane.xlu1 %5066 }
0x1922   :  { %v5111_v21 = vmul.f32 %v5067_v34, %v7579_v4 }
0x1924   :  { %v9698_v32 = vsub.f32 %v9610_v8, %v5111_v21 }
0x1926   :  { %v5143_v57 = vmul.f32 %v9698_v32, %v9698_v32 }
0x1928   :  { %v5161_v52 = vsel %vm10370_vm5, %v5143_v57, 0.0  ;;  %vm10382_vm5 = vmmov %vm10233_vm0 }
0x1929   :  { %5084 = vadd.xlane.f32.xlu2 %v5083_v22  ;;  %v5070_v3 = vpop.xlane.xlu0 %5069  ;;  %5162 = vadd.xlane.f32.xlu0 %v5161_v52 }
0x192a   :  { %v5112_v37 = vmul.f32 %v5070_v3, %v7579_v4  ;;  %v6516_v3 = vld [vmem:[%s10063_s0 + $0x60] sm:$0xff] }
0x192c   :  { %v5005_v61 = vpop.f32.mrf.mxu0  ;;  %v9707_v47 = vsub.f32 %v9622_v50, %v5112_v37 }
0x192d   :  { %v5006_v5 = vadd.f32 %v5005_v61, %v9589_v54 }
0x192e   :  { %v5144_v39 = vmul.f32 %v9707_v47, %v9707_v47 }
0x192f   :  { %v5038_v44 = vmul.f32 %v9592_v27, %v5006_v5 }
0x1930   :  { %v5164_v58 = vsel %vm10371_vm4, %v5144_v39, 0.0  ;;  %vm10383_vm4 = vmmov %vm10233_vm0 }
0x1931   :  { %v9716_v63 = vadd.f32 %v6512_v19, %v5038_v44  ;;  %5165 = vadd.xlane.f32.xlu1 %v5164_v58 }
0x1933   :  { %v5086_v55 = vsel %vm10372_vm2, %v9716_v63, 0.0 }
0x1934   :  { %v5008_v40 = vpop.f32.mrf.mxu0  ;;  %5087 = vadd.xlane.f32.xlu0 %v5086_v55  ;;  %v6517_v55 = vld [vmem:[%s10063_s0 + $0x68] sm:$0xff] }
0x1935   :  { %v5009_v11 = vadd.f32 %v5008_v40, %v9589_v54 }
0x1937   :  { %v5039_v9 = vmul.f32 %v9592_v27, %v5009_v11 }
0x1939   :  { %v9726_v28 = vadd.f32 %v6513_v33, %v5039_v9 }
0x193b   :  { %v5089_v16 = vsel %vm10373_vm6, %v9726_v28, 0.0 }
0x193c   :  { %5090 = vadd.xlane.f32.xlu1 %v5089_v16  ;;  %v5011_v35 = vpop.f32.mrf.mxu0 }
0x193d   :  { %v5012_v49 = vadd.f32 %v5011_v35, %v9589_v54 }
0x193f   :  { %v5040_v10 = vmul.f32 %v9592_v27, %v5012_v49 }
0x1941   :  { %v9742_v59 = vadd.f32 %v6514_v12, %v5040_v10  ;;  %v123_v12 = vld [vmem:[#allocation2 + $0x168] sm:$0xff] }
0x1943   :  { %v5092_v7 = vsel %vm10375_vm9, %v9742_v59, 0.0  ;;  %vm10384_vm9 = vmmov %vm10233_vm0 }
0x1944   :  { %v5014_v62 = vpop.f32.mrf.mxu0 }
0x1945   :  { %v5015_v38 = vadd.f32 %v5014_v62, %v9589_v54 }
0x1946   :  { %v5073_v20 = vpop.xlane.xlu2 %5072 }
0x1947   :  { %v5113_v26 = vmul.f32 %v5073_v20, %v7579_v4  ;;  %v5041_v48 = vmul.f32 %v9592_v27, %v5015_v38  ;;  %v125_v20 = vld [vmem:[#allocation2 + $0x178] sm:$0xff]  ;;  %v122_v38 = vld [vmem:[#allocation2 + $0x160] sm:$0xff] }
0x1948   :  { %5509 = vmatpush.msrb.mxu2 %v125_v20 }
0x1949   :  { %v9733_v2 = vsub.f32 %v9641_v6, %v5113_v26  ;;  %v9759_v17 = vadd.f32 %v6515_v56, %v5041_v48  ;;  %v124_v26 = vld [vmem:[#allocation2 + $0x170] sm:$0xff] }
0x194a   :  { %5510 = vmatpush.msrb.mxu2 %v124_v26 }
0x194b   :  { %v5145_v41 = vmul.f32 %v9733_v2, %v9733_v2  ;;  %v5095_v24 = vsel %vm10378_vm1, %v9759_v17, 0.0 }
0x194c   :  { %v5017_v23 = vpop.f32.mrf.mxu0  ;;  %5511 = vmatpush.msrb.mxu2 %v123_v12 }
0x194d   :  { %v5167_v51 = vsel %vm10374_vm3, %v5145_v41, 0.0  ;;  %v5018_v42 = vadd.f32 %v5017_v23, %v9589_v54 }
0x194e   :  { %5168 = vadd.xlane.f32.xlu2 %v5167_v51  ;;  %5512 = vmatpush.msrb.mxu2 %v122_v38 }
0x194f   :  { %v5042_v34 = vmul.f32 %v9592_v27, %v5018_v42 }
0x1951   :  { %v9775_v37 = vadd.f32 %v6516_v3, %v5042_v34 }
0x1953   :  { %v5098_v19 = vsel %vm10379_vm14, %v9775_v37, 0.0 }
0x1954   :  { %v5020_v57 = vpop.f32.mrf.mxu0 }
0x1955   :  { %v5021_v61 = vadd.f32 %v5020_v57, %v9589_v54  ;;  %v6518_v57 = vld [vmem:[%s10063_s0 + $0x70] sm:$0xff] }
0x1956   :  { %5093 = vadd.xlane.f32.xlu2 %v5092_v7 }
0x1957   :  { %v5043_v39 = vmul.f32 %v9592_v27, %v5021_v61 }
0x1959   :  { %v9790_v40 = vadd.f32 %v6517_v55, %v5043_v39 }
0x195b   :  { %v5101_v11 = vsel %vm10233_vm0, %v9790_v40, 0.0 }
0x195c   :  { %v5023_v35 = vpop.f32.mrf.mxu0 }
0x195d   :  { %v5024_v62 = vadd.f32 %v5023_v35, %v9589_v54 }
0x195e   :  { %v5076_v45 = vpop.xlane.xlu1 %5075 }
0x195f   :  { %v5114_v15 = vmul.f32 %v5076_v45, %v7579_v4 }
0x1961   :  { %v9749_v0 = vsub.f32 %v9660_v1, %v5114_v15 }
0x1963   :  { %v5146_v53 = vmul.f32 %v9749_v0, %v9749_v0 }
0x1965   :  { %v5170_v30 = vsel %vm10376_vm12, %v5146_v53, 0.0  ;;  %vm10385_vm12 = vmmov %vm10233_vm0 }
0x1966   :  { %v5079_v60 = vpop.xlane.xlu0 %5078  ;;  %5171 = vadd.xlane.f32.xlu0 %v5170_v30  ;;  %v5044_v30 = vmul.f32 %v9592_v27, %v5024_v62 }
0x1967   :  { %v5115_v25 = vmul.f32 %v5079_v60, %v7579_v4 }
0x1969   :  { %v9763_v36 = vsub.f32 %v9669_v46, %v5115_v25 }
0x196b   :  { %v5147_v29 = vmul.f32 %v9763_v36, %v9763_v36 }
0x196d   :  { %v5173_v21 = vsel %vm10377_vm13, %v5147_v29, 0.0  ;;  %v5026_v29 = vpop.f32.mrf.mxu0  ;;  %vm10386_vm13 = vmmov %vm10233_vm0 }
0x196e   :  { %5174 = vadd.xlane.f32.xlu1 %v5173_v21  ;;  %5096 = vadd.xlane.f32.xlu0 %v5095_v24  ;;  %v5082_v22 = vpop.xlane.xlu1 %5081  ;;  %v5027_v39 = vadd.f32 %v5026_v29, %v9589_v54 }
0x196f   :  { %v5116_v52 = vmul.f32 %v5082_v22, %v7579_v4  ;;  %v9809_v22 = vadd.f32 %v6518_v57, %v5044_v30 }
0x1970   :  { %v5045_v20 = vmul.f32 %v9592_v27, %v5027_v39  ;;  %v6519_v27 = vld [vmem:[%s10063_s0 + $0x78] sm:$0xff] }
0x1971   :  { %v9779_v5 = vsub.f32 %v9678_v43, %v5116_v52 }
0x1972   :  { %v9835_v38 = vadd.f32 %v6519_v27, %v5045_v20 }
0x1973   :  { %v5148_v44 = vmul.f32 %v9779_v5, %v9779_v5 }
0x1975   :  { %v5176_v58 = vsel %vm10380_vm15, %v5148_v44, 0.0 }
0x1976   :  { %5099 = vadd.xlane.f32.xlu1 %v5098_v19  ;;  %5177 = vadd.xlane.f32.xlu2 %v5176_v58  ;;  %v9814_v19 = vperm.slane %v9586_v31, 0 }
0x197e   :  { %5102 = vadd.xlane.f32.xlu2 %v5101_v11 }
0x1994   :  { %v5160_v9 = vpop.xlane.xlu2 %5159 }
0x1995   :  { %v5206_v33 = vmul.f32 %v5160_v9, %v7579_v4  ;;  %v9820_v9 = vperm.slane %v9586_v31, 1 }
0x1997   :  { %v5222_v16 = vadd.f32 1e-05, %v5206_v33 }
0x1999   :  { %6453 = vrsqrt.f32 %v5222_v16  ;;  %vm5244_vm7 = vweird.f32 %v5222_v16 }
0x199c   :  { %v5085_v49 = vpop.xlane.xlu2 %5084  ;;  %v5163_v41 = vpop.xlane.xlu0 %5162 }
0x199d   :  { %v5117_v10 = vmul.f32 %v5085_v49, %v7579_v4  ;;  %v5207_v51 = vmul.f32 %v5163_v41, %v7579_v4 }
0x199f   :  { %v6454_v7 = vpop.eup %6453  ;;  %v9799_v45 = vsub.f32 %v9695_v13, %v5117_v10  ;;  %v5223_v15 = vadd.f32 1e-05, %v5207_v51 }
0x19a0   :  { %v5239_v53 = vmul.f32 %v6454_v7, %v5222_v16  ;;  %vm5245_vm11 = vweird.f32 %v6454_v7  ;;  %v5104_v16 = vsel %vm10382_vm5, %v9809_v22, 0.0 }
0x19a1   :  { %6455 = vrsqrt.f32 %v5223_v15  ;;  %v5149_v23 = vmul.f32 %v9799_v45, %v9799_v45  ;;  %vm5246_vm10 = vmor %vm5244_vm7, %vm5245_vm11  ;;  %vm5254_vm6 = vweird.f32 %v5223_v15 }
0x19a2   :  { %v5240_v48 = vmul.f32 %v6454_v7, %v5239_v53  ;;  %vm10388_vm11 = vmmov %vm10233_vm0 }
0x19a3   :  { %v5179_v60 = vsel %vm10381_vm8, %v5149_v23, 0.0  ;;  %vm10387_vm8 = vmmov %vm10233_vm0 }
0x19a4   :  { %v5241_v25 = vmul.f32 0.5, %v5240_v48  ;;  %5180 = vadd.xlane.f32.xlu0 %v5179_v60  ;;  %v5166_v56 = vpop.xlane.xlu1 %5165 }
0x19a5   :  { %v5208_v42 = vmul.f32 %v5166_v56, %v7579_v4 }
0x19a6   :  { %v5242_v34 = vsub.f32 1.5, %v5241_v25  ;;  %v5107_v25 = vsel %vm10385_vm12, %v9835_v38, 0.0  ;;  %vm10391_vm12 = vmmov %vm10233_vm0 }
0x19a7   :  { %v5088_v21 = vpop.xlane.xlu0 %5087  ;;  %v6456_v24 = vpop.eup %6455  ;;  %v5224_v52 = vadd.f32 1e-05, %v5208_v42 }
0x19a8   :  { %v5118_v3 = vmul.f32 %v5088_v21, %v7579_v4  ;;  %v5243_v61 = vmul.f32 %v6454_v7, %v5242_v34  ;;  %v5249_v44 = vmul.f32 %v6456_v24, %v5223_v15  ;;  %vm5255_vm2 = vweird.f32 %v6456_v24 }
0x19a9   :  { %6457 = vrsqrt.f32 %v5224_v52  ;;  %vm5256_vm3 = vmor %vm5254_vm6, %vm5255_vm2  ;;  %vm5264_vm14 = vweird.f32 %v5224_v52 }
0x19aa   :  { %v9817_v58 = vsub.f32 %v9716_v63, %v5118_v3  ;;  %v5247_v55 = vsel %vm5246_vm10, %v6454_v7, %v5243_v61  ;;  %v5250_v11 = vmul.f32 %v6456_v24, %v5249_v44  ;;  %vm10390_vm2 = vmmov %vm10233_vm0 }
0x19ab   :  { %v5398_v33 = vmul.f32 %v5247_v55, %v9685_v14 }
0x19ac   :  { %v5150_v54 = vmul.f32 %v9817_v58, %v9817_v58  ;;  %v5251_v35 = vmul.f32 0.5, %v5250_v11  ;;  %5105 = vadd.xlane.f32.xlu0 %v5104_v16 }
0x19ad   :  { %v5415_v26 = vmul.f32 %v9814_v19, %v5398_v33 }
0x19ae   :  { %v5182_v49 = vsel %vm10383_vm4, %v5150_v54, 0.0  ;;  %v5252_v41 = vsub.f32 1.5, %v5251_v35  ;;  %vm10389_vm4 = vmmov %vm10233_vm0 }
0x19af   :  { %5183 = vadd.xlane.f32.xlu1 %v5182_v49  ;;  %v5091_v10 = vpop.xlane.xlu1 %5090  ;;  %v6458_v51 = vpop.eup %6457  ;;  %v5432_v14 = vadd.f32 %v9820_v9, %v5415_v26 }
0x19b0   :  { %v5119_v12 = vmul.f32 %v5091_v10, %v7579_v4  ;;  %v5253_v7 = vmul.f32 %v6456_v24, %v5252_v41  ;;  %v5259_v62 = vmul.f32 %v6458_v51, %v5224_v52  ;;  %vm5265_vm1 = vweird.f32 %v6458_v51 }
0x19b1   :  { %5954 = vmatmul.msk.f32.vlgmr.msrb.gmra.mxu2 %vm10384_vm9, %v5432_v14  ;;  %vm5266_vm15 = vmor %vm5264_vm14, %vm5265_vm1 }
0x19b2   :  { %v9838_v53 = vsub.f32 %v9726_v28, %v5119_v12  ;;  %v5257_v23 = vsel %vm5256_vm3, %v6456_v24, %v5253_v7  ;;  %v5260_v48 = vmul.f32 %v6458_v51, %v5259_v62 }
0x19b3   :  { %v5399_v30 = vmul.f32 %v5257_v23, %v9698_v32 }
0x19b4   :  { %v5151_v15 = vmul.f32 %v9838_v53, %v9838_v53  ;;  %v5261_v60 = vmul.f32 0.5, %v5260_v48 }
0x19b5   :  { %v5416_v42 = vmul.f32 %v9814_v19, %v5399_v30 }
0x19b6   :  { %v5185_v56 = vsel %vm10386_vm13, %v5151_v15, 0.0  ;;  %v5262_v29 = vsub.f32 1.5, %v5261_v60 }
0x19b7   :  { %5108 = vadd.xlane.f32.xlu1 %v5107_v25  ;;  %5186 = vadd.xlane.f32.xlu2 %v5185_v56  ;;  %v5433_v34 = vadd.f32 %v9820_v9, %v5416_v42 }
0x19b8   :  { %v5263_v21 = vmul.f32 %v6458_v51, %v5262_v29 }
0x19b9   :  { %5955 = vmatmul.msk.f32.gmra.mxu2 %vm10233_vm0, %v5433_v34 }
0x19ba   :  { %v5267_v32 = vsel %vm5266_vm15, %v6458_v51, %v5263_v21  ;;  %vm10392_vm15 = vmmov %vm10233_vm0 }
0x19bb   :  { %v5400_v24 = vmul.f32 %v5267_v32, %v9707_v47 }
0x19bd   :  { %v5417_v57 = vmul.f32 %v9814_v19, %v5400_v24 }
0x19bf   :  { %v5434_v3 = vadd.f32 %v9820_v9, %v5417_v57 }
0x19c1   :  { %v5169_v61 = vpop.xlane.xlu2 %5168  ;;  %5956 = vmatmul.msk.f32.gmra.mxu2 %vm10387_vm8, %v5434_v3 }
0x19c2   :  { %v5209_v44 = vmul.f32 %v5169_v61, %v7579_v4 }
0x19c4   :  { %v5225_v39 = vadd.f32 1e-05, %v5209_v44 }
0x19c6   :  { %6459 = vrsqrt.f32 %v5225_v39  ;;  %vm5274_vm10 = vweird.f32 %v5225_v39 }
0x19c9   :  { %v5094_v55 = vpop.xlane.xlu2 %5093 }
0x19ca   :  { %v5120_v52 = vmul.f32 %v5094_v55, %v7579_v4 }
0x19cc   :  { %v6460_v11 = vpop.eup %6459  ;;  %v9857_v33 = vsub.f32 %v9742_v59, %v5120_v52 }
0x19cd   :  { %v5269_v16 = vmul.f32 %v6460_v11, %v5225_v39  ;;  %vm5275_vm7 = vweird.f32 %v6460_v11 }
0x19ce   :  { %v5152_v47 = vmul.f32 %v9857_v33, %v9857_v33  ;;  %vm5276_vm5 = vmor %vm5274_vm10, %vm5275_vm7 }
0x19cf   :  { %v5270_v54 = vmul.f32 %v6460_v11, %v5269_v16  ;;  %vm10393_vm10 = vmmov %vm10233_vm0 }
0x19d0   :  { %v5188_v35 = vsel %vm10388_vm11, %v5152_v47, 0.0 }
0x19d1   :  { %v5271_v20 = vmul.f32 0.5, %v5270_v54  ;;  %5189 = vadd.xlane.f32.xlu0 %v5188_v35 }
0x19d3   :  { %v5272_v26 = vsub.f32 1.5, %v5271_v20 }
0x19d5   :  { %v5273_v49 = vmul.f32 %v6460_v11, %v5272_v26 }
0x19d7   :  { %v5277_v41 = vsel %vm5276_vm5, %v6460_v11, %v5273_v49  ;;  %vm10394_vm5 = vmmov %vm10233_vm0 }
0x19d8   :  { %v5401_v10 = vmul.f32 %v5277_v41, %v9733_v2 }
0x19d9   :  { %v5172_v51 = vpop.xlane.xlu0 %5171 }
0x19da   :  { %v5418_v14 = vmul.f32 %v9814_v19, %v5401_v10  ;;  %v5210_v12 = vmul.f32 %v5172_v51, %v7579_v4 }
0x19dc   :  { %v5435_v7 = vadd.f32 %v9820_v9, %v5418_v14  ;;  %v5226_v62 = vadd.f32 1e-05, %v5210_v12 }
0x19de   :  { %5957 = vmatmul.msk.f32.gmra.mxu2 %vm10389_vm4, %v5435_v7  ;;  %6461 = vrsqrt.f32 %v5226_v62  ;;  %vm5284_vm3 = vweird.f32 %v5226_v62  ;;  %vm10395_vm4 = vmmov %vm10233_vm0 }
0x19e1   :  { %v5097_v27 = vpop.xlane.xlu0 %5096  ;;  %v5175_v23 = vpop.xlane.xlu1 %5174 }
0x19e2   :  { %v5121_v48 = vmul.f32 %v5097_v27, %v7579_v4  ;;  %v5211_v30 = vmul.f32 %v5175_v23, %v7579_v4 }
0x19e4   :  { %v6462_v15 = vpop.eup %6461  ;;  %v9870_v2 = vsub.f32 %v9759_v17, %v5121_v48  ;;  %v5227_v60 = vadd.f32 1e-05, %v5211_v30 }
0x19e5   :  { %v5279_v25 = vmul.f32 %v6462_v15, %v5226_v62  ;;  %vm5285_vm6 = vweird.f32 %v6462_v15 }
0x19e6   :  { %6463 = vrsqrt.f32 %v5227_v60  ;;  %v5153_v56 = vmul.f32 %v9870_v2, %v9870_v2  ;;  %vm5286_vm9 = vmor %vm5284_vm3, %vm5285_vm6  ;;  %vm5294_vm1 = vweird.f32 %v5227_v60 }
0x19e7   :  { %v5280_v42 = vmul.f32 %v6462_v15, %v5279_v25 }
0x19e8   :  { %v5191_v29 = vsel %vm10390_vm2, %v5153_v56, 0.0 }
0x19e9   :  { %v5281_v34 = vmul.f32 0.5, %v5280_v42  ;;  %v5178_v21 = vpop.xlane.xlu2 %5177  ;;  %5192 = vadd.xlane.f32.xlu2 %v5191_v29  ;;  %v5100_v32 = vpop.xlane.xlu1 %5099 }
0x19ea   :  { %v5212_v24 = vmul.f32 %v5178_v21, %v7579_v4  ;;  %v5122_v57 = vmul.f32 %v5100_v32, %v7579_v4 }
0x19eb   :  { %v5282_v3 = vsub.f32 1.5, %v5281_v34 }
0x19ec   :  { %v6464_v61 = vpop.eup %6463  ;;  %v5228_v44 = vadd.f32 1e-05, %v5212_v24  ;;  %v9878_v39 = vsub.f32 %v9775_v37, %v5122_v57 }
0x19ed   :  { %v5283_v55 = vmul.f32 %v6462_v15, %v5282_v3  ;;  %v5289_v52 = vmul.f32 %v6464_v61, %v5227_v60  ;;  %vm5295_vm13 = vweird.f32 %v6464_v61 }
0x19ee   :  { %6465 = vrsqrt.f32 %v5228_v44  ;;  %v5154_v11 = vmul.f32 %v9878_v39, %v9878_v39  ;;  %vm5296_vm14 = vmor %vm5294_vm1, %vm5295_vm13  ;;  %vm5304_vm11 = vweird.f32 %v5228_v44 }
0x19ef   :  { %v5287_v16 = vsel %vm5286_vm9, %v6462_v15, %v5283_v55  ;;  %v5290_v47 = vmul.f32 %v6464_v61, %v5289_v52  ;;  %vm10396_vm9 = vmmov %vm10233_vm0 }
0x19f0   :  { %v5402_v54 = vmul.f32 %v5287_v16, %v9749_v0  ;;  %v5194_v35 = vsel %vm10391_vm12, %v5154_v11, 0.0  ;;  %vm10397_vm13 = vmmov %vm10233_vm0 }
0x19f1   :  { %v5291_v20 = vmul.f32 0.5, %v5290_v47  ;;  %v5103_v26 = vpop.xlane.xlu2 %5102  ;;  %5195 = vadd.xlane.f32.xlu1 %v5194_v35 }
0x19f2   :  { %v5123_v49 = vmul.f32 %v5103_v26, %v7579_v4  ;;  %v5419_v41 = vmul.f32 %v9814_v19, %v5402_v54 }
0x19f3   :  { %v5292_v10 = vsub.f32 1.5, %v5291_v20 }
0x19f4   :  { %v6466_v51 = vpop.eup %6465  ;;  %v9887_v14 = vsub.f32 %v9790_v40, %v5123_v49  ;;  %v5436_v12 = vadd.f32 %v9820_v9, %v5419_v41 }
0x19f5   :  { %v5293_v7 = vmul.f32 %v6464_v61, %v5292_v10  ;;  %v5299_v0 = vmul.f32 %v6466_v51, %v5228_v44  ;;  %vm5305_vm8 = vweird.f32 %v6466_v51 }
0x19f6   :  { %5958 = vmatmul.msk.f32.gmra.mxu2 %vm10392_vm15, %v5436_v12  ;;  %v5155_v62 = vmul.f32 %v9887_v14, %v9887_v14  ;;  %vm5306_vm7 = vmor %vm5304_vm11, %vm5305_vm8 }
0x19f7   :  { %v5297_v27 = vsel %vm5296_vm14, %v6464_v61, %v5293_v7  ;;  %v5300_v23 = vmul.f32 %v6466_v51, %v5299_v0  ;;  %vm10398_vm15 = vmmov %vm10233_vm0 }
0x19f8   :  { %v5403_v48 = vmul.f32 %v5297_v27, %v9763_v36  ;;  %v5197_v30 = vsel %vm10233_vm0, %v5155_v62, 0.0 }
0x19f9   :  { %v5301_v15 = vmul.f32 0.5, %v5300_v23  ;;  %5198 = vadd.xlane.f32.xlu0 %v5197_v30 }
0x19fa   :  { %v5420_v25 = vmul.f32 %v9814_v19, %v5403_v48 }
0x19fb   :  { %v5302_v56 = vsub.f32 1.5, %v5301_v15 }
0x19fc   :  { %v5437_v60 = vadd.f32 %v9820_v9, %v5420_v25 }
0x19fd   :  { %v5303_v42 = vmul.f32 %v6466_v51, %v5302_v56 }
0x19fe   :  { %5959 = vmatmul.msk.f32.gmra.mxu2 %vm10393_vm10, %v5437_v60  ;;  %vm10400_vm10 = vmmov %vm10395_vm4 }
0x19ff   :  { %v5307_v29 = vsel %vm5306_vm7, %v6466_v51, %v5303_v42  ;;  %v9922_v42 = vperm.slane %v9586_v31, 5  ;;  %vm10399_vm7 = vmmov %vm10395_vm4 }
0x1a00   :  { %v5404_v34 = vmul.f32 %v5307_v29, %v9779_v5 }
0x1a02   :  { %v5421_v36 = vmul.f32 %v9814_v19, %v5404_v34 }
0x1a04   :  { %v5438_v21 = vadd.f32 %v9820_v9, %v5421_v36 }
0x1a06   :  { %5960 = vmatmul.msk.f32.gmra.mxu2 %vm10394_vm5, %v5438_v21  ;;  %vm10401_vm5 = vmmov %vm10395_vm4 }
0x1a17   :  { %v5181_v32 = vpop.xlane.xlu0 %5180 }
0x1a18   :  { %v5213_v24 = vmul.f32 %v5181_v32, %v7579_v4 }
0x1a1a   :  { %v5229_v57 = vadd.f32 1e-05, %v5213_v24 }
0x1a1c   :  { %6467 = vrsqrt.f32 %v5229_v57  ;;  %vm5314_vm6 = vweird.f32 %v5229_v57 }
0x1a1f   :  { %v5106_v3 = vpop.xlane.xlu0 %5105 }
0x1a20   :  { %v5124_v61 = vmul.f32 %v5106_v3, %v7579_v4 }
0x1a22   :  { %v5184_v44 = vpop.xlane.xlu1 %5183  ;;  %v6468_v55 = vpop.eup %6467  ;;  %v9905_v52 = vsub.f32 %v9809_v22, %v5124_v61 }
0x1a23   :  { %v5214_v5 = vmul.f32 %v5184_v44, %v7579_v4  ;;  %v5309_v11 = vmul.f32 %v6468_v55, %v5229_v57  ;;  %vm5315_vm2 = vweird.f32 %v6468_v55 }
0x1a24   :  { %v5156_v47 = vmul.f32 %v9905_v52, %v9905_v52  ;;  %vm5316_vm3 = vmor %vm5314_vm6, %vm5315_vm2 }
0x1a25   :  { %v5230_v16 = vadd.f32 1e-05, %v5214_v5  ;;  %v5310_v54 = vmul.f32 %v6468_v55, %v5309_v11 }
0x1a26   :  { %v5200_v35 = vsel %vm10395_vm4, %v5156_v47, 0.0 }
0x1a27   :  { %6469 = vrsqrt.f32 %v5230_v16  ;;  %v5311_v20 = vmul.f32 0.5, %v5310_v54  ;;  %5201 = vadd.xlane.f32.xlu2 %v5200_v35  ;;  %vm5324_vm1 = vweird.f32 %v5230_v16 }
0x1a29   :  { %v5312_v26 = vsub.f32 1.5, %v5311_v20 }
0x1a2a   :  { %v5187_v49 = vpop.xlane.xlu2 %5186  ;;  %v5109_v41 = vpop.xlane.xlu1 %5108 }
0x1a2b   :  { %v5215_v10 = vmul.f32 %v5187_v49, %v7579_v4  ;;  %v5125_v51 = vmul.f32 %v5109_v41, %v7579_v4  ;;  %v5313_v12 = vmul.f32 %v6468_v55, %v5312_v26 }
0x1a2d   :  { %v6470_v7 = vpop.eup %6469  ;;  %v5231_v0 = vadd.f32 1e-05, %v5215_v10  ;;  %v9914_v62 = vsub.f32 %v9835_v38, %v5125_v51  ;;  %v5317_v27 = vsel %vm5316_vm3, %v6468_v55, %v5313_v12 }
0x1a2e   :  { %v5319_v23 = vmul.f32 %v6470_v7, %v5230_v16  ;;  %v5405_v48 = vmul.f32 %v5317_v27, %v9799_v45  ;;  %vm5325_vm12 = vweird.f32 %v6470_v7 }
0x1a2f   :  { %6471 = vrsqrt.f32 %v5231_v0  ;;  %v5157_v30 = vmul.f32 %v9914_v62, %v9914_v62  ;;  %vm5326_vm14 = vmor %vm5324_vm1, %vm5325_vm12  ;;  %vm5334_vm8 = vweird.f32 %v5231_v0 }
0x1a30   :  { %v5320_v15 = vmul.f32 %v6470_v7, %v5319_v23  ;;  %v5422_v56 = vmul.f32 %v9814_v19, %v5405_v48  ;;  %vm10403_vm12 = vmmov %vm10395_vm4 }
0x1a31   :  { %v5203_v25 = vsel %vm10396_vm9, %v5157_v30, 0.0  ;;  %vm10402_vm9 = vmmov %vm10395_vm4 }
0x1a32   :  { %v5321_v60 = vmul.f32 0.5, %v5320_v15  ;;  %5204 = vadd.xlane.f32.xlu1 %v5203_v25  ;;  %v5439_v29 = vadd.f32 %v9820_v9, %v5422_v56 }
0x1a34   :  { %v5322_v34 = vsub.f32 1.5, %v5321_v60  ;;  %v5514_v45 = vpop.f32.mrf.mxu2  ;;  %5961 = vmatmul.msk.f32.gmra.mxu2 %vm10397_vm13, %v5439_v29 }
0x1a35   :  { %v6472_v36 = vpop.eup %6471  ;;  %v5515_v24 = vadd.f32 %v5514_v45, %v9922_v42 }
0x1a36   :  { %v5323_v21 = vmul.f32 %v6470_v7, %v5322_v34  ;;  %v5329_v32 = vmul.f32 %v6472_v36, %v5231_v0  ;;  %vm5335_vm0 = vweird.f32 %v6472_v36 }
0x1a37   :  { %v5562_v61 = vadd.f32 %v5515_v24, %v9599_v18  ;;  %vm5336_vm11 = vmor %vm5334_vm8, %vm5335_vm0 }
0x1a38   :  { %v5327_v57 = vsel %vm5326_vm14, %v6470_v7, %v5323_v21  ;;  %v5330_v3 = vmul.f32 %v6472_v36, %v5329_v32 }
0x1a39   :  { %v5406_v31 = vmul.f32 %v5327_v57, %v9817_v58  ;;  %5578 = vst.msk [vmem:[%s10068_s5] sm:$0xff] %vm10398_vm15, %v5562_v61 }
0x1a3a   :  { %v5331_v44 = vmul.f32 0.5, %v5330_v3 }
0x1a3b   :  { %v5423_v55 = vmul.f32 %v9814_v19, %v5406_v31 }
0x1a3c   :  { %v5332_v5 = vsub.f32 1.5, %v5331_v44  ;;  %v5517_v11 = vpop.f32.mrf.mxu2 }
0x1a3d   :  { %v5440_v16 = vadd.f32 %v9820_v9, %v5423_v55  ;;  %v5518_v54 = vadd.f32 %v5517_v11, %v9922_v42 }
0x1a3e   :  { %v5333_v47 = vmul.f32 %v6472_v36, %v5332_v5 }
0x1a3f   :  { %5962 = vmatmul.msk.f32.gmra.mxu2 %vm10399_vm7, %v5440_v16  ;;  %v5563_v58 = vadd.f32 %v5518_v54, %v9610_v8 }
0x1a40   :  { %v5337_v18 = vsel %vm5336_vm11, %v6472_v36, %v5333_v47  ;;  %vm10404_vm11 = vmmov %vm10395_vm4 }
0x1a41   :  { %v5407_v35 = vmul.f32 %v5337_v18, %v9838_v53  ;;  %5579 = vst.msk [vmem:[%s10068_s5 + $0x8] sm:$0xff] %vm10400_vm10, %v5563_v58  ;;  %vm10405_vm10 = vmmov %vm10395_vm4 }
0x1a43   :  { %v5424_v20 = vmul.f32 %v9814_v19, %v5407_v35 }
0x1a44   :  { %v5190_v26 = vpop.xlane.xlu0 %5189  ;;  %v5520_v49 = vpop.f32.mrf.mxu2 }
0x1a45   :  { %v5216_v41 = vmul.f32 %v5190_v26, %v7579_v4  ;;  %v5441_v10 = vadd.f32 %v9820_v9, %v5424_v20  ;;  %v5521_v51 = vadd.f32 %v5520_v49, %v9922_v42 }
0x1a47   :  { %v5232_v12 = vadd.f32 1e-05, %v5216_v41  ;;  %5963 = vmatmul.msk.f32.gmra.mxu2 %vm10401_vm5, %v5441_v10  ;;  %v5564_v8 = vadd.f32 %v5521_v51, %v9622_v50 }
0x1a49   :  { %6473 = vrsqrt.f32 %v5232_v12  ;;  %5580 = vst.msk [vmem:[%s10068_s5 + $0x10] sm:$0xff] %vm10395_vm4, %v5564_v8  ;;  %vm5344_vm6 = vweird.f32 %v5232_v12 }
0x1a4f   :  { %v6474_v53 = vpop.eup %6473 }
0x1a50   :  { %v5339_v7 = vmul.f32 %v6474_v53, %v5232_v12  ;;  %vm5345_vm2 = vweird.f32 %v6474_v53 }
0x1a51   :  { %vm5346_vm3 = vmor %vm5344_vm6, %vm5345_vm2 }
0x1a52   :  { %v5340_v0 = vmul.f32 %v6474_v53, %v5339_v7  ;;  %vm10406_vm2 = vmmov %vm10402_vm9 }
0x1a53   :  { %vm10407_vm6 = vmmov %vm10406_vm2 }
0x1a54   :  { %v5341_v27 = vmul.f32 0.5, %v5340_v0 }
0x1a56   :  { %v5342_v23 = vsub.f32 1.5, %v5341_v27 }
0x1a58   :  { %v5343_v48 = vmul.f32 %v6474_v53, %v5342_v23 }
0x1a5a   :  { %v5347_v30 = vsel %vm5346_vm3, %v6474_v53, %v5343_v48  ;;  %vm10408_vm3 = vmmov %vm10406_vm2 }
0x1a5b   :  { %v5408_v15 = vmul.f32 %v5347_v30, %v9857_v33 }
0x1a5c   :  { %v5193_v25 = vpop.xlane.xlu2 %5192 }
0x1a5d   :  { %v5425_v50 = vmul.f32 %v9814_v19, %v5408_v15  ;;  %v5217_v56 = vmul.f32 %v5193_v25, %v7579_v4 }
0x1a5f   :  { %v5442_v60 = vadd.f32 %v9820_v9, %v5425_v50  ;;  %v5233_v29 = vadd.f32 1e-05, %v5217_v56 }
0x1a61   :  { %v5523_v34 = vpop.f32.mrf.mxu2  ;;  %5964 = vmatmul.msk.f32.gmra.mxu2 %vm10402_vm9, %v5442_v60  ;;  %6475 = vrsqrt.f32 %v5233_v29  ;;  %vm5354_vm1 = vweird.f32 %v5233_v29  ;;  %vm10409_vm9 = vmmov %vm10406_vm2 }
0x1a62   :  { %v5524_v36 = vadd.f32 %v5523_v34, %v9922_v42 }
0x1a64   :  { %v5565_v45 = vadd.f32 %v5524_v36, %v9641_v6  ;;  %v5196_v21 = vpop.xlane.xlu1 %5195 }
0x1a65   :  { %v5218_v33 = vmul.f32 %v5196_v21, %v7579_v4 }
0x1a66   :  { %5581 = vst.msk [vmem:[%s10068_s5 + $0x18] sm:$0xff] %vm10403_vm12, %v5565_v45 }
0x1a67   :  { %v6476_v32 = vpop.eup %6475  ;;  %v5234_v24 = vadd.f32 1e-05, %v5218_v33 }
0x1a68   :  { %v5349_v57 = vmul.f32 %v6476_v32, %v5233_v29  ;;  %vm5355_vm13 = vweird.f32 %v6476_v32 }
0x1a69   :  { %6477 = vrsqrt.f32 %v5234_v24  ;;  %vm5356_vm14 = vmor %vm5354_vm1, %vm5355_vm13  ;;  %vm5364_vm0 = vweird.f32 %v5234_v24 }
0x1a6a   :  { %v5350_v3 = vmul.f32 %v6476_v32, %v5349_v57 }
0x1a6c   :  { %v5351_v61 = vmul.f32 0.5, %v5350_v3  ;;  %v5199_v31 = vpop.xlane.xlu0 %5198 }
0x1a6d   :  { %v5219_v44 = vmul.f32 %v5199_v31, %v7579_v4 }
0x1a6e   :  { %v5352_v55 = vsub.f32 1.5, %v5351_v61 }
0x1a6f   :  { %v6478_v6 = vpop.eup %6477  ;;  %v5235_v5 = vadd.f32 1e-05, %v5219_v44 }
0x1a70   :  { %v5353_v11 = vmul.f32 %v6476_v32, %v5352_v55  ;;  %v5359_v16 = vmul.f32 %v6478_v6, %v5234_v24  ;;  %vm5365_vm15 = vweird.f32 %v6478_v6 }
0x1a71   :  { %6479 = vrsqrt.f32 %v5235_v5  ;;  %vm5366_vm8 = vmor %vm5364_vm0, %vm5365_vm15  ;;  %vm5374_vm5 = vweird.f32 %v5235_v5 }
0x1a72   :  { %v5357_v47 = vsel %vm5356_vm14, %v6476_v32, %v5353_v11  ;;  %v5360_v54 = vmul.f32 %v6478_v6, %v5359_v16  ;;  %vm10410_vm15 = vmmov %vm10406_vm2 }
0x1a73   :  { %v5409_v18 = vmul.f32 %v5357_v47, %v9870_v2 }
0x1a74   :  { %v5361_v58 = vmul.f32 0.5, %v5360_v54 }
0x1a75   :  { %v5426_v35 = vmul.f32 %v9814_v19, %v5409_v18 }
0x1a76   :  { %v5362_v20 = vsub.f32 1.5, %v5361_v58 }
0x1a77   :  { %v6480_v26 = vpop.eup %6479  ;;  %v5443_v49 = vadd.f32 %v9820_v9, %v5426_v35 }
0x1a78   :  { %v5363_v41 = vmul.f32 %v6478_v6, %v5362_v20  ;;  %v5369_v10 = vmul.f32 %v6480_v26, %v5235_v5  ;;  %vm5375_vm7 = vweird.f32 %v6480_v26 }
0x1a79   :  { %v5526_v51 = vpop.f32.mrf.mxu2  ;;  %5965 = vmatmul.msk.f32.gmra.mxu2 %vm10404_vm11, %v5443_v49  ;;  %vm5376_vm4 = vmor %vm5374_vm5, %vm5375_vm7 }
0x1a7a   :  { %v5367_v12 = vsel %vm5366_vm8, %v6478_v6, %v5363_v41  ;;  %v5370_v8 = vmul.f32 %v6480_v26, %v5369_v10  ;;  %v5527_v53 = vadd.f32 %v5526_v51, %v9922_v42  ;;  %vm10411_vm11 = vmmov %vm10406_vm2 }
0x1a7b   :  { %v5410_v2 = vmul.f32 %v5367_v12, %v9878_v39  ;;  %vm10412_vm7 = vmmov %vm10406_vm2 }
0x1a7c   :  { %v5371_v7 = vmul.f32 0.5, %v5370_v8  ;;  %v5566_v0 = vadd.f32 %v5527_v53, %v9660_v1  ;;  %vm10414_vm5 = vmmov %vm10406_vm2 }
0x1a7d   :  { %v5427_v27 = vmul.f32 %v9814_v19, %v5410_v2 }
0x1a7e   :  { %v5372_v23 = vsub.f32 1.5, %v5371_v7  ;;  %5582 = vst.msk [vmem:[%s10068_s5 + $0x20] sm:$0xff] %vm10405_vm10, %v5566_v0  ;;  %vm10413_vm10 = vmmov %vm10406_vm2 }
0x1a7f   :  { %v5444_v48 = vadd.f32 %v9820_v9, %v5427_v27 }
0x1a80   :  { %v5373_v30 = vmul.f32 %v6480_v26, %v5372_v23 }
0x1a81   :  { %v5529_v15 = vpop.f32.mrf.mxu2  ;;  %5966 = vmatmul.msk.f32.gmra.mxu2 %vm10406_vm2, %v5444_v48 }
0x1a82   :  { %v5377_v39 = vsel %vm5376_vm4, %v6480_v26, %v5373_v30  ;;  %v5530_v1 = vadd.f32 %v5529_v15, %v9922_v42  ;;  %vm10415_vm4 = vmmov %vm10406_vm2 }
0x1a83   :  { %v5411_v25 = vmul.f32 %v5377_v39, %v9887_v14 }
0x1a84   :  { %v5567_v50 = vadd.f32 %v5530_v1, %v9669_v46 }
0x1a85   :  { %v5428_v56 = vmul.f32 %v9814_v19, %v5411_v25 }
0x1a86   :  { %5583 = vst.msk [vmem:[%s10068_s5 + $0x28] sm:$0xff] %vm10407_vm6, %v5567_v50  ;;  %vm10416_vm6 = vmmov %vm10406_vm2 }
0x1a87   :  { %v5445_v60 = vadd.f32 %v9820_v9, %v5428_v56 }
0x1a89   :  { %v5532_v29 = vpop.f32.mrf.mxu2  ;;  %5967 = vmatmul.msk.f32.gmra.mxu2 %vm10408_vm3, %v5445_v60  ;;  %vm10417_vm3 = vmmov %vm10406_vm2 }
0x1a8a   :  { %v5533_v34 = vadd.f32 %v5532_v29, %v9922_v42 }
0x1a8c   :  { %v5568_v36 = vadd.f32 %v5533_v34, %v9678_v43 }
0x1a8e   :  { %5584 = vst.msk [vmem:[%s10068_s5 + $0x30] sm:$0xff] %vm10409_vm9, %v5568_v36  ;;  %vm10418_vm9 = vmmov %vm10406_vm2 }
0x1a9a   :  { %v5202_v46 = vpop.xlane.xlu2 %5201 }
0x1a9b   :  { %v5220_v14 = vmul.f32 %v5202_v46, %v7579_v4 }
0x1a9d   :  { %v5236_v45 = vadd.f32 1e-05, %v5220_v14 }
0x1a9f   :  { %6481 = vrsqrt.f32 %v5236_v45  ;;  %vm5384_vm13 = vweird.f32 %v5236_v45 }
0x1aa5   :  { %v5205_v21 = vpop.xlane.xlu1 %5204  ;;  %v6482_v33 = vpop.eup %6481 }
0x1aa6   :  { %v5221_v32 = vmul.f32 %v5205_v21, %v7579_v4  ;;  %v5379_v24 = vmul.f32 %v6482_v33, %v5236_v45  ;;  %vm5385_vm12 = vweird.f32 %v6482_v33 }
0x1aa7   :  { %vm5386_vm1 = vmor %vm5384_vm13, %vm5385_vm12 }
0x1aa8   :  { %v5237_v57 = vadd.f32 1e-05, %v5221_v32  ;;  %v5380_v3 = vmul.f32 %v6482_v33, %v5379_v24  ;;  %vm10419_vm12 = vmmov %vm10406_vm2 }
0x1aaa   :  { %6483 = vrsqrt.f32 %v5237_v57  ;;  %v5381_v61 = vmul.f32 0.5, %v5380_v3  ;;  %vm5394_vm0 = vweird.f32 %v5237_v57 }
0x1aac   :  { %v5382_v43 = vsub.f32 1.5, %v5381_v61 }
0x1aae   :  { %v5383_v31 = vmul.f32 %v6482_v33, %v5382_v43 }
0x1ab0   :  { %v6484_v44 = vpop.eup %6483  ;;  %v5387_v55 = vsel %vm5386_vm1, %v6482_v33, %v5383_v31 }
0x1ab1   :  { %v5389_v6 = vmul.f32 %v6484_v44, %v5237_v57  ;;  %v5412_v5 = vmul.f32 %v5387_v55, %v9905_v52  ;;  %vm5395_vm14 = vweird.f32 %v6484_v44 }
0x1ab2   :  { %vm5396_vm8 = vmor %vm5394_vm0, %vm5395_vm14 }
0x1ab3   :  { %v5390_v11 = vmul.f32 %v6484_v44, %v5389_v6  ;;  %v5429_v16 = vmul.f32 %v9814_v19, %v5412_v5 }
0x1ab5   :  { %v5391_v47 = vmul.f32 0.5, %v5390_v11  ;;  %v5446_v4 = vadd.f32 %v9820_v9, %v5429_v16 }
0x1ab7   :  { %v5392_v54 = vsub.f32 1.5, %v5391_v47  ;;  %v5535_v18 = vpop.f32.mrf.mxu2  ;;  %5968 = vmatmul.msk.f32.gmra.mxu2 %vm10410_vm15, %v5446_v4 }
0x1ab8   :  { %v5536_v35 = vadd.f32 %v5535_v18, %v9922_v42 }
0x1ab9   :  { %v5393_v58 = vmul.f32 %v6484_v44, %v5392_v54 }
0x1aba   :  { %v5569_v26 = vadd.f32 %v5536_v35, %v9695_v13 }
0x1abb   :  { %v5397_v20 = vsel %vm5396_vm8, %v6484_v44, %v5393_v58 }
0x1abc   :  { %v5413_v52 = vmul.f32 %v5397_v20, %v9914_v62  ;;  %5585 = vst.msk [vmem:[%s10068_s5 + $0x38] sm:$0xff] %vm10411_vm11, %v5569_v26 }
0x1abe   :  { %v5430_v49 = vmul.f32 %v9814_v19, %v5413_v52 }
0x1ac0   :  { %v5447_v41 = vadd.f32 %v9820_v9, %v5430_v49 }
0x1ac2   :  { %v5538_v10 = vpop.f32.mrf.mxu2  ;;  %5969 = vmatmul.msk.f32.gmra.mxu2 %vm10412_vm7, %v5447_v41 }
0x1ac3   :  { %v5539_v51 = vadd.f32 %v5538_v10, %v9922_v42 }
0x1ac5   :  { %v5570_v12 = vadd.f32 %v5539_v51, %v9716_v63 }
0x1ac7   :  { %5586 = vst.msk [vmem:[%s10068_s5 + $0x40] sm:$0xff] %vm10413_vm10, %v5570_v12 }
0x1aca   :  { %v5541_v13 = vpop.f32.mrf.mxu2 }
0x1acb   :  { %v5542_v19 = vadd.f32 %v5541_v13, %v9922_v42 }
0x1acd   :  { %v5571_v9 = vadd.f32 %v5542_v19, %v9726_v28 }
0x1acf   :  { %5587 = vst.msk [vmem:[%s10068_s5 + $0x48] sm:$0xff] %vm10414_vm5, %v5571_v9 }
0x1ae4   :  { %v5544_v63 = vpop.f32.mrf.mxu2 }
0x1ae5   :  { %v5545_v62 = vadd.f32 %v5544_v63, %v9922_v42 }
0x1ae7   :  { %v5572_v8 = vadd.f32 %v5545_v62, %v9742_v59 }
0x1ae9   :  { %5588 = vst.msk [vmem:[%s10068_s5 + $0x50] sm:$0xff] %vm10415_vm4, %v5572_v8 }
0x1afc   :  { %v5547_v53 = vpop.f32.mrf.mxu2 }
0x1afd   :  { %v5548_v2 = vadd.f32 %v5547_v53, %v9922_v42 }
0x1aff   :  { %v5573_v28 = vadd.f32 %v5548_v2, %v9759_v17 }
0x1b01   :  { %5589 = vst.msk [vmem:[%s10068_s5 + $0x58] sm:$0xff] %vm10406_vm2, %v5573_v28 }
0x1b04   :  { %v5550_v7 = vpop.f32.mrf.mxu2 }
0x1b05   :  { %v5551_v0 = vadd.f32 %v5550_v7, %v9922_v42 }
0x1b07   :  { %v5574_v59 = vadd.f32 %v5551_v0, %v9775_v37 }
0x1b09   :  { %5590 = vst.msk [vmem:[%s10068_s5 + $0x60] sm:$0xff] %vm10416_vm6, %v5574_v59 }
0x1b0c   :  { %v5553_v27 = vpop.f32.mrf.mxu2 }
0x1b0d   :  { %v5554_v23 = vadd.f32 %v5553_v27, %v9922_v42 }
0x1b0f   :  { %v5575_v17 = vadd.f32 %v5554_v23, %v9790_v40 }
0x1b11   :  { %5591 = vst.msk [vmem:[%s10068_s5 + $0x68] sm:$0xff] %vm10417_vm3, %v5575_v17 }
0x1b3a   :  { %v5556_v48 = vpop.f32.mrf.mxu2 }
0x1b3b   :  { %v5557_v30 = vadd.f32 %v5556_v48, %v9922_v42 }
0x1b3d   :  { %v5576_v37 = vadd.f32 %v5557_v30, %v9809_v22 }
0x1b3f   :  { %5592 = vst.msk [vmem:[%s10068_s5 + $0x70] sm:$0xff] %vm10418_vm9, %v5576_v37 }
0x1b45   :  { %v5559_v15 = vpop.f32.mrf.mxu2 }
0x1b46   :  { %v5560_v39 = vadd.f32 %v5559_v15, %v9922_v42 }
0x1b48   :  { %v5577_v40 = vadd.f32 %v5560_v39, %v9835_v38 }
0x1b4a   :  { %5593 = vst.msk [vmem:[%s10068_s5 + $0x78] sm:$0xff] %vm10419_vm12, %v5577_v40 }
0x1b4b   :  { %6570 = dma.done.wait [#allocation4], 32  }
0x1b4c   :  { %6571 = vsyncadd [#allocation4], 4294967264 }
0x1b4d   :  { %5613 = vsyncpa [#allocation3], 1 }
0x1b4e   :  { %5614 = vsyncpa [#allocation4], 1 }

</bundles_post_ra>
